<compile_context>
chip_gen: v6e
topology: v6e:2x2x1
jax: 0.10.0
libtpu: 0.0.40
codegen_flags: <defaults>
</compile_context>

<pallas_src>
import math
import numpy as np
import jax
import jax.numpy as jnp
from jax.experimental import pallas as pl
from jax.experimental.pallas import tpu as pltpu

ACTION_DIM = 7       # pose representation size (g is [B, 7])
POINT_DIM = 1024     # pointnet_dim default
HID = 256            # hidden_feature_dim

# Fused cloud channel order: [cloud3 (256) | cloud2 (128) | cloud1 (64)]
CCAT = 448
C3_OFF, C2_OFF, C1_OFF = 0, 256, 384


# ---------------------------------------------------------------------------
# Static slab layouts (shared by host-side packing and the kernel).
# ---------------------------------------------------------------------------
def _build_layout(order):
    seg, off = {}, 0
    for name, w in order:
        seg[name] = (off, w)
        off += ((w + 127) // 128) * 128   # keep every segment start 128-aligned
    return seg, off


# "Early" slabs: needed by the pose down path -> auto-DMA'd (VMEM BlockSpec).
WE256_ORDER = [("first_w2", 256), ("d1_up3b", 512), ("d1_w2", 256), ("d2_up2b", 384)]
WE128_ORDER = [("d2_w2", 128), ("d3_up1b", 256), ("d3_w2", 128)]
# "Late" slabs: only needed after the down path -> manual async copy (overlap).
WL256_ORDER = [("c3_w2", 256), ("up2_w2", 256), ("up3_w1a", 256),
               ("up3_w2", 256), ("fin_w1", 128)]
WL128_ORDER = [("c2_w2", 128), ("up1_w1a", 128), ("up1_w2", 128),
               ("up2_w1a", 256), ("fin_w2", 128)]
# All (1, .) vectors packed into one f32 lane slab.
VEC_ORDER = [("cloud_b1", 448), ("gn_gamma", 448), ("gn_beta", 448),
             ("t_freqs", 512), ("t_sinmask", 512),
             ("c3_b2", 256), ("c2_b2", 128), ("c1_b2", 128),
             ("first_b1", 256), ("first_b2", 256),
             ("d1_b1", 256), ("d1_b2", 256),
             ("d2_b1", 128), ("d2_b2", 128),
             ("d3_b1", 128), ("d3_b2", 128),
             ("up1_b1", 128), ("up1_b2", 128),
             ("up2_b1", 256), ("up2_b2", 256),
             ("up3_b1", 256), ("up3_b2", 256),
             ("fin_b1", 128), ("fin_b2", 128)]

WE256_SEG, WE256_TOTAL = _build_layout(WE256_ORDER)
WE128_SEG, WE128_TOTAL = _build_layout(WE128_ORDER)
WL256_SEG, WL256_TOTAL = _build_layout(WL256_ORDER)
WL128_SEG, WL128_TOTAL = _build_layout(WL128_ORDER)
VEC_SEG, VEC_TOTAL = _build_layout(VEC_ORDER)

_INV_SQRT2 = 1.0 / math.sqrt(2.0)


# ---------------------------------------------------------------------------
# In-kernel GELU (exact erf polynomial; divide replaced by EUP approx recip).
# ---------------------------------------------------------------------------
def _gelu_fast(x):
    ax = jnp.abs(x * _INV_SQRT2)
    t = pl.reciprocal(1.0 + 0.3275911 * ax, approx=True)
    poly = ((((1.061405429 * t - 1.453152027) * t + 1.421413741) * t
             - 0.284496736) * t + 0.254829592) * t
    y = 1.0 - poly * jnp.exp(-ax * ax)
    erf = jnp.where(x < 0, -y, y)
    return 0.5 * x * (1.0 + erf)


# ---------------------------------------------------------------------------
# Pallas kernel (single invocation, no grid).
# ---------------------------------------------------------------------------
def unet_pose_kernel(g_ref, c_ref, mask_ref, t_ref,
                     fw1_ref, we256_ref, we128_ref,
                     gnm_ref, gnbc_ref, vec_ref,
                     wc1_hbm, wl256_hbm, wl128_hbm, wl64_hbm,
                     out_ref,
                     wc1_v, wl256_v, wl128_v, wl64_v, dma_sem):
    # -- kick off the "late" weight DMAs; they overlap with the pose down path
    cp_wc1 = pltpu.make_async_copy(wc1_hbm, wc1_v, dma_sem.at[0])
    cp_l256 = pltpu.make_async_copy(wl256_hbm, wl256_v, dma_sem.at[1])
    cp_l128 = pltpu.make_async_copy(wl128_hbm, wl128_v, dma_sem.at[2])
    cp_l64 = pltpu.make_async_copy(wl64_hbm, wl64_v, dma_sem.at[3])
    cp_wc1.start()
    cp_l256.start()
    cp_l128.start()
    cp_l64.start()

    def dot(a, b):
        # Weights are stored in bf16; cast the (tiny) activation instead of
        # upcasting the weight slab.  MXU accumulates in f32 regardless.
        if b.dtype == jnp.bfloat16:
            a = a.astype(jnp.bfloat16)
        return jnp.dot(a, b, preferred_element_type=jnp.float32)

    def vec(name):
        o, w = VEC_SEG[name]
        return vec_ref[:, o:o + w]

    def we256(name):
        o, w = WE256_SEG[name]
        return we256_ref[:, o:o + w]

    def we128(name):
        o, w = WE128_SEG[name]
        return we128_ref[:, o:o + w]

    def wl256(name):
        o, w = WL256_SEG[name]
        return wl256_v[:, o:o + w]

    def wl128(name):
        o, w = WL128_SEG[name]
        return wl128_v[:, o:o + w]

    g = g_ref[...]                               # (BP, 128)  zero-padded pose
    cm = c_ref[...] * mask_ref[...]              # (BP, 1024)
    t = t_ref[...]                               # (BP, 1)

    # ---- fused sinusoidal time embeddings (host-precomputed 512-lane tables) --
    args = t * vec("t_freqs")
    temb = jnp.where(vec("t_sinmask") > 0.5, jnp.sin(args), jnp.cos(args))
    t3 = temb[:, 0:256]
    t2 = temb[:, 256:384]
    t1 = temb[:, 384:512]                        # (BP,128), upper 64 lanes = 0

    # ---- pose down path (runs while the late weight DMAs are in flight) -------
    h0 = _gelu_fast(dot(g, fw1_ref[...]) + vec("first_b1"))
    g0 = dot(h0, we256("first_w2")) + vec("first_b2")                # (BP, 256)

    pre = dot(g0, we256("d1_up3b"))                                  # (BP, 512)
    gd1 = dot(_gelu_fast(pre[:, :256] + vec("d1_b1")), we256("d1_w2")) + vec("d1_b2")
    up3_pre = pre[:, 256:512]                                        # g0 @ up3_w1b

    pre = dot(gd1, we256("d2_up2b"))                                 # (BP, 384)
    gd2 = dot(_gelu_fast(pre[:, :128] + vec("d2_b1")), we128("d2_w2")) + vec("d2_b2")
    up2_pre = pre[:, 128:384]                                        # gd1 @ up2_w1b

    pre = dot(gd2, we128("d3_up1b"))                                 # (BP, 256)
    up1_pre = pre[:, :128]                                           # gd2 @ up1_w1b
    gd3 = dot(_gelu_fast(pre[:, 128:256] + vec("d3_b1")), we128("d3_w2")) + vec("d3_b2")
    # gd3 is (BP,128) with the upper 64 lanes exactly zero (padded weights/bias).

    # ---- cloud path ------------------------------------------------------------
    cp_wc1.wait()
    h = dot(cm, wc1_v[...]) + vec("cloud_b1")                        # (BP, 448)
    # Fused GroupNorm over all 16 groups: mean and E[x^2] as two independent
    # 2-deep MXU chains; var = E[x^2] - mean^2.
    hm = jnp.dot(h, gnm_ref[...], preferred_element_type=jnp.float32)      # (BP,16)
    hs = jnp.dot(h * h, gnm_ref[...], preferred_element_type=jnp.float32)  # (BP,16)
    mean = jnp.dot(hm, gnbc_ref[...], preferred_element_type=jnp.float32)  # (BP,448)
    ex2 = jnp.dot(hs, gnbc_ref[...], preferred_element_type=jnp.float32)   # (BP,448)
    var = ex2 - mean * mean
    h = (h - mean) * jax.lax.rsqrt(var + 1e-5) * vec("gn_gamma") + vec("gn_beta")
    h = _gelu_fast(h)

    cp_l256.wait()
    cp_l128.wait()
    cp_l64.wait()
    c3 = dot(h[:, C3_OFF:C3_OFF + 256], wl256("c3_w2")) + vec("c3_b2")
    c2 = dot(h[:, C2_OFF:C2_OFF + 128], wl128("c2_w2")) + vec("c2_b2")
    c1 = dot(h[:, C1_OFF:C1_OFF + 64], wl64_v[...]) + vec("c1_b2")   # (BP,128), upper 0

    # ---- up path ----------------------------------------------------------------
    x1 = gd3 * c1 + t1                                               # (BP,128), upper 0
    hh = _gelu_fast(dot(x1, wl128("up1_w1a")) + up1_pre + vec("up1_b1"))
    up1 = dot(hh, wl128("up1_w2")) + vec("up1_b2")                   # (BP, 128)

    x2 = up1 * c2 + t2
    hh = _gelu_fast(dot(x2, wl128("up2_w1a")) + up2_pre + vec("up2_b1"))
    up2 = dot(hh, wl256("up2_w2")) + vec("up2_b2")                   # (BP, 256)

    x3 = up2 * c3 + t3
    hh = _gelu_fast(dot(x3, wl256("up3_w1a")) + up3_pre + vec("up3_b1"))
    up3 = dot(hh, wl256("up3_w2")) + vec("up3_b2")                   # (BP, 256)

    # ---- final layer, zero-padded to 128 lanes => unmasked matmuls + store -------
    hh = _gelu_fast(dot(up3, wl256("fin_w1")) + vec("fin_b1"))
    out_ref[...] = dot(hh, wl128("fin_w2")) + vec("fin_b2")          # (BP, 128)


def unet_pose_forward(g, c, context_mask, t, packed):
    b = g.shape[0]
    # NOTE: if the application evaluates many candidate poses / timesteps,
    # batch them here (BP up to ~256-512) -- the weight load is reused and the
    # per-call cost barely changes.
    bp = max(8, ((b + 7) // 8) * 8)        # pad batch to the sublane quantum

    def pad_rows(x, lanes=None):
        x = x.astype(jnp.float32)
        lanes = x.shape[1] if lanes is None else lanes
        return jnp.pad(x, ((0, bp - b), (0, lanes - x.shape[1])))

    inputs = [pad_rows(g, 128), pad_rows(c), pad_rows(context_mask),
              pad_rows(t.reshape(b, 1)),
              packed["fw1"], packed["we256"], packed["we128"],
              packed["gn_m"], packed["gn_bc"], packed["vec"],
              packed["wc1"], packed["wl256"], packed["wl128"], packed["wl64"]]

    vmem = pl.BlockSpec(memory_space=pltpu.MemorySpace.VMEM)
    anyspace = pl.BlockSpec(memory_space=pl.ANY)
    in_specs = [vmem] * 10 + [anyspace] * 4

    out = pl.pallas_call(
        unet_pose_kernel,
        out_shape=jax.ShapeDtypeStruct((bp, 128), jnp.float32),
        in_specs=in_specs,
        out_specs=vmem,
        scratch_shapes=[
            pltpu.VMEM((POINT_DIM, CCAT), jnp.bfloat16),
            pltpu.VMEM((256, WL256_TOTAL), jnp.bfloat16),
            pltpu.VMEM((128, WL128_TOTAL), jnp.bfloat16),
            pltpu.VMEM((64, 128), jnp.bfloat16),
            pltpu.SemaphoreType.DMA((4,)),
        ],
        compiler_params=pltpu.CompilerParams(vmem_limit_bytes=32 * 1024 * 1024),
    )(*inputs)
    return out[:b, :ACTION_DIM]


# ---------------------------------------------------------------------------
# Parameter construction (PyTorch-style init, natural layout) and host packing.
# Linear weights stored pre-transposed as (in, out); biases / GN params (1, out).
# ---------------------------------------------------------------------------
def make_params(key):
    keys = iter(jax.random.split(key, 64))
    P = {}

    def linear(name, fin, fout):
        bound = 1.0 / math.sqrt(fin)
        P[name + "_w"] = jax.random.uniform(next(keys), (fin, fout), jnp.float32, -bound, bound)
        P[name + "_b"] = jax.random.uniform(next(keys), (1, fout), jnp.float32, -bound, bound)

    def cloud(tag, cdim):
        linear(tag + "_l1", POINT_DIM, cdim)
        P[tag + "_gamma"] = jnp.ones((1, cdim), jnp.float32)
        P[tag + "_beta"] = jnp.zeros((1, cdim), jnp.float32)
        linear(tag + "_l2", cdim, cdim)

    cloud("cn1", HID // 4)                              # cloud_net1: GroupNorm(4, 64)
    cloud("cn2", HID // 2)                              # cloud_net2: GroupNorm(4, 128)
    cloud("cn3", HID)                                   # cloud_net3: GroupNorm(8, 256)
    linear("first_l1", ACTION_DIM, HID); linear("first_l2", HID, HID)
    linear("d1_l1", HID, HID); linear("d1_l2", HID, HID)
    linear("d2_l1", HID, HID // 2); linear("d2_l2", HID // 2, HID // 2)
    linear("d3_l1", HID // 2, HID // 4); linear("d3_l2", HID // 4, HID // 4)
    linear("u1_l1", HID // 4 + HID // 2, HID // 2); linear("u1_l2", HID // 2, HID // 2)
    linear("u2_l1", HID // 2 + HID, HID); linear("u2_l2", HID, HID)
    linear("u3_l1", HID + HID, HID); linear("u3_l2", HID, HID)
    linear("fin_l1", HID, ACTION_DIM); linear("fin_l2", ACTION_DIM, ACTION_DIM)
    return P


def _padded(a, rows, cols):
    out = np.zeros((rows, cols), np.float32)
    aa = np.asarray(a, np.float32)
    out[:aa.shape[0], :aa.shape[1]] = aa
    return out


def _slab(rows, seg, total, parts, dtype=jnp.float32):
    s = np.zeros((rows, total), np.float32)
    for name, arr in parts.items():
        off, w = seg[name]
        a = np.asarray(arr, dtype=np.float32)
        assert a.shape == (rows, w), (name, a.shape, (rows, w))
        s[:, off:off + w] = a
    return jnp.asarray(s).astype(dtype)


def pack_params(P):
    # pose head weight, rows padded 7 -> 128 (aligned K on the first matmul)
    fw1 = jnp.asarray(_padded(P["first_l1_w"], 128, HID)).astype(jnp.bfloat16)

    # up-path first-layer weights pre-split on the host
    u1a = np.asarray(P["u1_l1_w"])[:64]       # (64, 128)
    u1b = np.asarray(P["u1_l1_w"])[64:]       # (128, 128)
    u2a = np.asarray(P["u2_l1_w"])[:128]      # (128, 256)
    u2b = np.asarray(P["u2_l1_w"])[128:]      # (256, 256)
    u3a = np.asarray(P["u3_l1_w"])[:256]      # (256, 256)
    u3b = np.asarray(P["u3_l1_w"])[256:]      # (256, 256)

    we256 = _slab(256, WE256_SEG, WE256_TOTAL, {
        "first_w2": P["first_l2_w"],
        "d1_up3b": np.concatenate([np.asarray(P["d1_l1_w"], np.float32), u3b], axis=1),
        "d1_w2": P["d1_l2_w"],
        "d2_up2b": np.concatenate([np.asarray(P["d2_l1_w"], np.float32), u2b], axis=1),
    }, jnp.bfloat16)

    we128 = _slab(128, WE128_SEG, WE128_TOTAL, {
        "d2_w2": P["d2_l2_w"],
        "d3_up1b": np.concatenate([u1b, _padded(P["d3_l1_w"], 128, 128)], axis=1),
        "d3_w2": _padded(P["d3_l2_w"], 128, 128),
    }, jnp.bfloat16)

    wl256 = _slab(256, WL256_SEG, WL256_TOTAL, {
        "c3_w2": P["cn3_l2_w"],
        "up2_w2": P["u2_l2_w"],
        "up3_w1a": u3a,
        "up3_w2": P["u3_l2_w"],
        "fin_w1": _padded(P["fin_l1_w"], 256, 128),
    }, jnp.bfloat16)

    wl128 = _slab(128, WL128_SEG, WL128_TOTAL, {
        "c2_w2": P["cn2_l2_w"],
        "up1_w1a": _padded(u1a, 128, 128),
        "up1_w2": P["u1_l2_w"],
        "up2_w1a": u2a,
        "fin_w2": _padded(P["fin_l2_w"], 128, 128),
    }, jnp.bfloat16)

    wl64 = jnp.asarray(_padded(P["cn1_l2_w"], 64, 128)).astype(jnp.bfloat16)

    # fused cloud first layer, channel order [cn3 | cn2 | cn1]
    wc1 = jnp.concatenate([P["cn3_l1_w"], P["cn2_l1_w"], P["cn1_l1_w"]],
                          axis=1).astype(jnp.bfloat16)

    # GroupNorm reducer / broadcaster for the 448-channel concat
    # (8 groups of 32 for cn3, 4 of 32 for cn2, 4 of 16 for cn1); 1/group_size
    # baked into gn_m so h @ gn_m gives per-group means directly.
    group_sizes = np.array([32] * 8 + [32] * 4 + [16] * 4)
    gidx = np.repeat(np.arange(16), group_sizes)
    gn_m = np.zeros((CCAT, 16), np.float32)
    gn_m[np.arange(CCAT), gidx] = 1.0 / group_sizes[gidx]
    gn_bc = (gn_m.T > 0).astype(np.float32)

    # fused sinusoidal time-embedding tables, order [t3 | t2 | t1 | 64-lane pad]
    # (pad lanes use freq=0 with the sin branch => exact zeros).
    def time_tables(dim):
        half = dim // 2
        fac = math.log(10000.0) / (half - 1)
        fr = np.exp(-fac * np.arange(half, dtype=np.float32)).astype(np.float32)
        return (np.concatenate([fr, fr]),
                np.concatenate([np.ones(half, np.float32), np.zeros(half, np.float32)]))
    f3, s3 = time_tables(HID)
    f2, s2 = time_tables(HID // 2)
    f1, s1 = time_tables(HID // 4)
    t_freqs = np.concatenate([f3, f2, f1, np.zeros(64, np.float32)])[None, :]
    t_sinmask = np.concatenate([s3, s2, s1, np.ones(64, np.float32)])[None, :]

    vec = _slab(1, VEC_SEG, VEC_TOTAL, {
        "cloud_b1": np.concatenate([np.asarray(P["cn3_l1_b"]), np.asarray(P["cn2_l1_b"]),
                                    np.asarray(P["cn1_l1_b"])], axis=1),
        "gn_gamma": np.concatenate([np.asarray(P["cn3_gamma"]), np.asarray(P["cn2_gamma"]),
                                    np.asarray(P["cn1_gamma"])], axis=1),
        "gn_beta": np.concatenate([np.asarray(P["cn3_beta"]), np.asarray(P["cn2_beta"]),
                                   np.asarray(P["cn1_beta"])], axis=1),
        "t_freqs": t_freqs, "t_sinmask": t_sinmask,
        "c3_b2": P["cn3_l2_b"], "c2_b2": P["cn2_l2_b"],
        "c1_b2": _padded(P["cn1_l2_b"], 1, 128),
        "first_b1": P["first_l1_b"], "first_b2": P["first_l2_b"],
        "d1_b1": P["d1_l1_b"], "d1_b2": P["d1_l2_b"],
        "d2_b1": P["d2_l1_b"], "d2_b2": P["d2_l2_b"],
        "d3_b1": _padded(P["d3_l1_b"], 1, 128), "d3_b2": _padded(P["d3_l2_b"], 1, 128),
        "up1_b1": P["u1_l1_b"], "up1_b2": P["u1_l2_b"],
        "up2_b1": P["u2_l1_b"], "up2_b2": P["u2_l2_b"],
        "up3_b1": P["u3_l1_b"], "up3_b2": P["u3_l2_b"],
        "fin_b1": _padded(P["fin_l1_b"], 1, 128), "fin_b2": _padded(P["fin_l2_b"], 1, 128),
    })  # f32

    return {"fw1": fw1, "we256": we256, "we128": we128,
            "wl256": wl256, "wl128": wl128, "wl64": wl64, "wc1": wc1,
            "gn_m": jnp.asarray(gn_m), "gn_bc": jnp.asarray(gn_bc), "vec": vec}


# ---------------------------------------------------------------------------
# Plain-JAX reference on the natural (unpacked, unfused) parameters — mirrors
# the PyTorch module layer-by-layer (exact erf GELU, f32 HIGHEST matmuls).
# ---------------------------------------------------------------------------
def reference_forward(g, c, context_mask, t, P):
    hp = jax.lax.Precision.HIGHEST

    def dot(a, b):
        return jnp.dot(a, b, preferred_element_type=jnp.float32, precision=hp)

    def lin(x, name):
        return dot(x, P[name + "_w"]) + P[name + "_b"]

    def gelu(x):
        return jax.nn.gelu(x, approximate=False)

    def group_norm(x, gamma, beta, groups, eps=1e-5):
        bb, ch = x.shape
        xg = x.reshape(bb, groups, ch // groups)
        m = xg.mean(-1, keepdims=True)
        v = ((xg - m) ** 2).mean(-1, keepdims=True)
        xn = ((xg - m) * jax.lax.rsqrt(v + eps)).reshape(bb, ch)
        return xn * gamma + beta

    def cloud(x, tag, groups):
        h = group_norm(lin(x, tag + "_l1"), P[tag + "_gamma"], P[tag + "_beta"], groups)
        return lin(gelu(h), tag + "_l2")

    def mlp(x, tag):
        return lin(gelu(lin(x, tag + "_l1")), tag + "_l2")

    def time_embed(tcol, dim):
        half = dim // 2
        fac = math.log(10000.0) / (half - 1)
        freqs = jnp.exp(-fac * jnp.arange(half, dtype=jnp.float32))
        a = tcol * freqs[None, :]
        return jnp.concatenate([jnp.sin(a), jnp.cos(a)], axis=-1)

    b = g.shape[0]
    g = g.astype(jnp.float32)
    cm = c.astype(jnp.float32) * context_mask.astype(jnp.float32)
    tcol = t.reshape(b, 1).astype(jnp.float32)

    c1 = cloud(cm, "cn1", 4)
    c2 = cloud(cm, "cn2", 4)
    c3 = cloud(cm, "cn3", 8)
    t1 = time_embed(tcol, HID // 4)
    t2 = time_embed(tcol, HID // 2)
    t3 = time_embed(tcol, HID)

    g0 = mlp(g, "first")
    gd1 = mlp(g0, "d1")
    gd2 = mlp(gd1, "d2")
    gd3 = mlp(gd2, "d3")
    u1 = mlp(jnp.concatenate([gd3 * c1 + t1, gd2], axis=1), "u1")
    u2 = mlp(jnp.concatenate([u1 * c2 + t2, gd1], axis=1), "u2")
    u3 = mlp(jnp.concatenate([u2 * c3 + t3, g0], axis=1), "u3")
    return mlp(u3, "fin")


if __name__ == "__main__":
    B = 2  # B >= 2 so torch's .squeeze() on the time embedding keeps the batch dim
    key = jax.random.PRNGKey(0)
    kp, kg, kc, km, kt = jax.random.split(key, 5)

    params = make_params(kp)
    packed = pack_params(params)
    g = jax.random.normal(kg, (B, ACTION_DIM), jnp.float32)
    c = jax.random.normal(kc, (B, POINT_DIM), jnp.float32)
    context_mask = jax.random.bernoulli(km, 0.5, (B, 1)).astype(jnp.float32)
    t = jax.random.uniform(kt, (B,), jnp.float32, 0.0, 1000.0)

    out = jax.block_until_ready(unet_pose_forward(g, c, context_mask, t, packed))
    ref = jax.block_until_ready(reference_forward(g, c, context_mask, t, params))

    assert out.shape == (B, ACTION_DIM)
    # Tolerance accounts for default MXU precision (bf16 operand rounding, same
    # for the f32 or bf16-stored weights) and the EUP approx reciprocal in the
    # kernel GELU vs. the f32 HIGHEST-precision, exact-erf reference.
    assert jnp.allclose(out, ref, rtol=2e-3, atol=2e-3), (
        f"mismatch: max abs diff {jnp.max(jnp.abs(out - ref))}")

    print("KERNEL_OK")
</pallas_src>

<mosaic_0001>
module attributes {stable_mosaic.version = 11 : i64} {
  func.func @unet_pose_kernel(%arg0: memref<8x128xf32, #tpu.memory_space<vmem>>, %arg1: memref<8x1024xf32, #tpu.memory_space<vmem>>, %arg2: memref<8x1xf32, #tpu.memory_space<vmem>>, %arg3: memref<8x1xf32, #tpu.memory_space<vmem>>, %arg4: memref<128x256xbf16, #tpu.memory_space<vmem>>, %arg5: memref<256x1408xbf16, #tpu.memory_space<vmem>>, %arg6: memref<128x512xbf16, #tpu.memory_space<vmem>>, %arg7: memref<448x16xf32, #tpu.memory_space<vmem>>, %arg8: memref<16x448xf32, #tpu.memory_space<vmem>>, %arg9: memref<1x6144xf32, #tpu.memory_space<vmem>>, %arg10: memref<1024x448xbf16, #tpu.memory_space<any>>, %arg11: memref<256x1152xbf16, #tpu.memory_space<any>>, %arg12: memref<128x768xbf16, #tpu.memory_space<any>>, %arg13: memref<64x128xbf16, #tpu.memory_space<any>>, %arg14: memref<8x128xf32, #tpu.memory_space<vmem>>, %arg15: memref<1024x448xbf16, #tpu.memory_space<vmem>>, %arg16: memref<256x1152xbf16, #tpu.memory_space<vmem>>, %arg17: memref<128x768xbf16, #tpu.memory_space<vmem>>, %arg18: memref<64x128xbf16, #tpu.memory_space<vmem>>, %arg19: memref<4x!tpu.dma_semaphore, #tpu.memory_space<semaphore_mem>>) attributes {dimension_semantics = [], scalar_prefetch = 0 : i64, scratch_operands = 5 : i64, tpu.core_type = #tpu.core_type<tc>} {
    %c0_i32 = arith.constant 0 : i32
    %0 = tpu.memref_slice %arg19[%c0_i32] : memref<4x!tpu.dma_semaphore, #tpu.memory_space<semaphore_mem>> -> memref<1x!tpu.dma_semaphore, #tpu.memory_space<semaphore_mem>>
    %1 = tpu.memref_squeeze %0 : memref<1x!tpu.dma_semaphore, #tpu.memory_space<semaphore_mem>> -> memref<!tpu.dma_semaphore, #tpu.memory_space<semaphore_mem>>
    tpu.enqueue_dma source(%arg10 : memref<1024x448xbf16, #tpu.memory_space<any>>) target(%arg15 : memref<1024x448xbf16, #tpu.memory_space<vmem>>) target_semaphore(%1 : memref<!tpu.dma_semaphore, #tpu.memory_space<semaphore_mem>>)
    %c1_i32 = arith.constant 1 : i32
    %2 = tpu.memref_slice %arg19[%c1_i32] : memref<4x!tpu.dma_semaphore, #tpu.memory_space<semaphore_mem>> -> memref<1x!tpu.dma_semaphore, #tpu.memory_space<semaphore_mem>>
    %3 = tpu.memref_squeeze %2 : memref<1x!tpu.dma_semaphore, #tpu.memory_space<semaphore_mem>> -> memref<!tpu.dma_semaphore, #tpu.memory_space<semaphore_mem>>
    tpu.enqueue_dma source(%arg11 : memref<256x1152xbf16, #tpu.memory_space<any>>) target(%arg16 : memref<256x1152xbf16, #tpu.memory_space<vmem>>) target_semaphore(%3 : memref<!tpu.dma_semaphore, #tpu.memory_space<semaphore_mem>>)
    %c2_i32 = arith.constant 2 : i32
    %4 = tpu.memref_slice %arg19[%c2_i32] : memref<4x!tpu.dma_semaphore, #tpu.memory_space<semaphore_mem>> -> memref<1x!tpu.dma_semaphore, #tpu.memory_space<semaphore_mem>>
    %5 = tpu.memref_squeeze %4 : memref<1x!tpu.dma_semaphore, #tpu.memory_space<semaphore_mem>> -> memref<!tpu.dma_semaphore, #tpu.memory_space<semaphore_mem>>
    tpu.enqueue_dma source(%arg12 : memref<128x768xbf16, #tpu.memory_space<any>>) target(%arg17 : memref<128x768xbf16, #tpu.memory_space<vmem>>) target_semaphore(%5 : memref<!tpu.dma_semaphore, #tpu.memory_space<semaphore_mem>>)
    %c3_i32 = arith.constant 3 : i32
    %6 = tpu.memref_slice %arg19[%c3_i32] : memref<4x!tpu.dma_semaphore, #tpu.memory_space<semaphore_mem>> -> memref<1x!tpu.dma_semaphore, #tpu.memory_space<semaphore_mem>>
    %7 = tpu.memref_squeeze %6 : memref<1x!tpu.dma_semaphore, #tpu.memory_space<semaphore_mem>> -> memref<!tpu.dma_semaphore, #tpu.memory_space<semaphore_mem>>
    tpu.enqueue_dma source(%arg13 : memref<64x128xbf16, #tpu.memory_space<any>>) target(%arg18 : memref<64x128xbf16, #tpu.memory_space<vmem>>) target_semaphore(%7 : memref<!tpu.dma_semaphore, #tpu.memory_space<semaphore_mem>>)
    %c0 = arith.constant 0 : index
    %c0_0 = arith.constant 0 : index
    %8 = vector.load %arg0[%c0, %c0_0] : memref<8x128xf32, #tpu.memory_space<vmem>>, vector<8x128xf32>
    %c0_1 = arith.constant 0 : index
    %c0_2 = arith.constant 0 : index
    %9 = vector.load %arg1[%c0_1, %c0_2] : memref<8x1024xf32, #tpu.memory_space<vmem>>, vector<8x1024xf32>
    %c0_3 = arith.constant 0 : index
    %c0_4 = arith.constant 0 : index
    %10 = vector.load %arg2[%c0_3, %c0_4] : memref<8x1xf32, #tpu.memory_space<vmem>>, vector<8x1xf32>
    %11 = vector.broadcast %10 : vector<8x1xf32> to vector<8x1024xf32>
    %12 = arith.mulf %9, %11 : vector<8x1024xf32>
    %c0_5 = arith.constant 0 : index
    %c0_6 = arith.constant 0 : index
    %13 = vector.load %arg3[%c0_5, %c0_6] : memref<8x1xf32, #tpu.memory_space<vmem>>, vector<8x1xf32>
    %c0_7 = arith.constant 0 : index
    %c1536 = arith.constant 1536 : index
    %14 = vector.load %arg9[%c0_7, %c1536] : memref<1x6144xf32, #tpu.memory_space<vmem>>, vector<1x512xf32>
    %15 = vector.broadcast %13 : vector<8x1xf32> to vector<8x512xf32>
    %16 = vector.broadcast %14 : vector<1x512xf32> to vector<8x512xf32>
    %17 = arith.mulf %15, %16 : vector<8x512xf32>
    %c0_8 = arith.constant 0 : index
    %c2048 = arith.constant 2048 : index
    %18 = vector.load %arg9[%c0_8, %c2048] : memref<1x6144xf32, #tpu.memory_space<vmem>>, vector<1x512xf32>
    %cst = arith.constant 5.000000e-01 : f32
    %19 = vector.broadcast %cst : f32 to vector<1x512xf32>
    %20 = arith.cmpf ogt, %18, %19 : vector<1x512xf32>
    %21 = math.sin %17 : vector<8x512xf32>
    %22 = math.cos %17 : vector<8x512xf32>
    %23 = vector.shape_cast %20 : vector<1x512xi1> to vector<1x512xi1>
    %24 = vector.broadcast %23 : vector<1x512xi1> to vector<8x512xi1>
    %25 = arith.select %24, %21, %22 : vector<8x512xi1>, vector<8x512xf32>
    %26 = vector.extract_strided_slice %25 {offsets = [0, 0], sizes = [8, 256], strides = [1, 1]} : vector<8x512xf32> to vector<8x256xf32>
    %27 = vector.extract_strided_slice %25 {offsets = [0, 256], sizes = [8, 128], strides = [1, 1]} : vector<8x512xf32> to vector<8x128xf32>
    %28 = vector.extract_strided_slice %25 {offsets = [0, 384], sizes = [8, 128], strides = [1, 1]} : vector<8x512xf32> to vector<8x128xf32>
    %c0_9 = arith.constant 0 : index
    %c0_10 = arith.constant 0 : index
    %29 = vector.load %arg4[%c0_9, %c0_10] : memref<128x256xbf16, #tpu.memory_space<vmem>>, vector<128x256xbf16>
    %30 = arith.truncf %8 : vector<8x128xf32> to vector<8x128xbf16>
    %cst_11 = arith.constant dense<0.000000e+00> : vector<8x256xf32>
    %31 = tpu.matmul %30, %29, %cst_11 {dimension_numbers = #tpu.dot_dimension_numbers<[1], [0], [0], [1], [0, 0, 1, 1], [], []>} : vector<8x128xbf16>, vector<128x256xbf16>, vector<8x256xf32> -> vector<8x256xf32>
    %c0_12 = arith.constant 0 : index
    %c3072 = arith.constant 3072 : index
    %32 = vector.load %arg9[%c0_12, %c3072] : memref<1x6144xf32, #tpu.memory_space<vmem>>, vector<1x256xf32>
    %33 = vector.broadcast %32 : vector<1x256xf32> to vector<8x256xf32>
    %34 = arith.addf %31, %33 : vector<8x256xf32>
    %cst_13 = arith.constant 0.707106769 : f32
    %35 = vector.broadcast %cst_13 : f32 to vector<8x256xf32>
    %36 = arith.mulf %34, %35 : vector<8x256xf32>
    %37 = math.absf %36 : vector<8x256xf32>
    %cst_14 = arith.constant 0.327591091 : f32
    %38 = vector.broadcast %cst_14 : f32 to vector<8x256xf32>
    %39 = arith.mulf %38, %37 : vector<8x256xf32>
    %cst_15 = arith.constant 1.000000e+00 : f32
    %40 = vector.broadcast %cst_15 : f32 to vector<8x256xf32>
    %41 = arith.addf %40, %39 : vector<8x256xf32>
    %42 = tpu.reciprocal %41 {approx = true} : vector<8x256xf32> -> vector<8x256xf32>
    %cst_16 = arith.constant 1.06140542 : f32
    %43 = vector.broadcast %cst_16 : f32 to vector<8x256xf32>
    %44 = arith.mulf %43, %42 : vector<8x256xf32>
    %cst_17 = arith.constant 1.45315206 : f32
    %45 = vector.broadcast %cst_17 : f32 to vector<8x256xf32>
    %46 = arith.subf %44, %45 : vector<8x256xf32>
    %47 = arith.mulf %46, %42 : vector<8x256xf32>
    %cst_18 = arith.constant 1.42141378 : f32
    %48 = vector.broadcast %cst_18 : f32 to vector<8x256xf32>
    %49 = arith.addf %47, %48 : vector<8x256xf32>
    %50 = arith.mulf %49, %42 : vector<8x256xf32>
    %cst_19 = arith.constant 0.284496725 : f32
    %51 = vector.broadcast %cst_19 : f32 to vector<8x256xf32>
    %52 = arith.subf %50, %51 : vector<8x256xf32>
    %53 = arith.mulf %52, %42 : vector<8x256xf32>
    %cst_20 = arith.constant 0.254829586 : f32
    %54 = vector.broadcast %cst_20 : f32 to vector<8x256xf32>
    %55 = arith.addf %53, %54 : vector<8x256xf32>
    %56 = arith.mulf %55, %42 : vector<8x256xf32>
    %cst_21 = arith.constant 0.000000e+00 : f32
    %57 = vector.broadcast %cst_21 : f32 to vector<8x256xf32>
    %58 = arith.subf %57, %37 : vector<8x256xf32>
    %59 = arith.mulf %58, %37 : vector<8x256xf32>
    %60 = math.exp %59 : vector<8x256xf32>
    %61 = arith.mulf %56, %60 : vector<8x256xf32>
    %cst_22 = arith.constant 1.000000e+00 : f32
    %62 = vector.broadcast %cst_22 : f32 to vector<8x256xf32>
    %63 = arith.subf %62, %61 : vector<8x256xf32>
    %cst_23 = arith.constant 0.000000e+00 : f32
    %64 = vector.broadcast %cst_23 : f32 to vector<8x256xf32>
    %65 = arith.cmpf olt, %34, %64 : vector<8x256xf32>
    %cst_24 = arith.constant 0.000000e+00 : f32
    %66 = vector.broadcast %cst_24 : f32 to vector<8x256xf32>
    %67 = arith.subf %66, %63 : vector<8x256xf32>
    %68 = arith.select %65, %67, %63 : vector<8x256xi1>, vector<8x256xf32>
    %cst_25 = arith.constant 5.000000e-01 : f32
    %69 = vector.broadcast %cst_25 : f32 to vector<8x256xf32>
    %70 = arith.mulf %69, %34 : vector<8x256xf32>
    %cst_26 = arith.constant 1.000000e+00 : f32
    %71 = vector.broadcast %cst_26 : f32 to vector<8x256xf32>
    %72 = arith.addf %71, %68 : vector<8x256xf32>
    %73 = arith.mulf %70, %72 : vector<8x256xf32>
    %c0_27 = arith.constant 0 : index
    %c0_28 = arith.constant 0 : index
    %74 = vector.load %arg5[%c0_27, %c0_28] : memref<256x1408xbf16, #tpu.memory_space<vmem>>, vector<256x256xbf16>
    %75 = arith.truncf %73 : vector<8x256xf32> to vector<8x256xbf16>
    %cst_29 = arith.constant dense<0.000000e+00> : vector<8x256xf32>
    %76 = tpu.matmul %75, %74, %cst_29 {dimension_numbers = #tpu.dot_dimension_numbers<[1], [0], [0], [1], [0, 0, 1, 1], [], []>} : vector<8x256xbf16>, vector<256x256xbf16>, vector<8x256xf32> -> vector<8x256xf32>
    %c0_30 = arith.constant 0 : index
    %c3328 = arith.constant 3328 : index
    %77 = vector.load %arg9[%c0_30, %c3328] : memref<1x6144xf32, #tpu.memory_space<vmem>>, vector<1x256xf32>
    %78 = vector.broadcast %77 : vector<1x256xf32> to vector<8x256xf32>
    %79 = arith.addf %76, %78 : vector<8x256xf32>
    %c0_31 = arith.constant 0 : index
    %c256 = arith.constant 256 : index
    %80 = vector.load %arg5[%c0_31, %c256] : memref<256x1408xbf16, #tpu.memory_space<vmem>>, vector<256x512xbf16>
    %81 = arith.truncf %79 : vector<8x256xf32> to vector<8x256xbf16>
    %cst_32 = arith.constant dense<0.000000e+00> : vector<8x512xf32>
    %82 = tpu.matmul %81, %80, %cst_32 {dimension_numbers = #tpu.dot_dimension_numbers<[1], [0], [0], [1], [0, 0, 1, 1], [], []>} : vector<8x256xbf16>, vector<256x512xbf16>, vector<8x512xf32> -> vector<8x512xf32>
    %83 = vector.extract_strided_slice %82 {offsets = [0, 0], sizes = [8, 256], strides = [1, 1]} : vector<8x512xf32> to vector<8x256xf32>
    %c0_33 = arith.constant 0 : index
    %c3584 = arith.constant 3584 : index
    %84 = vector.load %arg9[%c0_33, %c3584] : memref<1x6144xf32, #tpu.memory_space<vmem>>, vector<1x256xf32>
    %85 = vector.broadcast %84 : vector<1x256xf32> to vector<8x256xf32>
    %86 = arith.addf %83, %85 : vector<8x256xf32>
    %cst_34 = arith.constant 0.707106769 : f32
    %87 = vector.broadcast %cst_34 : f32 to vector<8x256xf32>
    %88 = arith.mulf %86, %87 : vector<8x256xf32>
    %89 = math.absf %88 : vector<8x256xf32>
    %cst_35 = arith.constant 0.327591091 : f32
    %90 = vector.broadcast %cst_35 : f32 to vector<8x256xf32>
    %91 = arith.mulf %90, %89 : vector<8x256xf32>
    %cst_36 = arith.constant 1.000000e+00 : f32
    %92 = vector.broadcast %cst_36 : f32 to vector<8x256xf32>
    %93 = arith.addf %92, %91 : vector<8x256xf32>
    %94 = tpu.reciprocal %93 {approx = true} : vector<8x256xf32> -> vector<8x256xf32>
    %cst_37 = arith.constant 1.06140542 : f32
    %95 = vector.broadcast %cst_37 : f32 to vector<8x256xf32>
    %96 = arith.mulf %95, %94 : vector<8x256xf32>
    %cst_38 = arith.constant 1.45315206 : f32
    %97 = vector.broadcast %cst_38 : f32 to vector<8x256xf32>
    %98 = arith.subf %96, %97 : vector<8x256xf32>
    %99 = arith.mulf %98, %94 : vector<8x256xf32>
    %cst_39 = arith.constant 1.42141378 : f32
    %100 = vector.broadcast %cst_39 : f32 to vector<8x256xf32>
    %101 = arith.addf %99, %100 : vector<8x256xf32>
    %102 = arith.mulf %101, %94 : vector<8x256xf32>
    %cst_40 = arith.constant 0.284496725 : f32
    %103 = vector.broadcast %cst_40 : f32 to vector<8x256xf32>
    %104 = arith.subf %102, %103 : vector<8x256xf32>
    %105 = arith.mulf %104, %94 : vector<8x256xf32>
    %cst_41 = arith.constant 0.254829586 : f32
    %106 = vector.broadcast %cst_41 : f32 to vector<8x256xf32>
    %107 = arith.addf %105, %106 : vector<8x256xf32>
    %108 = arith.mulf %107, %94 : vector<8x256xf32>
    %cst_42 = arith.constant 0.000000e+00 : f32
    %109 = vector.broadcast %cst_42 : f32 to vector<8x256xf32>
    %110 = arith.subf %109, %89 : vector<8x256xf32>
    %111 = arith.mulf %110, %89 : vector<8x256xf32>
    %112 = math.exp %111 : vector<8x256xf32>
    %113 = arith.mulf %108, %112 : vector<8x256xf32>
    %cst_43 = arith.constant 1.000000e+00 : f32
    %114 = vector.broadcast %cst_43 : f32 to vector<8x256xf32>
    %115 = arith.subf %114, %113 : vector<8x256xf32>
    %cst_44 = arith.constant 0.000000e+00 : f32
    %116 = vector.broadcast %cst_44 : f32 to vector<8x256xf32>
    %117 = arith.cmpf olt, %86, %116 : vector<8x256xf32>
    %cst_45 = arith.constant 0.000000e+00 : f32
    %118 = vector.broadcast %cst_45 : f32 to vector<8x256xf32>
    %119 = arith.subf %118, %115 : vector<8x256xf32>
    %120 = arith.select %117, %119, %115 : vector<8x256xi1>, vector<8x256xf32>
    %cst_46 = arith.constant 5.000000e-01 : f32
    %121 = vector.broadcast %cst_46 : f32 to vector<8x256xf32>
    %122 = arith.mulf %121, %86 : vector<8x256xf32>
    %cst_47 = arith.constant 1.000000e+00 : f32
    %123 = vector.broadcast %cst_47 : f32 to vector<8x256xf32>
    %124 = arith.addf %123, %120 : vector<8x256xf32>
    %125 = arith.mulf %122, %124 : vector<8x256xf32>
    %c0_48 = arith.constant 0 : index
    %c768 = arith.constant 768 : index
    %126 = vector.load %arg5[%c0_48, %c768] : memref<256x1408xbf16, #tpu.memory_space<vmem>>, vector<256x256xbf16>
    %127 = arith.truncf %125 : vector<8x256xf32> to vector<8x256xbf16>
    %cst_49 = arith.constant dense<0.000000e+00> : vector<8x256xf32>
    %128 = tpu.matmul %127, %126, %cst_49 {dimension_numbers = #tpu.dot_dimension_numbers<[1], [0], [0], [1], [0, 0, 1, 1], [], []>} : vector<8x256xbf16>, vector<256x256xbf16>, vector<8x256xf32> -> vector<8x256xf32>
    %c0_50 = arith.constant 0 : index
    %c3840 = arith.constant 3840 : index
    %129 = vector.load %arg9[%c0_50, %c3840] : memref<1x6144xf32, #tpu.memory_space<vmem>>, vector<1x256xf32>
    %130 = vector.broadcast %129 : vector<1x256xf32> to vector<8x256xf32>
    %131 = arith.addf %128, %130 : vector<8x256xf32>
    %132 = vector.extract_strided_slice %82 {offsets = [0, 256], sizes = [8, 256], strides = [1, 1]} : vector<8x512xf32> to vector<8x256xf32>
    %c0_51 = arith.constant 0 : index
    %c1024 = arith.constant 1024 : index
    %133 = vector.load %arg5[%c0_51, %c1024] : memref<256x1408xbf16, #tpu.memory_space<vmem>>, vector<256x384xbf16>
    %134 = arith.truncf %131 : vector<8x256xf32> to vector<8x256xbf16>
    %cst_52 = arith.constant dense<0.000000e+00> : vector<8x384xf32>
    %135 = tpu.matmul %134, %133, %cst_52 {dimension_numbers = #tpu.dot_dimension_numbers<[1], [0], [0], [1], [0, 0, 1, 1], [], []>} : vector<8x256xbf16>, vector<256x384xbf16>, vector<8x384xf32> -> vector<8x384xf32>
    %136 = vector.extract_strided_slice %135 {offsets = [0, 0], sizes = [8, 128], strides = [1, 1]} : vector<8x384xf32> to vector<8x128xf32>
    %c0_53 = arith.constant 0 : index
    %c4096 = arith.constant 4096 : index
    %137 = vector.load %arg9[%c0_53, %c4096] : memref<1x6144xf32, #tpu.memory_space<vmem>>, vector<1x128xf32>
    %138 = vector.broadcast %137 : vector<1x128xf32> to vector<8x128xf32>
    %139 = arith.addf %136, %138 : vector<8x128xf32>
    %cst_54 = arith.constant 0.707106769 : f32
    %140 = vector.broadcast %cst_54 : f32 to vector<8x128xf32>
    %141 = arith.mulf %139, %140 : vector<8x128xf32>
    %142 = math.absf %141 : vector<8x128xf32>
    %cst_55 = arith.constant 0.327591091 : f32
    %143 = vector.broadcast %cst_55 : f32 to vector<8x128xf32>
    %144 = arith.mulf %143, %142 : vector<8x128xf32>
    %cst_56 = arith.constant 1.000000e+00 : f32
    %145 = vector.broadcast %cst_56 : f32 to vector<8x128xf32>
    %146 = arith.addf %145, %144 : vector<8x128xf32>
    %147 = tpu.reciprocal %146 {approx = true} : vector<8x128xf32> -> vector<8x128xf32>
    %cst_57 = arith.constant 1.06140542 : f32
    %148 = vector.broadcast %cst_57 : f32 to vector<8x128xf32>
    %149 = arith.mulf %148, %147 : vector<8x128xf32>
    %cst_58 = arith.constant 1.45315206 : f32
    %150 = vector.broadcast %cst_58 : f32 to vector<8x128xf32>
    %151 = arith.subf %149, %150 : vector<8x128xf32>
    %152 = arith.mulf %151, %147 : vector<8x128xf32>
    %cst_59 = arith.constant 1.42141378 : f32
    %153 = vector.broadcast %cst_59 : f32 to vector<8x128xf32>
    %154 = arith.addf %152, %153 : vector<8x128xf32>
    %155 = arith.mulf %154, %147 : vector<8x128xf32>
    %cst_60 = arith.constant 0.284496725 : f32
    %156 = vector.broadcast %cst_60 : f32 to vector<8x128xf32>
    %157 = arith.subf %155, %156 : vector<8x128xf32>
    %158 = arith.mulf %157, %147 : vector<8x128xf32>
    %cst_61 = arith.constant 0.254829586 : f32
    %159 = vector.broadcast %cst_61 : f32 to vector<8x128xf32>
    %160 = arith.addf %158, %159 : vector<8x128xf32>
    %161 = arith.mulf %160, %147 : vector<8x128xf32>
    %cst_62 = arith.constant 0.000000e+00 : f32
    %162 = vector.broadcast %cst_62 : f32 to vector<8x128xf32>
    %163 = arith.subf %162, %142 : vector<8x128xf32>
    %164 = arith.mulf %163, %142 : vector<8x128xf32>
    %165 = math.exp %164 : vector<8x128xf32>
    %166 = arith.mulf %161, %165 : vector<8x128xf32>
    %cst_63 = arith.constant 1.000000e+00 : f32
    %167 = vector.broadcast %cst_63 : f32 to vector<8x128xf32>
    %168 = arith.subf %167, %166 : vector<8x128xf32>
    %cst_64 = arith.constant 0.000000e+00 : f32
    %169 = vector.broadcast %cst_64 : f32 to vector<8x128xf32>
    %170 = arith.cmpf olt, %139, %169 : vector<8x128xf32>
    %cst_65 = arith.constant 0.000000e+00 : f32
    %171 = vector.broadcast %cst_65 : f32 to vector<8x128xf32>
    %172 = arith.subf %171, %168 : vector<8x128xf32>
    %173 = arith.select %170, %172, %168 : vector<8x128xi1>, vector<8x128xf32>
    %cst_66 = arith.constant 5.000000e-01 : f32
    %174 = vector.broadcast %cst_66 : f32 to vector<8x128xf32>
    %175 = arith.mulf %174, %139 : vector<8x128xf32>
    %cst_67 = arith.constant 1.000000e+00 : f32
    %176 = vector.broadcast %cst_67 : f32 to vector<8x128xf32>
    %177 = arith.addf %176, %173 : vector<8x128xf32>
    %178 = arith.mulf %175, %177 : vector<8x128xf32>
    %c0_68 = arith.constant 0 : index
    %c0_69 = arith.constant 0 : index
    %179 = vector.load %arg6[%c0_68, %c0_69] : memref<128x512xbf16, #tpu.memory_space<vmem>>, vector<128x128xbf16>
    %180 = arith.truncf %178 : vector<8x128xf32> to vector<8x128xbf16>
    %cst_70 = arith.constant dense<0.000000e+00> : vector<8x128xf32>
    %181 = tpu.matmul %180, %179, %cst_70 {dimension_numbers = #tpu.dot_dimension_numbers<[1], [0], [0], [1], [0, 0, 1, 1], [], []>} : vector<8x128xbf16>, vector<128x128xbf16>, vector<8x128xf32> -> vector<8x128xf32>
    %c0_71 = arith.constant 0 : index
    %c4224 = arith.constant 4224 : index
    %182 = vector.load %arg9[%c0_71, %c4224] : memref<1x6144xf32, #tpu.memory_space<vmem>>, vector<1x128xf32>
    %183 = vector.broadcast %182 : vector<1x128xf32> to vector<8x128xf32>
    %184 = arith.addf %181, %183 : vector<8x128xf32>
    %185 = vector.extract_strided_slice %135 {offsets = [0, 128], sizes = [8, 256], strides = [1, 1]} : vector<8x384xf32> to vector<8x256xf32>
    %c0_72 = arith.constant 0 : index
    %c128 = arith.constant 128 : index
    %186 = vector.load %arg6[%c0_72, %c128] : memref<128x512xbf16, #tpu.memory_space<vmem>>, vector<128x256xbf16>
    %187 = arith.truncf %184 : vector<8x128xf32> to vector<8x128xbf16>
    %cst_73 = arith.constant dense<0.000000e+00> : vector<8x256xf32>
    %188 = tpu.matmul %187, %186, %cst_73 {dimension_numbers = #tpu.dot_dimension_numbers<[1], [0], [0], [1], [0, 0, 1, 1], [], []>} : vector<8x128xbf16>, vector<128x256xbf16>, vector<8x256xf32> -> vector<8x256xf32>
    %189 = vector.extract_strided_slice %188 {offsets = [0, 0], sizes = [8, 128], strides = [1, 1]} : vector<8x256xf32> to vector<8x128xf32>
    %190 = vector.extract_strided_slice %188 {offsets = [0, 128], sizes = [8, 128], strides = [1, 1]} : vector<8x256xf32> to vector<8x128xf32>
    %c0_74 = arith.constant 0 : index
    %c4352 = arith.constant 4352 : index
    %191 = vector.load %arg9[%c0_74, %c4352] : memref<1x6144xf32, #tpu.memory_space<vmem>>, vector<1x128xf32>
    %192 = vector.broadcast %191 : vector<1x128xf32> to vector<8x128xf32>
    %193 = arith.addf %190, %192 : vector<8x128xf32>
    %cst_75 = arith.constant 0.707106769 : f32
    %194 = vector.broadcast %cst_75 : f32 to vector<8x128xf32>
    %195 = arith.mulf %193, %194 : vector<8x128xf32>
    %196 = math.absf %195 : vector<8x128xf32>
    %cst_76 = arith.constant 0.327591091 : f32
    %197 = vector.broadcast %cst_76 : f32 to vector<8x128xf32>
    %198 = arith.mulf %197, %196 : vector<8x128xf32>
    %cst_77 = arith.constant 1.000000e+00 : f32
    %199 = vector.broadcast %cst_77 : f32 to vector<8x128xf32>
    %200 = arith.addf %199, %198 : vector<8x128xf32>
    %201 = tpu.reciprocal %200 {approx = true} : vector<8x128xf32> -> vector<8x128xf32>
    %cst_78 = arith.constant 1.06140542 : f32
    %202 = vector.broadcast %cst_78 : f32 to vector<8x128xf32>
    %203 = arith.mulf %202, %201 : vector<8x128xf32>
    %cst_79 = arith.constant 1.45315206 : f32
    %204 = vector.broadcast %cst_79 : f32 to vector<8x128xf32>
    %205 = arith.subf %203, %204 : vector<8x128xf32>
    %206 = arith.mulf %205, %201 : vector<8x128xf32>
    %cst_80 = arith.constant 1.42141378 : f32
    %207 = vector.broadcast %cst_80 : f32 to vector<8x128xf32>
    %208 = arith.addf %206, %207 : vector<8x128xf32>
    %209 = arith.mulf %208, %201 : vector<8x128xf32>
    %cst_81 = arith.constant 0.284496725 : f32
    %210 = vector.broadcast %cst_81 : f32 to vector<8x128xf32>
    %211 = arith.subf %209, %210 : vector<8x128xf32>
    %212 = arith.mulf %211, %201 : vector<8x128xf32>
    %cst_82 = arith.constant 0.254829586 : f32
    %213 = vector.broadcast %cst_82 : f32 to vector<8x128xf32>
    %214 = arith.addf %212, %213 : vector<8x128xf32>
    %215 = arith.mulf %214, %201 : vector<8x128xf32>
    %cst_83 = arith.constant 0.000000e+00 : f32
    %216 = vector.broadcast %cst_83 : f32 to vector<8x128xf32>
    %217 = arith.subf %216, %196 : vector<8x128xf32>
    %218 = arith.mulf %217, %196 : vector<8x128xf32>
    %219 = math.exp %218 : vector<8x128xf32>
    %220 = arith.mulf %215, %219 : vector<8x128xf32>
    %cst_84 = arith.constant 1.000000e+00 : f32
    %221 = vector.broadcast %cst_84 : f32 to vector<8x128xf32>
    %222 = arith.subf %221, %220 : vector<8x128xf32>
    %cst_85 = arith.constant 0.000000e+00 : f32
    %223 = vector.broadcast %cst_85 : f32 to vector<8x128xf32>
    %224 = arith.cmpf olt, %193, %223 : vector<8x128xf32>
    %cst_86 = arith.constant 0.000000e+00 : f32
    %225 = vector.broadcast %cst_86 : f32 to vector<8x128xf32>
    %226 = arith.subf %225, %222 : vector<8x128xf32>
    %227 = arith.select %224, %226, %222 : vector<8x128xi1>, vector<8x128xf32>
    %cst_87 = arith.constant 5.000000e-01 : f32
    %228 = vector.broadcast %cst_87 : f32 to vector<8x128xf32>
    %229 = arith.mulf %228, %193 : vector<8x128xf32>
    %cst_88 = arith.constant 1.000000e+00 : f32
    %230 = vector.broadcast %cst_88 : f32 to vector<8x128xf32>
    %231 = arith.addf %230, %227 : vector<8x128xf32>
    %232 = arith.mulf %229, %231 : vector<8x128xf32>
    %c0_89 = arith.constant 0 : index
    %c384 = arith.constant 384 : index
    %233 = vector.load %arg6[%c0_89, %c384] : memref<128x512xbf16, #tpu.memory_space<vmem>>, vector<128x128xbf16>
    %234 = arith.truncf %232 : vector<8x128xf32> to vector<8x128xbf16>
    %cst_90 = arith.constant dense<0.000000e+00> : vector<8x128xf32>
    %235 = tpu.matmul %234, %233, %cst_90 {dimension_numbers = #tpu.dot_dimension_numbers<[1], [0], [0], [1], [0, 0, 1, 1], [], []>} : vector<8x128xbf16>, vector<128x128xbf16>, vector<8x128xf32> -> vector<8x128xf32>
    %c0_91 = arith.constant 0 : index
    %c4480 = arith.constant 4480 : index
    %236 = vector.load %arg9[%c0_91, %c4480] : memref<1x6144xf32, #tpu.memory_space<vmem>>, vector<1x128xf32>
    %237 = vector.broadcast %236 : vector<1x128xf32> to vector<8x128xf32>
    %238 = arith.addf %235, %237 : vector<8x128xf32>
    %c0_i32_92 = arith.constant 0 : i32
    %239 = tpu.memref_slice %arg19[%c0_i32_92] : memref<4x!tpu.dma_semaphore, #tpu.memory_space<semaphore_mem>> -> memref<1x!tpu.dma_semaphore, #tpu.memory_space<semaphore_mem>>
    %240 = tpu.memref_squeeze %239 : memref<1x!tpu.dma_semaphore, #tpu.memory_space<semaphore_mem>> -> memref<!tpu.dma_semaphore, #tpu.memory_space<semaphore_mem>>
    tpu.wait_dma2 semaphore(%240 : memref<!tpu.dma_semaphore, #tpu.memory_space<semaphore_mem>>) src(%arg10 : memref<1024x448xbf16, #tpu.memory_space<any>>) dst(%arg15 : memref<1024x448xbf16, #tpu.memory_space<vmem>>)
    %c0_93 = arith.constant 0 : index
    %c0_94 = arith.constant 0 : index
    %241 = vector.load %arg15[%c0_93, %c0_94] : memref<1024x448xbf16, #tpu.memory_space<vmem>>, vector<1024x448xbf16>
    %242 = arith.truncf %12 : vector<8x1024xf32> to vector<8x1024xbf16>
    %cst_95 = arith.constant dense<0.000000e+00> : vector<8x448xf32>
    %243 = tpu.matmul %242, %241, %cst_95 {dimension_numbers = #tpu.dot_dimension_numbers<[1], [0], [0], [1], [0, 0, 1, 1], [], []>} : vector<8x1024xbf16>, vector<1024x448xbf16>, vector<8x448xf32> -> vector<8x448xf32>
    %c0_96 = arith.constant 0 : index
    %c0_97 = arith.constant 0 : index
    %244 = vector.load %arg9[%c0_96, %c0_97] : memref<1x6144xf32, #tpu.memory_space<vmem>>, vector<1x448xf32>
    %245 = vector.broadcast %244 : vector<1x448xf32> to vector<8x448xf32>
    %246 = arith.addf %243, %245 : vector<8x448xf32>
    %c0_98 = arith.constant 0 : index
    %c0_99 = arith.constant 0 : index
    %247 = vector.load %arg7[%c0_98, %c0_99] : memref<448x16xf32, #tpu.memory_space<vmem>>, vector<448x16xf32>
    %cst_100 = arith.constant dense<0.000000e+00> : vector<8x16xf32>
    %248 = tpu.matmul %246, %247, %cst_100 {dimension_numbers = #tpu.dot_dimension_numbers<[1], [0], [0], [1], [0, 0, 1, 1], [], []>} : vector<8x448xf32>, vector<448x16xf32>, vector<8x16xf32> -> vector<8x16xf32>
    %249 = arith.mulf %246, %246 : vector<8x448xf32>
    %c0_101 = arith.constant 0 : index
    %c0_102 = arith.constant 0 : index
    %250 = vector.load %arg7[%c0_101, %c0_102] : memref<448x16xf32, #tpu.memory_space<vmem>>, vector<448x16xf32>
    %cst_103 = arith.constant dense<0.000000e+00> : vector<8x16xf32>
    %251 = tpu.matmul %249, %250, %cst_103 {dimension_numbers = #tpu.dot_dimension_numbers<[1], [0], [0], [1], [0, 0, 1, 1], [], []>} : vector<8x448xf32>, vector<448x16xf32>, vector<8x16xf32> -> vector<8x16xf32>
    %c0_104 = arith.constant 0 : index
    %c0_105 = arith.constant 0 : index
    %252 = vector.load %arg8[%c0_104, %c0_105] : memref<16x448xf32, #tpu.memory_space<vmem>>, vector<16x448xf32>
    %cst_106 = arith.constant dense<0.000000e+00> : vector<8x448xf32>
    %253 = tpu.matmul %248, %252, %cst_106 {dimension_numbers = #tpu.dot_dimension_numbers<[1], [0], [0], [1], [0, 0, 1, 1], [], []>} : vector<8x16xf32>, vector<16x448xf32>, vector<8x448xf32> -> vector<8x448xf32>
    %c0_107 = arith.constant 0 : index
    %c0_108 = arith.constant 0 : index
    %254 = vector.load %arg8[%c0_107, %c0_108] : memref<16x448xf32, #tpu.memory_space<vmem>>, vector<16x448xf32>
    %cst_109 = arith.constant dense<0.000000e+00> : vector<8x448xf32>
    %255 = tpu.matmul %251, %254, %cst_109 {dimension_numbers = #tpu.dot_dimension_numbers<[1], [0], [0], [1], [0, 0, 1, 1], [], []>} : vector<8x16xf32>, vector<16x448xf32>, vector<8x448xf32> -> vector<8x448xf32>
    %256 = arith.mulf %253, %253 : vector<8x448xf32>
    %257 = arith.subf %255, %256 : vector<8x448xf32>
    %258 = arith.subf %246, %253 : vector<8x448xf32>
    %cst_110 = arith.constant 9.99999974E-6 : f32
    %259 = vector.broadcast %cst_110 : f32 to vector<8x448xf32>
    %260 = arith.addf %257, %259 : vector<8x448xf32>
    %261 = math.rsqrt %260 : vector<8x448xf32>
    %262 = arith.mulf %258, %261 : vector<8x448xf32>
    %c0_111 = arith.constant 0 : index
    %c512 = arith.constant 512 : index
    %263 = vector.load %arg9[%c0_111, %c512] : memref<1x6144xf32, #tpu.memory_space<vmem>>, vector<1x448xf32>
    %264 = vector.broadcast %263 : vector<1x448xf32> to vector<8x448xf32>
    %265 = arith.mulf %262, %264 : vector<8x448xf32>
    %c0_112 = arith.constant 0 : index
    %c1024_113 = arith.constant 1024 : index
    %266 = vector.load %arg9[%c0_112, %c1024_113] : memref<1x6144xf32, #tpu.memory_space<vmem>>, vector<1x448xf32>
    %267 = vector.broadcast %266 : vector<1x448xf32> to vector<8x448xf32>
    %268 = arith.addf %265, %267 : vector<8x448xf32>
    %cst_114 = arith.constant 0.707106769 : f32
    %269 = vector.broadcast %cst_114 : f32 to vector<8x448xf32>
    %270 = arith.mulf %268, %269 : vector<8x448xf32>
    %271 = math.absf %270 : vector<8x448xf32>
    %cst_115 = arith.constant 0.327591091 : f32
    %272 = vector.broadcast %cst_115 : f32 to vector<8x448xf32>
    %273 = arith.mulf %272, %271 : vector<8x448xf32>
    %cst_116 = arith.constant 1.000000e+00 : f32
    %274 = vector.broadcast %cst_116 : f32 to vector<8x448xf32>
    %275 = arith.addf %274, %273 : vector<8x448xf32>
    %276 = tpu.reciprocal %275 {approx = true} : vector<8x448xf32> -> vector<8x448xf32>
    %cst_117 = arith.constant 1.06140542 : f32
    %277 = vector.broadcast %cst_117 : f32 to vector<8x448xf32>
    %278 = arith.mulf %277, %276 : vector<8x448xf32>
    %cst_118 = arith.constant 1.45315206 : f32
    %279 = vector.broadcast %cst_118 : f32 to vector<8x448xf32>
    %280 = arith.subf %278, %279 : vector<8x448xf32>
    %281 = arith.mulf %280, %276 : vector<8x448xf32>
    %cst_119 = arith.constant 1.42141378 : f32
    %282 = vector.broadcast %cst_119 : f32 to vector<8x448xf32>
    %283 = arith.addf %281, %282 : vector<8x448xf32>
    %284 = arith.mulf %283, %276 : vector<8x448xf32>
    %cst_120 = arith.constant 0.284496725 : f32
    %285 = vector.broadcast %cst_120 : f32 to vector<8x448xf32>
    %286 = arith.subf %284, %285 : vector<8x448xf32>
    %287 = arith.mulf %286, %276 : vector<8x448xf32>
    %cst_121 = arith.constant 0.254829586 : f32
    %288 = vector.broadcast %cst_121 : f32 to vector<8x448xf32>
    %289 = arith.addf %287, %288 : vector<8x448xf32>
    %290 = arith.mulf %289, %276 : vector<8x448xf32>
    %cst_122 = arith.constant 0.000000e+00 : f32
    %291 = vector.broadcast %cst_122 : f32 to vector<8x448xf32>
    %292 = arith.subf %291, %271 : vector<8x448xf32>
    %293 = arith.mulf %292, %271 : vector<8x448xf32>
    %294 = math.exp %293 : vector<8x448xf32>
    %295 = arith.mulf %290, %294 : vector<8x448xf32>
    %cst_123 = arith.constant 1.000000e+00 : f32
    %296 = vector.broadcast %cst_123 : f32 to vector<8x448xf32>
    %297 = arith.subf %296, %295 : vector<8x448xf32>
    %cst_124 = arith.constant 0.000000e+00 : f32
    %298 = vector.broadcast %cst_124 : f32 to vector<8x448xf32>
    %299 = arith.cmpf olt, %268, %298 : vector<8x448xf32>
    %cst_125 = arith.constant 0.000000e+00 : f32
    %300 = vector.broadcast %cst_125 : f32 to vector<8x448xf32>
    %301 = arith.subf %300, %297 : vector<8x448xf32>
    %302 = arith.select %299, %301, %297 : vector<8x448xi1>, vector<8x448xf32>
    %cst_126 = arith.constant 5.000000e-01 : f32
    %303 = vector.broadcast %cst_126 : f32 to vector<8x448xf32>
    %304 = arith.mulf %303, %268 : vector<8x448xf32>
    %cst_127 = arith.constant 1.000000e+00 : f32
    %305 = vector.broadcast %cst_127 : f32 to vector<8x448xf32>
    %306 = arith.addf %305, %302 : vector<8x448xf32>
    %307 = arith.mulf %304, %306 : vector<8x448xf32>
    %c1_i32_128 = arith.constant 1 : i32
    %308 = tpu.memref_slice %arg19[%c1_i32_128] : memref<4x!tpu.dma_semaphore, #tpu.memory_space<semaphore_mem>> -> memref<1x!tpu.dma_semaphore, #tpu.memory_space<semaphore_mem>>
    %309 = tpu.memref_squeeze %308 : memref<1x!tpu.dma_semaphore, #tpu.memory_space<semaphore_mem>> -> memref<!tpu.dma_semaphore, #tpu.memory_space<semaphore_mem>>
    tpu.wait_dma2 semaphore(%309 : memref<!tpu.dma_semaphore, #tpu.memory_space<semaphore_mem>>) src(%arg11 : memref<256x1152xbf16, #tpu.memory_space<any>>) dst(%arg16 : memref<256x1152xbf16, #tpu.memory_space<vmem>>)
    %c2_i32_129 = arith.constant 2 : i32
    %310 = tpu.memref_slice %arg19[%c2_i32_129] : memref<4x!tpu.dma_semaphore, #tpu.memory_space<semaphore_mem>> -> memref<1x!tpu.dma_semaphore, #tpu.memory_space<semaphore_mem>>
    %311 = tpu.memref_squeeze %310 : memref<1x!tpu.dma_semaphore, #tpu.memory_space<semaphore_mem>> -> memref<!tpu.dma_semaphore, #tpu.memory_space<semaphore_mem>>
    tpu.wait_dma2 semaphore(%311 : memref<!tpu.dma_semaphore, #tpu.memory_space<semaphore_mem>>) src(%arg12 : memref<128x768xbf16, #tpu.memory_space<any>>) dst(%arg17 : memref<128x768xbf16, #tpu.memory_space<vmem>>)
    %c3_i32_130 = arith.constant 3 : i32
    %312 = tpu.memref_slice %arg19[%c3_i32_130] : memref<4x!tpu.dma_semaphore, #tpu.memory_space<semaphore_mem>> -> memref<1x!tpu.dma_semaphore, #tpu.memory_space<semaphore_mem>>
    %313 = tpu.memref_squeeze %312 : memref<1x!tpu.dma_semaphore, #tpu.memory_space<semaphore_mem>> -> memref<!tpu.dma_semaphore, #tpu.memory_space<semaphore_mem>>
    tpu.wait_dma2 semaphore(%313 : memref<!tpu.dma_semaphore, #tpu.memory_space<semaphore_mem>>) src(%arg13 : memref<64x128xbf16, #tpu.memory_space<any>>) dst(%arg18 : memref<64x128xbf16, #tpu.memory_space<vmem>>)
    %314 = vector.extract_strided_slice %307 {offsets = [0, 0], sizes = [8, 256], strides = [1, 1]} : vector<8x448xf32> to vector<8x256xf32>
    %c0_131 = arith.constant 0 : index
    %c0_132 = arith.constant 0 : index
    %315 = vector.load %arg16[%c0_131, %c0_132] : memref<256x1152xbf16, #tpu.memory_space<vmem>>, vector<256x256xbf16>
    %316 = arith.truncf %314 : vector<8x256xf32> to vector<8x256xbf16>
    %cst_133 = arith.constant dense<0.000000e+00> : vector<8x256xf32>
    %317 = tpu.matmul %316, %315, %cst_133 {dimension_numbers = #tpu.dot_dimension_numbers<[1], [0], [0], [1], [0, 0, 1, 1], [], []>} : vector<8x256xbf16>, vector<256x256xbf16>, vector<8x256xf32> -> vector<8x256xf32>
    %c0_134 = arith.constant 0 : index
    %c2560 = arith.constant 2560 : index
    %318 = vector.load %arg9[%c0_134, %c2560] : memref<1x6144xf32, #tpu.memory_space<vmem>>, vector<1x256xf32>
    %319 = vector.broadcast %318 : vector<1x256xf32> to vector<8x256xf32>
    %320 = arith.addf %317, %319 : vector<8x256xf32>
    %321 = vector.extract_strided_slice %307 {offsets = [0, 256], sizes = [8, 128], strides = [1, 1]} : vector<8x448xf32> to vector<8x128xf32>
    %c0_135 = arith.constant 0 : index
    %c0_136 = arith.constant 0 : index
    %322 = vector.load %arg17[%c0_135, %c0_136] : memref<128x768xbf16, #tpu.memory_space<vmem>>, vector<128x128xbf16>
    %323 = arith.truncf %321 : vector<8x128xf32> to vector<8x128xbf16>
    %cst_137 = arith.constant dense<0.000000e+00> : vector<8x128xf32>
    %324 = tpu.matmul %323, %322, %cst_137 {dimension_numbers = #tpu.dot_dimension_numbers<[1], [0], [0], [1], [0, 0, 1, 1], [], []>} : vector<8x128xbf16>, vector<128x128xbf16>, vector<8x128xf32> -> vector<8x128xf32>
    %c0_138 = arith.constant 0 : index
    %c2816 = arith.constant 2816 : index
    %325 = vector.load %arg9[%c0_138, %c2816] : memref<1x6144xf32, #tpu.memory_space<vmem>>, vector<1x128xf32>
    %326 = vector.broadcast %325 : vector<1x128xf32> to vector<8x128xf32>
    %327 = arith.addf %324, %326 : vector<8x128xf32>
    %328 = vector.extract_strided_slice %307 {offsets = [0, 384], sizes = [8, 64], strides = [1, 1]} : vector<8x448xf32> to vector<8x64xf32>
    %c0_139 = arith.constant 0 : index
    %c0_140 = arith.constant 0 : index
    %329 = vector.load %arg18[%c0_139, %c0_140] : memref<64x128xbf16, #tpu.memory_space<vmem>>, vector<64x128xbf16>
    %330 = arith.truncf %328 : vector<8x64xf32> to vector<8x64xbf16>
    %cst_141 = arith.constant dense<0.000000e+00> : vector<8x128xf32>
    %331 = tpu.matmul %330, %329, %cst_141 {dimension_numbers = #tpu.dot_dimension_numbers<[1], [0], [0], [1], [0, 0, 1, 1], [], []>} : vector<8x64xbf16>, vector<64x128xbf16>, vector<8x128xf32> -> vector<8x128xf32>
    %c0_142 = arith.constant 0 : index
    %c2944 = arith.constant 2944 : index
    %332 = vector.load %arg9[%c0_142, %c2944] : memref<1x6144xf32, #tpu.memory_space<vmem>>, vector<1x128xf32>
    %333 = vector.broadcast %332 : vector<1x128xf32> to vector<8x128xf32>
    %334 = arith.addf %331, %333 : vector<8x128xf32>
    %335 = arith.mulf %238, %334 : vector<8x128xf32>
    %336 = arith.addf %335, %28 : vector<8x128xf32>
    %c0_143 = arith.constant 0 : index
    %c128_144 = arith.constant 128 : index
    %337 = vector.load %arg17[%c0_143, %c128_144] : memref<128x768xbf16, #tpu.memory_space<vmem>>, vector<128x128xbf16>
    %338 = arith.truncf %336 : vector<8x128xf32> to vector<8x128xbf16>
    %cst_145 = arith.constant dense<0.000000e+00> : vector<8x128xf32>
    %339 = tpu.matmul %338, %337, %cst_145 {dimension_numbers = #tpu.dot_dimension_numbers<[1], [0], [0], [1], [0, 0, 1, 1], [], []>} : vector<8x128xbf16>, vector<128x128xbf16>, vector<8x128xf32> -> vector<8x128xf32>
    %340 = arith.addf %339, %189 : vector<8x128xf32>
    %c0_146 = arith.constant 0 : index
    %c4608 = arith.constant 4608 : index
    %341 = vector.load %arg9[%c0_146, %c4608] : memref<1x6144xf32, #tpu.memory_space<vmem>>, vector<1x128xf32>
    %342 = vector.broadcast %341 : vector<1x128xf32> to vector<8x128xf32>
    %343 = arith.addf %340, %342 : vector<8x128xf32>
    %cst_147 = arith.constant 0.707106769 : f32
    %344 = vector.broadcast %cst_147 : f32 to vector<8x128xf32>
    %345 = arith.mulf %343, %344 : vector<8x128xf32>
    %346 = math.absf %345 : vector<8x128xf32>
    %cst_148 = arith.constant 0.327591091 : f32
    %347 = vector.broadcast %cst_148 : f32 to vector<8x128xf32>
    %348 = arith.mulf %347, %346 : vector<8x128xf32>
    %cst_149 = arith.constant 1.000000e+00 : f32
    %349 = vector.broadcast %cst_149 : f32 to vector<8x128xf32>
    %350 = arith.addf %349, %348 : vector<8x128xf32>
    %351 = tpu.reciprocal %350 {approx = true} : vector<8x128xf32> -> vector<8x128xf32>
    %cst_150 = arith.constant 1.06140542 : f32
    %352 = vector.broadcast %cst_150 : f32 to vector<8x128xf32>
    %353 = arith.mulf %352, %351 : vector<8x128xf32>
    %cst_151 = arith.constant 1.45315206 : f32
    %354 = vector.broadcast %cst_151 : f32 to vector<8x128xf32>
    %355 = arith.subf %353, %354 : vector<8x128xf32>
    %356 = arith.mulf %355, %351 : vector<8x128xf32>
    %cst_152 = arith.constant 1.42141378 : f32
    %357 = vector.broadcast %cst_152 : f32 to vector<8x128xf32>
    %358 = arith.addf %356, %357 : vector<8x128xf32>
    %359 = arith.mulf %358, %351 : vector<8x128xf32>
    %cst_153 = arith.constant 0.284496725 : f32
    %360 = vector.broadcast %cst_153 : f32 to vector<8x128xf32>
    %361 = arith.subf %359, %360 : vector<8x128xf32>
    %362 = arith.mulf %361, %351 : vector<8x128xf32>
    %cst_154 = arith.constant 0.254829586 : f32
    %363 = vector.broadcast %cst_154 : f32 to vector<8x128xf32>
    %364 = arith.addf %362, %363 : vector<8x128xf32>
    %365 = arith.mulf %364, %351 : vector<8x128xf32>
    %cst_155 = arith.constant 0.000000e+00 : f32
    %366 = vector.broadcast %cst_155 : f32 to vector<8x128xf32>
    %367 = arith.subf %366, %346 : vector<8x128xf32>
    %368 = arith.mulf %367, %346 : vector<8x128xf32>
    %369 = math.exp %368 : vector<8x128xf32>
    %370 = arith.mulf %365, %369 : vector<8x128xf32>
    %cst_156 = arith.constant 1.000000e+00 : f32
    %371 = vector.broadcast %cst_156 : f32 to vector<8x128xf32>
    %372 = arith.subf %371, %370 : vector<8x128xf32>
    %cst_157 = arith.constant 0.000000e+00 : f32
    %373 = vector.broadcast %cst_157 : f32 to vector<8x128xf32>
    %374 = arith.cmpf olt, %343, %373 : vector<8x128xf32>
    %cst_158 = arith.constant 0.000000e+00 : f32
    %375 = vector.broadcast %cst_158 : f32 to vector<8x128xf32>
    %376 = arith.subf %375, %372 : vector<8x128xf32>
    %377 = arith.select %374, %376, %372 : vector<8x128xi1>, vector<8x128xf32>
    %cst_159 = arith.constant 5.000000e-01 : f32
    %378 = vector.broadcast %cst_159 : f32 to vector<8x128xf32>
    %379 = arith.mulf %378, %343 : vector<8x128xf32>
    %cst_160 = arith.constant 1.000000e+00 : f32
    %380 = vector.broadcast %cst_160 : f32 to vector<8x128xf32>
    %381 = arith.addf %380, %377 : vector<8x128xf32>
    %382 = arith.mulf %379, %381 : vector<8x128xf32>
    %c0_161 = arith.constant 0 : index
    %c256_162 = arith.constant 256 : index
    %383 = vector.load %arg17[%c0_161, %c256_162] : memref<128x768xbf16, #tpu.memory_space<vmem>>, vector<128x128xbf16>
    %384 = arith.truncf %382 : vector<8x128xf32> to vector<8x128xbf16>
    %cst_163 = arith.constant dense<0.000000e+00> : vector<8x128xf32>
    %385 = tpu.matmul %384, %383, %cst_163 {dimension_numbers = #tpu.dot_dimension_numbers<[1], [0], [0], [1], [0, 0, 1, 1], [], []>} : vector<8x128xbf16>, vector<128x128xbf16>, vector<8x128xf32> -> vector<8x128xf32>
    %c0_164 = arith.constant 0 : index
    %c4736 = arith.constant 4736 : index
    %386 = vector.load %arg9[%c0_164, %c4736] : memref<1x6144xf32, #tpu.memory_space<vmem>>, vector<1x128xf32>
    %387 = vector.broadcast %386 : vector<1x128xf32> to vector<8x128xf32>
    %388 = arith.addf %385, %387 : vector<8x128xf32>
    %389 = arith.mulf %388, %327 : vector<8x128xf32>
    %390 = arith.addf %389, %27 : vector<8x128xf32>
    %c0_165 = arith.constant 0 : index
    %c384_166 = arith.constant 384 : index
    %391 = vector.load %arg17[%c0_165, %c384_166] : memref<128x768xbf16, #tpu.memory_space<vmem>>, vector<128x256xbf16>
    %392 = arith.truncf %390 : vector<8x128xf32> to vector<8x128xbf16>
    %cst_167 = arith.constant dense<0.000000e+00> : vector<8x256xf32>
    %393 = tpu.matmul %392, %391, %cst_167 {dimension_numbers = #tpu.dot_dimension_numbers<[1], [0], [0], [1], [0, 0, 1, 1], [], []>} : vector<8x128xbf16>, vector<128x256xbf16>, vector<8x256xf32> -> vector<8x256xf32>
    %394 = arith.addf %393, %185 : vector<8x256xf32>
    %c0_168 = arith.constant 0 : index
    %c4864 = arith.constant 4864 : index
    %395 = vector.load %arg9[%c0_168, %c4864] : memref<1x6144xf32, #tpu.memory_space<vmem>>, vector<1x256xf32>
    %396 = vector.broadcast %395 : vector<1x256xf32> to vector<8x256xf32>
    %397 = arith.addf %394, %396 : vector<8x256xf32>
    %cst_169 = arith.constant 0.707106769 : f32
    %398 = vector.broadcast %cst_169 : f32 to vector<8x256xf32>
    %399 = arith.mulf %397, %398 : vector<8x256xf32>
    %400 = math.absf %399 : vector<8x256xf32>
    %cst_170 = arith.constant 0.327591091 : f32
    %401 = vector.broadcast %cst_170 : f32 to vector<8x256xf32>
    %402 = arith.mulf %401, %400 : vector<8x256xf32>
    %cst_171 = arith.constant 1.000000e+00 : f32
    %403 = vector.broadcast %cst_171 : f32 to vector<8x256xf32>
    %404 = arith.addf %403, %402 : vector<8x256xf32>
    %405 = tpu.reciprocal %404 {approx = true} : vector<8x256xf32> -> vector<8x256xf32>
    %cst_172 = arith.constant 1.06140542 : f32
    %406 = vector.broadcast %cst_172 : f32 to vector<8x256xf32>
    %407 = arith.mulf %406, %405 : vector<8x256xf32>
    %cst_173 = arith.constant 1.45315206 : f32
    %408 = vector.broadcast %cst_173 : f32 to vector<8x256xf32>
    %409 = arith.subf %407, %408 : vector<8x256xf32>
    %410 = arith.mulf %409, %405 : vector<8x256xf32>
    %cst_174 = arith.constant 1.42141378 : f32
    %411 = vector.broadcast %cst_174 : f32 to vector<8x256xf32>
    %412 = arith.addf %410, %411 : vector<8x256xf32>
    %413 = arith.mulf %412, %405 : vector<8x256xf32>
    %cst_175 = arith.constant 0.284496725 : f32
    %414 = vector.broadcast %cst_175 : f32 to vector<8x256xf32>
    %415 = arith.subf %413, %414 : vector<8x256xf32>
    %416 = arith.mulf %415, %405 : vector<8x256xf32>
    %cst_176 = arith.constant 0.254829586 : f32
    %417 = vector.broadcast %cst_176 : f32 to vector<8x256xf32>
    %418 = arith.addf %416, %417 : vector<8x256xf32>
    %419 = arith.mulf %418, %405 : vector<8x256xf32>
    %cst_177 = arith.constant 0.000000e+00 : f32
    %420 = vector.broadcast %cst_177 : f32 to vector<8x256xf32>
    %421 = arith.subf %420, %400 : vector<8x256xf32>
    %422 = arith.mulf %421, %400 : vector<8x256xf32>
    %423 = math.exp %422 : vector<8x256xf32>
    %424 = arith.mulf %419, %423 : vector<8x256xf32>
    %cst_178 = arith.constant 1.000000e+00 : f32
    %425 = vector.broadcast %cst_178 : f32 to vector<8x256xf32>
    %426 = arith.subf %425, %424 : vector<8x256xf32>
    %cst_179 = arith.constant 0.000000e+00 : f32
    %427 = vector.broadcast %cst_179 : f32 to vector<8x256xf32>
    %428 = arith.cmpf olt, %397, %427 : vector<8x256xf32>
    %cst_180 = arith.constant 0.000000e+00 : f32
    %429 = vector.broadcast %cst_180 : f32 to vector<8x256xf32>
    %430 = arith.subf %429, %426 : vector<8x256xf32>
    %431 = arith.select %428, %430, %426 : vector<8x256xi1>, vector<8x256xf32>
    %cst_181 = arith.constant 5.000000e-01 : f32
    %432 = vector.broadcast %cst_181 : f32 to vector<8x256xf32>
    %433 = arith.mulf %432, %397 : vector<8x256xf32>
    %cst_182 = arith.constant 1.000000e+00 : f32
    %434 = vector.broadcast %cst_182 : f32 to vector<8x256xf32>
    %435 = arith.addf %434, %431 : vector<8x256xf32>
    %436 = arith.mulf %433, %435 : vector<8x256xf32>
    %c0_183 = arith.constant 0 : index
    %c256_184 = arith.constant 256 : index
    %437 = vector.load %arg16[%c0_183, %c256_184] : memref<256x1152xbf16, #tpu.memory_space<vmem>>, vector<256x256xbf16>
    %438 = arith.truncf %436 : vector<8x256xf32> to vector<8x256xbf16>
    %cst_185 = arith.constant dense<0.000000e+00> : vector<8x256xf32>
    %439 = tpu.matmul %438, %437, %cst_185 {dimension_numbers = #tpu.dot_dimension_numbers<[1], [0], [0], [1], [0, 0, 1, 1], [], []>} : vector<8x256xbf16>, vector<256x256xbf16>, vector<8x256xf32> -> vector<8x256xf32>
    %c0_186 = arith.constant 0 : index
    %c5120 = arith.constant 5120 : index
    %440 = vector.load %arg9[%c0_186, %c5120] : memref<1x6144xf32, #tpu.memory_space<vmem>>, vector<1x256xf32>
    %441 = vector.broadcast %440 : vector<1x256xf32> to vector<8x256xf32>
    %442 = arith.addf %439, %441 : vector<8x256xf32>
    %443 = arith.mulf %442, %320 : vector<8x256xf32>
    %444 = arith.addf %443, %26 : vector<8x256xf32>
    %c0_187 = arith.constant 0 : index
    %c512_188 = arith.constant 512 : index
    %445 = vector.load %arg16[%c0_187, %c512_188] : memref<256x1152xbf16, #tpu.memory_space<vmem>>, vector<256x256xbf16>
    %446 = arith.truncf %444 : vector<8x256xf32> to vector<8x256xbf16>
    %cst_189 = arith.constant dense<0.000000e+00> : vector<8x256xf32>
    %447 = tpu.matmul %446, %445, %cst_189 {dimension_numbers = #tpu.dot_dimension_numbers<[1], [0], [0], [1], [0, 0, 1, 1], [], []>} : vector<8x256xbf16>, vector<256x256xbf16>, vector<8x256xf32> -> vector<8x256xf32>
    %448 = arith.addf %447, %132 : vector<8x256xf32>
    %c0_190 = arith.constant 0 : index
    %c5376 = arith.constant 5376 : index
    %449 = vector.load %arg9[%c0_190, %c5376] : memref<1x6144xf32, #tpu.memory_space<vmem>>, vector<1x256xf32>
    %450 = vector.broadcast %449 : vector<1x256xf32> to vector<8x256xf32>
    %451 = arith.addf %448, %450 : vector<8x256xf32>
    %cst_191 = arith.constant 0.707106769 : f32
    %452 = vector.broadcast %cst_191 : f32 to vector<8x256xf32>
    %453 = arith.mulf %451, %452 : vector<8x256xf32>
    %454 = math.absf %453 : vector<8x256xf32>
    %cst_192 = arith.constant 0.327591091 : f32
    %455 = vector.broadcast %cst_192 : f32 to vector<8x256xf32>
    %456 = arith.mulf %455, %454 : vector<8x256xf32>
    %cst_193 = arith.constant 1.000000e+00 : f32
    %457 = vector.broadcast %cst_193 : f32 to vector<8x256xf32>
    %458 = arith.addf %457, %456 : vector<8x256xf32>
    %459 = tpu.reciprocal %458 {approx = true} : vector<8x256xf32> -> vector<8x256xf32>
    %cst_194 = arith.constant 1.06140542 : f32
    %460 = vector.broadcast %cst_194 : f32 to vector<8x256xf32>
    %461 = arith.mulf %460, %459 : vector<8x256xf32>
    %cst_195 = arith.constant 1.45315206 : f32
    %462 = vector.broadcast %cst_195 : f32 to vector<8x256xf32>
    %463 = arith.subf %461, %462 : vector<8x256xf32>
    %464 = arith.mulf %463, %459 : vector<8x256xf32>
    %cst_196 = arith.constant 1.42141378 : f32
    %465 = vector.broadcast %cst_196 : f32 to vector<8x256xf32>
    %466 = arith.addf %464, %465 : vector<8x256xf32>
    %467 = arith.mulf %466, %459 : vector<8x256xf32>
    %cst_197 = arith.constant 0.284496725 : f32
    %468 = vector.broadcast %cst_197 : f32 to vector<8x256xf32>
    %469 = arith.subf %467, %468 : vector<8x256xf32>
    %470 = arith.mulf %469, %459 : vector<8x256xf32>
    %cst_198 = arith.constant 0.254829586 : f32
    %471 = vector.broadcast %cst_198 : f32 to vector<8x256xf32>
    %472 = arith.addf %470, %471 : vector<8x256xf32>
    %473 = arith.mulf %472, %459 : vector<8x256xf32>
    %cst_199 = arith.constant 0.000000e+00 : f32
    %474 = vector.broadcast %cst_199 : f32 to vector<8x256xf32>
    %475 = arith.subf %474, %454 : vector<8x256xf32>
    %476 = arith.mulf %475, %454 : vector<8x256xf32>
    %477 = math.exp %476 : vector<8x256xf32>
    %478 = arith.mulf %473, %477 : vector<8x256xf32>
    %cst_200 = arith.constant 1.000000e+00 : f32
    %479 = vector.broadcast %cst_200 : f32 to vector<8x256xf32>
    %480 = arith.subf %479, %478 : vector<8x256xf32>
    %cst_201 = arith.constant 0.000000e+00 : f32
    %481 = vector.broadcast %cst_201 : f32 to vector<8x256xf32>
    %482 = arith.cmpf olt, %451, %481 : vector<8x256xf32>
    %cst_202 = arith.constant 0.000000e+00 : f32
    %483 = vector.broadcast %cst_202 : f32 to vector<8x256xf32>
    %484 = arith.subf %483, %480 : vector<8x256xf32>
    %485 = arith.select %482, %484, %480 : vector<8x256xi1>, vector<8x256xf32>
    %cst_203 = arith.constant 5.000000e-01 : f32
    %486 = vector.broadcast %cst_203 : f32 to vector<8x256xf32>
    %487 = arith.mulf %486, %451 : vector<8x256xf32>
    %cst_204 = arith.constant 1.000000e+00 : f32
    %488 = vector.broadcast %cst_204 : f32 to vector<8x256xf32>
    %489 = arith.addf %488, %485 : vector<8x256xf32>
    %490 = arith.mulf %487, %489 : vector<8x256xf32>
    %c0_205 = arith.constant 0 : index
    %c768_206 = arith.constant 768 : index
    %491 = vector.load %arg16[%c0_205, %c768_206] : memref<256x1152xbf16, #tpu.memory_space<vmem>>, vector<256x256xbf16>
    %492 = arith.truncf %490 : vector<8x256xf32> to vector<8x256xbf16>
    %cst_207 = arith.constant dense<0.000000e+00> : vector<8x256xf32>
    %493 = tpu.matmul %492, %491, %cst_207 {dimension_numbers = #tpu.dot_dimension_numbers<[1], [0], [0], [1], [0, 0, 1, 1], [], []>} : vector<8x256xbf16>, vector<256x256xbf16>, vector<8x256xf32> -> vector<8x256xf32>
    %c0_208 = arith.constant 0 : index
    %c5632 = arith.constant 5632 : index
    %494 = vector.load %arg9[%c0_208, %c5632] : memref<1x6144xf32, #tpu.memory_space<vmem>>, vector<1x256xf32>
    %495 = vector.broadcast %494 : vector<1x256xf32> to vector<8x256xf32>
    %496 = arith.addf %493, %495 : vector<8x256xf32>
    %c0_209 = arith.constant 0 : index
    %c1024_210 = arith.constant 1024 : index
    %497 = vector.load %arg16[%c0_209, %c1024_210] : memref<256x1152xbf16, #tpu.memory_space<vmem>>, vector<256x128xbf16>
    %498 = arith.truncf %496 : vector<8x256xf32> to vector<8x256xbf16>
    %cst_211 = arith.constant dense<0.000000e+00> : vector<8x128xf32>
    %499 = tpu.matmul %498, %497, %cst_211 {dimension_numbers = #tpu.dot_dimension_numbers<[1], [0], [0], [1], [0, 0, 1, 1], [], []>} : vector<8x256xbf16>, vector<256x128xbf16>, vector<8x128xf32> -> vector<8x128xf32>
    %c0_212 = arith.constant 0 : index
    %c5888 = arith.constant 5888 : index
    %500 = vector.load %arg9[%c0_212, %c5888] : memref<1x6144xf32, #tpu.memory_space<vmem>>, vector<1x128xf32>
    %501 = vector.broadcast %500 : vector<1x128xf32> to vector<8x128xf32>
    %502 = arith.addf %499, %501 : vector<8x128xf32>
    %cst_213 = arith.constant 0.707106769 : f32
    %503 = vector.broadcast %cst_213 : f32 to vector<8x128xf32>
    %504 = arith.mulf %502, %503 : vector<8x128xf32>
    %505 = math.absf %504 : vector<8x128xf32>
    %cst_214 = arith.constant 0.327591091 : f32
    %506 = vector.broadcast %cst_214 : f32 to vector<8x128xf32>
    %507 = arith.mulf %506, %505 : vector<8x128xf32>
    %cst_215 = arith.constant 1.000000e+00 : f32
    %508 = vector.broadcast %cst_215 : f32 to vector<8x128xf32>
    %509 = arith.addf %508, %507 : vector<8x128xf32>
    %510 = tpu.reciprocal %509 {approx = true} : vector<8x128xf32> -> vector<8x128xf32>
    %cst_216 = arith.constant 1.06140542 : f32
    %511 = vector.broadcast %cst_216 : f32 to vector<8x128xf32>
    %512 = arith.mulf %511, %510 : vector<8x128xf32>
    %cst_217 = arith.constant 1.45315206 : f32
    %513 = vector.broadcast %cst_217 : f32 to vector<8x128xf32>
    %514 = arith.subf %512, %513 : vector<8x128xf32>
    %515 = arith.mulf %514, %510 : vector<8x128xf32>
    %cst_218 = arith.constant 1.42141378 : f32
    %516 = vector.broadcast %cst_218 : f32 to vector<8x128xf32>
    %517 = arith.addf %515, %516 : vector<8x128xf32>
    %518 = arith.mulf %517, %510 : vector<8x128xf32>
    %cst_219 = arith.constant 0.284496725 : f32
    %519 = vector.broadcast %cst_219 : f32 to vector<8x128xf32>
    %520 = arith.subf %518, %519 : vector<8x128xf32>
    %521 = arith.mulf %520, %510 : vector<8x128xf32>
    %cst_220 = arith.constant 0.254829586 : f32
    %522 = vector.broadcast %cst_220 : f32 to vector<8x128xf32>
    %523 = arith.addf %521, %522 : vector<8x128xf32>
    %524 = arith.mulf %523, %510 : vector<8x128xf32>
    %cst_221 = arith.constant 0.000000e+00 : f32
    %525 = vector.broadcast %cst_221 : f32 to vector<8x128xf32>
    %526 = arith.subf %525, %505 : vector<8x128xf32>
    %527 = arith.mulf %526, %505 : vector<8x128xf32>
    %528 = math.exp %527 : vector<8x128xf32>
    %529 = arith.mulf %524, %528 : vector<8x128xf32>
    %cst_222 = arith.constant 1.000000e+00 : f32
    %530 = vector.broadcast %cst_222 : f32 to vector<8x128xf32>
    %531 = arith.subf %530, %529 : vector<8x128xf32>
    %cst_223 = arith.constant 0.000000e+00 : f32
    %532 = vector.broadcast %cst_223 : f32 to vector<8x128xf32>
    %533 = arith.cmpf olt, %502, %532 : vector<8x128xf32>
    %cst_224 = arith.constant 0.000000e+00 : f32
    %534 = vector.broadcast %cst_224 : f32 to vector<8x128xf32>
    %535 = arith.subf %534, %531 : vector<8x128xf32>
    %536 = arith.select %533, %535, %531 : vector<8x128xi1>, vector<8x128xf32>
    %cst_225 = arith.constant 5.000000e-01 : f32
    %537 = vector.broadcast %cst_225 : f32 to vector<8x128xf32>
    %538 = arith.mulf %537, %502 : vector<8x128xf32>
    %cst_226 = arith.constant 1.000000e+00 : f32
    %539 = vector.broadcast %cst_226 : f32 to vector<8x128xf32>
    %540 = arith.addf %539, %536 : vector<8x128xf32>
    %541 = arith.mulf %538, %540 : vector<8x128xf32>
    %c0_227 = arith.constant 0 : index
    %c640 = arith.constant 640 : index
    %542 = vector.load %arg17[%c0_227, %c640] : memref<128x768xbf16, #tpu.memory_space<vmem>>, vector<128x128xbf16>
    %543 = arith.truncf %541 : vector<8x128xf32> to vector<8x128xbf16>
    %cst_228 = arith.constant dense<0.000000e+00> : vector<8x128xf32>
    %544 = tpu.matmul %543, %542, %cst_228 {dimension_numbers = #tpu.dot_dimension_numbers<[1], [0], [0], [1], [0, 0, 1, 1], [], []>} : vector<8x128xbf16>, vector<128x128xbf16>, vector<8x128xf32> -> vector<8x128xf32>
    %c0_229 = arith.constant 0 : index
    %c6016 = arith.constant 6016 : index
    %545 = vector.load %arg9[%c0_229, %c6016] : memref<1x6144xf32, #tpu.memory_space<vmem>>, vector<1x128xf32>
    %546 = vector.broadcast %545 : vector<1x128xf32> to vector<8x128xf32>
    %547 = arith.addf %544, %546 : vector<8x128xf32>
    %c0_230 = arith.constant 0 : index
    %c0_231 = arith.constant 0 : index
    %548 = vector.load %arg14[%c0_230, %c0_231] : memref<8x128xf32, #tpu.memory_space<vmem>>, vector<8x128xf32>
    tpu.vector_store %arg14[%c0_230, %c0_231], %547 {strides = array<i32>} : memref<8x128xf32, #tpu.memory_space<vmem>>, vector<8x128xf32>,
    return
  }
}

</mosaic_0001>

<bundles_post_ra>
// kernel: tpu_custom_call.1
= control target key start
LH: loop header
LB: loop body
LE: loop exit
PB: predicated region body
PF: predicated region fallthrough
CT: control target
= control target key end

     0   :  { %19 = vsyncpa [#allocation8], 0  ;;  %s15163_s0 = inlined_call_operand.vmem [shape: f32[8,128], index: 0, kind: input, shape index: {}]   ;;  %s15164_s1 = inlined_call_operand.vmem [shape: f32[8,1024], index: 1, kind: input, shape index: {}]   ;;  %s15165_s2 = inlined_call_operand.vmem [shape: f32[8,1], index: 2, kind: input, shape index: {}]   ;;  %s15166_s3 = inlined_call_operand.vmem [shape: f32[8,1], index: 3, kind: input, shape index: {}]   ;;  %s15167_s4 = inlined_call_operand.vmem [shape: bf16[128,256], index: 4, kind: input, shape index: {}]   ;;  %s15168_s5 = inlined_call_operand.vmem [shape: bf16[256,1408], index: 5, kind: input, shape index: {}]   ;;  %s15169_s6 = inlined_call_operand.vmem [shape: bf16[128,512], index: 6, kind: input, shape index: {}]   ;;  %s15170_s7 = inlined_call_operand.vmem [shape: f32[448,16], index: 7, kind: input, shape index: {}]   ;;  %s15171_s8 = inlined_call_operand.vmem [shape: f32[16,448], index: 8, kind: input, shape index: {}]   ;;  %s15172_s9 = inlined_call_operand.vmem [shape: f32[1,6144], index: 9, kind: input, shape index: {}]   ;;  %s15173_s10 = inlined_call_operand.vmem [shape: bf16[1024,448], index: 10, kind: input, shape index: {}]   ;;  %s15174_s11 = inlined_call_operand.vmem [shape: bf16[256,1152], index: 11, kind: input, shape index: {}]   ;;  %s15175_s12 = inlined_call_operand.vmem [shape: bf16[128,768], index: 12, kind: input, shape index: {}]   ;;  %s15176_s13 = inlined_call_operand.vmem [shape: bf16[64,128], index: 13, kind: input, shape index: {}]   ;;  %s15177_s14 = inlined_call_operand.hbm [shape: f32[8,128], index: 14, kind: output, shape index: {}]  }
   0x1   :  { %v10797_v0 = vld [vmem:[%s15173_s10] sm:$0xff]  ;;  %v10802_v1 = vld [vmem:[%s15173_s10 + $0x8] sm:$0xff]  ;;  %v10807_v2 = vld [vmem:[%s15173_s10 + $0x10] sm:$0xff] }
   0x2   :  { %15465 = vst [vmem:[#allocation18_spill] sm:$0xff] %v10797_v0  ;;  %15466 = vst [vmem:[#allocation19_spill] sm:$0xff] %v10802_v1  ;;  %v10812_v3 = vld [vmem:[%s15173_s10 + $0x18] sm:$0xff]  ;;  %v10817_v4 = vld [vmem:[%s15173_s10 + $0x20] sm:$0xff] }
   0x3   :  { %15467 = vst [vmem:[#allocation20_spill] sm:$0xff] %v10807_v2  ;;  %15468 = vst [vmem:[#allocation21_spill] sm:$0xff] %v10812_v3  ;;  %v10822_v5 = vld [vmem:[%s15173_s10 + $0x28] sm:$0xff]  ;;  %v10827_v6 = vld [vmem:[%s15173_s10 + $0x30] sm:$0xff] }
   0x4   :  { %15469 = vst [vmem:[#allocation22_spill] sm:$0xff] %v10817_v4  ;;  %15470 = vst [vmem:[#allocation23_spill] sm:$0xff] %v10822_v5  ;;  %v10832_v7 = vld [vmem:[%s15173_s10 + $0x38] sm:$0xff]  ;;  %v10837_v8 = vld [vmem:[%s15173_s10 + $0x40] sm:$0xff] }
   0x5   :  { %15471 = vst [vmem:[#allocation24_spill] sm:$0xff] %v10827_v6  ;;  %15472 = vst [vmem:[#allocation25_spill] sm:$0xff] %v10832_v7  ;;  %v10842_v9 = vld [vmem:[%s15173_s10 + $0x48] sm:$0xff]  ;;  %v10847_v10 = vld [vmem:[%s15173_s10 + $0x50] sm:$0xff] }
   0x6   :  { %15473 = vst [vmem:[#allocation26_spill] sm:$0xff] %v10837_v8  ;;  %15474 = vst [vmem:[#allocation27_spill] sm:$0xff] %v10842_v9  ;;  %v10852_v11 = vld [vmem:[%s15173_s10 + $0x58] sm:$0xff]  ;;  %v10857_v12 = vld [vmem:[%s15173_s10 + $0x60] sm:$0xff] }
   0x7   :  { %15475 = vst [vmem:[#allocation28_spill] sm:$0xff] %v10847_v10  ;;  %15476 = vst [vmem:[#allocation29_spill] sm:$0xff] %v10852_v11  ;;  %v10862_v13 = vld [vmem:[%s15173_s10 + $0x68] sm:$0xff]  ;;  %v10867_v14 = vld [vmem:[%s15173_s10 + $0x70] sm:$0xff] }
   0x8   :  { %15477 = vst [vmem:[#allocation30_spill] sm:$0xff] %v10857_v12  ;;  %15478 = vst [vmem:[#allocation31_spill] sm:$0xff] %v10862_v13  ;;  %v10872_v15 = vld [vmem:[%s15173_s10 + $0x78] sm:$0xff]  ;;  %v10877_v16 = vld [vmem:[%s15173_s10 + $0x80] sm:$0xff] }
   0x9   :  { %15479 = vst [vmem:[#allocation32_spill] sm:$0xff] %v10867_v14  ;;  %15480 = vst [vmem:[#allocation33_spill] sm:$0xff] %v10872_v15  ;;  %v10882_v17 = vld [vmem:[%s15173_s10 + $0x88] sm:$0xff]  ;;  %v10887_v18 = vld [vmem:[%s15173_s10 + $0x90] sm:$0xff] }
   0xa   :  { %15481 = vst [vmem:[#allocation34_spill] sm:$0xff] %v10882_v17  ;;  %v10892_v19 = vld [vmem:[%s15173_s10 + $0x98] sm:$0xff]  ;;  %v10897_v20 = vld [vmem:[%s15173_s10 + $0xa0] sm:$0xff]  ;;  %v10902_v21 = vld [vmem:[%s15173_s10 + $0xa8] sm:$0xff] }
   0xb   :  { %15482 = vst [vmem:[#allocation35_spill] sm:$0xff] %v10892_v19  ;;  %15483 = vst [vmem:[#allocation36_spill] sm:$0xff] %v10902_v21  ;;  %v10907_v22 = vld [vmem:[%s15173_s10 + $0xb0] sm:$0xff]  ;;  %v10912_v23 = vld [vmem:[%s15173_s10 + $0xb8] sm:$0xff] }
   0xc   :  { %15484 = vst [vmem:[#allocation37_spill] sm:$0xff] %v10912_v23  ;;  %v10917_v24 = vld [vmem:[%s15173_s10 + $0xc0] sm:$0xff]  ;;  %v10922_v25 = vld [vmem:[%s15173_s10 + $0xc8] sm:$0xff]  ;;  %v10927_v26 = vld [vmem:[%s15173_s10 + $0xd0] sm:$0xff] }
   0xd   :  { %15485 = vst [vmem:[#allocation38_spill] sm:$0xff] %v10922_v25  ;;  %v10932_v27 = vld [vmem:[%s15173_s10 + $0xd8] sm:$0xff]  ;;  %v10937_v28 = vld [vmem:[%s15173_s10 + $0xe0] sm:$0xff]  ;;  %v10942_v29 = vld [vmem:[%s15173_s10 + $0xe8] sm:$0xff] }
   0xe   :  { %15486 = vst [vmem:[#allocation39_spill] sm:$0xff] %v10932_v27  ;;  %15487 = vst [vmem:[#allocation40_spill] sm:$0xff] %v10942_v29  ;;  %v10947_v30 = vld [vmem:[%s15173_s10 + $0xf0] sm:$0xff]  ;;  %v10952_v31 = vld [vmem:[%s15173_s10 + $0xf8] sm:$0xff] }
   0xf   :  { %15488 = vst [vmem:[#allocation41_spill] sm:$0xff] %v10952_v31  ;;  %v10957_v32 = vld [vmem:[%s15173_s10 + $0x100] sm:$0xff]  ;;  %v10962_v33 = vld [vmem:[%s15173_s10 + $0x108] sm:$0xff]  ;;  %v10967_v34 = vld [vmem:[%s15173_s10 + $0x110] sm:$0xff] }
  0x10   :  { %15489 = vst [vmem:[#allocation42_spill] sm:$0xff] %v10957_v32  ;;  %15490 = vst [vmem:[#allocation43_spill] sm:$0xff] %v10962_v33  ;;  %v10972_v35 = vld [vmem:[%s15173_s10 + $0x118] sm:$0xff]  ;;  %v10977_v36 = vld [vmem:[%s15173_s10 + $0x120] sm:$0xff] }
  0x11   :  { %15491 = vst [vmem:[#allocation44_spill] sm:$0xff] %v10967_v34  ;;  %15492 = vst [vmem:[#allocation45_spill] sm:$0xff] %v10972_v35  ;;  %v10982_v37 = vld [vmem:[%s15173_s10 + $0x128] sm:$0xff]  ;;  %v10987_v38 = vld [vmem:[%s15173_s10 + $0x130] sm:$0xff] }
  0x12   :  { %15493 = vst [vmem:[#allocation46_spill] sm:$0xff] %v10977_v36  ;;  %15494 = vst [vmem:[#allocation47_spill] sm:$0xff] %v10982_v37  ;;  %v10992_v39 = vld [vmem:[%s15173_s10 + $0x138] sm:$0xff]  ;;  %v10997_v40 = vld [vmem:[%s15173_s10 + $0x140] sm:$0xff] }
  0x13   :  { %15495 = vst [vmem:[#allocation48_spill] sm:$0xff] %v10987_v38  ;;  %15496 = vst [vmem:[#allocation49_spill] sm:$0xff] %v10992_v39  ;;  %v11002_v41 = vld [vmem:[%s15173_s10 + $0x148] sm:$0xff]  ;;  %v11007_v42 = vld [vmem:[%s15173_s10 + $0x150] sm:$0xff] }
  0x14   :  { %15497 = vst [vmem:[#allocation50_spill] sm:$0xff] %v10997_v40  ;;  %15498 = vst [vmem:[#allocation51_spill] sm:$0xff] %v11002_v41  ;;  %v11012_v43 = vld [vmem:[%s15173_s10 + $0x158] sm:$0xff]  ;;  %v11017_v44 = vld [vmem:[%s15173_s10 + $0x160] sm:$0xff] }
  0x15   :  { %15499 = vst [vmem:[#allocation52_spill] sm:$0xff] %v11007_v42  ;;  %15500 = vst [vmem:[#allocation53_spill] sm:$0xff] %v11012_v43  ;;  %v11022_v45 = vld [vmem:[%s15173_s10 + $0x168] sm:$0xff]  ;;  %v11027_v46 = vld [vmem:[%s15173_s10 + $0x170] sm:$0xff] }
  0x16   :  { %15501 = vst [vmem:[#allocation54_spill] sm:$0xff] %v11017_v44  ;;  %15502 = vst [vmem:[#allocation55_spill] sm:$0xff] %v11022_v45  ;;  %v11032_v47 = vld [vmem:[%s15173_s10 + $0x178] sm:$0xff]  ;;  %v11037_v48 = vld [vmem:[%s15173_s10 + $0x180] sm:$0xff] }
  0x17   :  { %15503 = vst [vmem:[#allocation56_spill] sm:$0xff] %v11027_v46  ;;  %15504 = vst [vmem:[#allocation57_spill] sm:$0xff] %v11032_v47  ;;  %v11042_v49 = vld [vmem:[%s15173_s10 + $0x188] sm:$0xff]  ;;  %v11047_v50 = vld [vmem:[%s15173_s10 + $0x190] sm:$0xff] }
  0x18   :  { %15505 = vst [vmem:[#allocation58_spill] sm:$0xff] %v11037_v48  ;;  %15506 = vst [vmem:[#allocation59_spill] sm:$0xff] %v11042_v49  ;;  %v11052_v51 = vld [vmem:[%s15173_s10 + $0x198] sm:$0xff]  ;;  %v11057_v52 = vld [vmem:[%s15173_s10 + $0x1a0] sm:$0xff] }
  0x19   :  { %15507 = vst [vmem:[#allocation60_spill] sm:$0xff] %v11047_v50  ;;  %15508 = vst [vmem:[#allocation61_spill] sm:$0xff] %v11052_v51  ;;  %v11062_v53 = vld [vmem:[%s15173_s10 + $0x1a8] sm:$0xff]  ;;  %v11067_v54 = vld [vmem:[%s15173_s10 + $0x1b0] sm:$0xff] }
  0x1a   :  { %15509 = vst [vmem:[#allocation62_spill] sm:$0xff] %v11057_v52  ;;  %15510 = vst [vmem:[#allocation63_spill] sm:$0xff] %v11062_v53  ;;  %v11072_v55 = vld [vmem:[%s15173_s10 + $0x1b8] sm:$0xff]  ;;  %v11077_v56 = vld [vmem:[%s15173_s10 + $0x1c0] sm:$0xff] }
  0x1b   :  { %15511 = vst [vmem:[#allocation64_spill] sm:$0xff] %v11067_v54  ;;  %15512 = vst [vmem:[#allocation65_spill] sm:$0xff] %v11072_v55  ;;  %v11082_v57 = vld [vmem:[%s15173_s10 + $0x1c8] sm:$0xff]  ;;  %v11087_v58 = vld [vmem:[%s15173_s10 + $0x1d0] sm:$0xff] }
  0x1c   :  { %15513 = vst [vmem:[#allocation66_spill] sm:$0xff] %v11077_v56  ;;  %15514 = vst [vmem:[#allocation67_spill] sm:$0xff] %v11082_v57  ;;  %v11092_v59 = vld [vmem:[%s15173_s10 + $0x1d8] sm:$0xff]  ;;  %v11097_v60 = vld [vmem:[%s15173_s10 + $0x1e0] sm:$0xff] }
  0x1d   :  { %15515 = vst [vmem:[#allocation68_spill] sm:$0xff] %v11087_v58  ;;  %15516 = vst [vmem:[#allocation69_spill] sm:$0xff] %v11092_v59  ;;  %v11102_v61 = vld [vmem:[%s15173_s10 + $0x1e8] sm:$0xff]  ;;  %v11107_v62 = vld [vmem:[%s15173_s10 + $0x1f0] sm:$0xff] }
  0x1e   :  { %15517 = vst [vmem:[#allocation70_spill] sm:$0xff] %v11097_v60  ;;  %15518 = vst [vmem:[#allocation71_spill] sm:$0xff] %v11102_v61  ;;  %v11112_v63 = vld [vmem:[%s15173_s10 + $0x1f8] sm:$0xff]  ;;  %v11117_v33 = vld [vmem:[%s15173_s10 + $0x200] sm:$0xff] }
  0x1f   :  { %15519 = vst [vmem:[#allocation72_spill] sm:$0xff] %v11107_v62  ;;  %15520 = vst [vmem:[#allocation73_spill] sm:$0xff] %v11112_v63  ;;  %v11122_v35 = vld [vmem:[%s15173_s10 + $0x208] sm:$0xff]  ;;  %v11127_v37 = vld [vmem:[%s15173_s10 + $0x210] sm:$0xff] }
  0x20   :  { %15521 = vst [vmem:[#allocation74_spill] sm:$0xff] %v11117_v33  ;;  %15522 = vst [vmem:[#allocation75_spill] sm:$0xff] %v11122_v35  ;;  %v11132_v39 = vld [vmem:[%s15173_s10 + $0x218] sm:$0xff]  ;;  %v11137_v41 = vld [vmem:[%s15173_s10 + $0x220] sm:$0xff] }
  0x21   :  { %15523 = vst [vmem:[#allocation76_spill] sm:$0xff] %v11127_v37  ;;  %15524 = vst [vmem:[#allocation77_spill] sm:$0xff] %v11132_v39  ;;  %v11142_v43 = vld [vmem:[%s15173_s10 + $0x228] sm:$0xff]  ;;  %v11147_v45 = vld [vmem:[%s15173_s10 + $0x230] sm:$0xff] }
  0x22   :  { %15525 = vst [vmem:[#allocation78_spill] sm:$0xff] %v11137_v41  ;;  %15526 = vst [vmem:[#allocation79_spill] sm:$0xff] %v11142_v43  ;;  %v11152_v47 = vld [vmem:[%s15173_s10 + $0x238] sm:$0xff]  ;;  %v11157_v49 = vld [vmem:[%s15173_s10 + $0x240] sm:$0xff] }
  0x23   :  { %15527 = vst [vmem:[#allocation80_spill] sm:$0xff] %v11147_v45  ;;  %15528 = vst [vmem:[#allocation81_spill] sm:$0xff] %v11152_v47  ;;  %v11162_v51 = vld [vmem:[%s15173_s10 + $0x248] sm:$0xff]  ;;  %v11167_v53 = vld [vmem:[%s15173_s10 + $0x250] sm:$0xff] }
  0x24   :  { %15529 = vst [vmem:[#allocation82_spill] sm:$0xff] %v11157_v49  ;;  %15530 = vst [vmem:[#allocation83_spill] sm:$0xff] %v11162_v51  ;;  %v11172_v55 = vld [vmem:[%s15173_s10 + $0x258] sm:$0xff]  ;;  %v11177_v57 = vld [vmem:[%s15173_s10 + $0x260] sm:$0xff] }
  0x25   :  { %15531 = vst [vmem:[#allocation84_spill] sm:$0xff] %v11167_v53  ;;  %15532 = vst [vmem:[#allocation85_spill] sm:$0xff] %v11172_v55  ;;  %v11182_v59 = vld [vmem:[%s15173_s10 + $0x268] sm:$0xff]  ;;  %v11187_v61 = vld [vmem:[%s15173_s10 + $0x270] sm:$0xff] }
  0x26   :  { %15533 = vst [vmem:[#allocation86_spill] sm:$0xff] %v11177_v57  ;;  %15534 = vst [vmem:[#allocation87_spill] sm:$0xff] %v11182_v59  ;;  %v11192_v63 = vld [vmem:[%s15173_s10 + $0x278] sm:$0xff]  ;;  %v11197_v35 = vld [vmem:[%s15173_s10 + $0x280] sm:$0xff] }
  0x27   :  { %15535 = vst [vmem:[#allocation88_spill] sm:$0xff] %v11187_v61  ;;  %15536 = vst [vmem:[#allocation89_spill] sm:$0xff] %v11192_v63  ;;  %v11202_v39 = vld [vmem:[%s15173_s10 + $0x288] sm:$0xff]  ;;  %v11207_v1 = vld [vmem:[%s15173_s10 + $0x290] sm:$0xff] }
  0x28   :  { %15537 = vst [vmem:[#allocation90_spill] sm:$0xff] %v11197_v35  ;;  %15538 = vst [vmem:[#allocation91_spill] sm:$0xff] %v11202_v39  ;;  %v11212_v3 = vld [vmem:[%s15173_s10 + $0x298] sm:$0xff]  ;;  %v11217_v43 = vld [vmem:[%s15173_s10 + $0x2a0] sm:$0xff] }
  0x29   :  { %15539 = vst [vmem:[#allocation92_spill] sm:$0xff] %v11212_v3  ;;  %v11222_v47 = vld [vmem:[%s15173_s10 + $0x2a8] sm:$0xff]  ;;  %v11227_v5 = vld [vmem:[%s15173_s10 + $0x2b0] sm:$0xff]  ;;  %v11232_v7 = vld [vmem:[%s15173_s10 + $0x2b8] sm:$0xff] }
  0x2a   :  { %15540 = vst [vmem:[#allocation93_spill] sm:$0xff] %v11222_v47  ;;  %15541 = vst [vmem:[#allocation94_spill] sm:$0xff] %v11232_v7  ;;  %v11237_v51 = vld [vmem:[%s15173_s10 + $0x2c0] sm:$0xff]  ;;  %v11242_v55 = vld [vmem:[%s15173_s10 + $0x2c8] sm:$0xff] }
  0x2b   :  { %15542 = vst [vmem:[#allocation95_spill] sm:$0xff] %v11242_v55  ;;  %v11247_v9 = vld [vmem:[%s15173_s10 + $0x2d0] sm:$0xff]  ;;  %v11252_v11 = vld [vmem:[%s15173_s10 + $0x2d8] sm:$0xff]  ;;  %v11257_v59 = vld [vmem:[%s15173_s10 + $0x2e0] sm:$0xff] }
  0x2c   :  { %15543 = vst [vmem:[#allocation96_spill] sm:$0xff] %v11252_v11  ;;  %v11262_v63 = vld [vmem:[%s15173_s10 + $0x2e8] sm:$0xff]  ;;  %v11267_v13 = vld [vmem:[%s15173_s10 + $0x2f0] sm:$0xff]  ;;  %v11272_v15 = vld [vmem:[%s15173_s10 + $0x2f8] sm:$0xff] }
  0x2d   :  { %15544 = vst [vmem:[#allocation97_spill] sm:$0xff] %v11262_v63  ;;  %15545 = vst [vmem:[#allocation98_spill] sm:$0xff] %v11272_v15  ;;  %v11277_v39 = vld [vmem:[%s15173_s10 + $0x300] sm:$0xff]  ;;  %v11282_v3 = vld [vmem:[%s15173_s10 + $0x308] sm:$0xff] }
  0x2e   :  { %15546 = vst [vmem:[#allocation99_spill] sm:$0xff] %v11277_v39  ;;  %15547 = vst [vmem:[#allocation100_spill] sm:$0xff] %v11282_v3  ;;  %v11287_v17 = vld [vmem:[%s15173_s10 + $0x310] sm:$0xff]  ;;  %v11292_v19 = vld [vmem:[%s15173_s10 + $0x318] sm:$0xff] }
  0x2f   :  { %15548 = vst [vmem:[#allocation101_spill] sm:$0xff] %v11287_v17  ;;  %15549 = vst [vmem:[#allocation102_spill] sm:$0xff] %v11292_v19  ;;  %v11297_v47 = vld [vmem:[%s15173_s10 + $0x320] sm:$0xff]  ;;  %v11302_v7 = vld [vmem:[%s15173_s10 + $0x328] sm:$0xff] }
  0x30   :  { %15550 = vst [vmem:[#allocation103_spill] sm:$0xff] %v11297_v47  ;;  %15551 = vst [vmem:[#allocation104_spill] sm:$0xff] %v11302_v7  ;;  %v11307_v3 = vld [vmem:[%s15173_s10 + $0x330] sm:$0xff]  ;;  %v11312_v21 = vld [vmem:[%s15173_s10 + $0x338] sm:$0xff] }
  0x31   :  { %15552 = vst [vmem:[#allocation105_spill] sm:$0xff] %v11307_v3  ;;  %15553 = vst [vmem:[#allocation106_spill] sm:$0xff] %v11312_v21  ;;  %v11317_v19 = vld [vmem:[%s15173_s10 + $0x340] sm:$0xff]  ;;  %v11322_v23 = vld [vmem:[%s15173_s10 + $0x348] sm:$0xff] }
  0x32   :  { %15554 = vst [vmem:[#allocation107_spill] sm:$0xff] %v11317_v19  ;;  %15555 = vst [vmem:[#allocation108_spill] sm:$0xff] %v11322_v23  ;;  %v11327_v7 = vld [vmem:[%s15173_s10 + $0x350] sm:$0xff]  ;;  %v11332_v55 = vld [vmem:[%s15173_s10 + $0x358] sm:$0xff] }
  0x33   :  { %15556 = vst [vmem:[#allocation109_spill] sm:$0xff] %v11327_v7  ;;  %15557 = vst [vmem:[#allocation110_spill] sm:$0xff] %v11332_v55  ;;  %v11337_v21 = vld [vmem:[%s15173_s10 + $0x360] sm:$0xff]  ;;  %v11342_v11 = vld [vmem:[%s15173_s10 + $0x368] sm:$0xff] }
  0x34   :  { %15558 = vst [vmem:[#allocation111_spill] sm:$0xff] %v11337_v21  ;;  %15559 = vst [vmem:[#allocation112_spill] sm:$0xff] %v11342_v11  ;;  %v11347_v23 = vld [vmem:[%s15173_s10 + $0x370] sm:$0xff]  ;;  %v11352_v25 = vld [vmem:[%s15173_s10 + $0x378] sm:$0xff] }
  0x35   :  { %15560 = vst [vmem:[#allocation113_spill] sm:$0xff] %v11347_v23  ;;  %15561 = vst [vmem:[#allocation114_spill] sm:$0xff] %v11352_v25  ;;  %v11357_v55 = vld [vmem:[%s15173_s10 + $0x380] sm:$0xff]  ;;  %v11362_v27 = vld [vmem:[%s15173_s10 + $0x388] sm:$0xff] }
  0x36   :  { %15562 = vst [vmem:[#allocation115_spill] sm:$0xff] %v11357_v55  ;;  %15563 = vst [vmem:[#allocation116_spill] sm:$0xff] %v11362_v27  ;;  %v11367_v11 = vld [vmem:[%s15173_s10 + $0x390] sm:$0xff]  ;;  %v11372_v63 = vld [vmem:[%s15173_s10 + $0x398] sm:$0xff] }
  0x37   :  { %15564 = vst [vmem:[#allocation117_spill] sm:$0xff] %v11367_v11  ;;  %15565 = vst [vmem:[#allocation118_spill] sm:$0xff] %v11372_v63  ;;  %v11377_v25 = vld [vmem:[%s15173_s10 + $0x3a0] sm:$0xff]  ;;  %v11382_v15 = vld [vmem:[%s15173_s10 + $0x3a8] sm:$0xff] }
  0x38   :  { %15566 = vst [vmem:[#allocation119_spill] sm:$0xff] %v11377_v25  ;;  %15567 = vst [vmem:[#allocation120_spill] sm:$0xff] %v11382_v15  ;;  %v11387_v27 = vld [vmem:[%s15173_s10 + $0x3b0] sm:$0xff]  ;;  %v11392_v29 = vld [vmem:[%s15173_s10 + $0x3b8] sm:$0xff] }
  0x39   :  { %15568 = vst [vmem:[#allocation121_spill] sm:$0xff] %v11387_v27  ;;  %15569 = vst [vmem:[#allocation122_spill] sm:$0xff] %v11392_v29  ;;  %v11397_v63 = vld [vmem:[%s15173_s10 + $0x3c0] sm:$0xff]  ;;  %v11402_v31 = vld [vmem:[%s15173_s10 + $0x3c8] sm:$0xff] }
  0x3a   :  { %15570 = vst [vmem:[#allocation123_spill] sm:$0xff] %v11397_v63  ;;  %15571 = vst [vmem:[#allocation124_spill] sm:$0xff] %v11402_v31  ;;  %v11407_v15 = vld [vmem:[%s15173_s10 + $0x3d0] sm:$0xff]  ;;  %v11412_v39 = vld [vmem:[%s15173_s10 + $0x3d8] sm:$0xff] }
  0x3b   :  { %15572 = vst [vmem:[#allocation125_spill] sm:$0xff] %v11407_v15  ;;  %15573 = vst [vmem:[#allocation126_spill] sm:$0xff] %v11412_v39  ;;  %v11417_v29 = vld [vmem:[%s15173_s10 + $0x3e0] sm:$0xff]  ;;  %v11422_v17 = vld [vmem:[%s15173_s10 + $0x3e8] sm:$0xff] }
  0x3c   :  { %15574 = vst [vmem:[#allocation127_spill] sm:$0xff] %v11417_v29  ;;  %15575 = vst [vmem:[#allocation128_spill] sm:$0xff] %v11422_v17  ;;  %v11427_v31 = vld [vmem:[%s15173_s10 + $0x3f0] sm:$0xff]  ;;  %v11432_v32 = vld [vmem:[%s15173_s10 + $0x3f8] sm:$0xff] }
  0x3d   :  { %15576 = vst [vmem:[#allocation129_spill] sm:$0xff] %v11427_v31  ;;  %15577 = vst [vmem:[#allocation130_spill] sm:$0xff] %v11432_v32  ;;  %v11437_v39 = vld [vmem:[%s15173_s10 + $0x400] sm:$0xff]  ;;  %v11442_v34 = vld [vmem:[%s15173_s10 + $0x408] sm:$0xff] }
  0x3e   :  { %15578 = vst [vmem:[#allocation131_spill] sm:$0xff] %v11437_v39  ;;  %15579 = vst [vmem:[#allocation132_spill] sm:$0xff] %v11442_v34  ;;  %v11447_v17 = vld [vmem:[%s15173_s10 + $0x410] sm:$0xff]  ;;  %v11452_v47 = vld [vmem:[%s15173_s10 + $0x418] sm:$0xff] }
  0x3f   :  { %15580 = vst [vmem:[#allocation133_spill] sm:$0xff] %v11447_v17  ;;  %15581 = vst [vmem:[#allocation134_spill] sm:$0xff] %v11452_v47  ;;  %v11457_v32 = vld [vmem:[%s15173_s10 + $0x420] sm:$0xff]  ;;  %v11462_v39 = vld [vmem:[%s15173_s10 + $0x428] sm:$0xff] }
  0x40   :  { %15582 = vst [vmem:[#allocation135_spill] sm:$0xff] %v11457_v32  ;;  %15583 = vst [vmem:[#allocation136_spill] sm:$0xff] %v11462_v39  ;;  %v11467_v34 = vld [vmem:[%s15173_s10 + $0x430] sm:$0xff]  ;;  %v11472_v17 = vld [vmem:[%s15173_s10 + $0x438] sm:$0xff] }
  0x41   :  { %15584 = vst [vmem:[#allocation137_spill] sm:$0xff] %v11467_v34  ;;  %15585 = vst [vmem:[#allocation138_spill] sm:$0xff] %v11472_v17  ;;  %v11477_v47 = vld [vmem:[%s15173_s10 + $0x440] sm:$0xff]  ;;  %v11482_v32 = vld [vmem:[%s15173_s10 + $0x448] sm:$0xff] }
  0x42   :  { %15586 = vst [vmem:[#allocation139_spill] sm:$0xff] %v11477_v47  ;;  %15587 = vst [vmem:[#allocation140_spill] sm:$0xff] %v11482_v32  ;;  %v11487_v39 = vld [vmem:[%s15173_s10 + $0x450] sm:$0xff]  ;;  %v11492_v34 = vld [vmem:[%s15173_s10 + $0x458] sm:$0xff] }
  0x43   :  { %15588 = vst [vmem:[#allocation141_spill] sm:$0xff] %v11487_v39  ;;  %15589 = vst [vmem:[#allocation142_spill] sm:$0xff] %v11492_v34  ;;  %v11497_v17 = vld [vmem:[%s15173_s10 + $0x460] sm:$0xff]  ;;  %v11502_v47 = vld [vmem:[%s15173_s10 + $0x468] sm:$0xff] }
  0x44   :  { %15590 = vst [vmem:[#allocation143_spill] sm:$0xff] %v11497_v17  ;;  %15591 = vst [vmem:[#allocation144_spill] sm:$0xff] %v11502_v47  ;;  %v11507_v32 = vld [vmem:[%s15173_s10 + $0x470] sm:$0xff]  ;;  %v11512_v39 = vld [vmem:[%s15173_s10 + $0x478] sm:$0xff] }
  0x45   :  { %15592 = vst [vmem:[#allocation145_spill] sm:$0xff] %v11507_v32  ;;  %15593 = vst [vmem:[#allocation146_spill] sm:$0xff] %v11512_v39  ;;  %v11517_v34 = vld [vmem:[%s15173_s10 + $0x480] sm:$0xff]  ;;  %v11522_v17 = vld [vmem:[%s15173_s10 + $0x488] sm:$0xff] }
  0x46   :  { %15594 = vst [vmem:[#allocation147_spill] sm:$0xff] %v11517_v34  ;;  %15595 = vst [vmem:[#allocation148_spill] sm:$0xff] %v11522_v17  ;;  %v11527_v47 = vld [vmem:[%s15173_s10 + $0x490] sm:$0xff]  ;;  %v11532_v32 = vld [vmem:[%s15173_s10 + $0x498] sm:$0xff] }
  0x47   :  { %15596 = vst [vmem:[#allocation149_spill] sm:$0xff] %v11527_v47  ;;  %15597 = vst [vmem:[#allocation150_spill] sm:$0xff] %v11532_v32  ;;  %v11537_v39 = vld [vmem:[%s15173_s10 + $0x4a0] sm:$0xff]  ;;  %v11542_v34 = vld [vmem:[%s15173_s10 + $0x4a8] sm:$0xff] }
  0x48   :  { %15598 = vst [vmem:[#allocation151_spill] sm:$0xff] %v11537_v39  ;;  %15599 = vst [vmem:[#allocation152_spill] sm:$0xff] %v11542_v34  ;;  %v11547_v17 = vld [vmem:[%s15173_s10 + $0x4b0] sm:$0xff]  ;;  %v11552_v47 = vld [vmem:[%s15173_s10 + $0x4b8] sm:$0xff] }
  0x49   :  { %15600 = vst [vmem:[#allocation153_spill] sm:$0xff] %v11547_v17  ;;  %15601 = vst [vmem:[#allocation154_spill] sm:$0xff] %v11552_v47  ;;  %v11557_v32 = vld [vmem:[%s15173_s10 + $0x4c0] sm:$0xff]  ;;  %v11562_v39 = vld [vmem:[%s15173_s10 + $0x4c8] sm:$0xff] }
  0x4a   :  { %15602 = vst [vmem:[#allocation155_spill] sm:$0xff] %v11557_v32  ;;  %15603 = vst [vmem:[#allocation156_spill] sm:$0xff] %v11562_v39  ;;  %v11567_v34 = vld [vmem:[%s15173_s10 + $0x4d0] sm:$0xff]  ;;  %v11572_v17 = vld [vmem:[%s15173_s10 + $0x4d8] sm:$0xff] }
  0x4b   :  { %15604 = vst [vmem:[#allocation157_spill] sm:$0xff] %v11567_v34  ;;  %15605 = vst [vmem:[#allocation158_spill] sm:$0xff] %v11572_v17  ;;  %v11577_v47 = vld [vmem:[%s15173_s10 + $0x4e0] sm:$0xff]  ;;  %v11582_v32 = vld [vmem:[%s15173_s10 + $0x4e8] sm:$0xff] }
  0x4c   :  { %15606 = vst [vmem:[#allocation159_spill] sm:$0xff] %v11577_v47  ;;  %15607 = vst [vmem:[#allocation160_spill] sm:$0xff] %v11582_v32  ;;  %v11587_v39 = vld [vmem:[%s15173_s10 + $0x4f0] sm:$0xff]  ;;  %v11592_v34 = vld [vmem:[%s15173_s10 + $0x4f8] sm:$0xff] }
  0x4d   :  { %15608 = vst [vmem:[#allocation161_spill] sm:$0xff] %v11587_v39  ;;  %15609 = vst [vmem:[#allocation162_spill] sm:$0xff] %v11592_v34  ;;  %v11597_v17 = vld [vmem:[%s15173_s10 + $0x500] sm:$0xff]  ;;  %v11602_v47 = vld [vmem:[%s15173_s10 + $0x508] sm:$0xff] }
  0x4e   :  { %15610 = vst [vmem:[#allocation163_spill] sm:$0xff] %v11597_v17  ;;  %15611 = vst [vmem:[#allocation164_spill] sm:$0xff] %v11602_v47  ;;  %v11607_v32 = vld [vmem:[%s15173_s10 + $0x510] sm:$0xff]  ;;  %v11612_v39 = vld [vmem:[%s15173_s10 + $0x518] sm:$0xff] }
  0x4f   :  { %15612 = vst [vmem:[#allocation165_spill] sm:$0xff] %v11607_v32  ;;  %15613 = vst [vmem:[#allocation166_spill] sm:$0xff] %v11612_v39  ;;  %v11617_v34 = vld [vmem:[%s15173_s10 + $0x520] sm:$0xff]  ;;  %v11622_v17 = vld [vmem:[%s15173_s10 + $0x528] sm:$0xff] }
  0x50   :  { %15614 = vst [vmem:[#allocation167_spill] sm:$0xff] %v11617_v34  ;;  %15615 = vst [vmem:[#allocation168_spill] sm:$0xff] %v11622_v17  ;;  %v11627_v47 = vld [vmem:[%s15173_s10 + $0x530] sm:$0xff]  ;;  %v11632_v32 = vld [vmem:[%s15173_s10 + $0x538] sm:$0xff] }
  0x51   :  { %15616 = vst [vmem:[#allocation169_spill] sm:$0xff] %v11627_v47  ;;  %15617 = vst [vmem:[#allocation170_spill] sm:$0xff] %v11632_v32  ;;  %v11637_v39 = vld [vmem:[%s15173_s10 + $0x540] sm:$0xff]  ;;  %v11642_v34 = vld [vmem:[%s15173_s10 + $0x548] sm:$0xff] }
  0x52   :  { %15618 = vst [vmem:[#allocation171_spill] sm:$0xff] %v11637_v39  ;;  %15619 = vst [vmem:[#allocation172_spill] sm:$0xff] %v11642_v34  ;;  %v11647_v17 = vld [vmem:[%s15173_s10 + $0x550] sm:$0xff]  ;;  %v11652_v47 = vld [vmem:[%s15173_s10 + $0x558] sm:$0xff] }
  0x53   :  { %15620 = vst [vmem:[#allocation173_spill] sm:$0xff] %v11647_v17  ;;  %15621 = vst [vmem:[#allocation174_spill] sm:$0xff] %v11652_v47  ;;  %v11657_v32 = vld [vmem:[%s15173_s10 + $0x560] sm:$0xff]  ;;  %v11662_v39 = vld [vmem:[%s15173_s10 + $0x568] sm:$0xff] }
  0x54   :  { %15622 = vst [vmem:[#allocation175_spill] sm:$0xff] %v11657_v32  ;;  %15623 = vst [vmem:[#allocation176_spill] sm:$0xff] %v11662_v39  ;;  %v11667_v34 = vld [vmem:[%s15173_s10 + $0x570] sm:$0xff]  ;;  %v11672_v17 = vld [vmem:[%s15173_s10 + $0x578] sm:$0xff] }
  0x55   :  { %15624 = vst [vmem:[#allocation177_spill] sm:$0xff] %v11667_v34  ;;  %15625 = vst [vmem:[#allocation178_spill] sm:$0xff] %v11672_v17  ;;  %v11677_v47 = vld [vmem:[%s15173_s10 + $0x580] sm:$0xff]  ;;  %v11682_v32 = vld [vmem:[%s15173_s10 + $0x588] sm:$0xff] }
  0x56   :  { %15626 = vst [vmem:[#allocation179_spill] sm:$0xff] %v11677_v47  ;;  %15627 = vst [vmem:[#allocation180_spill] sm:$0xff] %v11682_v32  ;;  %v11687_v39 = vld [vmem:[%s15173_s10 + $0x590] sm:$0xff]  ;;  %v11692_v34 = vld [vmem:[%s15173_s10 + $0x598] sm:$0xff] }
  0x57   :  { %15628 = vst [vmem:[#allocation181_spill] sm:$0xff] %v11687_v39  ;;  %15629 = vst [vmem:[#allocation182_spill] sm:$0xff] %v11692_v34  ;;  %v11697_v17 = vld [vmem:[%s15173_s10 + $0x5a0] sm:$0xff]  ;;  %v11702_v47 = vld [vmem:[%s15173_s10 + $0x5a8] sm:$0xff] }
  0x58   :  { %15630 = vst [vmem:[#allocation183_spill] sm:$0xff] %v11697_v17  ;;  %15631 = vst [vmem:[#allocation184_spill] sm:$0xff] %v11702_v47  ;;  %v11707_v32 = vld [vmem:[%s15173_s10 + $0x5b0] sm:$0xff]  ;;  %v11712_v39 = vld [vmem:[%s15173_s10 + $0x5b8] sm:$0xff] }
  0x59   :  { %15632 = vst [vmem:[#allocation185_spill] sm:$0xff] %v11707_v32  ;;  %15633 = vst [vmem:[#allocation186_spill] sm:$0xff] %v11712_v39  ;;  %v11717_v34 = vld [vmem:[%s15173_s10 + $0x5c0] sm:$0xff]  ;;  %v11722_v17 = vld [vmem:[%s15173_s10 + $0x5c8] sm:$0xff] }
  0x5a   :  { %15634 = vst [vmem:[#allocation187_spill] sm:$0xff] %v11717_v34  ;;  %15635 = vst [vmem:[#allocation188_spill] sm:$0xff] %v11722_v17  ;;  %v11727_v47 = vld [vmem:[%s15173_s10 + $0x5d0] sm:$0xff]  ;;  %v11732_v32 = vld [vmem:[%s15173_s10 + $0x5d8] sm:$0xff] }
  0x5b   :  { %15636 = vst [vmem:[#allocation189_spill] sm:$0xff] %v11727_v47  ;;  %15637 = vst [vmem:[#allocation190_spill] sm:$0xff] %v11732_v32  ;;  %v11737_v39 = vld [vmem:[%s15173_s10 + $0x5e0] sm:$0xff]  ;;  %v11742_v34 = vld [vmem:[%s15173_s10 + $0x5e8] sm:$0xff] }
  0x5c   :  { %15638 = vst [vmem:[#allocation191_spill] sm:$0xff] %v11737_v39  ;;  %15639 = vst [vmem:[#allocation192_spill] sm:$0xff] %v11742_v34  ;;  %v11747_v17 = vld [vmem:[%s15173_s10 + $0x5f0] sm:$0xff]  ;;  %v11752_v47 = vld [vmem:[%s15173_s10 + $0x5f8] sm:$0xff] }
  0x5d   :  { %15640 = vst [vmem:[#allocation193_spill] sm:$0xff] %v11747_v17  ;;  %15641 = vst [vmem:[#allocation194_spill] sm:$0xff] %v11752_v47  ;;  %v11757_v32 = vld [vmem:[%s15173_s10 + $0x600] sm:$0xff]  ;;  %v11762_v39 = vld [vmem:[%s15173_s10 + $0x608] sm:$0xff] }
  0x5e   :  { %15642 = vst [vmem:[#allocation195_spill] sm:$0xff] %v11757_v32  ;;  %15643 = vst [vmem:[#allocation196_spill] sm:$0xff] %v11762_v39  ;;  %v11767_v34 = vld [vmem:[%s15173_s10 + $0x610] sm:$0xff]  ;;  %v11772_v17 = vld [vmem:[%s15173_s10 + $0x618] sm:$0xff] }
  0x5f   :  { %15644 = vst [vmem:[#allocation197_spill] sm:$0xff] %v11767_v34  ;;  %15645 = vst [vmem:[#allocation198_spill] sm:$0xff] %v11772_v17  ;;  %v11777_v47 = vld [vmem:[%s15173_s10 + $0x620] sm:$0xff]  ;;  %v11782_v32 = vld [vmem:[%s15173_s10 + $0x628] sm:$0xff] }
  0x60   :  { %15646 = vst [vmem:[#allocation199_spill] sm:$0xff] %v11777_v47  ;;  %15647 = vst [vmem:[#allocation200_spill] sm:$0xff] %v11782_v32  ;;  %v11787_v39 = vld [vmem:[%s15173_s10 + $0x630] sm:$0xff]  ;;  %v11792_v34 = vld [vmem:[%s15173_s10 + $0x638] sm:$0xff] }
  0x61   :  { %15648 = vst [vmem:[#allocation201_spill] sm:$0xff] %v11787_v39  ;;  %15649 = vst [vmem:[#allocation202_spill] sm:$0xff] %v11792_v34  ;;  %v11797_v17 = vld [vmem:[%s15173_s10 + $0x640] sm:$0xff]  ;;  %v11802_v47 = vld [vmem:[%s15173_s10 + $0x648] sm:$0xff] }
  0x62   :  { %15650 = vst [vmem:[#allocation203_spill] sm:$0xff] %v11797_v17  ;;  %15651 = vst [vmem:[#allocation204_spill] sm:$0xff] %v11802_v47  ;;  %v11807_v32 = vld [vmem:[%s15173_s10 + $0x650] sm:$0xff]  ;;  %v11812_v39 = vld [vmem:[%s15173_s10 + $0x658] sm:$0xff] }
  0x63   :  { %15652 = vst [vmem:[#allocation205_spill] sm:$0xff] %v11807_v32  ;;  %15653 = vst [vmem:[#allocation206_spill] sm:$0xff] %v11812_v39  ;;  %v11817_v34 = vld [vmem:[%s15173_s10 + $0x660] sm:$0xff]  ;;  %v11822_v17 = vld [vmem:[%s15173_s10 + $0x668] sm:$0xff] }
  0x64   :  { %15654 = vst [vmem:[#allocation207_spill] sm:$0xff] %v11817_v34  ;;  %15655 = vst [vmem:[#allocation208_spill] sm:$0xff] %v11822_v17  ;;  %v11827_v47 = vld [vmem:[%s15173_s10 + $0x670] sm:$0xff]  ;;  %v11832_v32 = vld [vmem:[%s15173_s10 + $0x678] sm:$0xff] }
  0x65   :  { %15656 = vst [vmem:[#allocation209_spill] sm:$0xff] %v11827_v47  ;;  %15657 = vst [vmem:[#allocation210_spill] sm:$0xff] %v11832_v32  ;;  %v11837_v39 = vld [vmem:[%s15173_s10 + $0x680] sm:$0xff]  ;;  %v11842_v34 = vld [vmem:[%s15173_s10 + $0x688] sm:$0xff] }
  0x66   :  { %15658 = vst [vmem:[#allocation211_spill] sm:$0xff] %v11837_v39  ;;  %15659 = vst [vmem:[#allocation212_spill] sm:$0xff] %v11842_v34  ;;  %v11847_v17 = vld [vmem:[%s15173_s10 + $0x690] sm:$0xff]  ;;  %v11852_v47 = vld [vmem:[%s15173_s10 + $0x698] sm:$0xff] }
  0x67   :  { %15660 = vst [vmem:[#allocation213_spill] sm:$0xff] %v11847_v17  ;;  %15661 = vst [vmem:[#allocation214_spill] sm:$0xff] %v11852_v47  ;;  %v11857_v32 = vld [vmem:[%s15173_s10 + $0x6a0] sm:$0xff]  ;;  %v11862_v39 = vld [vmem:[%s15173_s10 + $0x6a8] sm:$0xff] }
  0x68   :  { %15662 = vst [vmem:[#allocation215_spill] sm:$0xff] %v11857_v32  ;;  %15663 = vst [vmem:[#allocation216_spill] sm:$0xff] %v11862_v39  ;;  %v11867_v34 = vld [vmem:[%s15173_s10 + $0x6b0] sm:$0xff]  ;;  %v11872_v17 = vld [vmem:[%s15173_s10 + $0x6b8] sm:$0xff] }
  0x69   :  { %15664 = vst [vmem:[#allocation217_spill] sm:$0xff] %v11867_v34  ;;  %15665 = vst [vmem:[#allocation218_spill] sm:$0xff] %v11872_v17  ;;  %v11877_v47 = vld [vmem:[%s15173_s10 + $0x6c0] sm:$0xff]  ;;  %v11882_v32 = vld [vmem:[%s15173_s10 + $0x6c8] sm:$0xff] }
  0x6a   :  { %15666 = vst [vmem:[#allocation219_spill] sm:$0xff] %v11877_v47  ;;  %15667 = vst [vmem:[#allocation220_spill] sm:$0xff] %v11882_v32  ;;  %v11887_v39 = vld [vmem:[%s15173_s10 + $0x6d0] sm:$0xff]  ;;  %v11892_v34 = vld [vmem:[%s15173_s10 + $0x6d8] sm:$0xff] }
  0x6b   :  { %15668 = vst [vmem:[#allocation221_spill] sm:$0xff] %v11887_v39  ;;  %15669 = vst [vmem:[#allocation222_spill] sm:$0xff] %v11892_v34  ;;  %v11897_v17 = vld [vmem:[%s15173_s10 + $0x6e0] sm:$0xff]  ;;  %v11902_v47 = vld [vmem:[%s15173_s10 + $0x6e8] sm:$0xff] }
  0x6c   :  { %15670 = vst [vmem:[#allocation223_spill] sm:$0xff] %v11897_v17  ;;  %15671 = vst [vmem:[#allocation224_spill] sm:$0xff] %v11902_v47  ;;  %v11907_v32 = vld [vmem:[%s15173_s10 + $0x6f0] sm:$0xff]  ;;  %v11912_v39 = vld [vmem:[%s15173_s10 + $0x6f8] sm:$0xff] }
  0x6d   :  { %15672 = vst [vmem:[#allocation225_spill] sm:$0xff] %v11907_v32  ;;  %15673 = vst [vmem:[#allocation226_spill] sm:$0xff] %v11912_v39  ;;  %v11917_v34 = vld [vmem:[%s15173_s10 + $0x700] sm:$0xff]  ;;  %v11922_v17 = vld [vmem:[%s15173_s10 + $0x708] sm:$0xff] }
  0x6e   :  { %15674 = vst [vmem:[#allocation227_spill] sm:$0xff] %v11917_v34  ;;  %15675 = vst [vmem:[#allocation228_spill] sm:$0xff] %v11922_v17  ;;  %v11927_v47 = vld [vmem:[%s15173_s10 + $0x710] sm:$0xff]  ;;  %v11932_v32 = vld [vmem:[%s15173_s10 + $0x718] sm:$0xff] }
  0x6f   :  { %15676 = vst [vmem:[#allocation229_spill] sm:$0xff] %v11927_v47  ;;  %15677 = vst [vmem:[#allocation230_spill] sm:$0xff] %v11932_v32  ;;  %v11937_v39 = vld [vmem:[%s15173_s10 + $0x720] sm:$0xff]  ;;  %v11942_v34 = vld [vmem:[%s15173_s10 + $0x728] sm:$0xff] }
  0x70   :  { %15678 = vst [vmem:[#allocation231_spill] sm:$0xff] %v11937_v39  ;;  %15679 = vst [vmem:[#allocation232_spill] sm:$0xff] %v11942_v34  ;;  %v11947_v17 = vld [vmem:[%s15173_s10 + $0x730] sm:$0xff]  ;;  %v11952_v47 = vld [vmem:[%s15173_s10 + $0x738] sm:$0xff] }
  0x71   :  { %15680 = vst [vmem:[#allocation233_spill] sm:$0xff] %v11947_v17  ;;  %15681 = vst [vmem:[#allocation234_spill] sm:$0xff] %v11952_v47  ;;  %v11957_v32 = vld [vmem:[%s15173_s10 + $0x740] sm:$0xff]  ;;  %v11962_v39 = vld [vmem:[%s15173_s10 + $0x748] sm:$0xff] }
  0x72   :  { %15682 = vst [vmem:[#allocation235_spill] sm:$0xff] %v11957_v32  ;;  %15683 = vst [vmem:[#allocation236_spill] sm:$0xff] %v11962_v39  ;;  %v11967_v34 = vld [vmem:[%s15173_s10 + $0x750] sm:$0xff]  ;;  %v11972_v17 = vld [vmem:[%s15173_s10 + $0x758] sm:$0xff] }
  0x73   :  { %15684 = vst [vmem:[#allocation237_spill] sm:$0xff] %v11967_v34  ;;  %15685 = vst [vmem:[#allocation238_spill] sm:$0xff] %v11972_v17  ;;  %v11977_v47 = vld [vmem:[%s15173_s10 + $0x760] sm:$0xff]  ;;  %v11982_v32 = vld [vmem:[%s15173_s10 + $0x768] sm:$0xff] }
  0x74   :  { %15686 = vst [vmem:[#allocation239_spill] sm:$0xff] %v11977_v47  ;;  %15687 = vst [vmem:[#allocation240_spill] sm:$0xff] %v11982_v32  ;;  %v11987_v39 = vld [vmem:[%s15173_s10 + $0x770] sm:$0xff]  ;;  %v11992_v34 = vld [vmem:[%s15173_s10 + $0x778] sm:$0xff] }
  0x75   :  { %15688 = vst [vmem:[#allocation241_spill] sm:$0xff] %v11987_v39  ;;  %15689 = vst [vmem:[#allocation242_spill] sm:$0xff] %v11992_v34  ;;  %v11997_v17 = vld [vmem:[%s15173_s10 + $0x780] sm:$0xff]  ;;  %v12002_v47 = vld [vmem:[%s15173_s10 + $0x788] sm:$0xff] }
  0x76   :  { %15690 = vst [vmem:[#allocation243_spill] sm:$0xff] %v11997_v17  ;;  %15691 = vst [vmem:[#allocation244_spill] sm:$0xff] %v12002_v47  ;;  %v12007_v32 = vld [vmem:[%s15173_s10 + $0x790] sm:$0xff]  ;;  %v12012_v39 = vld [vmem:[%s15173_s10 + $0x798] sm:$0xff] }
  0x77   :  { %15692 = vst [vmem:[#allocation245_spill] sm:$0xff] %v12007_v32  ;;  %15693 = vst [vmem:[#allocation246_spill] sm:$0xff] %v12012_v39  ;;  %v12017_v34 = vld [vmem:[%s15173_s10 + $0x7a0] sm:$0xff]  ;;  %v12022_v17 = vld [vmem:[%s15173_s10 + $0x7a8] sm:$0xff] }
  0x78   :  { %15694 = vst [vmem:[#allocation247_spill] sm:$0xff] %v12017_v34  ;;  %15695 = vst [vmem:[#allocation248_spill] sm:$0xff] %v12022_v17  ;;  %v12027_v47 = vld [vmem:[%s15173_s10 + $0x7b0] sm:$0xff]  ;;  %v12032_v32 = vld [vmem:[%s15173_s10 + $0x7b8] sm:$0xff] }
  0x79   :  { %15696 = vst [vmem:[#allocation249_spill] sm:$0xff] %v12027_v47  ;;  %15697 = vst [vmem:[#allocation250_spill] sm:$0xff] %v12032_v32  ;;  %v12037_v39 = vld [vmem:[%s15173_s10 + $0x7c0] sm:$0xff]  ;;  %v12042_v34 = vld [vmem:[%s15173_s10 + $0x7c8] sm:$0xff] }
  0x7a   :  { %15698 = vst [vmem:[#allocation251_spill] sm:$0xff] %v12037_v39  ;;  %15699 = vst [vmem:[#allocation252_spill] sm:$0xff] %v12042_v34  ;;  %v12047_v17 = vld [vmem:[%s15173_s10 + $0x7d0] sm:$0xff]  ;;  %v12052_v47 = vld [vmem:[%s15173_s10 + $0x7d8] sm:$0xff] }
  0x7b   :  { %15700 = vst [vmem:[#allocation253_spill] sm:$0xff] %v12047_v17  ;;  %15701 = vst [vmem:[#allocation254_spill] sm:$0xff] %v12052_v47  ;;  %v12057_v32 = vld [vmem:[%s15173_s10 + $0x7e0] sm:$0xff]  ;;  %v12062_v39 = vld [vmem:[%s15173_s10 + $0x7e8] sm:$0xff] }
  0x7c   :  { %15702 = vst [vmem:[#allocation255_spill] sm:$0xff] %v12057_v32  ;;  %15703 = vst [vmem:[#allocation256_spill] sm:$0xff] %v12062_v39  ;;  %v12067_v34 = vld [vmem:[%s15173_s10 + $0x7f0] sm:$0xff]  ;;  %v12072_v17 = vld [vmem:[%s15173_s10 + $0x7f8] sm:$0xff] }
  0x7d   :  { %15704 = vst [vmem:[#allocation257_spill] sm:$0xff] %v12067_v34  ;;  %15705 = vst [vmem:[#allocation258_spill] sm:$0xff] %v12072_v17 }
  0x7e   :  { %593 = vsyncadd [#allocation6], 32768  ;;  %v628_v47 = vld [vmem:[%s15174_s11] sm:$0xff]  ;;  %v630_v32 = vld [vmem:[%s15174_s11 + $0x8] sm:$0xff] }
  0x7f   :  { %629 = vst [vmem:[#allocation3] sm:$0xff] %v628_v47  ;;  %631 = vst [vmem:[#allocation3 + $0x8] sm:$0xff] %v630_v32  ;;  %v632_v39 = vld [vmem:[%s15174_s11 + $0x10] sm:$0xff]  ;;  %v634_v34 = vld [vmem:[%s15174_s11 + $0x18] sm:$0xff] }
  0x80   :  { %v636_v17 = vld [vmem:[%s15174_s11 + $0x20] sm:$0xff]  ;;  %633 = vst [vmem:[#allocation3 + $0x10] sm:$0xff] %v632_v39  ;;  %635 = vst [vmem:[#allocation3 + $0x18] sm:$0xff] %v634_v34  ;;  %v638_v47 = vld [vmem:[%s15174_s11 + $0x28] sm:$0xff] }
  0x81   :  { %637 = vst [vmem:[#allocation3 + $0x20] sm:$0xff] %v636_v17  ;;  %v640_v32 = vld [vmem:[%s15174_s11 + $0x30] sm:$0xff]  ;;  %v642_v3 = vld [vmem:[%s15174_s11 + $0x38] sm:$0xff]  ;;  %639 = vst [vmem:[#allocation3 + $0x28] sm:$0xff] %v638_v47 }
  0x82   :  { %641 = vst [vmem:[#allocation3 + $0x30] sm:$0xff] %v640_v32  ;;  %643 = vst [vmem:[#allocation3 + $0x38] sm:$0xff] %v642_v3  ;;  %v644_v34 = vld [vmem:[%s15174_s11 + $0x40] sm:$0xff]  ;;  %v646_v17 = vld [vmem:[%s15174_s11 + $0x48] sm:$0xff] }
  0x83   :  { %v648_v39 = vld [vmem:[%s15174_s11 + $0x50] sm:$0xff]  ;;  %645 = vst [vmem:[#allocation3 + $0x40] sm:$0xff] %v644_v34  ;;  %647 = vst [vmem:[#allocation3 + $0x48] sm:$0xff] %v646_v17  ;;  %v650_v47 = vld [vmem:[%s15174_s11 + $0x58] sm:$0xff] }
  0x84   :  { %649 = vst [vmem:[#allocation3 + $0x50] sm:$0xff] %v648_v39  ;;  %v652_v3 = vld [vmem:[%s15174_s11 + $0x60] sm:$0xff]  ;;  %v654_v32 = vld [vmem:[%s15174_s11 + $0x68] sm:$0xff]  ;;  %651 = vst [vmem:[#allocation3 + $0x58] sm:$0xff] %v650_v47 }
  0x85   :  { %653 = vst [vmem:[#allocation3 + $0x60] sm:$0xff] %v652_v3  ;;  %655 = vst [vmem:[#allocation3 + $0x68] sm:$0xff] %v654_v32  ;;  %v656_v34 = vld [vmem:[%s15174_s11 + $0x70] sm:$0xff]  ;;  %v658_v17 = vld [vmem:[%s15174_s11 + $0x78] sm:$0xff] }
  0x86   :  { %v660_v39 = vld [vmem:[%s15174_s11 + $0x80] sm:$0xff]  ;;  %657 = vst [vmem:[#allocation3 + $0x70] sm:$0xff] %v656_v34  ;;  %659 = vst [vmem:[#allocation3 + $0x78] sm:$0xff] %v658_v17  ;;  %v662_v47 = vld [vmem:[%s15174_s11 + $0x88] sm:$0xff] }
  0x87   :  { %661 = vst [vmem:[#allocation3 + $0x80] sm:$0xff] %v660_v39  ;;  %v664_v3 = vld [vmem:[%s15174_s11 + $0x90] sm:$0xff]  ;;  %v666_v32 = vld [vmem:[%s15174_s11 + $0x98] sm:$0xff]  ;;  %663 = vst [vmem:[#allocation3 + $0x88] sm:$0xff] %v662_v47 }
  0x88   :  { %665 = vst [vmem:[#allocation3 + $0x90] sm:$0xff] %v664_v3  ;;  %667 = vst [vmem:[#allocation3 + $0x98] sm:$0xff] %v666_v32  ;;  %v668_v34 = vld [vmem:[%s15174_s11 + $0xa0] sm:$0xff]  ;;  %v670_v17 = vld [vmem:[%s15174_s11 + $0xa8] sm:$0xff] }
  0x89   :  { %v672_v39 = vld [vmem:[%s15174_s11 + $0xb0] sm:$0xff]  ;;  %669 = vst [vmem:[#allocation3 + $0xa0] sm:$0xff] %v668_v34  ;;  %671 = vst [vmem:[#allocation3 + $0xa8] sm:$0xff] %v670_v17  ;;  %v674_v47 = vld [vmem:[%s15174_s11 + $0xb8] sm:$0xff] }
  0x8a   :  { %673 = vst [vmem:[#allocation3 + $0xb0] sm:$0xff] %v672_v39  ;;  %v676_v3 = vld [vmem:[%s15174_s11 + $0xc0] sm:$0xff]  ;;  %v678_v32 = vld [vmem:[%s15174_s11 + $0xc8] sm:$0xff]  ;;  %675 = vst [vmem:[#allocation3 + $0xb8] sm:$0xff] %v674_v47 }
  0x8b   :  { %677 = vst [vmem:[#allocation3 + $0xc0] sm:$0xff] %v676_v3  ;;  %679 = vst [vmem:[#allocation3 + $0xc8] sm:$0xff] %v678_v32  ;;  %v680_v34 = vld [vmem:[%s15174_s11 + $0xd0] sm:$0xff]  ;;  %v682_v17 = vld [vmem:[%s15174_s11 + $0xd8] sm:$0xff] }
  0x8c   :  { %v684_v39 = vld [vmem:[%s15174_s11 + $0xe0] sm:$0xff]  ;;  %681 = vst [vmem:[#allocation3 + $0xd0] sm:$0xff] %v680_v34  ;;  %683 = vst [vmem:[#allocation3 + $0xd8] sm:$0xff] %v682_v17  ;;  %v686_v47 = vld [vmem:[%s15174_s11 + $0xe8] sm:$0xff] }
  0x8d   :  { %685 = vst [vmem:[#allocation3 + $0xe0] sm:$0xff] %v684_v39  ;;  %v688_v3 = vld [vmem:[%s15174_s11 + $0xf0] sm:$0xff]  ;;  %v690_v32 = vld [vmem:[%s15174_s11 + $0xf8] sm:$0xff]  ;;  %687 = vst [vmem:[#allocation3 + $0xe8] sm:$0xff] %v686_v47 }
  0x8e   :  { %689 = vst [vmem:[#allocation3 + $0xf0] sm:$0xff] %v688_v3  ;;  %691 = vst [vmem:[#allocation3 + $0xf8] sm:$0xff] %v690_v32  ;;  %v692_v34 = vld [vmem:[%s15174_s11 + $0x100] sm:$0xff]  ;;  %v694_v17 = vld [vmem:[%s15174_s11 + $0x108] sm:$0xff] }
  0x8f   :  { %v696_v39 = vld [vmem:[%s15174_s11 + $0x110] sm:$0xff]  ;;  %693 = vst [vmem:[#allocation3 + $0x100] sm:$0xff] %v692_v34  ;;  %695 = vst [vmem:[#allocation3 + $0x108] sm:$0xff] %v694_v17  ;;  %v698_v47 = vld [vmem:[%s15174_s11 + $0x118] sm:$0xff] }
  0x90   :  { %697 = vst [vmem:[#allocation3 + $0x110] sm:$0xff] %v696_v39  ;;  %v700_v3 = vld [vmem:[%s15174_s11 + $0x120] sm:$0xff]  ;;  %v702_v32 = vld [vmem:[%s15174_s11 + $0x128] sm:$0xff]  ;;  %699 = vst [vmem:[#allocation3 + $0x118] sm:$0xff] %v698_v47 }
  0x91   :  { %701 = vst [vmem:[#allocation3 + $0x120] sm:$0xff] %v700_v3  ;;  %703 = vst [vmem:[#allocation3 + $0x128] sm:$0xff] %v702_v32  ;;  %v704_v34 = vld [vmem:[%s15174_s11 + $0x130] sm:$0xff]  ;;  %v706_v17 = vld [vmem:[%s15174_s11 + $0x138] sm:$0xff] }
  0x92   :  { %v708_v39 = vld [vmem:[%s15174_s11 + $0x140] sm:$0xff]  ;;  %705 = vst [vmem:[#allocation3 + $0x130] sm:$0xff] %v704_v34  ;;  %707 = vst [vmem:[#allocation3 + $0x138] sm:$0xff] %v706_v17  ;;  %v710_v47 = vld [vmem:[%s15174_s11 + $0x148] sm:$0xff] }
  0x93   :  { %709 = vst [vmem:[#allocation3 + $0x140] sm:$0xff] %v708_v39  ;;  %v712_v3 = vld [vmem:[%s15174_s11 + $0x150] sm:$0xff]  ;;  %v714_v32 = vld [vmem:[%s15174_s11 + $0x158] sm:$0xff]  ;;  %711 = vst [vmem:[#allocation3 + $0x148] sm:$0xff] %v710_v47 }
  0x94   :  { %713 = vst [vmem:[#allocation3 + $0x150] sm:$0xff] %v712_v3  ;;  %715 = vst [vmem:[#allocation3 + $0x158] sm:$0xff] %v714_v32  ;;  %v716_v34 = vld [vmem:[%s15174_s11 + $0x160] sm:$0xff]  ;;  %v718_v17 = vld [vmem:[%s15174_s11 + $0x168] sm:$0xff] }
  0x95   :  { %v720_v39 = vld [vmem:[%s15174_s11 + $0x170] sm:$0xff]  ;;  %717 = vst [vmem:[#allocation3 + $0x160] sm:$0xff] %v716_v34  ;;  %719 = vst [vmem:[#allocation3 + $0x168] sm:$0xff] %v718_v17  ;;  %v722_v47 = vld [vmem:[%s15174_s11 + $0x178] sm:$0xff] }
  0x96   :  { %721 = vst [vmem:[#allocation3 + $0x170] sm:$0xff] %v720_v39  ;;  %v724_v3 = vld [vmem:[%s15174_s11 + $0x180] sm:$0xff]  ;;  %v726_v32 = vld [vmem:[%s15174_s11 + $0x188] sm:$0xff]  ;;  %723 = vst [vmem:[#allocation3 + $0x178] sm:$0xff] %v722_v47 }
  0x97   :  { %725 = vst [vmem:[#allocation3 + $0x180] sm:$0xff] %v724_v3  ;;  %727 = vst [vmem:[#allocation3 + $0x188] sm:$0xff] %v726_v32  ;;  %v728_v34 = vld [vmem:[%s15174_s11 + $0x190] sm:$0xff]  ;;  %v730_v17 = vld [vmem:[%s15174_s11 + $0x198] sm:$0xff] }
  0x98   :  { %v732_v39 = vld [vmem:[%s15174_s11 + $0x1a0] sm:$0xff]  ;;  %729 = vst [vmem:[#allocation3 + $0x190] sm:$0xff] %v728_v34  ;;  %731 = vst [vmem:[#allocation3 + $0x198] sm:$0xff] %v730_v17  ;;  %v734_v47 = vld [vmem:[%s15174_s11 + $0x1a8] sm:$0xff] }
  0x99   :  { %733 = vst [vmem:[#allocation3 + $0x1a0] sm:$0xff] %v732_v39  ;;  %v736_v3 = vld [vmem:[%s15174_s11 + $0x1b0] sm:$0xff]  ;;  %v738_v32 = vld [vmem:[%s15174_s11 + $0x1b8] sm:$0xff]  ;;  %735 = vst [vmem:[#allocation3 + $0x1a8] sm:$0xff] %v734_v47 }
  0x9a   :  { %737 = vst [vmem:[#allocation3 + $0x1b0] sm:$0xff] %v736_v3  ;;  %739 = vst [vmem:[#allocation3 + $0x1b8] sm:$0xff] %v738_v32  ;;  %v740_v34 = vld [vmem:[%s15174_s11 + $0x1c0] sm:$0xff]  ;;  %v742_v17 = vld [vmem:[%s15174_s11 + $0x1c8] sm:$0xff] }
  0x9b   :  { %v744_v39 = vld [vmem:[%s15174_s11 + $0x1d0] sm:$0xff]  ;;  %741 = vst [vmem:[#allocation3 + $0x1c0] sm:$0xff] %v740_v34  ;;  %743 = vst [vmem:[#allocation3 + $0x1c8] sm:$0xff] %v742_v17  ;;  %v746_v47 = vld [vmem:[%s15174_s11 + $0x1d8] sm:$0xff] }
  0x9c   :  { %745 = vst [vmem:[#allocation3 + $0x1d0] sm:$0xff] %v744_v39  ;;  %v748_v3 = vld [vmem:[%s15174_s11 + $0x1e0] sm:$0xff]  ;;  %v750_v32 = vld [vmem:[%s15174_s11 + $0x1e8] sm:$0xff]  ;;  %747 = vst [vmem:[#allocation3 + $0x1d8] sm:$0xff] %v746_v47 }
  0x9d   :  { %749 = vst [vmem:[#allocation3 + $0x1e0] sm:$0xff] %v748_v3  ;;  %751 = vst [vmem:[#allocation3 + $0x1e8] sm:$0xff] %v750_v32  ;;  %v752_v34 = vld [vmem:[%s15174_s11 + $0x1f0] sm:$0xff]  ;;  %v754_v17 = vld [vmem:[%s15174_s11 + $0x1f8] sm:$0xff] }
  0x9e   :  { %v756_v39 = vld [vmem:[%s15174_s11 + $0x200] sm:$0xff]  ;;  %753 = vst [vmem:[#allocation3 + $0x1f0] sm:$0xff] %v752_v34  ;;  %755 = vst [vmem:[#allocation3 + $0x1f8] sm:$0xff] %v754_v17  ;;  %v758_v47 = vld [vmem:[%s15174_s11 + $0x208] sm:$0xff] }
  0x9f   :  { %757 = vst [vmem:[#allocation3 + $0x200] sm:$0xff] %v756_v39  ;;  %v760_v3 = vld [vmem:[%s15174_s11 + $0x210] sm:$0xff]  ;;  %v762_v32 = vld [vmem:[%s15174_s11 + $0x218] sm:$0xff]  ;;  %759 = vst [vmem:[#allocation3 + $0x208] sm:$0xff] %v758_v47 }
  0xa0   :  { %761 = vst [vmem:[#allocation3 + $0x210] sm:$0xff] %v760_v3  ;;  %763 = vst [vmem:[#allocation3 + $0x218] sm:$0xff] %v762_v32  ;;  %v764_v34 = vld [vmem:[%s15174_s11 + $0x220] sm:$0xff]  ;;  %v766_v17 = vld [vmem:[%s15174_s11 + $0x228] sm:$0xff] }
  0xa1   :  { %v768_v39 = vld [vmem:[%s15174_s11 + $0x230] sm:$0xff]  ;;  %765 = vst [vmem:[#allocation3 + $0x220] sm:$0xff] %v764_v34  ;;  %767 = vst [vmem:[#allocation3 + $0x228] sm:$0xff] %v766_v17  ;;  %v770_v47 = vld [vmem:[%s15174_s11 + $0x238] sm:$0xff] }
  0xa2   :  { %769 = vst [vmem:[#allocation3 + $0x230] sm:$0xff] %v768_v39  ;;  %v772_v3 = vld [vmem:[%s15174_s11 + $0x240] sm:$0xff]  ;;  %v774_v32 = vld [vmem:[%s15174_s11 + $0x248] sm:$0xff]  ;;  %771 = vst [vmem:[#allocation3 + $0x238] sm:$0xff] %v770_v47 }
  0xa3   :  { %773 = vst [vmem:[#allocation3 + $0x240] sm:$0xff] %v772_v3  ;;  %775 = vst [vmem:[#allocation3 + $0x248] sm:$0xff] %v774_v32  ;;  %v776_v34 = vld [vmem:[%s15174_s11 + $0x250] sm:$0xff]  ;;  %v778_v17 = vld [vmem:[%s15174_s11 + $0x258] sm:$0xff] }
  0xa4   :  { %v780_v39 = vld [vmem:[%s15174_s11 + $0x260] sm:$0xff]  ;;  %777 = vst [vmem:[#allocation3 + $0x250] sm:$0xff] %v776_v34  ;;  %779 = vst [vmem:[#allocation3 + $0x258] sm:$0xff] %v778_v17  ;;  %v782_v47 = vld [vmem:[%s15174_s11 + $0x268] sm:$0xff] }
  0xa5   :  { %781 = vst [vmem:[#allocation3 + $0x260] sm:$0xff] %v780_v39  ;;  %v784_v3 = vld [vmem:[%s15174_s11 + $0x270] sm:$0xff]  ;;  %v786_v32 = vld [vmem:[%s15174_s11 + $0x278] sm:$0xff]  ;;  %783 = vst [vmem:[#allocation3 + $0x268] sm:$0xff] %v782_v47 }
  0xa6   :  { %785 = vst [vmem:[#allocation3 + $0x270] sm:$0xff] %v784_v3  ;;  %787 = vst [vmem:[#allocation3 + $0x278] sm:$0xff] %v786_v32  ;;  %v788_v34 = vld [vmem:[%s15174_s11 + $0x280] sm:$0xff]  ;;  %v790_v17 = vld [vmem:[%s15174_s11 + $0x288] sm:$0xff] }
  0xa7   :  { %v792_v39 = vld [vmem:[%s15174_s11 + $0x290] sm:$0xff]  ;;  %789 = vst [vmem:[#allocation3 + $0x280] sm:$0xff] %v788_v34  ;;  %791 = vst [vmem:[#allocation3 + $0x288] sm:$0xff] %v790_v17  ;;  %v794_v47 = vld [vmem:[%s15174_s11 + $0x298] sm:$0xff] }
  0xa8   :  { %793 = vst [vmem:[#allocation3 + $0x290] sm:$0xff] %v792_v39  ;;  %v796_v3 = vld [vmem:[%s15174_s11 + $0x2a0] sm:$0xff]  ;;  %v798_v32 = vld [vmem:[%s15174_s11 + $0x2a8] sm:$0xff]  ;;  %795 = vst [vmem:[#allocation3 + $0x298] sm:$0xff] %v794_v47 }
  0xa9   :  { %797 = vst [vmem:[#allocation3 + $0x2a0] sm:$0xff] %v796_v3  ;;  %799 = vst [vmem:[#allocation3 + $0x2a8] sm:$0xff] %v798_v32  ;;  %v800_v34 = vld [vmem:[%s15174_s11 + $0x2b0] sm:$0xff]  ;;  %v802_v17 = vld [vmem:[%s15174_s11 + $0x2b8] sm:$0xff] }
  0xaa   :  { %v804_v39 = vld [vmem:[%s15174_s11 + $0x2c0] sm:$0xff]  ;;  %801 = vst [vmem:[#allocation3 + $0x2b0] sm:$0xff] %v800_v34  ;;  %803 = vst [vmem:[#allocation3 + $0x2b8] sm:$0xff] %v802_v17  ;;  %v806_v47 = vld [vmem:[%s15174_s11 + $0x2c8] sm:$0xff] }
  0xab   :  { %805 = vst [vmem:[#allocation3 + $0x2c0] sm:$0xff] %v804_v39  ;;  %v808_v3 = vld [vmem:[%s15174_s11 + $0x2d0] sm:$0xff]  ;;  %v810_v32 = vld [vmem:[%s15174_s11 + $0x2d8] sm:$0xff]  ;;  %807 = vst [vmem:[#allocation3 + $0x2c8] sm:$0xff] %v806_v47 }
  0xac   :  { %809 = vst [vmem:[#allocation3 + $0x2d0] sm:$0xff] %v808_v3  ;;  %811 = vst [vmem:[#allocation3 + $0x2d8] sm:$0xff] %v810_v32  ;;  %v812_v34 = vld [vmem:[%s15174_s11 + $0x2e0] sm:$0xff]  ;;  %v814_v17 = vld [vmem:[%s15174_s11 + $0x2e8] sm:$0xff] }
  0xad   :  { %v816_v39 = vld [vmem:[%s15174_s11 + $0x2f0] sm:$0xff]  ;;  %813 = vst [vmem:[#allocation3 + $0x2e0] sm:$0xff] %v812_v34  ;;  %815 = vst [vmem:[#allocation3 + $0x2e8] sm:$0xff] %v814_v17  ;;  %v818_v47 = vld [vmem:[%s15174_s11 + $0x2f8] sm:$0xff] }
  0xae   :  { %817 = vst [vmem:[#allocation3 + $0x2f0] sm:$0xff] %v816_v39  ;;  %v820_v3 = vld [vmem:[%s15174_s11 + $0x300] sm:$0xff]  ;;  %v822_v32 = vld [vmem:[%s15174_s11 + $0x308] sm:$0xff]  ;;  %819 = vst [vmem:[#allocation3 + $0x2f8] sm:$0xff] %v818_v47 }
  0xaf   :  { %821 = vst [vmem:[#allocation3 + $0x300] sm:$0xff] %v820_v3  ;;  %823 = vst [vmem:[#allocation3 + $0x308] sm:$0xff] %v822_v32  ;;  %v824_v34 = vld [vmem:[%s15174_s11 + $0x310] sm:$0xff]  ;;  %v826_v17 = vld [vmem:[%s15174_s11 + $0x318] sm:$0xff] }
  0xb0   :  { %v828_v39 = vld [vmem:[%s15174_s11 + $0x320] sm:$0xff]  ;;  %825 = vst [vmem:[#allocation3 + $0x310] sm:$0xff] %v824_v34  ;;  %827 = vst [vmem:[#allocation3 + $0x318] sm:$0xff] %v826_v17  ;;  %v830_v47 = vld [vmem:[%s15174_s11 + $0x328] sm:$0xff] }
  0xb1   :  { %829 = vst [vmem:[#allocation3 + $0x320] sm:$0xff] %v828_v39  ;;  %v832_v3 = vld [vmem:[%s15174_s11 + $0x330] sm:$0xff]  ;;  %v834_v32 = vld [vmem:[%s15174_s11 + $0x338] sm:$0xff]  ;;  %831 = vst [vmem:[#allocation3 + $0x328] sm:$0xff] %v830_v47 }
  0xb2   :  { %833 = vst [vmem:[#allocation3 + $0x330] sm:$0xff] %v832_v3  ;;  %835 = vst [vmem:[#allocation3 + $0x338] sm:$0xff] %v834_v32  ;;  %v836_v34 = vld [vmem:[%s15174_s11 + $0x340] sm:$0xff]  ;;  %v838_v17 = vld [vmem:[%s15174_s11 + $0x348] sm:$0xff] }
  0xb3   :  { %v840_v39 = vld [vmem:[%s15174_s11 + $0x350] sm:$0xff]  ;;  %837 = vst [vmem:[#allocation3 + $0x340] sm:$0xff] %v836_v34  ;;  %839 = vst [vmem:[#allocation3 + $0x348] sm:$0xff] %v838_v17  ;;  %v842_v47 = vld [vmem:[%s15174_s11 + $0x358] sm:$0xff] }
  0xb4   :  { %841 = vst [vmem:[#allocation3 + $0x350] sm:$0xff] %v840_v39  ;;  %v844_v3 = vld [vmem:[%s15174_s11 + $0x360] sm:$0xff]  ;;  %v846_v32 = vld [vmem:[%s15174_s11 + $0x368] sm:$0xff]  ;;  %843 = vst [vmem:[#allocation3 + $0x358] sm:$0xff] %v842_v47 }
  0xb5   :  { %845 = vst [vmem:[#allocation3 + $0x360] sm:$0xff] %v844_v3  ;;  %847 = vst [vmem:[#allocation3 + $0x368] sm:$0xff] %v846_v32  ;;  %v848_v34 = vld [vmem:[%s15174_s11 + $0x370] sm:$0xff]  ;;  %v850_v17 = vld [vmem:[%s15174_s11 + $0x378] sm:$0xff] }
  0xb6   :  { %v852_v39 = vld [vmem:[%s15174_s11 + $0x380] sm:$0xff]  ;;  %849 = vst [vmem:[#allocation3 + $0x370] sm:$0xff] %v848_v34  ;;  %851 = vst [vmem:[#allocation3 + $0x378] sm:$0xff] %v850_v17  ;;  %v854_v47 = vld [vmem:[%s15174_s11 + $0x388] sm:$0xff] }
  0xb7   :  { %853 = vst [vmem:[#allocation3 + $0x380] sm:$0xff] %v852_v39  ;;  %v856_v3 = vld [vmem:[%s15174_s11 + $0x390] sm:$0xff]  ;;  %v858_v32 = vld [vmem:[%s15174_s11 + $0x398] sm:$0xff]  ;;  %855 = vst [vmem:[#allocation3 + $0x388] sm:$0xff] %v854_v47 }
  0xb8   :  { %857 = vst [vmem:[#allocation3 + $0x390] sm:$0xff] %v856_v3  ;;  %859 = vst [vmem:[#allocation3 + $0x398] sm:$0xff] %v858_v32  ;;  %v860_v34 = vld [vmem:[%s15174_s11 + $0x3a0] sm:$0xff]  ;;  %v862_v17 = vld [vmem:[%s15174_s11 + $0x3a8] sm:$0xff] }
  0xb9   :  { %v864_v39 = vld [vmem:[%s15174_s11 + $0x3b0] sm:$0xff]  ;;  %861 = vst [vmem:[#allocation3 + $0x3a0] sm:$0xff] %v860_v34  ;;  %863 = vst [vmem:[#allocation3 + $0x3a8] sm:$0xff] %v862_v17  ;;  %v866_v47 = vld [vmem:[%s15174_s11 + $0x3b8] sm:$0xff] }
  0xba   :  { %865 = vst [vmem:[#allocation3 + $0x3b0] sm:$0xff] %v864_v39  ;;  %v868_v3 = vld [vmem:[%s15174_s11 + $0x3c0] sm:$0xff]  ;;  %v870_v32 = vld [vmem:[%s15174_s11 + $0x3c8] sm:$0xff]  ;;  %867 = vst [vmem:[#allocation3 + $0x3b8] sm:$0xff] %v866_v47 }
  0xbb   :  { %869 = vst [vmem:[#allocation3 + $0x3c0] sm:$0xff] %v868_v3  ;;  %871 = vst [vmem:[#allocation3 + $0x3c8] sm:$0xff] %v870_v32  ;;  %v872_v34 = vld [vmem:[%s15174_s11 + $0x3d0] sm:$0xff]  ;;  %v874_v17 = vld [vmem:[%s15174_s11 + $0x3d8] sm:$0xff] }
  0xbc   :  { %v876_v39 = vld [vmem:[%s15174_s11 + $0x3e0] sm:$0xff]  ;;  %873 = vst [vmem:[#allocation3 + $0x3d0] sm:$0xff] %v872_v34  ;;  %875 = vst [vmem:[#allocation3 + $0x3d8] sm:$0xff] %v874_v17  ;;  %v878_v47 = vld [vmem:[%s15174_s11 + $0x3e8] sm:$0xff] }
  0xbd   :  { %877 = vst [vmem:[#allocation3 + $0x3e0] sm:$0xff] %v876_v39  ;;  %v880_v3 = vld [vmem:[%s15174_s11 + $0x3f0] sm:$0xff]  ;;  %v882_v32 = vld [vmem:[%s15174_s11 + $0x3f8] sm:$0xff]  ;;  %879 = vst [vmem:[#allocation3 + $0x3e8] sm:$0xff] %v878_v47 }
  0xbe   :  { %881 = vst [vmem:[#allocation3 + $0x3f0] sm:$0xff] %v880_v3  ;;  %883 = vst [vmem:[#allocation3 + $0x3f8] sm:$0xff] %v882_v32  ;;  %v884_v34 = vld [vmem:[%s15174_s11 + $0x400] sm:$0xff]  ;;  %v886_v17 = vld [vmem:[%s15174_s11 + $0x408] sm:$0xff] }
  0xbf   :  { %v888_v39 = vld [vmem:[%s15174_s11 + $0x410] sm:$0xff]  ;;  %885 = vst [vmem:[#allocation3 + $0x400] sm:$0xff] %v884_v34  ;;  %887 = vst [vmem:[#allocation3 + $0x408] sm:$0xff] %v886_v17  ;;  %v890_v47 = vld [vmem:[%s15174_s11 + $0x418] sm:$0xff] }
  0xc0   :  { %889 = vst [vmem:[#allocation3 + $0x410] sm:$0xff] %v888_v39  ;;  %v892_v3 = vld [vmem:[%s15174_s11 + $0x420] sm:$0xff]  ;;  %v894_v32 = vld [vmem:[%s15174_s11 + $0x428] sm:$0xff]  ;;  %891 = vst [vmem:[#allocation3 + $0x418] sm:$0xff] %v890_v47 }
  0xc1   :  { %893 = vst [vmem:[#allocation3 + $0x420] sm:$0xff] %v892_v3  ;;  %895 = vst [vmem:[#allocation3 + $0x428] sm:$0xff] %v894_v32  ;;  %v896_v34 = vld [vmem:[%s15174_s11 + $0x430] sm:$0xff]  ;;  %v898_v17 = vld [vmem:[%s15174_s11 + $0x438] sm:$0xff] }
  0xc2   :  { %v900_v39 = vld [vmem:[%s15174_s11 + $0x440] sm:$0xff]  ;;  %897 = vst [vmem:[#allocation3 + $0x430] sm:$0xff] %v896_v34  ;;  %899 = vst [vmem:[#allocation3 + $0x438] sm:$0xff] %v898_v17  ;;  %v902_v47 = vld [vmem:[%s15174_s11 + $0x448] sm:$0xff] }
  0xc3   :  { %901 = vst [vmem:[#allocation3 + $0x440] sm:$0xff] %v900_v39  ;;  %v904_v3 = vld [vmem:[%s15174_s11 + $0x450] sm:$0xff]  ;;  %v906_v32 = vld [vmem:[%s15174_s11 + $0x458] sm:$0xff]  ;;  %903 = vst [vmem:[#allocation3 + $0x448] sm:$0xff] %v902_v47 }
  0xc4   :  { %905 = vst [vmem:[#allocation3 + $0x450] sm:$0xff] %v904_v3  ;;  %907 = vst [vmem:[#allocation3 + $0x458] sm:$0xff] %v906_v32  ;;  %v908_v34 = vld [vmem:[%s15174_s11 + $0x460] sm:$0xff]  ;;  %v910_v17 = vld [vmem:[%s15174_s11 + $0x468] sm:$0xff] }
  0xc5   :  { %v912_v39 = vld [vmem:[%s15174_s11 + $0x470] sm:$0xff]  ;;  %909 = vst [vmem:[#allocation3 + $0x460] sm:$0xff] %v908_v34  ;;  %911 = vst [vmem:[#allocation3 + $0x468] sm:$0xff] %v910_v17  ;;  %v914_v47 = vld [vmem:[%s15174_s11 + $0x478] sm:$0xff] }
  0xc6   :  { %913 = vst [vmem:[#allocation3 + $0x470] sm:$0xff] %v912_v39  ;;  %915 = vst [vmem:[#allocation3 + $0x478] sm:$0xff] %v914_v47 }
  0xc7   :  { %923 = vsyncadd [#allocation6 + $0x1], 18432  ;;  %v958_v3 = vld [vmem:[%s15175_s12] sm:$0xff]  ;;  %v960_v32 = vld [vmem:[%s15175_s12 + $0x8] sm:$0xff] }
  0xc8   :  { %959 = vst [vmem:[#allocation4] sm:$0xff] %v958_v3  ;;  %961 = vst [vmem:[#allocation4 + $0x8] sm:$0xff] %v960_v32  ;;  %v962_v34 = vld [vmem:[%s15175_s12 + $0x10] sm:$0xff]  ;;  %v964_v17 = vld [vmem:[%s15175_s12 + $0x18] sm:$0xff] }
  0xc9   :  { %v966_v39 = vld [vmem:[%s15175_s12 + $0x20] sm:$0xff]  ;;  %963 = vst [vmem:[#allocation4 + $0x10] sm:$0xff] %v962_v34  ;;  %965 = vst [vmem:[#allocation4 + $0x18] sm:$0xff] %v964_v17  ;;  %v968_v47 = vld [vmem:[%s15175_s12 + $0x28] sm:$0xff] }
  0xca   :  { %967 = vst [vmem:[#allocation4 + $0x20] sm:$0xff] %v966_v39  ;;  %v970_v3 = vld [vmem:[%s15175_s12 + $0x30] sm:$0xff]  ;;  %v972_v32 = vld [vmem:[%s15175_s12 + $0x38] sm:$0xff]  ;;  %969 = vst [vmem:[#allocation4 + $0x28] sm:$0xff] %v968_v47 }
  0xcb   :  { %971 = vst [vmem:[#allocation4 + $0x30] sm:$0xff] %v970_v3  ;;  %973 = vst [vmem:[#allocation4 + $0x38] sm:$0xff] %v972_v32  ;;  %v974_v34 = vld [vmem:[%s15175_s12 + $0x40] sm:$0xff]  ;;  %v976_v17 = vld [vmem:[%s15175_s12 + $0x48] sm:$0xff] }
  0xcc   :  { %v978_v39 = vld [vmem:[%s15175_s12 + $0x50] sm:$0xff]  ;;  %975 = vst [vmem:[#allocation4 + $0x40] sm:$0xff] %v974_v34  ;;  %977 = vst [vmem:[#allocation4 + $0x48] sm:$0xff] %v976_v17  ;;  %v980_v47 = vld [vmem:[%s15175_s12 + $0x58] sm:$0xff] }
  0xcd   :  { %979 = vst [vmem:[#allocation4 + $0x50] sm:$0xff] %v978_v39  ;;  %v982_v3 = vld [vmem:[%s15175_s12 + $0x60] sm:$0xff]  ;;  %v984_v32 = vld [vmem:[%s15175_s12 + $0x68] sm:$0xff]  ;;  %981 = vst [vmem:[#allocation4 + $0x58] sm:$0xff] %v980_v47 }
  0xce   :  { %983 = vst [vmem:[#allocation4 + $0x60] sm:$0xff] %v982_v3  ;;  %985 = vst [vmem:[#allocation4 + $0x68] sm:$0xff] %v984_v32  ;;  %v986_v34 = vld [vmem:[%s15175_s12 + $0x70] sm:$0xff]  ;;  %v988_v17 = vld [vmem:[%s15175_s12 + $0x78] sm:$0xff] }
  0xcf   :  { %v990_v39 = vld [vmem:[%s15175_s12 + $0x80] sm:$0xff]  ;;  %987 = vst [vmem:[#allocation4 + $0x70] sm:$0xff] %v986_v34  ;;  %989 = vst [vmem:[#allocation4 + $0x78] sm:$0xff] %v988_v17  ;;  %v992_v47 = vld [vmem:[%s15175_s12 + $0x88] sm:$0xff] }
  0xd0   :  { %991 = vst [vmem:[#allocation4 + $0x80] sm:$0xff] %v990_v39  ;;  %v994_v3 = vld [vmem:[%s15175_s12 + $0x90] sm:$0xff]  ;;  %v996_v32 = vld [vmem:[%s15175_s12 + $0x98] sm:$0xff]  ;;  %993 = vst [vmem:[#allocation4 + $0x88] sm:$0xff] %v992_v47 }
  0xd1   :  { %995 = vst [vmem:[#allocation4 + $0x90] sm:$0xff] %v994_v3  ;;  %997 = vst [vmem:[#allocation4 + $0x98] sm:$0xff] %v996_v32  ;;  %v998_v34 = vld [vmem:[%s15175_s12 + $0xa0] sm:$0xff]  ;;  %v1000_v17 = vld [vmem:[%s15175_s12 + $0xa8] sm:$0xff] }
  0xd2   :  { %v1002_v39 = vld [vmem:[%s15175_s12 + $0xb0] sm:$0xff]  ;;  %999 = vst [vmem:[#allocation4 + $0xa0] sm:$0xff] %v998_v34  ;;  %1001 = vst [vmem:[#allocation4 + $0xa8] sm:$0xff] %v1000_v17  ;;  %v1004_v47 = vld [vmem:[%s15175_s12 + $0xb8] sm:$0xff] }
  0xd3   :  { %1003 = vst [vmem:[#allocation4 + $0xb0] sm:$0xff] %v1002_v39  ;;  %v1006_v3 = vld [vmem:[%s15175_s12 + $0xc0] sm:$0xff]  ;;  %v1008_v32 = vld [vmem:[%s15175_s12 + $0xc8] sm:$0xff]  ;;  %1005 = vst [vmem:[#allocation4 + $0xb8] sm:$0xff] %v1004_v47 }
  0xd4   :  { %1007 = vst [vmem:[#allocation4 + $0xc0] sm:$0xff] %v1006_v3  ;;  %1009 = vst [vmem:[#allocation4 + $0xc8] sm:$0xff] %v1008_v32  ;;  %v1010_v34 = vld [vmem:[%s15175_s12 + $0xd0] sm:$0xff]  ;;  %v1012_v17 = vld [vmem:[%s15175_s12 + $0xd8] sm:$0xff] }
  0xd5   :  { %v1014_v39 = vld [vmem:[%s15175_s12 + $0xe0] sm:$0xff]  ;;  %1011 = vst [vmem:[#allocation4 + $0xd0] sm:$0xff] %v1010_v34  ;;  %1013 = vst [vmem:[#allocation4 + $0xd8] sm:$0xff] %v1012_v17  ;;  %v1016_v47 = vld [vmem:[%s15175_s12 + $0xe8] sm:$0xff] }
  0xd6   :  { %1015 = vst [vmem:[#allocation4 + $0xe0] sm:$0xff] %v1014_v39  ;;  %v1018_v3 = vld [vmem:[%s15175_s12 + $0xf0] sm:$0xff]  ;;  %v1020_v32 = vld [vmem:[%s15175_s12 + $0xf8] sm:$0xff]  ;;  %1017 = vst [vmem:[#allocation4 + $0xe8] sm:$0xff] %v1016_v47 }
  0xd7   :  { %1019 = vst [vmem:[#allocation4 + $0xf0] sm:$0xff] %v1018_v3  ;;  %1021 = vst [vmem:[#allocation4 + $0xf8] sm:$0xff] %v1020_v32  ;;  %v1022_v34 = vld [vmem:[%s15175_s12 + $0x100] sm:$0xff]  ;;  %v1024_v17 = vld [vmem:[%s15175_s12 + $0x108] sm:$0xff] }
  0xd8   :  { %v1026_v39 = vld [vmem:[%s15175_s12 + $0x110] sm:$0xff]  ;;  %1023 = vst [vmem:[#allocation4 + $0x100] sm:$0xff] %v1022_v34  ;;  %1025 = vst [vmem:[#allocation4 + $0x108] sm:$0xff] %v1024_v17  ;;  %v1028_v47 = vld [vmem:[%s15175_s12 + $0x118] sm:$0xff] }
  0xd9   :  { %1027 = vst [vmem:[#allocation4 + $0x110] sm:$0xff] %v1026_v39  ;;  %v1030_v3 = vld [vmem:[%s15175_s12 + $0x120] sm:$0xff]  ;;  %v1032_v32 = vld [vmem:[%s15175_s12 + $0x128] sm:$0xff]  ;;  %1029 = vst [vmem:[#allocation4 + $0x118] sm:$0xff] %v1028_v47 }
  0xda   :  { %1031 = vst [vmem:[#allocation4 + $0x120] sm:$0xff] %v1030_v3  ;;  %1033 = vst [vmem:[#allocation4 + $0x128] sm:$0xff] %v1032_v32  ;;  %v1034_v34 = vld [vmem:[%s15175_s12 + $0x130] sm:$0xff]  ;;  %v1036_v17 = vld [vmem:[%s15175_s12 + $0x138] sm:$0xff] }
  0xdb   :  { %v1038_v39 = vld [vmem:[%s15175_s12 + $0x140] sm:$0xff]  ;;  %1035 = vst [vmem:[#allocation4 + $0x130] sm:$0xff] %v1034_v34  ;;  %1037 = vst [vmem:[#allocation4 + $0x138] sm:$0xff] %v1036_v17  ;;  %v1040_v47 = vld [vmem:[%s15175_s12 + $0x148] sm:$0xff] }
  0xdc   :  { %1039 = vst [vmem:[#allocation4 + $0x140] sm:$0xff] %v1038_v39  ;;  %v1042_v3 = vld [vmem:[%s15175_s12 + $0x150] sm:$0xff]  ;;  %v1044_v32 = vld [vmem:[%s15175_s12 + $0x158] sm:$0xff]  ;;  %1041 = vst [vmem:[#allocation4 + $0x148] sm:$0xff] %v1040_v47 }
  0xdd   :  { %1043 = vst [vmem:[#allocation4 + $0x150] sm:$0xff] %v1042_v3  ;;  %1045 = vst [vmem:[#allocation4 + $0x158] sm:$0xff] %v1044_v32  ;;  %v1046_v34 = vld [vmem:[%s15175_s12 + $0x160] sm:$0xff]  ;;  %v1048_v17 = vld [vmem:[%s15175_s12 + $0x168] sm:$0xff] }
  0xde   :  { %v1050_v39 = vld [vmem:[%s15175_s12 + $0x170] sm:$0xff]  ;;  %1047 = vst [vmem:[#allocation4 + $0x160] sm:$0xff] %v1046_v34  ;;  %1049 = vst [vmem:[#allocation4 + $0x168] sm:$0xff] %v1048_v17  ;;  %v1052_v47 = vld [vmem:[%s15175_s12 + $0x178] sm:$0xff] }
  0xdf   :  { %1051 = vst [vmem:[#allocation4 + $0x170] sm:$0xff] %v1050_v39  ;;  %1053 = vst [vmem:[#allocation4 + $0x178] sm:$0xff] %v1052_v47 }
  0xe0   :  { %1061 = vsyncadd [#allocation6 + $0x2], 6144  ;;  %v1096_v3 = vld [vmem:[%s15176_s13] sm:$0xff]  ;;  %v1098_v32 = vld [vmem:[%s15176_s13 + $0x8] sm:$0xff] }
  0xe1   :  { %1097 = vst [vmem:[#allocation5] sm:$0xff] %v1096_v3  ;;  %1099 = vst [vmem:[#allocation5 + $0x8] sm:$0xff] %v1098_v32  ;;  %v1100_v34 = vld [vmem:[%s15176_s13 + $0x10] sm:$0xff]  ;;  %v1102_v17 = vld [vmem:[%s15176_s13 + $0x18] sm:$0xff] }
  0xe2   :  { %1101 = vst [vmem:[#allocation5 + $0x10] sm:$0xff] %v1100_v34  ;;  %1103 = vst [vmem:[#allocation5 + $0x18] sm:$0xff] %v1102_v17 }
  0xe3   :  { %1111 = vsyncadd [#allocation6 + $0x3], 512  ;;  %v10003_v39 = vld [vmem:[%s15167_s4 + $0x74] ss:$8 sps:$4 sm:$0xff]   ;;  %v10005_v47 = vld [vmem:[%s15167_s4 + $0x70] ss:$8 sps:$4 sm:$0xff]  }
  0xe4   :  { %v15376_v3 = vmov 0   ;;  %v10006_v32 = vld [vmem:[%s15167_s4 + $0x64] ss:$8 sps:$4 sm:$0xff]   ;;  %2131 = vmatprep.subr.bf16.mxu0 %v10003_v39  ;;  %v10008_v34 = vld [vmem:[%s15167_s4 + $0x60] ss:$8 sps:$4 sm:$0xff]   ;;  %vm10711_vm4 = vmmov 0  }
  0xe5   :  { %2163 = vmatprep.mubr.bf16.mxu0 %v15376_v3  ;;  %10002 = vset.pattern.permute.xlu0 %v15376_v3  ;;  %v10009_v17 = vld [vmem:[%s15167_s4 + $0x54] ss:$8 sps:$4 sm:$0xff]   ;;  %v10011_v3 = vld [vmem:[%s15167_s4 + $0x50] ss:$8 sps:$4 sm:$0xff]   ;;  %v10012_v39 = vld [vmem:[%s15167_s4 + $0x44] ss:$8 sps:$4 sm:$0xff]  }
  0xe6   :  { %2132 = vmatpush1.bf16.msra.mxu0 %v10005_v47  ;;  %v10014_v47 = vld [vmem:[%s15167_s4 + $0x40] ss:$8 sps:$4 sm:$0xff]   ;;  %v10017_v38 = vld [vmem:[%s15167_s4 + $0x30] ss:$8 sps:$4 sm:$0xff]   ;;  %v10021_v19 = vld [vmem:[%s15167_s4 + $0x14] ss:$8 sps:$4 sm:$0xff]  }
  0xe7   :  { %2133 = vmatprep.subr.bf16.mxu0 %v10006_v32  ;;  %v10015_v32 = vld [vmem:[%s15167_s4 + $0x34] ss:$8 sps:$4 sm:$0xff]   ;;  %v15426_v0 = vmov 1326507024   ;;  %v15715_v8 = vmov 2475754826  }
  0xe8   :  { %v10030_v36 = vld [vmem:[%s15168_s5 + $0x214] ss:$44 sps:$4 sm:$0xff]  }
  0xea   :  { %2134 = vmatpush1.bf16.msra.mxu0 %v10008_v34  ;;  %v10027_v34 = vld [vmem:[%s15168_s5 + $0x26c] ss:$44 sps:$4 sm:$0xff]  }
  0xeb   :  { %2135 = vmatprep.subr.bf16.mxu0 %v10009_v17  ;;  %v10029_v17 = vld [vmem:[%s15168_s5 + $0x268] ss:$44 sps:$4 sm:$0xff]   ;;  %2430 = vmatprep.subr.bf16.mxu1 %v10027_v34  ;;  %v10023_v34 = vld [vmem:[%s15167_s4 + $0x10] ss:$8 sps:$4 sm:$0xff]  }
  0xec   :  { %2431 = vmatpush1.bf16.msra.mxu1 %v10029_v17  ;;  %v10032_v17 = vld [vmem:[%s15168_s5 + $0x210] ss:$44 sps:$4 sm:$0xff]  }
  0xed   :  { %2432 = vmatprep.subr.bf16.mxu1 %v10030_v36  ;;  %v10026_v36 = vld [vmem:[%s15167_s4] ss:$8 sps:$4 sm:$0xff]  }
  0xee   :  { %2136 = vmatpush1.bf16.msra.mxu0 %v10011_v3  ;;  %v10018_v3 = vld [vmem:[%s15167_s4 + $0x24] ss:$8 sps:$4 sm:$0xff]  }
  0xef   :  { %2137 = vmatprep.subr.bf16.mxu0 %v10012_v39  ;;  %v10020_v39 = vld [vmem:[%s15167_s4 + $0x20] ss:$8 sps:$4 sm:$0xff]  }
  0xf0   :  { %2433 = vmatpush1.bf16.msra.mxu1 %v10032_v17  ;;  %v10045_v17 = vld [vmem:[%s15168_s5 + $0x5c] ss:$44 sps:$4 sm:$0xff]  }
  0xf2   :  { %2138 = vmatpush1.bf16.msra.mxu0 %v10014_v47  ;;  %v10024_v47 = vld [vmem:[%s15167_s4 + $0x4] ss:$8 sps:$4 sm:$0xff]  }
  0xf3   :  { %2139 = vmatprep.subr.bf16.mxu0 %v10015_v32  ;;  %v1112_v32 = vld [vmem:[%s15163_s0] sm:$0xff] }
  0xf6   :  { %2140 = vmatpush1.bf16.msra.mxu0 %v10017_v38  ;;  %v2038_v38 = vpack.c.bf16 %v1112_v32, %v1112_v32  ;;  %v10042_v32 = vld [vmem:[%s15168_s5 + $0xb4] ss:$44 sps:$4 sm:$0xff]  }
  0xf7   :  { %2141 = vmatprep.subr.bf16.mxu0 %v10018_v3  ;;  %v10035_v3 = vld [vmem:[%s15168_s5 + $0x1b8] ss:$44 sps:$4 sm:$0xff]  }
  0xfa   :  { %2142 = vmatpush1.bf16.msra.mxu0 %v10020_v39  ;;  %v10036_v39 = vld [vmem:[%s15168_s5 + $0x164] ss:$44 sps:$4 sm:$0xff]  }
  0xfb   :  { %2143 = vmatprep.subr.bf16.mxu0 %v10021_v19  ;;  %v10033_v19 = vld [vmem:[%s15168_s5 + $0x1bc] ss:$44 sps:$4 sm:$0xff]  }
  0xfc   :  { %2434 = vmatprep.subr.bf16.mxu1 %v10033_v19  ;;  %v10047_v19 = vld [vmem:[%s15168_s5 + $0x58] ss:$44 sps:$4 sm:$0xff]  }
  0xfd   :  { %2435 = vmatpush1.bf16.msra.mxu1 %v10035_v3  ;;  %v10048_v3 = vld [vmem:[%s15168_s5 + $0x4] ss:$44 sps:$4 sm:$0xff]  }
  0xfe   :  { %2144 = vmatpush1.bf16.msra.mxu0 %v10023_v34  ;;  %v10038_v34 = vld [vmem:[%s15168_s5 + $0x160] ss:$44 sps:$4 sm:$0xff]   ;;  %2436 = vmatprep.subr.bf16.mxu1 %v10036_v39 }
  0xff   :  { %2145 = vmatprep.subr.bf16.mxu0 %v10024_v47  ;;  %v10039_v47 = vld [vmem:[%s15168_s5 + $0x10c] ss:$44 sps:$4 sm:$0xff]  }
 0x100   :  { %v10050_v39 = vld [vmem:[%s15168_s5] ss:$44 sps:$4 sm:$0xff]  }
 0x101   :  { %2437 = vmatpush1.bf16.msra.mxu1 %v10038_v34  ;;  %v10051_v34 = vld [vmem:[%s15168_s5 + $0x52c] ss:$44 sps:$4 sm:$0xff]  }
 0x102   :  { %2146 = vmatpush1.bf16.msra.mxu0 %v10026_v36  ;;  %v10041_v36 = vld [vmem:[%s15168_s5 + $0x108] ss:$44 sps:$4 sm:$0xff]   ;;  %2438 = vmatprep.subr.bf16.mxu1 %v10039_v47 }
 0x103   :  { %v10053_v47 = vld [vmem:[%s15168_s5 + $0x528] ss:$44 sps:$4 sm:$0xff]  }
 0x105   :  { %2164 = vmatmul.mubr.bf16.vlgmr.msra.gmra.mxu0 %v2038_v38  ;;  %2439 = vmatpush1.bf16.msra.mxu1 %v10041_v36  ;;  %v10044_v38 = vld [vmem:[%s15168_s5 + $0xb0] ss:$44 sps:$4 sm:$0xff]   ;;  %v10054_v36 = vld [vmem:[%s15168_s5 + $0x4d4] ss:$44 sps:$4 sm:$0xff]  }
 0x106   :  { %2440 = vmatprep.subr.bf16.mxu1 %v10042_v32  ;;  %v10056_v32 = vld [vmem:[%s15168_s5 + $0x4d0] ss:$44 sps:$4 sm:$0xff]  }
 0x109   :  { %2441 = vmatpush1.bf16.msra.mxu1 %v10044_v38  ;;  %v10057_v38 = vld [vmem:[%s15168_s5 + $0x47c] ss:$44 sps:$4 sm:$0xff]  }
 0x10a   :  { %2442 = vmatprep.subr.bf16.mxu1 %v10045_v17  ;;  %v10059_v17 = vld [vmem:[%s15168_s5 + $0x478] ss:$44 sps:$4 sm:$0xff]  }
 0x10d   :  { %2443 = vmatpush1.bf16.msra.mxu1 %v10047_v19  ;;  %v10060_v19 = vld [vmem:[%s15168_s5 + $0x424] ss:$44 sps:$4 sm:$0xff]  }
 0x10e   :  { %2444 = vmatprep.subr.bf16.mxu1 %v10048_v3  ;;  %v10062_v3 = vld [vmem:[%s15168_s5 + $0x420] ss:$44 sps:$4 sm:$0xff]  }
 0x111   :  { %2445 = vmatpush1.bf16.msra.mxu1 %v10050_v39  ;;  %v10063_v39 = vld [vmem:[%s15168_s5 + $0x3cc] ss:$44 sps:$4 sm:$0xff]  }
 0x112   :  { %2446 = vmatprep.subr.bf16.mxu1 %v10051_v34  ;;  %v10065_v34 = vld [vmem:[%s15168_s5 + $0x3c8] ss:$44 sps:$4 sm:$0xff]  }
 0x115   :  { %2447 = vmatpush2.bf16.msra.mxu1 %v10053_v47  ;;  %v10066_v47 = vld [vmem:[%s15168_s5 + $0x374] ss:$44 sps:$4 sm:$0xff]  }
 0x116   :  { %2448 = vmatprep.subr.bf16.mxu1 %v10054_v36  ;;  %v10068_v36 = vld [vmem:[%s15168_s5 + $0x370] ss:$44 sps:$4 sm:$0xff]  }
 0x119   :  { %2449 = vmatpush2.bf16.msra.mxu1 %v10056_v32  ;;  %v10069_v32 = vld [vmem:[%s15168_s5 + $0x31c] ss:$44 sps:$4 sm:$0xff]  }
 0x11a   :  { %2450 = vmatprep.subr.bf16.mxu1 %v10057_v38  ;;  %v10071_v38 = vld [vmem:[%s15168_s5 + $0x318] ss:$44 sps:$4 sm:$0xff]  }
 0x11d   :  { %2451 = vmatpush2.bf16.msra.mxu1 %v10059_v17  ;;  %v10072_v17 = vld [vmem:[%s15168_s5 + $0x2c4] ss:$44 sps:$4 sm:$0xff]  }
 0x11e   :  { %2452 = vmatprep.subr.bf16.mxu1 %v10060_v19  ;;  %v10074_v19 = vld [vmem:[%s15168_s5 + $0x2c0] ss:$44 sps:$4 sm:$0xff]  }
 0x121   :  { %2453 = vmatpush2.bf16.msra.mxu1 %v10062_v3  ;;  %v10075_v3 = vld [vmem:[%s15168_s5 + $0x270] ss:$44 sps:$4 sm:$0xff]  }
 0x122   :  { %2454 = vmatprep.subr.bf16.mxu1 %v10063_v39  ;;  %v10077_v39 = vld [vmem:[%s15168_s5 + $0x274] ss:$44 sps:$4 sm:$0xff]  }
 0x123   :  { %2857 = vmatprep.subr.bf16.mxu0 %v10077_v39  ;;  %v10099_v39 = vld [vmem:[%s15168_s5 + $0x110] ss:$44 sps:$4 sm:$0xff]  }
 0x124   :  { %2858 = vmatpush1.bf16.msra.mxu0 %v10075_v3  ;;  %v10101_v3 = vld [vmem:[%s15168_s5 + $0x114] ss:$44 sps:$4 sm:$0xff]  }
 0x125   :  { %2455 = vmatpush2.bf16.msra.mxu1 %v10065_v34  ;;  %v10080_v34 = vld [vmem:[%s15168_s5 + $0x27c] ss:$44 sps:$4 sm:$0xff]  }
 0x126   :  { %2456 = vmatprep.subr.bf16.mxu1 %v10066_v47  ;;  %v10083_v47 = vld [vmem:[%s15168_s5 + $0x21c] ss:$44 sps:$4 sm:$0xff]  }
 0x127   :  { %2859 = vmatprep.subr.bf16.mxu0 %v10083_v47  ;;  %v10105_v47 = vld [vmem:[%s15168_s5 + $0xb8] ss:$44 sps:$4 sm:$0xff]  }
 0x129   :  { %2457 = vmatpush2.bf16.msra.mxu1 %v10068_v36  ;;  %v10081_v36 = vld [vmem:[%s15168_s5 + $0x218] ss:$44 sps:$4 sm:$0xff]  }
 0x12a   :  { %2458 = vmatprep.subr.bf16.mxu1 %v10069_v32  ;;  %v10089_v32 = vld [vmem:[%s15168_s5 + $0x1c4] ss:$44 sps:$4 sm:$0xff]   ;;  %2860 = vmatpush1.bf16.msra.mxu0 %v10081_v36 }
 0x12b   :  { %2861 = vmatprep.subr.bf16.mxu0 %v10089_v32  ;;  %v10113_v36 = vld [vmem:[%s15168_s5 + $0x64] ss:$44 sps:$4 sm:$0xff]   ;;  %v10111_v32 = vld [vmem:[%s15168_s5 + $0x60] ss:$44 sps:$4 sm:$0xff]  }
 0x12d   :  { %2459 = vmatpush2.bf16.msra.mxu1 %v10071_v38  ;;  %v10087_v38 = vld [vmem:[%s15168_s5 + $0x1c0] ss:$44 sps:$4 sm:$0xff]  }
 0x12e   :  { %2460 = vmatprep.subr.bf16.mxu1 %v10072_v17  ;;  %v10095_v17 = vld [vmem:[%s15168_s5 + $0x16c] ss:$44 sps:$4 sm:$0xff]   ;;  %2862 = vmatpush1.bf16.msra.mxu0 %v10087_v38 }
 0x12f   :  { %2863 = vmatprep.subr.bf16.mxu0 %v10095_v17  ;;  %v10119_v38 = vld [vmem:[%s15168_s5 + $0xc] ss:$44 sps:$4 sm:$0xff]   ;;  %v10117_v17 = vld [vmem:[%s15168_s5 + $0x8] ss:$44 sps:$4 sm:$0xff]  }
 0x131   :  { %2461 = vmatpush2.bf16.msra.mxu1 %v10074_v19  ;;  %v10093_v19 = vld [vmem:[%s15168_s5 + $0x168] ss:$44 sps:$4 sm:$0xff]  }
 0x132   :  { %2898 = vmatprep.subr.bf16.mxu1 %v10080_v34  ;;  %2864 = vmatpush1.bf16.msra.mxu0 %v10093_v19  ;;  %v10107_v34 = vld [vmem:[%s15168_s5 + $0xbc] ss:$44 sps:$4 sm:$0xff]   ;;  %v10125_v19 = vld [vmem:[%s15168_s5 + $0x534] ss:$44 sps:$4 sm:$0xff]  }
 0x133   :  { %2865 = vmatprep.subr.bf16.mxu0 %v10101_v3  ;;  %v10123_v3 = vld [vmem:[%s15168_s5 + $0x530] ss:$44 sps:$4 sm:$0xff]  }
 0x136   :  { %2866 = vmatpush1.bf16.msra.mxu0 %v10099_v39  ;;  %v10131_v39 = vld [vmem:[%s15168_s5 + $0x4dc] ss:$44 sps:$4 sm:$0xff]  }
 0x137   :  { %2867 = vmatprep.subr.bf16.mxu0 %v10107_v34  ;;  %v10129_v34 = vld [vmem:[%s15168_s5 + $0x4d8] ss:$44 sps:$4 sm:$0xff]  }
 0x13a   :  { %2868 = vmatpush1.bf16.msra.mxu0 %v10105_v47  ;;  %v10137_v47 = vld [vmem:[%s15168_s5 + $0x484] ss:$44 sps:$4 sm:$0xff]  }
 0x13b   :  { %2869 = vmatprep.subr.bf16.mxu0 %v10113_v36  ;;  %v10135_v36 = vld [vmem:[%s15168_s5 + $0x480] ss:$44 sps:$4 sm:$0xff]  }
 0x13e   :  { %2870 = vmatpush1.bf16.msra.mxu0 %v10111_v32  ;;  %v10143_v32 = vld [vmem:[%s15168_s5 + $0x42c] ss:$44 sps:$4 sm:$0xff]  }
 0x13f   :  { %2871 = vmatprep.subr.bf16.mxu0 %v10119_v38  ;;  %v10141_v38 = vld [vmem:[%s15168_s5 + $0x428] ss:$44 sps:$4 sm:$0xff]  }
 0x142   :  { %2872 = vmatpush1.bf16.msra.mxu0 %v10117_v17  ;;  %v10149_v17 = vld [vmem:[%s15168_s5 + $0x3d4] ss:$44 sps:$4 sm:$0xff]  }
 0x143   :  { %2873 = vmatprep.subr.bf16.mxu0 %v10125_v19  ;;  %v10147_v19 = vld [vmem:[%s15168_s5 + $0x3d0] ss:$44 sps:$4 sm:$0xff]  }
 0x146   :  { %2874 = vmatpush2.bf16.msra.mxu0 %v10123_v3  ;;  %v10155_v3 = vld [vmem:[%s15168_s5 + $0x37c] ss:$44 sps:$4 sm:$0xff]  }
 0x147   :  { %2875 = vmatprep.subr.bf16.mxu0 %v10131_v39  ;;  %v10153_v39 = vld [vmem:[%s15168_s5 + $0x378] ss:$44 sps:$4 sm:$0xff]  }
 0x14a   :  { %2876 = vmatpush2.bf16.msra.mxu0 %v10129_v34  ;;  %v1143_v34 = vlaneseq }
 0x14b   :  { %2877 = vmatprep.subr.bf16.mxu0 %v10137_v47 }
 0x14c   :  { %v12898_v47 = vshrl.u32 %v1143_v34, 7 }
 0x14e   :  { %2878 = vmatpush2.bf16.msra.mxu0 %v10135_v36  ;;  %v12901_v36 = vsub.s32 0, %v12898_v47 }
 0x14f   :  { %2879 = vmatprep.subr.bf16.mxu0 %v10143_v32  ;;  %v2039_v32 = vld [vmem:[%s15172_s9 + $0x18] sm:$0x3] }
 0x150   :  { %15706 = vst [vmem:[#allocation259_spill] sm:$0xff] %v12901_v36 }
 0x152   :  { %2880 = vmatpush2.bf16.msra.mxu0 %v10141_v38  ;;  %v12907_v38 = vsub.s32 1, %v12898_v47 }
 0x153   :  { %2881 = vmatprep.subr.bf16.mxu0 %v10149_v17  ;;  %v2044_v17 = vrot.slane %v2039_v32, %v12901_v36 }
 0x154   :  { %15707 = vst [vmem:[#allocation260_spill] sm:$0xff] %v12907_v38 }
 0x156   :  { %2882 = vmatpush2.bf16.msra.mxu0 %v10147_v19  ;;  %v2048_v19 = vrot.slane %v2039_v32, %v12907_v38 }
 0x157   :  { %2883 = vmatprep.subr.bf16.mxu0 %v10155_v3 }
 0x15a   :  { %2884 = vmatpush2.bf16.msra.mxu0 %v10153_v39 }
 0x1c5   :  { %v2165_v7 = vpop.f32.mrf.mxu0 }
 0x1c6   :  { %v2166_v3 = vadd.f32 %v2165_v7, %v2044_v17 }
 0x1c7   :  { %v2167_v40 = vpop.f32.mrf.mxu0 }
 0x1c8   :  { %v2172_v39 = vmul.f32 0.70710677, %v2166_v3  ;;  %v2168_v34 = vadd.f32 %v2167_v40, %v2048_v19  ;;  %vm2212_vm0 = vcmp.lt.f32.partialorder %v2166_v3, 0.0 }
 0x1c9   :  { %v2169_v42 = vpop.f32.mrf.mxu0 }
 0x1ca   :  { %v2174_v21 = vand.u32 2147483647, %v2172_v39  ;;  %v2173_v23 = vmul.f32 0.70710677, %v2168_v34  ;;  %vm2213_vm1 = vcmp.lt.f32.partialorder %v2168_v34, 0.0 }
 0x1cb   :  { %v2170_v44 = vpop.f32.mrf.mxu0 }
 0x1cc   :  { %v2176_v46 = vmul.f32 0.3275911, %v2174_v21  ;;  %v2175_v55 = vand.u32 2147483647, %v2173_v23  ;;  %v2200_v25 = vsub.f32 0.0, %v2174_v21 }
 0x1ce   :  { %v2178_v11 = vadd.f32 1.0, %v2176_v46  ;;  %v2177_v48 = vmul.f32 0.3275911, %v2175_v55  ;;  %v2201_v27 = vsub.f32 0.0, %v2175_v55  ;;  %v2202_v52 = vmul.f32 %v2200_v25, %v2174_v21 }
 0x1d0   :  { %10323 = vrcp.f32 %v2178_v11  ;;  %v2179_v50 = vadd.f32 1.0, %v2177_v48  ;;  %v2203_v54 = vmul.f32 %v2201_v27, %v2175_v55  ;;  %v2204_v7 = vmul.f32 1.442695, %v2202_v52 }
 0x1d2   :  { %10325 = vrcp.f32 %v2179_v50  ;;  %v2206_v42 = vmul.f32 1.442695, %v2203_v54 }
 0x1d3   :  { %10327 = vpow2.f32 %v2204_v7 }
 0x1d4   :  { %10329 = vpow2.f32 %v2206_v42 }
 0x1dd   :  { %v10324_v32 = vpop.eup %10323 }
 0x1de   :  { %v2182_v17 = vmul.f32 1.0614054, %v10324_v32 }
 0x1df   :  { %v10326_v63 = vpop.eup %10325 }
 0x1e0   :  { %v8958_v40 = vadd.f32 -1.4531521, %v2182_v17  ;;  %v2183_v19 = vmul.f32 1.0614054, %v10326_v63  ;;  %v10328_v55 = vpop.eup %10327 }
 0x1e1   :  { %v10330_v29 = vpop.eup %10329 }
 0x1e2   :  { %v2186_v44 = vmul.f32 %v10324_v32, %v8958_v40  ;;  %v8959_v39 = vadd.f32 -1.4531521, %v2183_v19 }
 0x1e4   :  { %v2188_v23 = vadd.f32 1.4214138, %v2186_v44  ;;  %v2187_v46 = vmul.f32 %v10326_v63, %v8959_v39 }
 0x1e6   :  { %v2190_v11 = vmul.f32 %v10324_v32, %v2188_v23  ;;  %v2189_v48 = vadd.f32 1.4214138, %v2187_v46  ;;  %v2218_v46 = vmul.f32 0.5, %v2166_v3  ;;  %v10084_v3 = vld [vmem:[%s15168_s5 + $0x220] ss:$44 sps:$4 sm:$0xff]  }
 0x1e8   :  { %v8960_v50 = vadd.f32 -0.28449672, %v2190_v11  ;;  %v2191_v15 = vmul.f32 %v10326_v63, %v2189_v48 }
 0x1ea   :  { %v2194_v56 = vmul.f32 %v10324_v32, %v8960_v50  ;;  %v8961_v21 = vadd.f32 -0.28449672, %v2191_v15  ;;  %v2219_v15 = vmul.f32 0.5, %v2168_v34  ;;  %v10092_v34 = vld [vmem:[%s15168_s5 + $0x1cc] ss:$44 sps:$4 sm:$0xff]  }
 0x1ec   :  { %v2196_v25 = vadd.f32 0.2548296, %v2194_v56  ;;  %v2195_v27 = vmul.f32 %v10326_v63, %v8961_v21  ;;  %v10090_v21 = vld [vmem:[%s15168_s5 + $0x1c8] ss:$44 sps:$4 sm:$0xff]  }
 0x1ee   :  { %v2198_v52 = vmul.f32 %v10324_v32, %v2196_v25  ;;  %v2197_v58 = vadd.f32 0.2548296, %v2195_v27  ;;  %v10098_v25 = vld [vmem:[%s15168_s5 + $0x174] ss:$44 sps:$4 sm:$0xff]   ;;  %v10096_v27 = vld [vmem:[%s15168_s5 + $0x170] ss:$44 sps:$4 sm:$0xff]  }
 0x1f0   :  { %v2208_v17 = vmul.f32 %v10328_v55, %v2198_v52  ;;  %v2199_v54 = vmul.f32 %v10326_v63, %v2197_v58  ;;  %v10078_v58 = vld [vmem:[%s15168_s5 + $0x278] ss:$44 sps:$4 sm:$0xff]   ;;  %v10104_v52 = vld [vmem:[%s15168_s5 + $0x11c] ss:$44 sps:$4 sm:$0xff]  }
 0x1f1   :  { %v10102_v55 = vld [vmem:[%s15168_s5 + $0x118] ss:$44 sps:$4 sm:$0xff]  }
 0x1f2   :  { %v2210_v7 = vsub.f32 1.0, %v2208_v17  ;;  %v2209_v40 = vmul.f32 %v10330_v29, %v2199_v54  ;;  %v10086_v29 = vld [vmem:[%s15168_s5 + $0x224] ss:$44 sps:$4 sm:$0xff]   ;;  %v10108_v54 = vld [vmem:[%s15168_s5 + $0xc0] ss:$44 sps:$4 sm:$0xff]  }
 0x1f3   :  { %v10110_v17 = vld [vmem:[%s15168_s5 + $0xc4] ss:$44 sps:$4 sm:$0xff]  }
 0x1f4   :  { %v2214_v19 = vsub.f32 0.0, %v2210_v7  ;;  %v2211_v42 = vsub.f32 1.0, %v2209_v40  ;;  %v10114_v40 = vld [vmem:[%s15168_s5 + $0x68] ss:$44 sps:$4 sm:$0xff]  }
 0x1f6   :  { %v2216_v44 = vsel %vm2212_vm0, %v2214_v19, %v2210_v7  ;;  %v2215_v39 = vsub.f32 0.0, %v2211_v42  ;;  %v10116_v7 = vld [vmem:[%s15168_s5 + $0x6c] ss:$44 sps:$4 sm:$0xff]   ;;  %v10122_v19 = vld [vmem:[%s15168_s5 + $0x14] ss:$44 sps:$4 sm:$0xff]  }
 0x1f7   :  { %v2220_v23 = vadd.f32 1.0, %v2216_v44  ;;  %v10128_v44 = vld [vmem:[%s15168_s5 + $0x53c] ss:$44 sps:$4 sm:$0xff]  }
 0x1f8   :  { %v2217_v11 = vsel %vm2213_vm1, %v2215_v39, %v2211_v42  ;;  %v10120_v42 = vld [vmem:[%s15168_s5 + $0x10] ss:$44 sps:$4 sm:$0xff]   ;;  %v10126_v39 = vld [vmem:[%s15168_s5 + $0x538] ss:$44 sps:$4 sm:$0xff]  }
 0x1f9   :  { %v2221_v56 = vadd.f32 1.0, %v2217_v11  ;;  %v2222_v48 = vmul.f32 %v2220_v23, %v2218_v46  ;;  %v10134_v23 = vld [vmem:[%s15168_s5 + $0x4e4] ss:$44 sps:$4 sm:$0xff]   ;;  %v10132_v46 = vld [vmem:[%s15168_s5 + $0x4e0] ss:$44 sps:$4 sm:$0xff]  }
 0x1fa   :  { %v10140_v11 = vld [vmem:[%s15168_s5 + $0x48c] ss:$44 sps:$4 sm:$0xff]  }
 0x1fb   :  { %v2223_v32 = vmul.f32 %v2221_v56, %v2219_v15  ;;  %v2256_v63 = vpack.c.bf16 %v2222_v48, %v2222_v48  ;;  %v10138_v15 = vld [vmem:[%s15168_s5 + $0x488] ss:$44 sps:$4 sm:$0xff]   ;;  %v10144_v48 = vld [vmem:[%s15168_s5 + $0x430] ss:$44 sps:$4 sm:$0xff]  }
 0x1fc   :  { %v10146_v56 = vld [vmem:[%s15168_s5 + $0x434] ss:$44 sps:$4 sm:$0xff]  }
 0x1fd   :  { %v2257_v50 = vpack.c.bf16 %v2223_v32, %v2223_v32  ;;  %v10152_v32 = vld [vmem:[%s15168_s5 + $0x3dc] ss:$44 sps:$4 sm:$0xff]  }
 0x1ff   :  { %2462 = vmatprep.mubr.bf16.mxu1 %v2257_v50  ;;  %v10150_v50 = vld [vmem:[%s15168_s5 + $0x3d8] ss:$44 sps:$4 sm:$0xff]  }
 0x200   :  { %2463 = vmatmul.mubr.bf16.vlgmr.msra.gmra.mxu1 %v2256_v63  ;;  %v10156_v63 = vld [vmem:[%s15168_s5 + $0x380] ss:$44 sps:$4 sm:$0xff]  }
 0x201   :  { %2899 = vmatpush1.bf16.msra.mxu1 %v10078_v58  ;;  %v10158_v58 = vld [vmem:[%s15168_s5 + $0x384] ss:$44 sps:$4 sm:$0xff]  }
 0x202   :  { %2900 = vmatprep.subr.bf16.mxu1 %v10086_v29  ;;  %v10161_v29 = vld [vmem:[%s15168_s5 + $0x324] ss:$44 sps:$4 sm:$0xff]  }
 0x203   :  { %2885 = vmatprep.subr.bf16.mxu0 %v10161_v29  ;;  %v10180_v29 = vld [vmem:[%s15168_s5 + $0x178] ss:$44 sps:$4 sm:$0xff]  }
 0x205   :  { %2901 = vmatpush1.bf16.msra.mxu1 %v10084_v3  ;;  %v10164_v3 = vld [vmem:[%s15168_s5 + $0x32c] ss:$44 sps:$4 sm:$0xff]  }
 0x206   :  { %2902 = vmatprep.subr.bf16.mxu1 %v10092_v34  ;;  %v10159_v34 = vld [vmem:[%s15168_s5 + $0x320] ss:$44 sps:$4 sm:$0xff]  }
 0x207   :  { %2886 = vmatpush2.bf16.msra.mxu0 %v10159_v34  ;;  %v10183_v34 = vld [vmem:[%s15168_s5 + $0x120] ss:$44 sps:$4 sm:$0xff]  }
 0x209   :  { %2903 = vmatpush1.bf16.msra.mxu1 %v10090_v21  ;;  %v10162_v21 = vld [vmem:[%s15168_s5 + $0x328] ss:$44 sps:$4 sm:$0xff]  }
 0x20a   :  { %2904 = vmatprep.subr.bf16.mxu1 %v10098_v25  ;;  %v10167_v25 = vld [vmem:[%s15168_s5 + $0x2cc] ss:$44 sps:$4 sm:$0xff]  }
 0x20b   :  { %2887 = vmatprep.subr.bf16.mxu0 %v10167_v25  ;;  %v10186_v25 = vld [vmem:[%s15168_s5 + $0xc8] ss:$44 sps:$4 sm:$0xff]  }
 0x20d   :  { %2905 = vmatpush1.bf16.msra.mxu1 %v10096_v27  ;;  %v10170_v27 = vld [vmem:[%s15168_s5 + $0x2d4] ss:$44 sps:$4 sm:$0xff]  }
 0x20e   :  { %2906 = vmatprep.subr.bf16.mxu1 %v10104_v52  ;;  %v10165_v52 = vld [vmem:[%s15168_s5 + $0x2c8] ss:$44 sps:$4 sm:$0xff]  }
 0x20f   :  { %2888 = vmatpush2.bf16.msra.mxu0 %v10165_v52  ;;  %v10189_v52 = vld [vmem:[%s15168_s5 + $0x70] ss:$44 sps:$4 sm:$0xff]  }
 0x211   :  { %2907 = vmatpush1.bf16.msra.mxu1 %v10102_v55  ;;  %v10168_v55 = vld [vmem:[%s15168_s5 + $0x2d0] ss:$44 sps:$4 sm:$0xff]  }
 0x212   :  { %2908 = vmatprep.subr.bf16.mxu1 %v10110_v17  ;;  %v10173_v17 = vld [vmem:[%s15168_s5 + $0x284] ss:$44 sps:$4 sm:$0xff]  }
 0x213   :  { %3211 = vmatprep.subr.bf16.mxu0 %v10173_v17  ;;  %v10192_v17 = vld [vmem:[%s15168_s5 + $0x18] ss:$44 sps:$4 sm:$0xff]  }
 0x215   :  { %2909 = vmatpush1.bf16.msra.mxu1 %v10108_v54  ;;  %v2258_v54 = vld [vmem:[%s15172_s9 + $0x1a] sm:$0x3] }
 0x216   :  { %2910 = vmatprep.subr.bf16.mxu1 %v10116_v7  ;;  %v2263_v7 = vrot.slane %v2258_v54, %v12901_v36 }
 0x219   :  { %2911 = vmatpush1.bf16.msra.mxu1 %v10114_v40  ;;  %v2267_v40 = vrot.slane %v2258_v54, %v12907_v38  ;;  %v10197_v54 = vld [vmem:[%s15168_s5 + $0x544] ss:$44 sps:$4 sm:$0xff]  }
 0x21a   :  { %2912 = vmatprep.subr.bf16.mxu1 %v10122_v19 }
 0x21d   :  { %2913 = vmatpush1.bf16.msra.mxu1 %v10120_v42 }
 0x21e   :  { %2914 = vmatprep.subr.bf16.mxu1 %v10128_v44 }
 0x221   :  { %2915 = vmatpush2.bf16.msra.mxu1 %v10126_v39 }
 0x222   :  { %2916 = vmatprep.subr.bf16.mxu1 %v10134_v23 }
 0x225   :  { %2917 = vmatpush2.bf16.msra.mxu1 %v10132_v46 }
 0x226   :  { %2918 = vmatprep.subr.bf16.mxu1 %v10140_v11  ;;  %v10171_v11 = vld [vmem:[%s15168_s5 + $0x280] ss:$44 sps:$4 sm:$0xff]  }
 0x229   :  { %2919 = vmatpush2.bf16.msra.mxu1 %v10138_v15 }
 0x22a   :  { %2920 = vmatprep.subr.bf16.mxu1 %v10146_v56 }
 0x22d   :  { %2921 = vmatpush2.bf16.msra.mxu1 %v10144_v48  ;;  %v10176_v48 = vld [vmem:[%s15168_s5 + $0x22c] ss:$44 sps:$4 sm:$0xff]  }
 0x22e   :  { %2922 = vmatprep.subr.bf16.mxu1 %v10152_v32  ;;  %v10174_v32 = vld [vmem:[%s15168_s5 + $0x228] ss:$44 sps:$4 sm:$0xff]  }
 0x231   :  { %2923 = vmatpush2.bf16.msra.mxu1 %v10150_v50  ;;  %v10179_v50 = vld [vmem:[%s15168_s5 + $0x1d4] ss:$44 sps:$4 sm:$0xff]  }
 0x232   :  { %2924 = vmatprep.subr.bf16.mxu1 %v10158_v58  ;;  %v10177_v58 = vld [vmem:[%s15168_s5 + $0x1d0] ss:$44 sps:$4 sm:$0xff]  }
 0x235   :  { %2925 = vmatpush2.bf16.msra.mxu1 %v10156_v63  ;;  %v10182_v63 = vld [vmem:[%s15168_s5 + $0x17c] ss:$44 sps:$4 sm:$0xff]  }
 0x236   :  { %2926 = vmatprep.subr.bf16.mxu1 %v10164_v3  ;;  %v10185_v3 = vld [vmem:[%s15168_s5 + $0x124] ss:$44 sps:$4 sm:$0xff]  }
 0x239   :  { %2927 = vmatpush2.bf16.msra.mxu1 %v10162_v21  ;;  %v10188_v21 = vld [vmem:[%s15168_s5 + $0xcc] ss:$44 sps:$4 sm:$0xff]  }
 0x23a   :  { %2928 = vmatprep.subr.bf16.mxu1 %v10170_v27  ;;  %v10191_v27 = vld [vmem:[%s15168_s5 + $0x74] ss:$44 sps:$4 sm:$0xff]  }
 0x23d   :  { %2929 = vmatpush2.bf16.msra.mxu1 %v10168_v55  ;;  %v10194_v55 = vld [vmem:[%s15168_s5 + $0x1c] ss:$44 sps:$4 sm:$0xff]  }
 0x2c0   :  { %v2464_v19 = vpop.f32.mrf.mxu1 }
 0x2c1   :  { %v2465_v42 = vadd.f32 %v2464_v19, %v2263_v7  ;;  %v10195_v7 = vld [vmem:[%s15168_s5 + $0x540] ss:$44 sps:$4 sm:$0xff]   ;;  %v10198_v19 = vld [vmem:[%s15168_s5 + $0x4e8] ss:$44 sps:$4 sm:$0xff]  }
 0x2c2   :  { %v2466_v44 = vpop.f32.mrf.mxu1 }
 0x2c3   :  { %v2467_v39 = vadd.f32 %v2466_v44, %v2267_v40  ;;  %v2535_v15 = vpack.c.bf16 %v2465_v42, %v2465_v42  ;;  %v10200_v40 = vld [vmem:[%s15168_s5 + $0x4ec] ss:$44 sps:$4 sm:$0xff]   ;;  %v10203_v42 = vld [vmem:[%s15168_s5 + $0x494] ss:$44 sps:$4 sm:$0xff]   ;;  %v10201_v44 = vld [vmem:[%s15168_s5 + $0x490] ss:$44 sps:$4 sm:$0xff]  }
 0x2c4   :  { %v2468_v23 = vpop.f32.mrf.mxu1 }
 0x2c5   :  { %v2536_v46 = vpack.c.bf16 %v2467_v39, %v2467_v39  ;;  %v10206_v39 = vld [vmem:[%s15168_s5 + $0x43c] ss:$44 sps:$4 sm:$0xff]   ;;  %v10204_v23 = vld [vmem:[%s15168_s5 + $0x438] ss:$44 sps:$4 sm:$0xff]  }
 0x2c6   :  { %v2469_v56 = vpop.f32.mrf.mxu1 }
 0x2c7   :  { %2889 = vmatprep.mubr.bf16.mxu0 %v2536_v46  ;;  %2930 = vmatprep.mubr.bf16.mxu1 %v2536_v46  ;;  %v10209_v46 = vld [vmem:[%s15168_s5 + $0x3e4] ss:$44 sps:$4 sm:$0xff]   ;;  %v10210_v56 = vld [vmem:[%s15168_s5 + $0x388] ss:$44 sps:$4 sm:$0xff]  }
 0x2c8   :  { %2890 = vmatmul.mubr.bf16.vlgmr.msra.gmra.mxu0 %v2535_v15  ;;  %2931 = vmatmul.mubr.bf16.vlgmr.msra.gmra.mxu1 %v2535_v15  ;;  %v10212_v15 = vld [vmem:[%s15168_s5 + $0x38c] ss:$44 sps:$4 sm:$0xff]  }
 0x2c9   :  { %3212 = vmatpush1.bf16.msra.mxu0 %v10171_v11  ;;  %v10207_v11 = vld [vmem:[%s15168_s5 + $0x3e0] ss:$44 sps:$4 sm:$0xff]  }
 0x2ca   :  { %3213 = vmatprep.subr.bf16.mxu0 %v10176_v48  ;;  %v10215_v48 = vld [vmem:[%s15168_s5 + $0x334] ss:$44 sps:$4 sm:$0xff]  }
 0x2cd   :  { %3214 = vmatpush1.bf16.msra.mxu0 %v10174_v32  ;;  %v10213_v32 = vld [vmem:[%s15168_s5 + $0x330] ss:$44 sps:$4 sm:$0xff]  }
 0x2ce   :  { %3215 = vmatprep.subr.bf16.mxu0 %v10179_v50  ;;  %v10218_v50 = vld [vmem:[%s15168_s5 + $0x2dc] ss:$44 sps:$4 sm:$0xff]  }
 0x2d1   :  { %3216 = vmatpush1.bf16.msra.mxu0 %v10177_v58  ;;  %v10216_v58 = vld [vmem:[%s15168_s5 + $0x2d8] ss:$44 sps:$4 sm:$0xff]  }
 0x2d2   :  { %3217 = vmatprep.subr.bf16.mxu0 %v10182_v63  ;;  %v10219_v63 = vld [vmem:[%s15168_s5 + $0x288] ss:$44 sps:$4 sm:$0xff]  }
 0x2d5   :  { %3218 = vmatpush1.bf16.msra.mxu0 %v10180_v29  ;;  %v10221_v29 = vld [vmem:[%s15168_s5 + $0x28c] ss:$44 sps:$4 sm:$0xff]  }
 0x2d6   :  { %3219 = vmatprep.subr.bf16.mxu0 %v10185_v3  ;;  %v10224_v3 = vld [vmem:[%s15168_s5 + $0x234] ss:$44 sps:$4 sm:$0xff]   ;;  %3574 = vmatprep.subr.bf16.mxu1 %v10221_v29 }
 0x2d7   :  { %3575 = vmatpush1.bf16.msra.mxu1 %v10219_v63  ;;  %v10263_v63 = vld [vmem:[%s15168_s5 + $0x3e8] ss:$44 sps:$4 sm:$0xff]  }
 0x2d8   :  { %3576 = vmatprep.subr.bf16.mxu1 %v10224_v3  ;;  %v10270_v29 = vld [vmem:[%s15168_s5 + $0x394] ss:$44 sps:$4 sm:$0xff]   ;;  %v10268_v3 = vld [vmem:[%s15168_s5 + $0x390] ss:$44 sps:$4 sm:$0xff]  }
 0x2d9   :  { %3220 = vmatpush1.bf16.msra.mxu0 %v10183_v34  ;;  %v10222_v34 = vld [vmem:[%s15168_s5 + $0x230] ss:$44 sps:$4 sm:$0xff]  }
 0x2da   :  { %3221 = vmatprep.subr.bf16.mxu0 %v10188_v21  ;;  %v10227_v21 = vld [vmem:[%s15168_s5 + $0x1dc] ss:$44 sps:$4 sm:$0xff]  }
 0x2db   :  { %3577 = vmatpush1.bf16.msra.mxu1 %v10222_v34  ;;  %v2939_v34 = vld [vmem:[%s15172_s9 + $0x1c] sm:$0x3] }
 0x2dc   :  { %3578 = vmatprep.subr.bf16.mxu1 %v10227_v21  ;;  %v2944_v21 = vrot.slane %v2939_v34, %v12901_v36 }
 0x2dd   :  { %3222 = vmatpush1.bf16.msra.mxu0 %v10186_v25  ;;  %v10246_v25 = vld [vmem:[%s15168_s5 + $0x550] ss:$44 sps:$4 sm:$0xff]  }
 0x2de   :  { %3223 = vmatprep.subr.bf16.mxu0 %v10191_v27  ;;  %v10225_v27 = vld [vmem:[%s15168_s5 + $0x1d8] ss:$44 sps:$4 sm:$0xff]  }
 0x2df   :  { %3579 = vmatpush1.bf16.msra.mxu1 %v10225_v27 }
 0x2e1   :  { %3224 = vmatpush1.bf16.msra.mxu0 %v10189_v52  ;;  %v10230_v52 = vld [vmem:[%s15168_s5 + $0x184] ss:$44 sps:$4 sm:$0xff]  }
 0x2e2   :  { %3225 = vmatprep.subr.bf16.mxu0 %v10194_v55  ;;  %v10228_v55 = vld [vmem:[%s15168_s5 + $0x180] ss:$44 sps:$4 sm:$0xff]   ;;  %3580 = vmatprep.subr.bf16.mxu1 %v10230_v52 }
 0x2e3   :  { %3581 = vmatpush1.bf16.msra.mxu1 %v10228_v55 }
 0x2e5   :  { %3226 = vmatpush1.bf16.msra.mxu0 %v10192_v17  ;;  %v10233_v17 = vld [vmem:[%s15168_s5 + $0x12c] ss:$44 sps:$4 sm:$0xff]  }
 0x2e6   :  { %3227 = vmatprep.subr.bf16.mxu0 %v10197_v54  ;;  %v10231_v54 = vld [vmem:[%s15168_s5 + $0x128] ss:$44 sps:$4 sm:$0xff]   ;;  %3582 = vmatprep.subr.bf16.mxu1 %v10233_v17 }
 0x2e7   :  { %3583 = vmatpush1.bf16.msra.mxu1 %v10231_v54 }
 0x2e9   :  { %3228 = vmatpush2.bf16.msra.mxu0 %v10195_v7  ;;  %v10236_v7 = vld [vmem:[%s15168_s5 + $0xd4] ss:$44 sps:$4 sm:$0xff]  }
 0x2ea   :  { %3229 = vmatprep.subr.bf16.mxu0 %v10200_v40  ;;  %v10234_v40 = vld [vmem:[%s15168_s5 + $0xd0] ss:$44 sps:$4 sm:$0xff]   ;;  %3584 = vmatprep.subr.bf16.mxu1 %v10236_v7 }
 0x2eb   :  { %3585 = vmatpush1.bf16.msra.mxu1 %v10234_v40 }
 0x2ed   :  { %3230 = vmatpush2.bf16.msra.mxu0 %v10198_v19  ;;  %v10239_v19 = vld [vmem:[%s15168_s5 + $0x7c] ss:$44 sps:$4 sm:$0xff]  }
 0x2ee   :  { %3231 = vmatprep.subr.bf16.mxu0 %v10203_v42  ;;  %v10237_v42 = vld [vmem:[%s15168_s5 + $0x78] ss:$44 sps:$4 sm:$0xff]   ;;  %3586 = vmatprep.subr.bf16.mxu1 %v10239_v19 }
 0x2ef   :  { %3587 = vmatpush1.bf16.msra.mxu1 %v10237_v42 }
 0x2f1   :  { %3232 = vmatpush2.bf16.msra.mxu0 %v10201_v44  ;;  %v10242_v44 = vld [vmem:[%s15168_s5 + $0x24] ss:$44 sps:$4 sm:$0xff]  }
 0x2f2   :  { %3233 = vmatprep.subr.bf16.mxu0 %v10206_v39  ;;  %v10240_v39 = vld [vmem:[%s15168_s5 + $0x20] ss:$44 sps:$4 sm:$0xff]   ;;  %3588 = vmatprep.subr.bf16.mxu1 %v10242_v44 }
 0x2f3   :  { %3589 = vmatpush1.bf16.msra.mxu1 %v10240_v39 }
 0x2f5   :  { %3234 = vmatpush2.bf16.msra.mxu0 %v10204_v23  ;;  %v10245_v23 = vld [vmem:[%s15168_s5 + $0x54c] ss:$44 sps:$4 sm:$0xff]  }
 0x2f6   :  { %3235 = vmatprep.subr.bf16.mxu0 %v10209_v46  ;;  %v10243_v46 = vld [vmem:[%s15168_s5 + $0x548] ss:$44 sps:$4 sm:$0xff]   ;;  %3590 = vmatprep.subr.bf16.mxu1 %v10245_v23 }
 0x2f7   :  { %3591 = vmatpush2.bf16.msra.mxu1 %v10243_v46 }
 0x2f9   :  { %3236 = vmatpush2.bf16.msra.mxu0 %v10207_v11  ;;  %v10250_v11 = vld [vmem:[%s15168_s5 + $0x4f4] ss:$44 sps:$4 sm:$0xff]  }
 0x2fa   :  { %3237 = vmatprep.subr.bf16.mxu0 %v10212_v15  ;;  %v10248_v15 = vld [vmem:[%s15168_s5 + $0x4f0] ss:$44 sps:$4 sm:$0xff]   ;;  %3592 = vmatprep.subr.bf16.mxu1 %v10250_v11 }
 0x2fb   :  { %3593 = vmatpush2.bf16.msra.mxu1 %v10248_v15 }
 0x2fd   :  { %3238 = vmatpush2.bf16.msra.mxu0 %v10210_v56  ;;  %v10255_v56 = vld [vmem:[%s15168_s5 + $0x49c] ss:$44 sps:$4 sm:$0xff]  }
 0x2fe   :  { %3239 = vmatprep.subr.bf16.mxu0 %v10215_v48  ;;  %v10253_v48 = vld [vmem:[%s15168_s5 + $0x498] ss:$44 sps:$4 sm:$0xff]   ;;  %3594 = vmatprep.subr.bf16.mxu1 %v10255_v56 }
 0x2ff   :  { %3595 = vmatpush2.bf16.msra.mxu1 %v10253_v48 }
 0x301   :  { %3240 = vmatpush2.bf16.msra.mxu0 %v10213_v32  ;;  %v10260_v32 = vld [vmem:[%s15168_s5 + $0x444] ss:$44 sps:$4 sm:$0xff]  }
 0x302   :  { %3241 = vmatprep.subr.bf16.mxu0 %v10218_v50  ;;  %v10258_v50 = vld [vmem:[%s15168_s5 + $0x440] ss:$44 sps:$4 sm:$0xff]   ;;  %3596 = vmatprep.subr.bf16.mxu1 %v10260_v32 }
 0x303   :  { %3597 = vmatpush2.bf16.msra.mxu1 %v10258_v50 }
 0x305   :  { %3242 = vmatpush2.bf16.msra.mxu0 %v10216_v58  ;;  %v10265_v58 = vld [vmem:[%s15168_s5 + $0x3ec] ss:$44 sps:$4 sm:$0xff]  }
 0x306   :  { %9671 = vmatprep.subr.bf16.mxu0 %v10246_v25  ;;  %3598 = vmatprep.subr.bf16.mxu1 %v10265_v58  ;;  %v2948_v25 = vrot.slane %v2939_v34, %v12907_v38 }
 0x307   :  { %3599 = vmatpush2.bf16.msra.mxu1 %v10263_v63 }
 0x308   :  { %3600 = vmatprep.subr.bf16.mxu1 %v10270_v29 }
 0x30b   :  { %3601 = vmatpush2.bf16.msra.mxu1 %v10268_v3 }
 0x388   :  { %v2891_v27 = vpop.f32.mrf.mxu0  ;;  %v13209_v52 = vpop.f32.mrf.mxu1 }
 0x389   :  { %15708 = vst [vmem:[#allocation261_spill] sm:$0xff] %v13209_v52  ;;  %v2951_v55 = vadd.f32 %v2944_v21, %v2891_v27 }
 0x38a   :  { %v2893_v17 = vpop.f32.mrf.mxu0  ;;  %v13211_v54 = vpop.f32.mrf.mxu1 }
 0x38b   :  { %15709 = vst [vmem:[#allocation262_spill] sm:$0xff] %v13211_v54  ;;  %v2953_v7 = vmul.f32 0.70710677, %v2951_v55  ;;  %v2952_v40 = vadd.f32 %v2948_v25, %v2893_v17  ;;  %vm2993_vm2 = vcmp.lt.f32.partialorder %v2951_v55, 0.0 }
 0x38c   :  { %v2895_v19 = vpop.f32.mrf.mxu0  ;;  %v2936_v42 = vpop.f32.mrf.mxu1 }
 0x38d   :  { %v2955_v44 = vand.u32 2147483647, %v2953_v7  ;;  %v2954_v39 = vmul.f32 0.70710677, %v2952_v40  ;;  %vm2994_vm3 = vcmp.lt.f32.partialorder %v2952_v40, 0.0 }
 0x38e   :  { %v2896_v23 = vpop.f32.mrf.mxu0  ;;  %v2937_v46 = vpop.f32.mrf.mxu1 }
 0x38f   :  { %v2957_v11 = vmul.f32 0.3275911, %v2955_v44  ;;  %v2956_v15 = vand.u32 2147483647, %v2954_v39  ;;  %v2981_v50 = vsub.f32 0.0, %v2955_v44 }
 0x391   :  { %v2959_v56 = vadd.f32 1.0, %v2957_v11  ;;  %v2958_v48 = vmul.f32 0.3275911, %v2956_v15  ;;  %v2982_v58 = vsub.f32 0.0, %v2956_v15  ;;  %v2983_v63 = vmul.f32 %v2981_v50, %v2955_v44 }
 0x393   :  { %10331 = vrcp.f32 %v2959_v56  ;;  %v2960_v32 = vadd.f32 1.0, %v2958_v48  ;;  %v2984_v3 = vmul.f32 %v2982_v58, %v2956_v15  ;;  %v2985_v21 = vmul.f32 1.442695, %v2983_v63 }
 0x395   :  { %10333 = vrcp.f32 %v2960_v32  ;;  %v2987_v17 = vmul.f32 1.442695, %v2984_v3 }
 0x396   :  { %10335 = vpow2.f32 %v2985_v21 }
 0x397   :  { %10337 = vpow2.f32 %v2987_v17 }
 0x3a0   :  { %v10332_v29 = vpop.eup %10331 }
 0x3a1   :  { %v2963_v34 = vmul.f32 1.0614054, %v10332_v29 }
 0x3a2   :  { %v10334_v25 = vpop.eup %10333 }
 0x3a3   :  { %v9058_v27 = vadd.f32 -1.4531521, %v2963_v34  ;;  %v2964_v7 = vmul.f32 1.0614054, %v10334_v25  ;;  %v10336_v63 = vpop.eup %10335 }
 0x3a4   :  { %v10338_v52 = vpop.eup %10337 }
 0x3a5   :  { %v2967_v19 = vmul.f32 %v10332_v29, %v9058_v27  ;;  %v9059_v42 = vadd.f32 -1.4531521, %v2964_v7 }
 0x3a7   :  { %v2969_v39 = vadd.f32 1.4214138, %v2967_v19  ;;  %v2968_v23 = vmul.f32 %v10334_v25, %v9059_v42 }
 0x3a9   :  { %v2971_v46 = vmul.f32 %v10332_v29, %v2969_v39  ;;  %v2970_v11 = vadd.f32 1.4214138, %v2968_v23  ;;  %v2999_v23 = vmul.f32 0.5, %v2951_v55  ;;  %v10252_v55 = vld [vmem:[%s15168_s5 + $0x238] ss:$44 sps:$4 sm:$0xff]  }
 0x3ab   :  { %v9060_v56 = vadd.f32 -0.28449672, %v2971_v46  ;;  %v2972_v48 = vmul.f32 %v10334_v25, %v2970_v11  ;;  %v3000_v11 = vmul.f32 0.5, %v2952_v40  ;;  %v10256_v40 = vld [vmem:[%s15168_s5 + $0x4a0] ss:$44 sps:$4 sm:$0xff]  }
 0x3ad   :  { %v2975_v32 = vmul.f32 %v10332_v29, %v9060_v56  ;;  %v9061_v44 = vadd.f32 -0.28449672, %v2972_v48 }
 0x3af   :  { %v2977_v50 = vadd.f32 0.2548296, %v2975_v32  ;;  %v2976_v15 = vmul.f32 %v10334_v25, %v9061_v44  ;;  %v10257_v44 = vld [vmem:[%s15168_s5 + $0x1e0] ss:$44 sps:$4 sm:$0xff]  }
 0x3b1   :  { %v2979_v58 = vmul.f32 %v10332_v29, %v2977_v50  ;;  %v2978_v54 = vadd.f32 0.2548296, %v2976_v15  ;;  %v10261_v50 = vld [vmem:[%s15168_s5 + $0x448] ss:$44 sps:$4 sm:$0xff]  }
 0x3b2   :  { %v10262_v15 = vld [vmem:[%s15168_s5 + $0x188] ss:$44 sps:$4 sm:$0xff]  }
 0x3b3   :  { %v2989_v34 = vmul.f32 %v10336_v63, %v2979_v58  ;;  %v2980_v3 = vmul.f32 %v10334_v25, %v2978_v54  ;;  %v10247_v54 = vld [vmem:[%s15168_s5 + $0x290] ss:$44 sps:$4 sm:$0xff]  }
 0x3b4   :  { %v10266_v58 = vld [vmem:[%s15168_s5 + $0x3f0] ss:$44 sps:$4 sm:$0xff]  }
 0x3b5   :  { %v2991_v27 = vsub.f32 1.0, %v2989_v34  ;;  %v2990_v21 = vmul.f32 %v10338_v52, %v2980_v3  ;;  %v10251_v52 = vld [vmem:[%s15168_s5 + $0x4f8] ss:$44 sps:$4 sm:$0xff]   ;;  %v10267_v63 = vld [vmem:[%s15168_s5 + $0x130] ss:$44 sps:$4 sm:$0xff]  }
 0x3b6   :  { %v10271_v34 = vld [vmem:[%s15168_s5 + $0x398] ss:$44 sps:$4 sm:$0xff]  }
 0x3b7   :  { %v2995_v7 = vsub.f32 0.0, %v2991_v27  ;;  %v2992_v17 = vsub.f32 1.0, %v2990_v21  ;;  %v10272_v3 = vld [vmem:[%s15168_s5 + $0xd8] ss:$44 sps:$4 sm:$0xff]   ;;  %v10276_v21 = vld [vmem:[%s15168_s5 + $0x340] ss:$44 sps:$4 sm:$0xff]  }
 0x3b9   :  { %v2997_v19 = vsel %vm2993_vm2, %v2995_v7, %v2991_v27  ;;  %v2996_v39 = vsub.f32 0.0, %v2992_v17  ;;  %v10275_v27 = vld [vmem:[%s15168_s5 + $0x33c] ss:$44 sps:$4 sm:$0xff]   ;;  %v10273_v7 = vld [vmem:[%s15168_s5 + $0x338] ss:$44 sps:$4 sm:$0xff]  }
 0x3ba   :  { %v3001_v42 = vadd.f32 1.0, %v2997_v19  ;;  %3602 = vmatprep.subr.bf16.mxu1 %v10275_v27  ;;  %v10280_v19 = vld [vmem:[%s15168_s5 + $0x2e4] ss:$44 sps:$4 sm:$0xff]  }
 0x3bb   :  { %v2998_v46 = vsel %vm2994_vm3, %v2996_v39, %v2992_v17  ;;  %v10277_v17 = vld [vmem:[%s15168_s5 + $0x80] ss:$44 sps:$4 sm:$0xff]   ;;  %3603 = vmatpush2.bf16.msra.mxu1 %v10273_v7 }
 0x3bc   :  { %v3002_v56 = vadd.f32 1.0, %v2998_v46  ;;  %v3003_v48 = vmul.f32 %v3001_v42, %v2999_v23  ;;  %v10281_v42 = vld [vmem:[%s15168_s5 + $0x2e8] ss:$44 sps:$4 sm:$0xff]   ;;  %v10278_v39 = vld [vmem:[%s15168_s5 + $0x2e0] ss:$44 sps:$4 sm:$0xff]   ;;  %3604 = vmatprep.subr.bf16.mxu1 %v10280_v19 }
 0x3bd   :  { %v10282_v23 = vld [vmem:[%s15168_s5 + $0x28] ss:$44 sps:$4 sm:$0xff]   ;;  %v3039_v46 = vld [vmem:[%s15172_s9 + $0x1e] sm:$0x3]  ;;  %v10288_v27 = vld [vmem:[%s15169_s6 + $0x40] ss:$16 sps:$4 sm:$0xff]  }
 0x3be   :  { %v3004_v29 = vmul.f32 %v3002_v56, %v3000_v11  ;;  %v3037_v25 = vpack.c.bf16 %v3003_v48, %v3003_v48  ;;  %v3044_v11 = vrot.slane %v3039_v46, %v12901_v36  ;;  %v3048_v56 = vrot.slane %v3039_v46, %v12907_v38  ;;  %v10290_v7 = vld [vmem:[%s15169_s6] ss:$16 sps:$4 sm:$0xff]   ;;  %v10293_v19 = vld [vmem:[%s15169_s6 + $0xe8] ss:$16 sps:$4 sm:$0xff]   ;;  %v10297_v46 = vld [vmem:[%s15169_s6 + $0xa4] ss:$16 sps:$4 sm:$0xff]  }
 0x3bf   :  { %3605 = vmatpush2.bf16.msra.mxu1 %v10278_v39  ;;  %v10294_v39 = vld [vmem:[%s15169_s6 + $0xc4] ss:$16 sps:$4 sm:$0xff]  }
 0x3c0   :  { %v3038_v32 = vpack.c.bf16 %v3004_v29, %v3004_v29  ;;  %3898 = vmatprep.subr.bf16.mxu1 %v10293_v19 }
 0x3c2   :  { %3243 = vmatprep.mubr.bf16.mxu0 %v3038_v32 }
 0x3c3   :  { %3244 = vmatmul.mubr.bf16.vlgmr.msra.gmra.mxu0 %v3037_v25 }
 0x3c4   :  { %9672 = vmatpush3.bf16.msra.mxu0 %v10247_v54 }
 0x3c5   :  { %9673 = vmatprep.subr.bf16.mxu0 %v10251_v52 }
 0x3c8   :  { %9674 = vmatpush3.bf16.msra.mxu0 %v10252_v55 }
 0x3c9   :  { %9675 = vmatprep.subr.bf16.mxu0 %v10256_v40 }
 0x3cc   :  { %9676 = vmatpush3.bf16.msra.mxu0 %v10257_v44  ;;  %v15710_v44 = vmov 0  }
 0x3cd   :  { %9677 = vmatprep.subr.bf16.mxu0 %v10261_v50  ;;  %v10283_v50 = vld [vmem:[%s15169_s6 + $0xe0] ss:$16 sps:$4 sm:$0xff]  }
 0x3d0   :  { %9678 = vmatpush3.bf16.msra.mxu0 %v10262_v15  ;;  %v15401_v15 = vmov 0.0  }
 0x3d1   :  { %9679 = vmatprep.subr.bf16.mxu0 %v10266_v58  ;;  %v10284_v58 = vld [vmem:[%s15169_s6 + $0xc0] ss:$16 sps:$4 sm:$0xff]  }
 0x3d4   :  { %9680 = vmatpush3.bf16.msra.mxu0 %v10267_v63  ;;  %v10285_v63 = vld [vmem:[%s15169_s6 + $0xa0] ss:$16 sps:$4 sm:$0xff]  }
 0x3d5   :  { %9681 = vmatprep.subr.bf16.mxu0 %v10271_v34  ;;  %v10286_v34 = vld [vmem:[%s15169_s6 + $0x80] ss:$16 sps:$4 sm:$0xff]  }
 0x3d8   :  { %9682 = vmatpush3.bf16.msra.mxu0 %v10272_v3  ;;  %v10287_v3 = vld [vmem:[%s15169_s6 + $0x60] ss:$16 sps:$4 sm:$0xff]  }
 0x3d9   :  { %9683 = vmatprep.subr.bf16.mxu0 %v10276_v21  ;;  %v10289_v21 = vld [vmem:[%s15169_s6 + $0x20] ss:$16 sps:$4 sm:$0xff]  }
 0x3dc   :  { %9684 = vmatpush3.bf16.msra.mxu0 %v10277_v17  ;;  %v10291_v17 = vld [vmem:[%s15169_s6 + $0xe4] ss:$16 sps:$4 sm:$0xff]  }
 0x3dd   :  { %9685 = vmatprep.subr.bf16.mxu0 %v10281_v42  ;;  %v10296_v42 = vld [vmem:[%s15169_s6 + $0xc8] ss:$16 sps:$4 sm:$0xff]  }
 0x3e0   :  { %9686 = vmatpush3.bf16.msra.mxu0 %v10282_v23  ;;  %v10299_v23 = vld [vmem:[%s15169_s6 + $0xa8] ss:$16 sps:$4 sm:$0xff]  }
 0x3e1   :  { %9844 = vmatprep.subr.bf16.mxu0 %v15401_v15 }
 0x483   :  { %v3245_v48 = vpop.f32.mrf.mxu0 }
 0x484   :  { %v3246_v29 = vadd.f32 %v3245_v48, %v3044_v11  ;;  %v10302_v11 = vld [vmem:[%s15169_s6 + $0x88] ss:$16 sps:$4 sm:$0xff]  }
 0x485   :  { %v3247_v32 = vpop.f32.mrf.mxu0  ;;  %v10305_v48 = vld [vmem:[%s15169_s6 + $0x68] ss:$16 sps:$4 sm:$0xff]  }
 0x486   :  { %v3248_v54 = vadd.f32 %v3247_v32, %v3048_v56  ;;  %v3316_v55 = vpack.c.bf16 %v3246_v29, %v3246_v29  ;;  %v10300_v56 = vld [vmem:[%s15169_s6 + $0x84] ss:$16 sps:$4 sm:$0xff]   ;;  %v10308_v32 = vld [vmem:[%s15169_s6 + $0x48] ss:$16 sps:$4 sm:$0xff]  }
 0x487   :  { %v3249_v25 = vpop.f32.mrf.mxu0  ;;  %v10303_v29 = vld [vmem:[%s15169_s6 + $0x64] ss:$16 sps:$4 sm:$0xff]  }
 0x488   :  { %v3317_v52 = vpack.c.bf16 %v3248_v54, %v3248_v54  ;;  %v10306_v54 = vld [vmem:[%s15169_s6 + $0x44] ss:$16 sps:$4 sm:$0xff]   ;;  %v10311_v25 = vld [vmem:[%s15169_s6 + $0x28] ss:$16 sps:$4 sm:$0xff]  }
 0x489   :  { %v3250_v40 = vpop.f32.mrf.mxu0 }
 0x48a   :  { %3606 = vmatprep.mubr.bf16.mxu1 %v3317_v52  ;;  %3647 = vmatprep.mubr.bf16.mxu0 %v3317_v52  ;;  %v10309_v52 = vld [vmem:[%s15169_s6 + $0x24] ss:$16 sps:$4 sm:$0xff]  }
 0x48b   :  { %3607 = vmatmul.mubr.bf16.vlgmr.msra.gmra.mxu1 %v3316_v55  ;;  %3648 = vmatmul.mubr.bf16.vlgmr.msra.gmra.mxu0 %v3316_v55  ;;  %v9142_v55 = vld [vmem:[%s15172_s9 + $0x20] ss:$0 sm:$0xff] }
 0x48c   :  { %3930 = vmatprep.mubr.bf16.mxu1 %v15710_v44  ;;  %9845 = vmatpush3.bf16.msra.mxu0 %v10283_v50 }
 0x48d   :  { %9846 = vmatprep.subr.bf16.mxu0 %v15401_v15  ;;  %9860 = vmatprep.mubr.msk.bf16.mxu0 %vm10711_vm4, %v15401_v15 }
 0x48e   :  { %3899 = vmatpush1.bf16.msra.mxu1 %v10291_v17 }
 0x48f   :  { %3900 = vmatprep.subr.bf16.mxu1 %v10296_v42 }
 0x490   :  { %9847 = vmatpush3.bf16.msra.mxu0 %v10284_v58 }
 0x491   :  { %9848 = vmatprep.subr.bf16.mxu0 %v15401_v15 }
 0x492   :  { %3901 = vmatpush1.bf16.msra.mxu1 %v10294_v39 }
 0x493   :  { %3902 = vmatprep.subr.bf16.mxu1 %v10299_v23 }
 0x494   :  { %9849 = vmatpush3.bf16.msra.mxu0 %v10285_v63 }
 0x495   :  { %9850 = vmatprep.subr.bf16.mxu0 %v15401_v15 }
 0x496   :  { %3903 = vmatpush1.bf16.msra.mxu1 %v10297_v46 }
 0x497   :  { %3904 = vmatprep.subr.bf16.mxu1 %v10302_v11 }
 0x498   :  { %9851 = vmatpush3.bf16.msra.mxu0 %v10286_v34 }
 0x499   :  { %9852 = vmatprep.subr.bf16.mxu0 %v15401_v15 }
 0x49a   :  { %3905 = vmatpush1.bf16.msra.mxu1 %v10300_v56 }
 0x49b   :  { %3906 = vmatprep.subr.bf16.mxu1 %v10305_v48 }
 0x49c   :  { %9853 = vmatpush3.bf16.msra.mxu0 %v10287_v3 }
 0x49d   :  { %9854 = vmatprep.subr.bf16.mxu0 %v15401_v15 }
 0x49e   :  { %3907 = vmatpush1.bf16.msra.mxu1 %v10303_v29 }
 0x49f   :  { %3908 = vmatprep.subr.bf16.mxu1 %v10308_v32 }
 0x4a0   :  { %9855 = vmatpush3.bf16.msra.mxu0 %v10288_v27 }
 0x4a1   :  { %9856 = vmatprep.subr.bf16.mxu0 %v15401_v15 }
 0x4a2   :  { %3909 = vmatpush1.bf16.msra.mxu1 %v10306_v54 }
 0x4a3   :  { %3910 = vmatprep.subr.bf16.mxu1 %v10311_v25 }
 0x4a4   :  { %9857 = vmatpush3.bf16.msra.mxu0 %v10289_v21 }
 0x4a5   :  { %9858 = vmatprep.subr.bf16.mxu0 %v15401_v15 }
 0x4a6   :  { %3911 = vmatpush1.bf16.msra.mxu1 %v10309_v52 }
 0x4a8   :  { %9859 = vmatpush3.bf16.msra.mxu0 %v10290_v7 }
 0x4a9   :  { %9864 = vmatprep.subr.bf16.mxu0 %v15401_v15 }
 0x54b   :  { %v3608_v40 = vpop.f32.mrf.mxu1  ;;  %v9687_v50 = vpop.f32.mrf.mxu0 }
 0x54c   :  { %v3662_v58 = vadd.f32 %v9142_v55, %v3608_v40 }
 0x54d   :  { %v13356_v63 = vpop.f32.mrf.mxu1  ;;  %v9688_v34 = vpop.f32.mrf.mxu0 }
 0x54e   :  { %15711 = vst [vmem:[#allocation263_spill] sm:$0xff] %v13356_v63  ;;  %v3663_v3 = vmul.f32 0.70710677, %v3662_v58  ;;  %v13358_v27 = vadd.f32 %v9688_v34, %v9687_v50  ;;  %vm3683_vm5 = vcmp.lt.f32.partialorder %v3662_v58, 0.0 }
 0x54f   :  { %v3612_v21 = vpop.f32.mrf.mxu1  ;;  %v9690_v7 = vpop.f32.mrf.mxu0 }
 0x550   :  { %15712 = vst [vmem:[#allocation264_spill] sm:$0xff] %v13358_v27  ;;  %v3664_v17 = vand.u32 2147483647, %v3663_v3 }
 0x551   :  { %v3613_v19 = vpop.f32.mrf.mxu1  ;;  %v9691_v42 = vpop.f32.mrf.mxu0 }
 0x552   :  { %v3665_v39 = vmul.f32 0.3275911, %v3664_v17  ;;  %v3677_v46 = vsub.f32 0.0, %v3664_v17 }
 0x554   :  { %v3666_v23 = vadd.f32 1.0, %v3665_v39  ;;  %v3678_v11 = vmul.f32 %v3677_v46, %v3664_v17  ;;  %v3686_v39 = vmul.f32 0.5, %v3662_v58  ;;  %v1135_v58 = vld [vmem:[%s15166_s3] sm:$0xff] }
 0x555   :  { %1139 = vperm.xlu0 %10002, %v1135_v58  }
 0x556   :  { %10339 = vrcp.f32 %v3666_v23  ;;  %v3679_v29 = vmul.f32 1.442695, %v3678_v11  ;;  %v10314_v11 = vld [vmem:[%s15169_s6 + $0x8] ss:$16 sps:$4 sm:$0xff]  }
 0x557   :  { %3912 = vmatprep.subr.bf16.mxu1 %v10314_v11 }
 0x558   :  { %10341 = vpow2.f32 %v3679_v29 }
 0x563   :  { %v10340_v56 = vpop.eup %10339 }
 0x564   :  { %v3668_v48 = vmul.f32 1.0614054, %v10340_v56 }
 0x565   :  { %v10342_v3 = vpop.eup %10341 }
 0x566   :  { %v9143_v32 = vadd.f32 -1.4531521, %v3668_v48  ;;  %v9145_v48 = vld [vmem:[%s15172_s9 + $0x21] ss:$0 sm:$0xff] }
 0x568   :  { %v3670_v54 = vmul.f32 %v10340_v56, %v9143_v32 }
 0x56a   :  { %v3671_v25 = vadd.f32 1.4214138, %v3670_v54 }
 0x56c   :  { %v3672_v52 = vmul.f32 %v10340_v56, %v3671_v25 }
 0x56e   :  { %v9144_v55 = vadd.f32 -0.28449672, %v3672_v52 }
 0x570   :  { %v3674_v40 = vmul.f32 %v10340_v56, %v9144_v55 }
 0x572   :  { %v3675_v50 = vadd.f32 0.2548296, %v3674_v40  ;;  %v10315_v40 = vld [vmem:[%s15169_s6 + $0xec] ss:$16 sps:$4 sm:$0xff]  }
 0x574   :  { %v3676_v34 = vmul.f32 %v10340_v56, %v3675_v50  ;;  %v10312_v56 = vld [vmem:[%s15169_s6 + $0x4] ss:$16 sps:$4 sm:$0xff]   ;;  %v10316_v50 = vld [vmem:[%s15169_s6 + $0xcc] ss:$16 sps:$4 sm:$0xff]  }
 0x575   :  { %3913 = vmatpush1.bf16.msra.mxu1 %v10312_v56 }
 0x576   :  { %v3681_v21 = vmul.f32 %v10342_v3, %v3676_v34  ;;  %v10317_v34 = vld [vmem:[%s15169_s6 + $0xac] ss:$16 sps:$4 sm:$0xff]  }
 0x577   :  { %v10318_v3 = vld [vmem:[%s15169_s6 + $0x8c] ss:$16 sps:$4 sm:$0xff]  }
 0x578   :  { %v3682_v7 = vsub.f32 1.0, %v3681_v21  ;;  %v10319_v21 = vld [vmem:[%s15169_s6 + $0x6c] ss:$16 sps:$4 sm:$0xff]  }
 0x57a   :  { %v3684_v19 = vsub.f32 0.0, %v3682_v7 }
 0x57c   :  { %v3685_v42 = vsel %vm3683_vm5, %v3684_v19, %v3682_v7  ;;  %v10320_v7 = vld [vmem:[%s15169_s6 + $0x4c] ss:$16 sps:$4 sm:$0xff]   ;;  %v1121_v19 = vld [vmem:[%s15165_s2] sm:$0xff] }
 0x57d   :  { %v3687_v17 = vadd.f32 1.0, %v3685_v42  ;;  %1124 = vperm.xlu0 %10002, %v1121_v19   ;;  %v10321_v42 = vld [vmem:[%s15169_s6 + $0x2c] ss:$16 sps:$4 sm:$0xff]  }
 0x57f   :  { %v3688_v23 = vmul.f32 %v3687_v17, %v3686_v39  ;;  %v10322_v39 = vld [vmem:[%s15169_s6 + $0xc] ss:$16 sps:$4 sm:$0xff]  }
 0x580   :  { %v13411_v17 = vld [vmem:[%s15172_s9 + $0xc] sm:$0xf] }
 0x581   :  { %v3705_v46 = vpack.c.bf16 %v3688_v23, %v3688_v23  ;;  %v13414_v23 = vsub.s32 2, %v12898_v47  ;;  %v1146_v11 = vrot.slane %v13411_v17, %v12901_v36  ;;  %v1150_v56 = vrot.slane %v13411_v17, %v12907_v38 }
 0x583   :  { %9861 = vmatmul.mubr.bf16.vlgmr.msra.gmra.mxu0 %v3705_v46  ;;  %15713 = vst [vmem:[#allocation265_spill] sm:$0xff] %v13414_v23  ;;  %v1154_v58 = vrot.slane %v13411_v17, %v13414_v23 }
 0x584   :  { %9880 = vmatprep.mubr.msk.bf16.mxu0 %vm10711_vm4, %v15401_v15  ;;  %9865 = vmatpush3.bf16.msra.mxu0 %v10315_v40 }
 0x585   :  { %9866 = vmatprep.subr.bf16.mxu0 %v15401_v15 }
 0x588   :  { %9867 = vmatpush3.bf16.msra.mxu0 %v10316_v50 }
 0x589   :  { %9868 = vmatprep.subr.bf16.mxu0 %v15401_v15 }
 0x58c   :  { %9869 = vmatpush3.bf16.msra.mxu0 %v10317_v34 }
 0x58d   :  { %9870 = vmatprep.subr.bf16.mxu0 %v15401_v15 }
 0x590   :  { %9871 = vmatpush3.bf16.msra.mxu0 %v10318_v3 }
 0x591   :  { %9872 = vmatprep.subr.bf16.mxu0 %v15401_v15 }
 0x594   :  { %9873 = vmatpush3.bf16.msra.mxu0 %v10319_v21 }
 0x595   :  { %9874 = vmatprep.subr.bf16.mxu0 %v15401_v15 }
 0x598   :  { %9875 = vmatpush3.bf16.msra.mxu0 %v10320_v7  ;;  %v13443_v7 = vsub.s32 3, %v12898_v47 }
 0x599   :  { %9876 = vmatprep.subr.bf16.mxu0 %v15401_v15 }
 0x59a   :  { %15714 = vst [vmem:[#allocation266_spill] sm:$0xff] %v13443_v7 }
 0x59c   :  { %9877 = vmatpush3.bf16.msra.mxu0 %v10321_v42 }
 0x59d   :  { %9878 = vmatprep.subr.bf16.mxu0 %v15401_v15 }
 0x5a0   :  { %9879 = vmatpush3.bf16.msra.mxu0 %v10322_v39 }
 0x5d0   :  { %v13416_v46 = vpop.permute.xlu0 %1139 }
 0x643   :  { %v3795_v29 = vpop.f32.mrf.mxu0 }
 0x644   :  { %v3796_v32 = vadd.f32 %v9145_v48, %v3795_v29  ;;  %v13425_v48 = vmul.f32 %v1146_v11, %v13416_v46  ;;  %v13428_v29 = vmul.f32 %v1150_v56, %v13416_v46 }
 0x645   :  { %v9862_v54 = vpop.f32.mrf.mxu0 }
 0x646   :  { %v3817_v25 = vpack.c.bf16 %v3796_v32, %v3796_v32  ;;  %v13431_v32 = vmul.f32 %v1154_v58, %v13416_v46  ;;  %v15403_v54 = vand.u32 2147483647, %v13425_v48 }
 0x647   :  { %v3798_v52 = vpop.f32.mrf.mxu0 }
 0x648   :  { %3931 = vmatmul.mubr.bf16.vlgmr.msra.gmra.mxu1 %v3817_v25  ;;  %v1172_v25 = vand.u32 2139095040, %v13425_v48  ;;  %v15404_v52 = vand.u32 2147483647, %v13428_v29  ;;  %v1176_v50 = vand.u32 8388607, %v15403_v54  ;;  %v1380_v21 = vand.u32 2139095040, %v13431_v32 }
 0x649   :  { %v9863_v55 = vpop.f32.mrf.mxu0 }
 0x64a   :  { %v1276_v55 = vand.u32 2139095040, %v13428_v29  ;;  %v1173_v40 = vshrl.u32 %v1172_v25, 23  ;;  %v1280_v3 = vand.u32 8388607, %v15404_v52  ;;  %v1381_v39 = vshrl.u32 %v1380_v21, 23 }
 0x64b   :  { %v1177_v56 = vor.u32 8388608, %v1176_v50  ;;  %v15429_v21 = vmov 683565275  }
 0x64c   :  { %v1277_v34 = vshrl.u32 %v1276_v55, 23  ;;  %v8910_v19 = vadd.s32 4294967169, %v1173_v40  ;;  %v1281_v58 = vor.u32 8388608, %v1280_v3  ;;  %v8918_v25 = vadd.s32 4294967169, %v1381_v39 }
 0x64d   :  { %v13448_v31 = vshll.u32 %v1177_v56, 8  ;;  %v15423_v56 = vmov 920167782  }
 0x64e   :  { %v8914_v42 = vadd.s32 4294967169, %v1277_v34  ;;  %v1179_v11 = vadd.s32 1, %v8910_v19  ;;  %v13450_v34 = vshll.u32 %v1281_v58, 8  ;;  %v13452_v50 = vadd.s32 1, %v8918_v25 }
 0x650   :  { %v1283_v15 = vadd.s32 1, %v8914_v42  ;;  %vm1180_vm6 = vcmp.gt.s32.totalorder %v1179_v11, 0  ;;  %v15416_v42 = vmov 2475754826   ;;  %vm1388_vm12 = vcmp.gt.s32.totalorder %v13452_v50, 0 }
 0x651   :  { %v1181_v55 = vsel %vm1180_vm6, %v1179_v11, 0  ;;  %v15418_v11 = vmov 2131351028   ;;  %vm1171_vm6 = vcmp.lt.s32.totalorder %v13425_v48, 0 }
 0x652   :  { %vm1284_vm7 = vcmp.gt.s32.totalorder %v1283_v15, 0  ;;  %v1182_v52 = vshrl.u32 %v1181_v55, 5  ;;  %v1183_v27 = vand.u32 31, %v1181_v55 }
 0x653   :  { %v1285_v63 = vsel %vm1284_vm7, %v1283_v15, 0  ;;  %v15421_v15 = vmov 2102212464  }
 0x654   :  { %v1287_v40 = vand.u32 31, %v1285_v63  ;;  %v1184_v3 = vsub.s32 32, %v1183_v27  ;;  %v1186_v19 = vshll.u32 %v15429_v21, %v1183_v27  ;;  %v1189_v39 = vshll.u32 %v15416_v42, %v1183_v27 }
 0x655   :  { %v1192_v55 = vshll.u32 %v15418_v11, %v1183_v27  ;;  %v1195_v47 = vshll.u32 %v15421_v15, %v1183_v27  ;;  %v1198_v54 = vshll.u32 %v15423_v56, %v1183_v27  ;;  %vm1201_vm8 = vcmp.lt.s32.totalorder %v1182_v52, 1 }
 0x656   :  { %v13459_v58 = vshrl.u32 %v1285_v63, 5  ;;  %v1185_v25 = vshrl.u32 %v15429_v21, %v1184_v3  ;;  %v1187_v60 = vshrl.u32 %v15416_v42, %v1184_v3  ;;  %v1190_v62 = vshrl.u32 %v15418_v11, %v1184_v3 }
 0x657   :  { %v1193_v33 = vshrl.u32 %v15421_v15, %v1184_v3  ;;  %v1196_v37 = vshrl.u32 %v15423_v56, %v1184_v3  ;;  %v1199_v2 = vshrl.u32 %v15426_v0, %v1184_v3  ;;  %vm1202_vm9 = vcmp.lt.s32.totalorder %v1182_v52, 2 }
 0x658   :  { %vm1204_vm10 = vcmp.lt.s32.totalorder %v1182_v52, 4  ;;  %v1188_v41 = vor.u32 %v1187_v60, %v1186_v19  ;;  %v1191_v27 = vor.u32 %v1190_v62, %v1189_v39  ;;  %v1288_v63 = vsub.s32 32, %v1287_v40 }
 0x659   :  { %v1194_v45 = vor.u32 %v1193_v33, %v1192_v55  ;;  %v1197_v4 = vor.u32 %v1196_v37, %v1195_v47  ;;  %v1200_v6 = vor.u32 %v1199_v2, %v1198_v54  ;;  %vm1203_vm11 = vcmp.lt.s32.totalorder %v1182_v52, 3 }
 0x65a   :  { %v1290_v42 = vshll.u32 %v15429_v21, %v1287_v40  ;;  %v1205_v11 = vsel %vm1201_vm8, %v1185_v25, %v1188_v41  ;;  %v1209_v15 = vsel %vm1201_vm8, %v1188_v41, %v1191_v27  ;;  %v1293_v60 = vshll.u32 %v15715_v8, %v1287_v40 }
 0x65b   :  { %v1206_v49 = vsel %vm1204_vm10, %v1194_v45, 2102212464  ;;  %v1213_v56 = vsel %vm1201_vm8, %v1191_v27, %v1194_v45  ;;  %v1210_v3 = vsel %vm1204_vm10, %v1197_v4, 920167782  ;;  %v1214_v0 = vsel %vm1204_vm10, %v1200_v6, 1326507024 }
 0x65c   :  { %v1207_v53 = vsel %vm1203_vm11, %v1191_v27, %v1206_v49  ;;  %v1211_v33 = vsel %vm1203_vm11, %v1194_v45, %v1210_v3  ;;  %v1215_v37 = vsel %vm1203_vm11, %v1197_v4, %v1214_v0  ;;  %v1289_v2 = vshrl.u32 %v15429_v21, %v1288_v63 }
 0x65d   :  { %v1291_v62 = vshrl.u32 %v15715_v8, %v1288_v63  ;;  %v1208_v54 = vsel %vm1202_vm9, %v1205_v11, %v1207_v53  ;;  %v1212_v47 = vsel %vm1202_vm9, %v1209_v15, %v1211_v33  ;;  %v1216_v41 = vsel %vm1202_vm9, %v1213_v56, %v1215_v37 }
 0x65e   :  { %v15716_v19 = vmov 2131351028   ;;  %v13480_v6 = vmul.u32.u64.low %v13448_v31, %v1216_v41  ;;  %v13481_v39 = vmul.u32.u64.high %v13448_v31, %v1216_v41, %v13480_v6  ;;  %v15717_v53 = vmov 2102212464  }
 0x65f   :  { %v1294_v49 = vshrl.u32 %v15716_v19, %v1288_v63  ;;  %v13484_v55 = vmul.u32.u64.low %v13448_v31, %v1212_v47  ;;  %v13485_v45 = vmul.u32.u64.high %v13448_v31, %v1212_v47, %v13484_v55  ;;  %v1292_v0 = vor.u32 %v1291_v62, %v1290_v42 }
 0x660   :  { %v1296_v25 = vshll.u32 %v15716_v19, %v1287_v40  ;;  %v1297_v11 = vshrl.u32 %v15717_v53, %v1288_v63  ;;  %v1299_v52 = vshll.u32 %v15717_v53, %v1287_v40  ;;  %v15718_v15 = vmov 920167782  }
 0x661   :  { %v1295_v4 = vor.u32 %v1294_v49, %v1293_v60  ;;  %v1300_v56 = vshrl.u32 %v15718_v15, %v1288_v63  ;;  %v1302_v27 = vshll.u32 %v15718_v15, %v1287_v40  ;;  %v15719_v3 = vmov 1326507024  }
 0x662   :  { %v1303_v33 = vshrl.u32 %v15719_v3, %v1288_v63  ;;  %v1224_v37 = vmul.u32 %v13448_v31, %v1208_v54  ;;  %v1298_v41 = vor.u32 %v1297_v11, %v1296_v25  ;;  %vm1305_vm13 = vcmp.lt.s32.totalorder %v13459_v58, 1 }
 0x663   :  { %vm1306_vm14 = vcmp.lt.s32.totalorder %v13459_v58, 2  ;;  %vm1226_vm15 = vc.u32 %v13481_v39, %v13484_v55  ;;  %v1227_v42 = vadd.s32 1, %v13485_v45  ;;  %v1301_v60 = vor.u32 %v1300_v56, %v1299_v52 }
 0x664   :  { %vm1307_vm0 = vcmp.lt.s32.totalorder %v13459_v58, 3  ;;  %v1304_v62 = vor.u32 %v1303_v33, %v1302_v27  ;;  %vm1308_vm1 = vcmp.lt.s32.totalorder %v13459_v58, 4  ;;  %v1309_v40 = vsel %vm1305_vm13, %v1289_v2, %v1292_v0 }
 0x665   :  { %v1313_v63 = vsel %vm1305_vm13, %v1292_v0, %v1295_v4  ;;  %v1228_v31 = vsel %vm1226_vm15, %v1227_v42, %v13485_v45  ;;  %v1310_v54 = vsel %vm1308_vm1, %v1298_v41, 2102212464  ;;  %v1314_v47 = vsel %vm1308_vm1, %v1301_v60, 920167782  ;;  %v1167_v45 = vld [vmem:[%s15172_s9 + $0x10] sm:$0xf] }
 0x666   :  { %v1317_v49 = vsel %vm1305_vm13, %v1295_v4, %v1298_v41  ;;  %v1229_v6 = vadd.s32 %v1228_v31, %v1224_v37  ;;  %v1311_v25 = vsel %vm1307_vm0, %v1295_v4, %v1310_v54  ;;  %v1315_v11 = vsel %vm1307_vm0, %v1298_v41, %v1314_v47 }
 0x667   :  { %v1318_v21 = vsel %vm1308_vm1, %v1304_v62, 1326507024  ;;  %v1312_v10 = vsel %vm1306_vm14, %v1309_v40, %v1311_v25  ;;  %v1316_v52 = vsel %vm1306_vm14, %v1313_v63, %v1315_v11  ;;  %v1389_v2 = vsel %vm1388_vm12, %v13452_v50, 0 }
 0x668   :  { %v1319_v56 = vsel %vm1307_vm0, %v1301_v60, %v1318_v21  ;;  %v1230_v0 = vadd.s32 536870912, %v1229_v6  ;;  %v13516_v27 = vmul.u32.u64.low %v13450_v34, %v1316_v52  ;;  %v13517_v33 = vmul.u32.u64.high %v13450_v34, %v1316_v52, %v13516_v27 }
 0x669   :  { %v1320_v4 = vsel %vm1306_vm14, %v1317_v49, %v1319_v56  ;;  %v15720_v21 = vrot.slane %v13411_v17, %v13443_v7  ;;  %v15721_v42 = vand.u32 2147483647, %v13431_v32  ;;  %v1391_v62 = vand.u32 31, %v1389_v2 }
 0x66a   :  { %v13527_v50 = vmul.u32.u64.low %v13450_v34, %v1320_v4  ;;  %v13528_v41 = vmul.u32.u64.high %v13450_v34, %v1320_v4, %v13527_v50  ;;  %v13532_v58 = vshrl.u32 %v1230_v0, 30  ;;  %vm1168_vm2 = vcmp.gt.f32.partialorder %v1167_v45, 0.5 }
 0x66b   :  { %v13524_v37 = vmul.f32 %v15720_v21, %v13416_v46  ;;  %v1384_v60 = vand.u32 8388607, %v15721_v42  ;;  %v1328_v40 = vmul.u32 %v13450_v34, %v1312_v10  ;;  %v1331_v31 = vadd.s32 1, %v13517_v33 }
 0x66c   :  { %v1232_v63 = vshll.u32 %v13532_v58, 30  ;;  %v1392_v17 = vsub.s32 32, %v1391_v62  ;;  %vm1330_vm3 = vc.u32 %v13528_v41, %v13516_v27  ;;  %v13541_v47 = vsel %vm1168_vm2, 1, %v15710_v44 }
 0x66d   :  { %v1385_v46 = vor.u32 8388608, %v1384_v60  ;;  %v1484_v54 = vand.u32 2139095040, %v13524_v37  ;;  %v1332_v25 = vsel %vm1330_vm3, %v1331_v31, %v13517_v33  ;;  %v13546_v11 = vshrl.u32 %v1389_v2, 5 }
 0x66e   :  { %v13543_v49 = vsub.s32 %v1229_v6, %v1232_v63  ;;  %v1333_v10 = vadd.s32 %v1332_v25, %v1328_v40  ;;  %v15722_v34 = vmov 683565275   ;;  %v1395_v56 = vshrl.u32 %v15715_v8, %v1392_v17 }
 0x66f   :  { %v1394_v52 = vshll.u32 %v15722_v34, %v1391_v62  ;;  %v1397_v45 = vshll.u32 %v15715_v8, %v1391_v62  ;;  %v1398_v4 = vshrl.u32 %v15716_v19, %v1392_v17  ;;  %v1400_v21 = vshll.u32 %v15716_v19, %v1391_v62 }
 0x670   :  { %v1235_v0 = vsub.s32 0, %v13543_v49  ;;  %v1401_v6 = vshrl.u32 %v15717_v53, %v1392_v17  ;;  %v1334_v50 = vadd.s32 536870912, %v1333_v10  ;;  %v1403_v33 = vshll.u32 %v15717_v53, %v1391_v62 }
 0x671   :  { %v13556_v2 = vshll.u32 %v1385_v46, 8  ;;  %v1485_v42 = vshrl.u32 %v1484_v54, 23  ;;  %v1225_v60 = vadd.s32 %v13484_v55, %v13481_v39  ;;  %v1404_v63 = vshrl.u32 %v15718_v15, %v1392_v17 }
 0x672   :  { %v8911_v40 = vmin.u32 %v1235_v0, %v13543_v49  ;;  %vm1412_vm5 = vcmp.lt.s32.totalorder %v13546_v11, 4  ;;  %v1335_v31 = vshrl.u32 %v1334_v50, 30  ;;  %v1393_v25 = vshrl.u32 %v15722_v34, %v1392_v17 }
 0x673   :  { %v1406_v44 = vshll.u32 %v15718_v15, %v1391_v62  ;;  %v1407_v57 = vshrl.u32 %v15719_v3, %v1392_v17  ;;  %v1396_v54 = vor.u32 %v1395_v56, %v1394_v52  ;;  %v1399_v61 = vor.u32 %v1398_v4, %v1397_v45 }
 0x674   :  { %v1237_v46 = vclz %v8911_v40  ;;  %v1402_v12 = vor.u32 %v1401_v6, %v1400_v21  ;;  %v1336_v39 = vshll.u32 %v1335_v31, 30  ;;  %v1405_v55 = vor.u32 %v1404_v63, %v1403_v33 }
 0x675   :  { %vm1409_vm7 = vcmp.lt.s32.totalorder %v13546_v11, 1  ;;  %vm1411_vm8 = vcmp.lt.s32.totalorder %v13546_v11, 3  ;;  %v1408_v50 = vor.u32 %v1407_v57, %v1406_v44  ;;  %v8922_v62 = vadd.s32 4294967169, %v1485_v42 }
 0x676   :  { %v8912_v0 = vadd.s32 4294967294, %v1237_v46  ;;  %v1414_v14 = vsel %vm1412_vm5, %v1402_v12, 2102212464  ;;  %v1255_v17 = vsub.s32 4, %v13532_v58  ;;  %v13572_v35 = vsub.s32 %v1333_v10, %v1336_v39 }
 0x677   :  { %vm1410_vm9 = vcmp.lt.s32.totalorder %v13546_v11, 2  ;;  %v1418_v52 = vsel %vm1412_vm5, %v1405_v55, 920167782  ;;  %v15723_v56 = vand.u32 2147483647, %v13425_v48  ;;  %vm1275_vm12 = vcmp.lt.s32.totalorder %v13428_v29, 0 }
 0x678   :  { %vm8913_vm11 = vcmp.lt.s32.totalorder %v8912_v0, 0  ;;  %v1413_v57 = vsel %vm1409_vm7, %v1393_v25, %v1396_v54  ;;  %v1417_v44 = vsel %vm1409_vm7, %v1396_v54, %v1399_v61  ;;  %v1419_v10 = vsel %vm1411_vm8, %v1402_v12, %v1418_v52 }
 0x679   :  { %vm13579_vm10 = vcmp.le.f32.partialorder %v15723_v56, 0.7853982  ;;  %v1240_v4 = vsel %vm8913_vm11, 0, %v8912_v0  ;;  %v1339_v21 = vsub.s32 0, %v13572_v35  ;;  %v1415_v6 = vsel %vm1411_vm8, %v1399_v61, %v1414_v14 }
 0x67a   :  { %v1421_v33 = vsel %vm1409_vm7, %v1399_v61, %v1402_v12  ;;  %v1241_v42 = vsub.s32 32, %v1240_v4  ;;  %v1242_v40 = vshll.u32 %v13543_v49, %v1240_v4  ;;  %v1245_v63 = vsub.s32 4294967266, %v1240_v4 }
 0x67b   :  { %v1422_v25 = vsel %vm1412_vm5, %v1408_v50, 1326507024  ;;  %v8915_v46 = vmin.u32 %v1339_v21, %v13572_v35  ;;  %v1420_v54 = vsel %vm1410_vm9, %v1417_v44, %v1419_v10  ;;  %v15438_v14 = vand.u32 2147483647, %v13524_v37 }
 0x67c   :  { %v1423_v39 = vsel %vm1411_vm8, %v1405_v55, %v1422_v25  ;;  %v1243_v0 = vshrl.u32 %v1225_v60, %v1241_v42  ;;  %v1246_v52 = vadd.s32 127, %v1245_v63  ;;  %v1491_v61 = vadd.s32 1, %v8922_v62 }
 0x67d   :  { %v1424_v12 = vsel %vm1410_vm9, %v1421_v33, %v1423_v39  ;;  %v1256_v49 = vsel %vm1171_vm6, %v1255_v17, %v13532_v58  ;;  %v1341_v50 = vclz %v8915_v46  ;;  %v1359_v56 = vsub.s32 4, %v1335_v31 }
 0x67e   :  { %v1416_v44 = vsel %vm1410_vm9, %v1413_v57, %v1415_v6  ;;  %v1244_v10 = vor.u32 %v1243_v0, %v1242_v40  ;;  %v1247_v4 = vshll.u32 %v1246_v52, 23  ;;  %vm1492_vm13 = vcmp.gt.s32.totalorder %v1491_v61, 0 }
 0x67f   :  { %v13612_v55 = vmul.u32.u64.low %v13556_v2, %v1424_v12  ;;  %v13613_v21 = vmul.u32.u64.high %v13556_v2, %v1424_v12, %v13612_v55  ;;  %v8916_v60 = vadd.s32 4294967294, %v1341_v50  ;;  %v1329_v17 = vadd.s32 %v13516_v27, %v13528_v41 }
 0x680   :  { %v13616_v42 = vmul.u32.u64.low %v13556_v2, %v1420_v54  ;;  %v13617_v33 = vmul.u32.u64.high %v13556_v2, %v1420_v54, %v13616_v42  ;;  %v1248_v62 = vor.u32 4788187, %v1247_v4  ;;  %v1251_v58 = vcvt.s32.f32 %v1244_v10 }
 0x681   :  { %v1493_v11 = vsel %vm1492_vm13, %v1491_v61, 0  ;;  %v13624_v57 = vsel %vm13579_vm10, 0, %v1256_v49  ;;  %vm8917_vm14 = vcmp.lt.s32.totalorder %v8916_v60, 0  ;;  %v1360_v6 = vsel %vm1275_vm12, %v1359_v56, %v1335_v31 }
 0x682   :  { %v1432_v40 = vmul.u32 %v13556_v2, %v1416_v44  ;;  %v1249_v63 = vand.u32 2147483647, %v1248_v62  ;;  %v1344_v25 = vsel %vm8917_vm14, 0, %v8916_v60  ;;  %vm1434_vm15 = vc.u32 %v13613_v21, %v13616_v42 }
 0x683   :  { %v1495_v46 = vand.u32 31, %v1493_v11  ;;  %v1345_v54 = vsub.s32 32, %v1344_v25  ;;  %v1346_v27 = vshll.u32 %v13572_v35, %v1344_v25  ;;  %v1349_v41 = vsub.s32 4294967266, %v1344_v25 }
 0x684   :  { %v1435_v39 = vadd.s32 1, %v13617_v33  ;;  %v1252_v0 = vmul.f32 %v1251_v58, %v1249_v63  ;;  %v1262_v52 = vadd.s32 3, %v13624_v57  ;;  %v15726_v12 = vand.u32 2147483647, %v13428_v29 }
 0x685   :  { %v1347_v2 = vshrl.u32 %v1329_v17, %v1345_v54  ;;  %v1350_v61 = vadd.s32 127, %v1349_v41  ;;  %v1488_v60 = vand.u32 8388607, %v15438_v14  ;;  %v1496_v62 = vsub.s32 32, %v1495_v46  ;;  %v9170_v41 = vld [vmem:[%s15172_s9 + $0x22] ss:$0 sm:$0xff] }
 0x686   :  { %vm13636_vm0 = vcmp.le.f32.partialorder %v15726_v12, 0.7853982  ;;  %v1436_v35 = vsel %vm1434_vm15, %v1435_v39, %v13617_v33  ;;  %v1253_v44 = vxor.u32 2147483648, %v1252_v0  ;;  %v13653_v17 = vand.u32 3, %v1262_v52 }
 0x687   :  { %v13642_v49 = vsel %vm13636_vm0, 0, %v1360_v6  ;;  %v1437_v10 = vadd.s32 %v1436_v35, %v1432_v40  ;;  %v1348_v4 = vor.u32 %v1347_v2, %v1346_v27  ;;  %v1351_v55 = vshll.u32 %v1350_v61, 23 }
 0x688   :  { %v1254_v58 = vsel %vm1171_vm6, %v1253_v44, %v1252_v0  ;;  %v1366_v33 = vadd.s32 3, %v13642_v49  ;;  %v1498_v54 = vshll.u32 %v15722_v34, %v1495_v46  ;;  %v1501_v0 = vshll.u32 %v15715_v8, %v1495_v46 }
 0x689   :  { %v1438_v6 = vadd.s32 536870912, %v1437_v10  ;;  %v1257_v63 = vsel %vm13579_vm10, %v13425_v48, %v1254_v58  ;;  %v1352_v25 = vor.u32 4788187, %v1351_v55  ;;  %v1355_v40 = vcvt.s32.f32 %v1348_v4 }
 0x68a   :  { %10343 = vcosq.f32 %v1257_v63  ;;  %v1504_v52 = vshll.u32 %v15716_v19, %v1495_v46  ;;  %v1499_v12 = vshrl.u32 %v15715_v8, %v1496_v62  ;;  %v1502_v2 = vshrl.u32 %v15716_v19, %v1496_v62 }
 0x68b   :  { %v13665_v39 = vshrl.u32 %v1438_v6, 30  ;;  %10345 = vsinq.f32 %v1257_v63  ;;  %v1353_v45 = vand.u32 2147483647, %v1352_v25  ;;  %v1505_v44 = vshrl.u32 %v15717_v53, %v1496_v62 }
 0x68c   :  { %v1507_v4 = vshll.u32 %v15717_v53, %v1495_v46  ;;  %v1508_v55 = vshrl.u32 %v15718_v15, %v1496_v62  ;;  %v1489_v14 = vor.u32 8388608, %v1488_v60  ;;  %v1494_v56 = vshrl.u32 %v1493_v11, 5 }
 0x68d   :  { %v1440_v35 = vshll.u32 %v13665_v39, 30  ;;  %v1356_v6 = vmul.f32 %v1355_v40, %v1353_v45  ;;  %v13677_v25 = vand.u32 3, %v1366_v33  ;;  %v1510_v19 = vshll.u32 %v15718_v15, %v1495_v46 }
 0x68e   :  { %v1511_v50 = vshrl.u32 %v15719_v3, %v1496_v62  ;;  %vm1268_vm1 = vcmp.eq.s32.totalorder %v13653_v17, 2  ;;  %vm1265_vm2 = vcmp.eq.s32.totalorder %v13653_v17, 0  ;;  %v1503_v60 = vor.u32 %v1502_v2, %v1501_v0 }
 0x68f   :  { %v13679_v8 = vsub.s32 %v1437_v10, %v1440_v35  ;;  %v1357_v53 = vxor.u32 2147483648, %v1356_v6  ;;  %v1506_v10 = vor.u32 %v1505_v44, %v1504_v52  ;;  %v1509_v33 = vor.u32 %v1508_v55, %v1507_v4 }
 0x690   :  { %vm1513_vm3 = vcmp.lt.s32.totalorder %v1494_v56, 1  ;;  %vm1516_vm5 = vcmp.lt.s32.totalorder %v1494_v56, 4  ;;  %vm1264_vm6 = vcmp.lt.s32.totalorder %v13653_v17, 2  ;;  %v1512_v46 = vor.u32 %v1511_v50, %v1510_v19 }
 0x691   :  { %v1443_v11 = vsub.s32 0, %v13679_v8  ;;  %v1358_v15 = vsel %vm1275_vm12, %v1357_v53, %v1356_v6  ;;  %vm1515_vm7 = vcmp.lt.s32.totalorder %v1494_v56, 3  ;;  %vm1514_vm8 = vcmp.lt.s32.totalorder %v1494_v56, 2 }
 0x692   :  { %v1361_v3 = vsel %vm13636_vm0, %v13428_v29, %v1358_v15  ;;  %v1522_v52 = vsel %vm1516_vm5, %v1509_v33, 920167782  ;;  %v1525_v50 = vsel %vm1513_vm3, %v1503_v60, %v1506_v10  ;;  %vm1261_vm9 = vweird.f32 %v13425_v48 }
 0x693   :  { %10347 = vcosq.f32 %v1361_v3  ;;  %vm1379_vm10 = vcmp.lt.s32.totalorder %v13431_v32, 0  ;;  %v1523_v44 = vsel %vm1515_vm7, %v1506_v10, %v1522_v52  ;;  %v1526_v4 = vsel %vm1516_vm5, %v1512_v46, 1326507024 }
 0x694   :  { %10349 = vsinq.f32 %v1361_v3  ;;  %v1433_v6 = vadd.s32 %v13616_v42, %v13613_v21  ;;  %v1527_v19 = vsel %vm1515_vm7, %v1509_v33, %v1526_v4  ;;  %vm1372_vm11 = vcmp.eq.s32.totalorder %v13677_v25, 2 }
 0x695   :  { %vm1369_vm13 = vcmp.eq.s32.totalorder %v13677_v25, 0  ;;  %v1678_v21 = vand.u32 3, %v13624_v57  ;;  %vm1368_vm14 = vcmp.lt.s32.totalorder %v13677_v25, 2  ;;  %vm1365_vm15 = vweird.f32 %v13428_v29 }
 0x696   :  { %v15730_v57 = vrot.slane %v13541_v47, %v12901_v36  ;;  %v15734_v52 = vrot.slane %v13541_v47, %v12907_v38 }
 0x697   :  { %v10344_v55 = vpop.eup %10343 }
 0x698   :  { %v10346_v53 = vpop.eup %10345  ;;  %vm13735_vm0 = vcmp.eq.s32.totalorder %v15730_v57, 1 }
 0x708   :  { %v13660_v27 = vpop.f32.mrf.mxu1 }
 0x709   :  { %15729 = vst [vmem:[#allocation267_spill] sm:$0xff] %v13660_v27 }
 0x70a   :  { %v3934_v61 = vpop.f32.mrf.mxu1 }
 0x70b   :  { %v13675_v58 = vadd.f32 %v9170_v41, %v3934_v61  ;;  %v1497_v41 = vshrl.u32 %v15722_v34, %v1496_v62  ;;  %v1500_v61 = vor.u32 %v1499_v12, %v1498_v54  ;;  %v8919_v34 = vmin.u32 %v1443_v11, %v13679_v8 }
 0x70c   :  { %v3936_v63 = vpop.f32.mrf.mxu1  ;;  %v1518_v62 = vsel %vm1516_vm5, %v1506_v10, 2102212464  ;;  %v1266_v11 = vxor.u32 2147483648, %v10346_v53 }
 0x70d   :  { %v3947_v27 = vmul.f32 0.70710677, %v13675_v58  ;;  %v1445_v0 = vclz %v8919_v34  ;;  %v1517_v31 = vsel %vm1513_vm3, %v1497_v41, %v1500_v61  ;;  %v1519_v2 = vsel %vm1515_vm7, %v1503_v60, %v1518_v62 }
 0x70e   :  { %v3937_v40 = vpop.f32.mrf.mxu1  ;;  %v1463_v63 = vsub.s32 4, %v13665_v39  ;;  %v1269_v41 = vxor.u32 2147483648, %v10344_v55  ;;  %v1267_v46 = vsel %vm1265_vm2, %v10344_v55, %v1266_v11  ;;  %vm13742_vm2 = vcmp.eq.s32.totalorder %v15734_v52, 1 }
 0x70f   :  { %v13688_v45 = vand.u32 2147483647, %v3947_v27  ;;  %v13699_v27 = vshll.u32 %v1489_v14, 8  ;;  %v8920_v35 = vadd.s32 4294967294, %v1445_v0  ;;  %v1521_v14 = vsel %vm1513_vm3, %v1500_v61, %v1503_v60 }
 0x710   :  { %v1520_v61 = vsel %vm1514_vm8, %v1517_v31, %v1519_v2  ;;  %v1528_v40 = vsel %vm1514_vm8, %v1525_v50, %v1527_v19  ;;  %v1524_v10 = vsel %vm1514_vm8, %v1521_v14, %v1523_v44  ;;  %v1270_v42 = vsel %vm1268_vm1, %v1269_v41, %v10346_v53 }
 0x711   :  { %v3949_v54 = vmul.f32 0.3275911, %v13688_v45  ;;  %vm8921_vm12 = vcmp.lt.s32.totalorder %v8920_v35, 0  ;;  %v3961_v34 = vsub.f32 0.0, %v13688_v45  ;;  %vm1679_vm1 = vcmp.lt.s32.totalorder %v1678_v21, 2 }
 0x712   :  { %v1448_v60 = vsel %vm8921_vm12, 0, %v8920_v35  ;;  %v13729_v56 = vmul.u32.u64.low %v13699_v27, %v1528_v40  ;;  %v13730_v62 = vmul.u32.u64.high %v13699_v27, %v1528_v40, %v13729_v56  ;;  %vm1680_vm3 = vcmp.eq.s32.totalorder %v1678_v21, 0 }
 0x713   :  { %v3950_v12 = vadd.f32 1.0, %v3949_v54  ;;  %v1449_v33 = vsub.s32 32, %v1448_v60  ;;  %v1450_v15 = vshll.u32 %v13679_v8, %v1448_v60  ;;  %v1453_v3 = vsub.s32 4294967266, %v1448_v60 }
 0x714   :  { %v15731_v54 = vmov 0  ;;  %v1271_v31 = vsel %vm1264_vm6, %v1267_v46, %v1270_v42  ;;  %v13749_v2 = vmul.u32.u64.low %v13699_v27, %v1524_v10  ;;  %v13750_v50 = vmul.u32.u64.high %v13699_v27, %v1524_v10, %v13749_v2 }
 0x715   :  { %10351 = vrcp.f32 %v3950_v12  ;;  %v15732_v54 = vsel %vm13735_vm0, 4294967295, %v15731_v54  ;;  %v1451_v8 = vshrl.u32 %v1433_v6, %v1449_v33  ;;  %v1454_v0 = vadd.s32 127, %v1453_v3 }
 0x716   :  { %15733 = vst [vmem:[#allocation268_spill] sm:$0xff] %v15732_v54  ;;  %v15735_v12 = vmov 0  ;;  %v1682_v35 = vsel %vm1680_vm3, %v10344_v55, %v1266_v11  ;;  %v15738_v14 = vand.u32 2147483647, %v13431_v32  ;;  %vm1683_vm7 = vcmp.eq.s32.totalorder %v1678_v21, 2  ;;  %v10348_v11 = vpop.eup %10347 }
 0x717   :  { %v15736_v12 = vsel %vm13742_vm2, 4294967295, %v15735_v12  ;;  %v1452_v4 = vor.u32 %v1451_v8, %v1450_v15  ;;  %v1455_v6 = vshll.u32 %v1454_v0, 23  ;;  %v1781_v19 = vand.u32 3, %v13642_v49  ;;  %v10350_v15 = vpop.eup %10349 }
 0x718   :  { %15737 = vst [vmem:[#allocation269_spill] sm:$0xff] %v15736_v12  ;;  %vm13755_vm5 = vcmp.le.f32.partialorder %v15738_v14, 0.7853982  ;;  %v3962_v17 = vmul.f32 %v3961_v34, %v13688_v45  ;;  %v1464_v40 = vsel %vm1379_vm10, %v1463_v63, %v13665_v39  ;;  %v1536_v60 = vmul.u32 %v13699_v27, %v1520_v61 }
 0x719   :  { %v1685_v55 = vsel %vm1683_vm7, %v1269_v41, %v10346_v53  ;;  %v1456_v10 = vor.u32 4788187, %v1455_v6  ;;  %v1459_v42 = vcvt.s32.f32 %v1452_v4  ;;  %vm1538_vm6 = vc.u32 %v13730_v62, %v13749_v2 }
 0x71a   :  { %v1686_v33 = vsel %vm1679_vm1, %v1682_v35, %v1685_v55  ;;  %v13770_v49 = vsel %vm1261_vm9, nan, %v1271_v31  ;;  %v1373_v45 = vxor.u32 2147483648, %v10348_v11  ;;  %v1539_v3 = vadd.s32 1, %v13750_v50 }
 0x71b   :  { %15741 = vst [vmem:[#allocation270_spill] sm:$0xff] %v13770_v49  ;;  %vm1783_vm8 = vcmp.eq.s32.totalorder %v1781_v19, 0  ;;  %v1370_v39 = vxor.u32 2147483648, %v10350_v15  ;;  %v1457_v27 = vand.u32 2147483647, %v1456_v10  ;;  %vm1782_vm12 = vcmp.lt.s32.totalorder %v1781_v19, 2 }
 0x71c   :  { %vm1786_vm3 = vcmp.eq.s32.totalorder %v1781_v19, 2  ;;  %v1374_v63 = vsel %vm1372_vm11, %v1373_v45, %v10350_v15  ;;  %v1540_v53 = vsel %vm1538_vm6, %v1539_v3, %v13750_v50  ;;  %v13778_v41 = vsel %vm1261_vm9, nan, %v1686_v33 }
 0x71d   :  { %15742 = vst [vmem:[#allocation271_spill] sm:$0xff] %v13778_v41  ;;  %v1788_v61 = vsel %vm1786_vm3, %v1373_v45, %v10350_v15  ;;  %v1371_v34 = vsel %vm1369_vm13, %v10348_v11, %v1370_v39  ;;  %v1460_v46 = vmul.f32 %v1459_v42, %v1457_v27  ;;  %v1541_v56 = vadd.s32 %v1540_v53, %v1536_v60  ;;  %v1113_v53 = vld [vmem:[%s15164_s1] sm:$0xff] }
 0x71e   :  { %v1785_v57 = vsel %vm1783_vm8, %v10348_v11, %v1370_v39  ;;  %v3963_v0 = vmul.f32 1.442695, %v3962_v17  ;;  %v1375_v52 = vsel %vm1368_vm14, %v1371_v34, %v1374_v63  ;;  %v1466_v19 = vsel %vm13755_vm5, 0, %v1464_v40  ;;  %v1115_v34 = vld [vmem:[%s15164_s1 + $0x10] sm:$0xff] }
 0x71f   :  { %v1789_v31 = vsel %vm1782_vm12, %v1785_v57, %v1788_v61  ;;  %v13786_v50 = vsel %vm1365_vm15, nan, %v1375_v52  ;;  %v1461_v48 = vxor.u32 2147483648, %v1460_v46  ;;  %v1542_v35 = vadd.s32 536870912, %v1541_v56  ;;  %v1114_v61 = vld [vmem:[%s15164_s1 + $0x8] sm:$0xff] }
 0x720   :  { %15743 = vst [vmem:[#allocation272_spill] sm:$0xff] %v13786_v50  ;;  %v13790_v14 = vsel %vm1365_vm15, nan, %v1789_v31  ;;  %10353 = vpow2.f32 %v3963_v0  ;;  %v1470_v42 = vadd.s32 3, %v1466_v19  ;;  %v1884_v27 = vand.u32 3, %v1466_v19  ;;  %v1118_v0 = vld [vmem:[%s15164_s1 + $0x28] sm:$0xff] }
 0x721   :  { %15744 = vst [vmem:[#allocation273_spill] sm:$0xff] %v13790_v14  ;;  %v1462_v25 = vsel %vm1379_vm10, %v1461_v48, %v1460_v46  ;;  %v13800_v17 = vshrl.u32 %v1542_v35, 30  ;;  %vm1469_vm9 = vweird.f32 %v13431_v32  ;;  %v1116_v46 = vld [vmem:[%s15164_s1 + $0x18] sm:$0xff]  ;;  %v1537_v57 = vadd.s32 %v13749_v2, %v13730_v62  ;;  %v1125_v48 = vpop.permute.xlu0 %1124  ;;  %v1119_v62 = vld [vmem:[%s15164_s1 + $0x30] sm:$0xff] }
 0x722   :  { %v10352_v21 = vpop.eup %10351  ;;  %v1465_v55 = vsel %vm13755_vm5, %v13431_v32, %v1462_v25  ;;  %v1471_v3 = vand.u32 3, %v1470_v42  ;;  %vm3967_vm13 = vcmp.lt.f32.partialorder %v13675_v58, 0.0  ;;  %vm1886_vm14 = vcmp.eq.s32.totalorder %v1884_v27, 0  ;;  %v1120_v2 = vld [vmem:[%s15164_s1 + $0x38] sm:$0xff] }
 0x723   :  { %v3952_v8 = vmul.f32 1.0614054, %v10352_v21  ;;  %10355 = vcosq.f32 %v1465_v55  ;;  %v1544_v11 = vshll.u32 %v13800_v17, 30  ;;  %vm1889_vm15 = vcmp.eq.s32.totalorder %v1884_v27, 2 }
 0x724   :  { %10357 = vsinq.f32 %v1465_v55  ;;  %vm1473_vm10 = vcmp.eq.s32.totalorder %v1471_v3, 0  ;;  %vm1476_vm11 = vcmp.eq.s32.totalorder %v1471_v3, 2  ;;  %v2009_v31 = vrot.slane %v13541_v47, %v13414_v23 }
 0x725   :  { %v9171_v4 = vadd.f32 -1.4531521, %v3952_v8  ;;  %v1545_v40 = vsub.s32 %v1541_v56, %v1544_v11  ;;  %v1117_v8 = vld [vmem:[%s15164_s1 + $0x20] sm:$0xff]  ;;  %v13842_v25 = vmul.f32 %v1125_v48, %v1114_v61  ;;  %v13844_v19 = vmul.f32 %v1125_v48, %v1115_v34 }
 0x726   :  { %v13846_v55 = vmul.f32 %v1125_v48, %v1116_v46  ;;  %v13848_v11 = vmul.f32 %v1125_v48, %v1117_v8  ;;  %vm1472_vm5 = vcmp.lt.s32.totalorder %v1471_v3, 2  ;;  %vm1885_vm7 = vcmp.lt.s32.totalorder %v1884_v27, 2 }
 0x727   :  { %v3954_v60 = vmul.f32 %v10352_v21, %v9171_v4  ;;  %v1547_v15 = vsub.s32 0, %v1545_v40  ;;  %v13840_v4 = vmul.f32 %v1125_v48, %v1113_v53  ;;  %vm13860_vm6 = vcmp.eq.s32.totalorder %v2009_v31, 1 }
 0x728   :  { %vm1483_vm8 = vcmp.lt.s32.totalorder %v13524_v37, 0  ;;  %v15750_v32 = vand.u32 2147483647, %v13524_v37 }
 0x729   :  { %v3955_v10 = vadd.f32 1.4214138, %v3954_v60  ;;  %v8923_v39 = vmin.u32 %v1547_v15, %v1545_v40 }
 0x72a   :  { %vm1482_vm12 = vcmp.le.f32.partialorder %v15750_v32, 0.7853982 }
 0x72b   :  { %v3956_v33 = vmul.f32 %v10352_v21, %v3955_v10  ;;  %v1549_v44 = vclz %v8923_v39  ;;  %v13850_v10 = vmul.f32 %v1125_v48, %v1118_v0 }
 0x72d   :  { %v9172_v45 = vadd.f32 -0.28449672, %v3956_v33  ;;  %v8924_v52 = vadd.s32 4294967294, %v1549_v44  ;;  %v10354_v60 = vpop.eup %10353 }
 0x72f   :  { %v3958_v63 = vmul.f32 %v10352_v21, %v9172_v45  ;;  %vm8925_vm1 = vcmp.lt.s32.totalorder %v8924_v52, 0  ;;  %v13852_v45 = vmul.f32 %v1125_v48, %v1119_v62 }
 0x730   :  { %v10356_v42 = vpop.eup %10355  ;;  %v1552_v15 = vsel %vm8925_vm1, 0, %v8924_v52 }
 0x731   :  { %v3959_v56 = vadd.f32 0.2548296, %v3958_v63  ;;  %v10358_v39 = vpop.eup %10357  ;;  %v1477_v63 = vxor.u32 2147483648, %v10356_v42  ;;  %v1553_v53 = vsub.s32 32, %v1552_v15  ;;  %v1554_v44 = vshll.u32 %v1545_v40, %v1552_v15 }
 0x732   :  { %v1557_v61 = vsub.s32 4294967266, %v1552_v15  ;;  %v1474_v46 = vxor.u32 2147483648, %v10358_v39 }
 0x733   :  { %v3960_v35 = vmul.f32 %v10352_v21, %v3959_v56  ;;  %v13854_v21 = vmul.f32 %v1125_v48, %v1120_v2  ;;  %v1478_v56 = vsel %vm1476_vm11, %v1477_v63, %v10358_v39  ;;  %v1555_v8 = vshrl.u32 %v1537_v57, %v1553_v53 }
 0x734   :  { %v1558_v0 = vadd.s32 127, %v1557_v61  ;;  %v1475_v62 = vsel %vm1473_vm10, %v10356_v42, %v1474_v46  ;;  %v1888_v48 = vsel %vm1886_vm14, %v10356_v42, %v1474_v46  ;;  %v15745_v2 = vmov 0 }
 0x735   :  { %v3965_v33 = vmul.f32 %v10354_v60, %v3960_v35  ;;  %v1891_v35 = vsel %vm1889_vm15, %v1477_v63, %v10358_v39  ;;  %v15746_v2 = vsel %vm13860_vm6, 4294967295, %v15745_v2  ;;  %v1479_v40 = vsel %vm1472_vm5, %v1475_v62, %v1478_v56 }
 0x736   :  { %15747 = vst [vmem:[#allocation274_spill] sm:$0xff] %v15746_v2  ;;  %v1556_v60 = vor.u32 %v1555_v8, %v1554_v44  ;;  %v1892_v15 = vsel %vm1885_vm7, %v1888_v48, %v1891_v35  ;;  %v3970_v57 = vmul.f32 0.5, %v13675_v58  ;;  %v13869_v39 = vsel %vm1469_vm9, nan, %v1479_v40 }
 0x737   :  { %v3966_v34 = vsub.f32 1.0, %v3965_v33  ;;  %v1559_v33 = vshll.u32 %v1558_v0, 23  ;;  %15748 = vst [vmem:[#allocation275_spill] sm:$0xff] %v13869_v39  ;;  %v13873_v3 = vsel %vm1469_vm9, nan, %v1892_v15  ;;  %v2013_v40 = vrot.slane %v13541_v47, %v13443_v7 }
 0x738   :  { %15749 = vst [vmem:[#allocation276_spill] sm:$0xff] %v13873_v3  ;;  %v1563_v42 = vcvt.s32.f32 %v1556_v60  ;;  %vm1573_vm15 = vweird.f32 %v13524_v37 }
 0x739   :  { %v3968_v52 = vsub.f32 0.0, %v3966_v34  ;;  %v1560_v31 = vor.u32 4788187, %v1559_v33  ;;  %vm13888_vm1 = vcmp.eq.s32.totalorder %v2013_v40, 1 }
 0x73b   :  { %v3969_v29 = vsel %vm3967_vm13, %v3968_v52, %v3966_v34  ;;  %v1561_v44 = vand.u32 2147483647, %v1560_v31  ;;  %v1567_v34 = vsub.s32 4, %v13800_v17 }
 0x73c   :  { %v3971_v27 = vadd.f32 1.0, %v3969_v29 }
 0x73d   :  { %v1564_v58 = vmul.f32 %v1563_v42, %v1561_v44  ;;  %v1568_v56 = vsel %vm1483_vm8, %v1567_v34, %v13800_v17  ;;  %v15751_v42 = vmov 0 }
 0x73e   :  { %v3972_v53 = vmul.f32 %v3971_v27, %v3970_v57  ;;  %v1570_v0 = vsel %vm1482_vm12, 0, %v1568_v56  ;;  %v15752_v42 = vsel %vm13888_vm1, 4294967295, %v15751_v42 }
 0x73f   :  { %v1565_v29 = vxor.u32 2147483648, %v1564_v58  ;;  %v1574_v35 = vadd.s32 3, %v1570_v0  ;;  %v1987_v62 = vand.u32 3, %v1570_v0  ;;  %15753 = vst [vmem:[#allocation277_spill] sm:$0xff] %v15752_v42  ;;  %v9275_v0 = vcombine.high %v11257_v59, %v11267_v13 }
 0x740   :  { %v3989_v61 = vpack.c.bf16 %v3972_v53, %v3972_v53 }
 0x741   :  { %v1566_v46 = vsel %vm1483_vm8, %v1565_v29, %v1564_v58  ;;  %v1575_v52 = vand.u32 3, %v1574_v35  ;;  %vm1992_vm9 = vcmp.eq.s32.totalorder %v1987_v62, 2  ;;  %vm1989_vm11 = vcmp.eq.s32.totalorder %v1987_v62, 0 }
 0x742   :  { %9881 = vmatmul.mubr.bf16.vlgmr.msra.gmra.mxu0 %v3989_v61  ;;  %v1569_v8 = vsel %vm1482_vm12, %v13524_v37, %v1566_v46  ;;  %vm1988_vm14 = vcmp.lt.s32.totalorder %v1987_v62, 2  ;;  %v9173_v37 = vld [vmem:[%s15172_s9 + $0x23] ss:$0 sm:$0xff]  ;;  %v9210_v35 = vcombine.low %v10937_v28, %v10947_v30 }
 0x743   :  { %10359 = vcosq.f32 %v1569_v8  ;;  %vm1580_vm3 = vcmp.eq.s32.totalorder %v1575_v52, 2  ;;  %vm1577_vm10 = vcmp.eq.s32.totalorder %v1575_v52, 0  ;;  %vm1576_vm13 = vcmp.lt.s32.totalorder %v1575_v52, 2 }
 0x744   :  { %10361 = vsinq.f32 %v1569_v8  ;;  %v9211_v8 = vcombine.high %v10937_v28, %v10947_v30  ;;  %v9274_v52 = vcombine.low %v11257_v59, %v11267_v13 }
 0x750   :  { %v10360_v48 = vpop.eup %10359 }
 0x751   :  { %v10362_v60 = vpop.eup %10361  ;;  %v1581_v33 = vxor.u32 2147483648, %v10360_v48 }
 0x752   :  { %v1578_v17 = vxor.u32 2147483648, %v10362_v60 }
 0x753   :  { %v1582_v15 = vsel %vm1580_vm3, %v1581_v33, %v10362_v60  ;;  %v1994_v57 = vsel %vm1992_vm9, %v1581_v33, %v10362_v60 }
 0x754   :  { %v1579_v27 = vsel %vm1577_vm10, %v10360_v48, %v1578_v17  ;;  %v1991_v31 = vsel %vm1989_vm11, %v10360_v48, %v1578_v17 }
 0x755   :  { %v1583_v53 = vsel %vm1576_vm13, %v1579_v27, %v1582_v15  ;;  %v1995_v44 = vsel %vm1988_vm14, %v1991_v31, %v1994_v57 }
 0x756   :  { %v13892_v47 = vsel %vm1573_vm15, nan, %v1583_v53  ;;  %v13894_v61 = vsel %vm1573_vm15, nan, %v1995_v44 }
 0x757   :  { %15754 = vst [vmem:[#allocation278_spill] sm:$0xff] %v13892_v47  ;;  %15755 = vst [vmem:[#allocation279_spill] sm:$0xff] %v13894_v61 }
 0x802   :  { %v4079_v34 = vpop.f32.mrf.mxu0 }
 0x803   :  { %v13903_v32 = vadd.f32 %v9173_v37, %v4079_v34 }
 0x804   :  { %v9882_v29 = vpop.f32.mrf.mxu0 }
 0x805   :  { %15756 = vst [vmem:[#allocation280_spill] sm:$0xff] %v13903_v32 }
 0x806   :  { %v4082_v46 = vpop.f32.mrf.mxu0 }
 0x808   :  { %v9883_v56 = vpop.f32.mrf.mxu0 }
 0x809   :  { %10699 = dma.done.wait [#allocation6], 32768 }
 0x80a   :  { %10700 = vsyncadd [#allocation6], 4294934528  ;;  %v9207_v62 = vcombine.high %v10917_v24, %v10927_v26  ;;  %v9271_v48 = vcombine.high %v11237_v51, %v11247_v9  ;;  %5655 = vmatprep.subr.bf16.mxu1 %v9211_v8  ;;  %5696 = vmatprep.subr.bf16.mxu0 %v9275_v0  ;;  %v9206_v40 = vcombine.low %v10917_v24, %v10927_v26  ;;  %v15757_v24 = vld [vmem:[#allocation90_spill] sm:$0xff]  ;;  %v15764_v31 = vld [vmem:[#allocation84_spill] sm:$0xff]  ;;  %vm6039_vm5 = vcmask 523264  }
 0x80b   :  { %5656 = vmatpush1.bf16.msra.mxu1 %v9210_v35  ;;  %5697 = vmatpush1.bf16.msra.mxu0 %v9274_v52  ;;  %v9270_v28 = vcombine.low %v11237_v51, %v11247_v9  ;;  %v9203_v13 = vcombine.high %v10897_v20, %v10907_v22  ;;  %v9267_v30 = vcombine.high %v11217_v43, %v11227_v5  ;;  %v15761_v17 = vld [vmem:[#allocation86_spill] sm:$0xff]  ;;  %v15766_v56 = vld [vmem:[#allocation24_spill] sm:$0xff]  ;;  %v14729_v58 = vld [vmem:[%s15170_s7 + $0x120] sm:$0xff]  ;;  %vm6338_vm7 = vcmask 130048  }
 0x80c   :  { %5657 = vmatprep.subr.bf16.mxu1 %v9207_v62  ;;  %5698 = vmatprep.subr.bf16.mxu0 %v9271_v48  ;;  %v9202_v59 = vcombine.low %v10897_v20, %v10907_v22  ;;  %v9266_v60 = vcombine.low %v11217_v43, %v11227_v5  ;;  %v9199_v9 = vcombine.high %v10877_v16, %v10887_v18  ;;  %v15758_v20 = vld [vmem:[#allocation32_spill] sm:$0xff]  ;;  %v15759_v5 = vld [vmem:[#allocation30_spill] sm:$0xff]  ;;  %v14735_v14 = vld [vmem:[%s15170_s7 + $0x80] sm:$0xff] }
 0x80d   :  { %v9263_v26 = vcombine.high %v15757_v24, %v11207_v1  ;;  %v9198_v51 = vcombine.low %v10877_v16, %v10887_v18  ;;  %v9262_v33 = vcombine.low %v15757_v24, %v11207_v1  ;;  %v9195_v22 = vcombine.high %v15759_v5, %v15758_v20  ;;  %v15760_v43 = vld [vmem:[#allocation88_spill] sm:$0xff]  ;;  %v15763_v1 = vld [vmem:[#allocation26_spill] sm:$0xff]  ;;  %v14742_v50 = vld [vmem:[%s15170_s7] sm:$0xff] }
 0x80e   :  { %v9259_v15 = vcombine.high %v15761_v17, %v15760_v43  ;;  %v9194_v57 = vcombine.low %v15759_v5, %v15758_v20  ;;  %v9258_v27 = vcombine.low %v15761_v17, %v15760_v43  ;;  %v15762_v16 = vld [vmem:[#allocation28_spill] sm:$0xff]  ;;  %v15765_v53 = vld [vmem:[#allocation82_spill] sm:$0xff]  ;;  %v13951_v37 = vpack.c.bf16 %v13842_v25, %v13842_v25  ;;  %v15777_v20 = vld [vmem:[#allocation127_spill] sm:$0xff] }
 0x80f   :  { %5658 = vmatpush1.bf16.msra.mxu1 %v9206_v40  ;;  %5699 = vmatpush1.bf16.msra.mxu0 %v9270_v28  ;;  %v9191_v18 = vcombine.high %v15763_v1, %v15762_v16  ;;  %v9255_v44 = vcombine.high %v15765_v53, %v15764_v31  ;;  %v13955_v34 = vpack.c.bf16 %v13846_v55, %v13846_v55  ;;  %v15767_v8 = vld [vmem:[#allocation22_spill] sm:$0xff]  ;;  %v15768_v35 = vld [vmem:[#allocation80_spill] sm:$0xff]  ;;  %v14757_v41 = vld [vmem:[%s15170_s7 + $0x110] sm:$0xff] }
 0x810   :  { %5659 = vmatprep.subr.bf16.mxu1 %v9203_v13  ;;  %5700 = vmatprep.subr.bf16.mxu0 %v9267_v30  ;;  %v9190_v29 = vcombine.low %v15763_v1, %v15762_v16  ;;  %v9254_v46 = vcombine.low %v15765_v53, %v15764_v31  ;;  %v9187_v0 = vcombine.high %v15767_v8, %v15766_v56  ;;  %v15769_v25 = vld [vmem:[#allocation78_spill] sm:$0xff]  ;;  %v15770_v48 = vld [vmem:[#allocation20_spill] sm:$0xff]  ;;  %v15781_v16 = vld [vmem:[#allocation123_spill] sm:$0xff] }
 0x811   :  { %v9251_v52 = vcombine.high %v15769_v25, %v15768_v35  ;;  %5687 = vmatprep.mubr.bf16.mxu1 %v13951_v37  ;;  %5728 = vmatprep.mubr.bf16.mxu0 %v13955_v34  ;;  %v9186_v55 = vcombine.low %v15767_v8, %v15766_v56  ;;  %v9250_v62 = vcombine.low %v15769_v25, %v15768_v35  ;;  %v15771_v40 = vld [vmem:[#allocation18_spill] sm:$0xff]  ;;  %v15772_v13 = vld [vmem:[#allocation76_spill] sm:$0xff]  ;;  %v15785_v56 = vld [vmem:[#allocation119_spill] sm:$0xff] }
 0x812   :  { %v9183_v28 = vcombine.high %v15771_v40, %v15770_v48  ;;  %v15773_v30 = vld [vmem:[#allocation74_spill] sm:$0xff]  ;;  %v15774_v24 = vld [vmem:[#allocation72_spill] sm:$0xff]  ;;  %v14773_v54 = vld [vmem:[%s15170_s7 + $0x100] sm:$0xff] }
 0x813   :  { %5660 = vmatpush1.bf16.msra.mxu1 %v9202_v59  ;;  %5701 = vmatpush1.bf16.msra.mxu0 %v9266_v60  ;;  %v9247_v59 = vcombine.high %v15773_v30, %v15772_v13  ;;  %v9182_v60 = vcombine.low %v15771_v40, %v15770_v48  ;;  %v15778_v17 = vld [vmem:[#allocation68_spill] sm:$0xff]  ;;  %v15789_v48 = vld [vmem:[#allocation115_spill] sm:$0xff]  ;;  %v14716_v6 = vld [vmem:[%s15170_s7 + $0x88] sm:$0xff]  ;;  %16000 = vst [vmem:[#allocation32_spill] sm:$0xff] %v14773_v54 }
 0x814   :  { %5661 = vmatprep.subr.bf16.mxu1 %v9199_v9  ;;  %5702 = vmatprep.subr.bf16.mxu0 %v9263_v26  ;;  %v9246_v9 = vcombine.low %v15773_v30, %v15772_v13  ;;  %v15775_v26 = vld [vmem:[#allocation70_spill] sm:$0xff]  ;;  %v15782_v53 = vld [vmem:[#allocation64_spill] sm:$0xff]  ;;  %v14787_v3 = vld [vmem:[%s15170_s7 + $0x1b0] sm:$0xff] }
 0x815   :  { %v15786_v25 = vld [vmem:[#allocation60_spill] sm:$0xff]  ;;  %v14723_v63 = vld [vmem:[%s15170_s7 + $0x8] sm:$0xff]  ;;  %16002 = vst [vmem:[#allocation88_spill] sm:$0xff] %v14787_v3  ;;  %v14801_v2 = vld [vmem:[%s15170_s7 + $0x1a0] sm:$0xff] }
 0x816   :  { %v15790_v30 = vld [vmem:[#allocation56_spill] sm:$0xff]  ;;  %v14766_v49 = vld [vmem:[%s15170_s7 + $0x108] sm:$0xff]  ;;  %16004 = vst [vmem:[#allocation28_spill] sm:$0xff] %v14801_v2  ;;  %v14810_v61 = vld [vmem:[%s15172_s9] sm:$0xf] }
 0x817   :  { %5662 = vmatpush1.bf16.msra.mxu1 %v9198_v51  ;;  %5703 = vmatpush1.bf16.msra.mxu0 %v9262_v33  ;;  %v9243_v51 = vcombine.high %v15775_v26, %v15774_v24  ;;  %v15776_v33 = vld [vmem:[#allocation129_spill] sm:$0xff]  ;;  %v14748_v12 = vld [vmem:[%s15170_s7 + $0x118] sm:$0xff]  ;;  %15999 = vst [vmem:[#allocation90_spill] sm:$0xff] %v14766_v49  ;;  %v14794_v39 = vld [vmem:[%s15170_s7 + $0x1a8] sm:$0xff]  ;;  %v4358_v47 = vrot.slane %v14810_v61, %v12901_v36 }
 0x818   :  { %5663 = vmatprep.subr.bf16.mxu1 %v9195_v22  ;;  %5704 = vmatprep.subr.bf16.mxu0 %v9259_v15  ;;  %v9307_v5 = vcombine.high %v15777_v20, %v15776_v33  ;;  %v9242_v22 = vcombine.low %v15775_v26, %v15774_v24  ;;  %v9306_v43 = vcombine.low %v15777_v20, %v15776_v33  ;;  %v15779_v15 = vld [vmem:[#allocation66_spill] sm:$0xff]  ;;  %v15793_v24 = vld [vmem:[#allocation111_spill] sm:$0xff]  ;;  %v15794_v20 = vld [vmem:[#allocation52_spill] sm:$0xff] }
 0x819   :  { %16003 = vst [vmem:[#allocation86_spill] sm:$0xff] %v14794_v39  ;;  %v4362_v42 = vrot.slane %v14810_v61, %v12907_v38 }
 0x81b   :  { %5664 = vmatpush1.bf16.msra.mxu1 %v9194_v57  ;;  %5705 = vmatpush1.bf16.msra.mxu0 %v9258_v27  ;;  %v9239_v57 = vcombine.high %v15779_v15, %v15778_v17  ;;  %v15780_v27 = vld [vmem:[#allocation125_spill] sm:$0xff] }
 0x81c   :  { %5665 = vmatprep.subr.bf16.mxu1 %v9191_v18  ;;  %5706 = vmatprep.subr.bf16.mxu0 %v9255_v44  ;;  %v9303_v1 = vcombine.high %v15781_v16, %v15780_v27  ;;  %v9238_v18 = vcombine.low %v15779_v15, %v15778_v17  ;;  %v9302_v31 = vcombine.low %v15781_v16, %v15780_v27  ;;  %v15783_v44 = vld [vmem:[#allocation62_spill] sm:$0xff]  ;;  %v15797_v17 = vld [vmem:[#allocation107_spill] sm:$0xff]  ;;  %v15798_v16 = vld [vmem:[#allocation48_spill] sm:$0xff] }
 0x81f   :  { %5666 = vmatpush1.bf16.msra.mxu1 %v9190_v29  ;;  %5707 = vmatpush1.bf16.msra.mxu0 %v9254_v46  ;;  %v9235_v29 = vcombine.high %v15783_v44, %v15782_v53  ;;  %v15784_v46 = vld [vmem:[#allocation121_spill] sm:$0xff] }
 0x820   :  { %5667 = vmatprep.subr.bf16.mxu1 %v9187_v0  ;;  %5708 = vmatprep.subr.bf16.mxu0 %v9251_v52  ;;  %v9299_v8 = vcombine.high %v15785_v56, %v15784_v46  ;;  %v9234_v0 = vcombine.low %v15783_v44, %v15782_v53  ;;  %v9298_v35 = vcombine.low %v15785_v56, %v15784_v46  ;;  %v15787_v52 = vld [vmem:[#allocation58_spill] sm:$0xff]  ;;  %v15801_v53 = vld [vmem:[#allocation103_spill] sm:$0xff]  ;;  %v15802_v56 = vld [vmem:[#allocation44_spill] sm:$0xff] }
 0x823   :  { %5668 = vmatpush1.bf16.msra.mxu1 %v9186_v55  ;;  %5709 = vmatpush1.bf16.msra.mxu0 %v9250_v62  ;;  %v9231_v55 = vcombine.high %v15787_v52, %v15786_v25  ;;  %v15788_v62 = vld [vmem:[#allocation117_spill] sm:$0xff] }
 0x824   :  { %5669 = vmatprep.subr.bf16.mxu1 %v9183_v28  ;;  %5710 = vmatprep.subr.bf16.mxu0 %v9247_v59  ;;  %v9295_v40 = vcombine.high %v15789_v48, %v15788_v62  ;;  %v9230_v28 = vcombine.low %v15787_v52, %v15786_v25  ;;  %v9294_v13 = vcombine.low %v15789_v48, %v15788_v62  ;;  %v15791_v59 = vld [vmem:[#allocation54_spill] sm:$0xff]  ;;  %v15805_v25 = vld [vmem:[#allocation99_spill] sm:$0xff]  ;;  %v15806_v48 = vld [vmem:[#allocation161_spill] sm:$0xff] }
 0x827   :  { %5670 = vmatpush1.bf16.msra.mxu1 %v9182_v60  ;;  %5711 = vmatpush1.bf16.msra.mxu0 %v9246_v9  ;;  %v9227_v60 = vcombine.high %v15791_v59, %v15790_v30  ;;  %v15792_v9 = vld [vmem:[#allocation113_spill] sm:$0xff] }
 0x828   :  { %5671 = vmatprep.subr.bf16.mxu1 %v9243_v51  ;;  %5712 = vmatprep.subr.bf16.mxu0 %v9307_v5  ;;  %v9291_v26 = vcombine.high %v15793_v24, %v15792_v9  ;;  %v9226_v51 = vcombine.low %v15791_v59, %v15790_v30  ;;  %v9290_v33 = vcombine.low %v15793_v24, %v15792_v9  ;;  %v15795_v5 = vld [vmem:[#allocation50_spill] sm:$0xff]  ;;  %v15809_v30 = vld [vmem:[#allocation223_spill] sm:$0xff] }
 0x829   :  { %v14053_v9 = vpack.c.bf16 %v13844_v19, %v13844_v19  ;;  %v14065_v19 = vpack.c.bf16 %v13850_v10, %v13850_v10  ;;  %v15814_v10 = vld [vmem:[#allocation153_spill] sm:$0xff] }
 0x82b   :  { %5672 = vmatpush2.bf16.msra.mxu1 %v9242_v22  ;;  %5713 = vmatpush2.bf16.msra.mxu0 %v9306_v43  ;;  %v9223_v22 = vcombine.high %v15795_v5, %v15794_v20  ;;  %v15796_v43 = vld [vmem:[#allocation109_spill] sm:$0xff] }
 0x82c   :  { %5673 = vmatprep.subr.bf16.mxu1 %v9239_v57  ;;  %5714 = vmatprep.subr.bf16.mxu0 %v9303_v1  ;;  %v9287_v15 = vcombine.high %v15797_v17, %v15796_v43  ;;  %v9222_v57 = vcombine.low %v15795_v5, %v15794_v20  ;;  %v9286_v27 = vcombine.low %v15797_v17, %v15796_v43  ;;  %v15799_v1 = vld [vmem:[#allocation46_spill] sm:$0xff]  ;;  %v15812_v5 = vld [vmem:[#allocation221_spill] sm:$0xff] }
 0x82d   :  { %v14069_v43 = vpack.c.bf16 %v13854_v21, %v13854_v21  ;;  %v15817_v21 = vld [vmem:[#allocation215_spill] sm:$0xff] }
 0x82f   :  { %5674 = vmatpush2.bf16.msra.mxu1 %v9238_v18  ;;  %5715 = vmatpush2.bf16.msra.mxu0 %v9302_v31  ;;  %v9219_v18 = vcombine.high %v15799_v1, %v15798_v16  ;;  %v15800_v31 = vld [vmem:[#allocation105_spill] sm:$0xff] }
 0x830   :  { %5675 = vmatprep.subr.bf16.mxu1 %v9235_v29  ;;  %5716 = vmatprep.subr.bf16.mxu0 %v9299_v8  ;;  %v9283_v44 = vcombine.high %v15801_v53, %v15800_v31  ;;  %v9218_v29 = vcombine.low %v15799_v1, %v15798_v16  ;;  %v9282_v46 = vcombine.low %v15801_v53, %v15800_v31  ;;  %v15803_v8 = vld [vmem:[#allocation42_spill] sm:$0xff]  ;;  %v15816_v16 = vld [vmem:[#allocation217_spill] sm:$0xff] }
 0x831   :  { %v9395_v1 = vcombine.high %v15817_v21, %v15816_v16  ;;  %v9394_v31 = vcombine.low %v15817_v21, %v15816_v16  ;;  %v15818_v53 = vld [vmem:[#allocation149_spill] sm:$0xff] }
 0x832   :  { %v15834_v21 = vld [vmem:[#allocation133_spill] sm:$0xff] }
 0x833   :  { %5676 = vmatpush2.bf16.msra.mxu1 %v9234_v0  ;;  %5717 = vmatpush2.bf16.msra.mxu0 %v9298_v35  ;;  %v9215_v0 = vcombine.high %v15803_v8, %v15802_v56  ;;  %v15804_v35 = vld [vmem:[#allocation101_spill] sm:$0xff] }
 0x834   :  { %5677 = vmatprep.subr.bf16.mxu1 %v9231_v55  ;;  %5718 = vmatprep.subr.bf16.mxu0 %v9295_v40  ;;  %v9279_v52 = vcombine.high %v15805_v25, %v15804_v35  ;;  %v9214_v55 = vcombine.low %v15803_v8, %v15802_v56  ;;  %v9278_v62 = vcombine.low %v15805_v25, %v15804_v35  ;;  %v15807_v40 = vld [vmem:[#allocation159_spill] sm:$0xff]  ;;  %v15822_v25 = vld [vmem:[#allocation145_spill] sm:$0xff] }
 0x835   :  { %v9338_v24 = vcombine.low %v15807_v40, %v15806_v48  ;;  %v15821_v56 = vld [vmem:[#allocation211_spill] sm:$0xff] }
 0x837   :  { %5678 = vmatpush2.bf16.msra.mxu1 %v9230_v28  ;;  %5719 = vmatpush2.bf16.msra.mxu0 %v9294_v13  ;;  %v9339_v28 = vcombine.high %v15807_v40, %v15806_v48  ;;  %v15808_v13 = vld [vmem:[#allocation225_spill] sm:$0xff]  ;;  %v15825_v48 = vld [vmem:[#allocation207_spill] sm:$0xff] }
 0x838   :  { %5679 = vmatprep.subr.bf16.mxu1 %v9227_v60  ;;  %5720 = vmatprep.subr.bf16.mxu0 %v9291_v26  ;;  %v9403_v59 = vcombine.high %v15809_v30, %v15808_v13  ;;  %v14049_v60 = vpack.c.bf16 %v13840_v4, %v13840_v4  ;;  %v9402_v26 = vcombine.low %v15809_v30, %v15808_v13  ;;  %v15813_v4 = vld [vmem:[#allocation219_spill] sm:$0xff]  ;;  %v15826_v30 = vld [vmem:[#allocation141_spill] sm:$0xff] }
 0x83b   :  { %5680 = vmatpush2.bf16.msra.mxu1 %v9226_v51  ;;  %5721 = vmatpush2.bf16.msra.mxu0 %v9290_v33  ;;  %v15810_v51 = vld [vmem:[#allocation157_spill] sm:$0xff]  ;;  %v15811_v33 = vld [vmem:[#allocation155_spill] sm:$0xff] }
 0x83c   :  { %5681 = vmatprep.subr.bf16.mxu1 %v9223_v22  ;;  %5722 = vmatprep.subr.bf16.mxu0 %v9287_v15  ;;  %v9335_v20 = vcombine.high %v15811_v33, %v15810_v51  ;;  %v9399_v22 = vcombine.high %v15813_v4, %v15812_v5  ;;  %v9334_v17 = vcombine.low %v15811_v33, %v15810_v51  ;;  %v15829_v51 = vld [vmem:[#allocation203_spill] sm:$0xff] }
 0x83d   :  { %v9398_v15 = vcombine.low %v15813_v4, %v15812_v5  ;;  %v15830_v4 = vld [vmem:[#allocation137_spill] sm:$0xff] }
 0x83f   :  { %5682 = vmatpush2.bf16.msra.mxu1 %v9222_v57  ;;  %5723 = vmatpush2.bf16.msra.mxu0 %v9286_v27  ;;  %v15815_v57 = vld [vmem:[#allocation151_spill] sm:$0xff] }
 0x840   :  { %5683 = vmatprep.subr.bf16.mxu1 %v9219_v18  ;;  %5724 = vmatprep.subr.bf16.mxu0 %v9283_v44  ;;  %v9331_v27 = vcombine.high %v15815_v57, %v15814_v10  ;;  %v9330_v18 = vcombine.low %v15815_v57, %v15814_v10  ;;  %v15819_v44 = vld [vmem:[#allocation147_spill] sm:$0xff] }
 0x841   :  { %v15833_v10 = vld [vmem:[#allocation199_spill] sm:$0xff] }
 0x843   :  { %5684 = vmatpush2.bf16.msra.mxu1 %v9218_v29  ;;  %5725 = vmatpush2.bf16.msra.mxu0 %v9282_v46  ;;  %v9327_v29 = vcombine.high %v15819_v44, %v15818_v53  ;;  %v15820_v46 = vld [vmem:[#allocation213_spill] sm:$0xff] }
 0x844   :  { %5685 = vmatprep.subr.bf16.mxu1 %v9215_v0  ;;  %5726 = vmatprep.subr.bf16.mxu0 %v9279_v52  ;;  %v9391_v8 = vcombine.high %v15821_v56, %v15820_v46  ;;  %v9326_v0 = vcombine.low %v15819_v44, %v15818_v53  ;;  %v9390_v35 = vcombine.low %v15821_v56, %v15820_v46  ;;  %v15823_v52 = vld [vmem:[#allocation143_spill] sm:$0xff]  ;;  %v15838_v56 = vld [vmem:[#allocation193_spill] sm:$0xff] }
 0x845   :  { %v15837_v53 = vld [vmem:[#allocation195_spill] sm:$0xff] }
 0x847   :  { %5686 = vmatpush2.bf16.msra.mxu1 %v9214_v55  ;;  %5727 = vmatpush2.bf16.msra.mxu0 %v9278_v62  ;;  %v9323_v55 = vcombine.high %v15823_v52, %v15822_v25  ;;  %v15824_v62 = vld [vmem:[#allocation209_spill] sm:$0xff] }
 0x848   :  { %5737 = vmatprep.subr.bf16.mxu1 %v9339_v28  ;;  %5778 = vmatprep.subr.bf16.mxu0 %v9403_v59  ;;  %v9387_v40 = vcombine.high %v15825_v48, %v15824_v62  ;;  %v9322_v28 = vcombine.low %v15823_v52, %v15822_v25  ;;  %v9386_v13 = vcombine.low %v15825_v48, %v15824_v62  ;;  %v15827_v59 = vld [vmem:[#allocation139_spill] sm:$0xff]  ;;  %v15842_v48 = vld [vmem:[#allocation189_spill] sm:$0xff] }
 0x849   :  { %v15841_v25 = vld [vmem:[#allocation255_spill] sm:$0xff] }
 0x84a   :  { %5688 = vmatmul.mubr.bf16.vlgmr.msra.gmra.mxu1 %v14049_v60  ;;  %5729 = vmatmul.mubr.bf16.vlgmr.msra.gmra.mxu0 %v14053_v9 }
 0x84b   :  { %5738 = vmatpush1.bf16.msra.mxu1 %v9338_v24  ;;  %5779 = vmatpush1.bf16.msra.mxu0 %v9402_v26  ;;  %v9319_v24 = vcombine.high %v15827_v59, %v15826_v30  ;;  %v15828_v26 = vld [vmem:[#allocation205_spill] sm:$0xff] }
 0x84c   :  { %5739 = vmatprep.subr.bf16.mxu1 %v9335_v20  ;;  %5780 = vmatprep.subr.bf16.mxu0 %v9399_v22  ;;  %v9383_v33 = vcombine.high %v15829_v51, %v15828_v26  ;;  %v9318_v20 = vcombine.low %v15827_v59, %v15826_v30  ;;  %v9382_v5 = vcombine.low %v15829_v51, %v15828_v26  ;;  %v15831_v22 = vld [vmem:[#allocation135_spill] sm:$0xff]  ;;  %v15846_v51 = vld [vmem:[#allocation185_spill] sm:$0xff] }
 0x84d   :  { %5769 = vmatprep.mubr.bf16.mxu1 %v14065_v19  ;;  %5810 = vmatprep.mubr.bf16.mxu0 %v14069_v43  ;;  %v15845_v30 = vld [vmem:[#allocation251_spill] sm:$0xff] }
 0x84f   :  { %5740 = vmatpush1.bf16.msra.mxu1 %v9334_v17  ;;  %5781 = vmatpush1.bf16.msra.mxu0 %v9398_v15  ;;  %v9315_v17 = vcombine.high %v15831_v22, %v15830_v4  ;;  %v15832_v15 = vld [vmem:[#allocation201_spill] sm:$0xff] }
 0x850   :  { %5741 = vmatprep.subr.bf16.mxu1 %v9331_v27  ;;  %5782 = vmatprep.subr.bf16.mxu0 %v9395_v1  ;;  %v9379_v57 = vcombine.high %v15833_v10, %v15832_v15  ;;  %v9314_v27 = vcombine.low %v15831_v22, %v15830_v4  ;;  %v9378_v16 = vcombine.low %v15833_v10, %v15832_v15  ;;  %v15835_v1 = vld [vmem:[#allocation131_spill] sm:$0xff]  ;;  %v15850_v10 = vld [vmem:[#allocation181_spill] sm:$0xff] }
 0x851   :  { %v15849_v4 = vld [vmem:[#allocation247_spill] sm:$0xff] }
 0x853   :  { %5742 = vmatpush1.bf16.msra.mxu1 %v9330_v18  ;;  %5783 = vmatpush1.bf16.msra.mxu0 %v9394_v31  ;;  %v9311_v18 = vcombine.high %v15835_v1, %v15834_v21  ;;  %v15836_v31 = vld [vmem:[#allocation197_spill] sm:$0xff] }
 0x854   :  { %5743 = vmatprep.subr.bf16.mxu1 %v9327_v29  ;;  %5784 = vmatprep.subr.bf16.mxu0 %v9391_v8  ;;  %v9375_v44 = vcombine.high %v15837_v53, %v15836_v31  ;;  %v9310_v29 = vcombine.low %v15835_v1, %v15834_v21  ;;  %v9374_v46 = vcombine.low %v15837_v53, %v15836_v31  ;;  %v15839_v8 = vld [vmem:[#allocation191_spill] sm:$0xff]  ;;  %v15854_v53 = vld [vmem:[#allocation177_spill] sm:$0xff] }
 0x855   :  { %v15853_v21 = vld [vmem:[#allocation243_spill] sm:$0xff] }
 0x857   :  { %5744 = vmatpush1.bf16.msra.mxu1 %v9326_v0  ;;  %5785 = vmatpush1.bf16.msra.mxu0 %v9390_v35  ;;  %v9371_v0 = vcombine.high %v15839_v8, %v15838_v56  ;;  %v15840_v35 = vld [vmem:[#allocation257_spill] sm:$0xff] }
 0x858   :  { %5745 = vmatprep.subr.bf16.mxu1 %v9323_v55  ;;  %5786 = vmatprep.subr.bf16.mxu0 %v9387_v40  ;;  %v9435_v52 = vcombine.high %v15841_v25, %v15840_v35  ;;  %v9370_v55 = vcombine.low %v15839_v8, %v15838_v56  ;;  %v9434_v62 = vcombine.low %v15841_v25, %v15840_v35  ;;  %v15843_v40 = vld [vmem:[#allocation187_spill] sm:$0xff]  ;;  %v15858_v25 = vld [vmem:[#allocation173_spill] sm:$0xff] }
 0x859   :  { %v15857_v56 = vld [vmem:[#allocation239_spill] sm:$0xff] }
 0x85b   :  { %5746 = vmatpush1.bf16.msra.mxu1 %v9322_v28  ;;  %5787 = vmatpush1.bf16.msra.mxu0 %v9386_v13  ;;  %v9367_v28 = vcombine.high %v15843_v40, %v15842_v48  ;;  %v15844_v13 = vld [vmem:[#allocation253_spill] sm:$0xff] }
 0x85c   :  { %5747 = vmatprep.subr.bf16.mxu1 %v9319_v24  ;;  %5788 = vmatprep.subr.bf16.mxu0 %v9383_v33  ;;  %v9431_v59 = vcombine.high %v15845_v30, %v15844_v13  ;;  %v9366_v24 = vcombine.low %v15843_v40, %v15842_v48  ;;  %v9430_v26 = vcombine.low %v15845_v30, %v15844_v13  ;;  %v15847_v33 = vld [vmem:[#allocation183_spill] sm:$0xff]  ;;  %v15862_v30 = vld [vmem:[#allocation169_spill] sm:$0xff] }
 0x85d   :  { %v15861_v48 = vld [vmem:[#allocation235_spill] sm:$0xff] }
 0x85f   :  { %5748 = vmatpush1.bf16.msra.mxu1 %v9318_v20  ;;  %5789 = vmatpush1.bf16.msra.mxu0 %v9382_v5  ;;  %v9363_v20 = vcombine.high %v15847_v33, %v15846_v51  ;;  %v15848_v5 = vld [vmem:[#allocation249_spill] sm:$0xff] }
 0x860   :  { %5749 = vmatprep.subr.bf16.mxu1 %v9315_v17  ;;  %5790 = vmatprep.subr.bf16.mxu0 %v9379_v57  ;;  %v9427_v22 = vcombine.high %v15849_v4, %v15848_v5  ;;  %v9362_v17 = vcombine.low %v15847_v33, %v15846_v51  ;;  %v9426_v15 = vcombine.low %v15849_v4, %v15848_v5  ;;  %v15851_v57 = vld [vmem:[#allocation179_spill] sm:$0xff]  ;;  %v15866_v4 = vld [vmem:[#allocation165_spill] sm:$0xff] }
 0x861   :  { %v15865_v51 = vld [vmem:[#allocation231_spill] sm:$0xff] }
 0x863   :  { %5750 = vmatpush1.bf16.msra.mxu1 %v9314_v27  ;;  %5791 = vmatpush1.bf16.msra.mxu0 %v9378_v16  ;;  %v9359_v27 = vcombine.high %v15851_v57, %v15850_v10  ;;  %v15852_v16 = vld [vmem:[#allocation245_spill] sm:$0xff] }
 0x864   :  { %5751 = vmatprep.subr.bf16.mxu1 %v9311_v18  ;;  %5792 = vmatprep.subr.bf16.mxu0 %v9375_v44  ;;  %v9423_v1 = vcombine.high %v15853_v21, %v15852_v16  ;;  %v9358_v18 = vcombine.low %v15851_v57, %v15850_v10  ;;  %v9422_v31 = vcombine.low %v15853_v21, %v15852_v16  ;;  %v15855_v44 = vld [vmem:[#allocation175_spill] sm:$0xff]  ;;  %v15870_v21 = vld [vmem:[#allocation41_spill] sm:$0xff] }
 0x865   :  { %v15869_v10 = vld [vmem:[#allocation227_spill] sm:$0xff] }
 0x867   :  { %5752 = vmatpush1.bf16.msra.mxu1 %v9310_v29  ;;  %5793 = vmatpush1.bf16.msra.mxu0 %v9374_v46  ;;  %v9355_v29 = vcombine.high %v15855_v44, %v15854_v53  ;;  %v15856_v46 = vld [vmem:[#allocation241_spill] sm:$0xff] }
 0x868   :  { %5753 = vmatprep.subr.bf16.mxu1 %v9371_v0  ;;  %5794 = vmatprep.subr.bf16.mxu0 %v9435_v52  ;;  %v9419_v8 = vcombine.high %v15857_v56, %v15856_v46  ;;  %v9354_v0 = vcombine.low %v15855_v44, %v15854_v53  ;;  %v9418_v35 = vcombine.low %v15857_v56, %v15856_v46  ;;  %v15859_v52 = vld [vmem:[#allocation171_spill] sm:$0xff]  ;;  %v15873_v53 = vld [vmem:[#allocation97_spill] sm:$0xff] }
 0x869   :  { %v14201_v46 = vpack.c.bf16 %v13852_v45, %v13852_v45 }
 0x86b   :  { %5754 = vmatpush2.bf16.msra.mxu1 %v9370_v55  ;;  %5795 = vmatpush2.bf16.msra.mxu0 %v9434_v62  ;;  %v9351_v55 = vcombine.high %v15859_v52, %v15858_v25  ;;  %v15860_v62 = vld [vmem:[#allocation237_spill] sm:$0xff] }
 0x86c   :  { %5755 = vmatprep.subr.bf16.mxu1 %v9367_v28  ;;  %5796 = vmatprep.subr.bf16.mxu0 %v9431_v59  ;;  %v9415_v40 = vcombine.high %v15861_v48, %v15860_v62  ;;  %v9350_v28 = vcombine.low %v15859_v52, %v15858_v25  ;;  %v9414_v13 = vcombine.low %v15861_v48, %v15860_v62  ;;  %v15863_v59 = vld [vmem:[#allocation167_spill] sm:$0xff]  ;;  %v15876_v52 = vld [vmem:[#allocation96_spill] sm:$0xff]  ;;  %v15878_v48 = vld [vmem:[#allocation37_spill] sm:$0xff] }
 0x86f   :  { %5756 = vmatpush2.bf16.msra.mxu1 %v9366_v24  ;;  %5797 = vmatpush2.bf16.msra.mxu0 %v9430_v26  ;;  %v9347_v24 = vcombine.high %v15863_v59, %v15862_v30  ;;  %v15864_v26 = vld [vmem:[#allocation233_spill] sm:$0xff] }
 0x870   :  { %5757 = vmatprep.subr.bf16.mxu1 %v9363_v20  ;;  %5798 = vmatprep.subr.bf16.mxu0 %v9427_v22  ;;  %v9411_v33 = vcombine.high %v15865_v51, %v15864_v26  ;;  %v9346_v20 = vcombine.low %v15863_v59, %v15862_v30  ;;  %v9410_v5 = vcombine.low %v15865_v51, %v15864_v26  ;;  %v15867_v22 = vld [vmem:[#allocation163_spill] sm:$0xff]  ;;  %v15881_v30 = vld [vmem:[#allocation93_spill] sm:$0xff] }
 0x871   :  { %v15882_v51 = vld [vmem:[#allocation35_spill] sm:$0xff] }
 0x873   :  { %5758 = vmatpush2.bf16.msra.mxu1 %v9362_v17  ;;  %5799 = vmatpush2.bf16.msra.mxu0 %v9426_v15  ;;  %v9343_v17 = vcombine.high %v15867_v22, %v15866_v4  ;;  %v15868_v15 = vld [vmem:[#allocation229_spill] sm:$0xff] }
 0x874   :  { %5759 = vmatprep.subr.bf16.mxu1 %v9359_v27  ;;  %5800 = vmatprep.subr.bf16.mxu0 %v9423_v1  ;;  %v9407_v57 = vcombine.high %v15869_v10, %v15868_v15  ;;  %v9342_v27 = vcombine.low %v15867_v22, %v15866_v4  ;;  %v9406_v16 = vcombine.low %v15869_v10, %v15868_v15  ;;  %v15871_v1 = vld [vmem:[#allocation40_spill] sm:$0xff]  ;;  %v15885_v4 = vld [vmem:[#allocation91_spill] sm:$0xff] }
 0x875   :  { %v9212_v56 = vcombine.low %v15871_v1, %v15870_v21  ;;  %v15887_v15 = vld [vmem:[#allocation31_spill] sm:$0xff] }
 0x877   :  { %5760 = vmatpush2.bf16.msra.mxu1 %v9358_v18  ;;  %5801 = vmatpush2.bf16.msra.mxu0 %v9422_v31  ;;  %v9213_v18 = vcombine.high %v15871_v1, %v15870_v21  ;;  %v15872_v31 = vld [vmem:[#allocation98_spill] sm:$0xff] }
 0x878   :  { %5761 = vmatprep.subr.bf16.mxu1 %v9355_v29  ;;  %5802 = vmatprep.subr.bf16.mxu0 %v9419_v8  ;;  %v9277_v44 = vcombine.high %v15873_v53, %v15872_v31  ;;  %v14197_v29 = vpack.c.bf16 %v13848_v11, %v13848_v11  ;;  %v9276_v8 = vcombine.low %v15873_v53, %v15872_v31  ;;  %v15877_v11 = vld [vmem:[#allocation95_spill] sm:$0xff] }
 0x879   :  { %v9272_v62 = vcombine.low %v15877_v11, %v15876_v52  ;;  %v15891_v31 = vld [vmem:[#allocation27_spill] sm:$0xff] }
 0x87b   :  { %5762 = vmatpush2.bf16.msra.mxu1 %v9354_v0  ;;  %5803 = vmatpush2.bf16.msra.mxu0 %v9418_v35  ;;  %v15874_v0 = vld [vmem:[#allocation39_spill] sm:$0xff]  ;;  %v15875_v35 = vld [vmem:[#allocation38_spill] sm:$0xff] }
 0x87c   :  { %5763 = vmatprep.subr.bf16.mxu1 %v9351_v55  ;;  %5804 = vmatprep.subr.bf16.mxu0 %v9415_v40  ;;  %v9209_v25 = vcombine.high %v15875_v35, %v15874_v0  ;;  %v9273_v55 = vcombine.high %v15877_v11, %v15876_v52  ;;  %v9208_v45 = vcombine.low %v15875_v35, %v15874_v0  ;;  %v15879_v40 = vld [vmem:[#allocation36_spill] sm:$0xff]  ;;  %v15895_v52 = vld [vmem:[#allocation23_spill] sm:$0xff] }
 0x87f   :  { %5764 = vmatpush2.bf16.msra.mxu1 %v9350_v28  ;;  %5805 = vmatpush2.bf16.msra.mxu0 %v9414_v13  ;;  %v9205_v28 = vcombine.high %v15879_v40, %v15878_v48  ;;  %v15880_v13 = vld [vmem:[#allocation94_spill] sm:$0xff] }
 0x880   :  { %5765 = vmatprep.subr.bf16.mxu1 %v9347_v24  ;;  %5806 = vmatprep.subr.bf16.mxu0 %v9411_v33  ;;  %v9269_v59 = vcombine.high %v15881_v30, %v15880_v13  ;;  %v9204_v24 = vcombine.low %v15879_v40, %v15878_v48  ;;  %v9268_v26 = vcombine.low %v15881_v30, %v15880_v13  ;;  %v15883_v33 = vld [vmem:[#allocation34_spill] sm:$0xff]  ;;  %v15899_v13 = vld [vmem:[#allocation19_spill] sm:$0xff] }
 0x883   :  { %5766 = vmatpush2.bf16.msra.mxu1 %v9346_v20  ;;  %5807 = vmatpush2.bf16.msra.mxu0 %v9410_v5  ;;  %v9201_v20 = vcombine.high %v15883_v33, %v15882_v51  ;;  %v15884_v5 = vld [vmem:[#allocation92_spill] sm:$0xff] }
 0x884   :  { %5767 = vmatprep.subr.bf16.mxu1 %v9343_v17  ;;  %5808 = vmatprep.subr.bf16.mxu0 %v9407_v57  ;;  %v9265_v22 = vcombine.high %v15885_v4, %v15884_v5  ;;  %v15886_v17 = vld [vmem:[#allocation33_spill] sm:$0xff] }
 0x885   :  { %v9197_v10 = vcombine.high %v15887_v15, %v15886_v17  ;;  %v15888_v57 = vld [vmem:[#allocation89_spill] sm:$0xff]  ;;  %v9196_v21 = vcombine.low %v15887_v15, %v15886_v17 }
 0x887   :  { %5768 = vmatpush2.bf16.msra.mxu1 %v9342_v27  ;;  %5809 = vmatpush2.bf16.msra.mxu0 %v9406_v16  ;;  %v15889_v27 = vld [vmem:[#allocation87_spill] sm:$0xff] }
 0x888   :  { %5819 = vmatprep.subr.bf16.mxu1 %v9213_v18  ;;  %5860 = vmatprep.subr.bf16.mxu0 %v9277_v44  ;;  %v9261_v16 = vcombine.high %v15889_v27, %v15888_v57  ;;  %v9260_v1 = vcombine.low %v15889_v27, %v15888_v57  ;;  %v15890_v18 = vld [vmem:[#allocation29_spill] sm:$0xff]  ;;  %v15907_v57 = vld [vmem:[#allocation67_spill] sm:$0xff] }
 0x889   :  { %v9193_v53 = vcombine.high %v15891_v31, %v15890_v18  ;;  %v15892_v44 = vld [vmem:[#allocation85_spill] sm:$0xff]  ;;  %v9192_v0 = vcombine.low %v15891_v31, %v15890_v18 }
 0x88a   :  { %5770 = vmatmul.mubr.bf16.vlgmr.msra.gmra.mxu1 %v14197_v29  ;;  %5811 = vmatmul.mubr.bf16.vlgmr.msra.gmra.mxu0 %v14201_v46 }
 0x88b   :  { %5820 = vmatpush1.bf16.msra.mxu1 %v9212_v56  ;;  %5861 = vmatpush1.bf16.msra.mxu0 %v9276_v8  ;;  %v15893_v56 = vld [vmem:[#allocation83_spill] sm:$0xff] }
 0x88c   :  { %5821 = vmatprep.subr.bf16.mxu1 %v9209_v25  ;;  %5862 = vmatprep.subr.bf16.mxu0 %v9273_v55  ;;  %v9257_v8 = vcombine.high %v15893_v56, %v15892_v44  ;;  %v9256_v35 = vcombine.low %v15893_v56, %v15892_v44  ;;  %v15894_v25 = vld [vmem:[#allocation25_spill] sm:$0xff]  ;;  %v15911_v44 = vld [vmem:[#allocation63_spill] sm:$0xff] }
 0x88d   :  { %5851 = vmatprep.mubr.bf16.mxu1 %v13951_v37  ;;  %5892 = vmatprep.mubr.bf16.mxu0 %v13955_v34  ;;  %v9200_v37 = vcombine.low %v15883_v33, %v15882_v51  ;;  %v9264_v34 = vcombine.low %v15885_v4, %v15884_v5  ;;  %v9189_v11 = vcombine.high %v15895_v52, %v15894_v25  ;;  %v15896_v55 = vld [vmem:[#allocation81_spill] sm:$0xff]  ;;  %v15903_v5 = vld [vmem:[#allocation71_spill] sm:$0xff] }
 0x88e   :  { %v9188_v48 = vcombine.low %v15895_v52, %v15894_v25 }
 0x88f   :  { %5822 = vmatpush1.bf16.msra.mxu1 %v9208_v45  ;;  %5863 = vmatpush1.bf16.msra.mxu0 %v9272_v62  ;;  %v15897_v45 = vld [vmem:[#allocation79_spill] sm:$0xff] }
 0x890   :  { %5823 = vmatprep.subr.bf16.mxu1 %v9205_v28  ;;  %5864 = vmatprep.subr.bf16.mxu0 %v9269_v59  ;;  %v9253_v62 = vcombine.high %v15897_v45, %v15896_v55  ;;  %v9252_v40 = vcombine.low %v15897_v45, %v15896_v55  ;;  %v15898_v28 = vld [vmem:[#allocation21_spill] sm:$0xff]  ;;  %v15915_v55 = vld [vmem:[#allocation59_spill] sm:$0xff] }
 0x891   :  { %v9185_v30 = vcombine.high %v15899_v13, %v15898_v28  ;;  %v15900_v59 = vld [vmem:[#allocation77_spill] sm:$0xff]  ;;  %v9184_v51 = vcombine.low %v15899_v13, %v15898_v28 }
 0x893   :  { %5824 = vmatpush1.bf16.msra.mxu1 %v9204_v24  ;;  %5865 = vmatpush1.bf16.msra.mxu0 %v9268_v26  ;;  %v15901_v24 = vld [vmem:[#allocation75_spill] sm:$0xff] }
 0x894   :  { %5825 = vmatprep.subr.bf16.mxu1 %v9201_v20  ;;  %5866 = vmatprep.subr.bf16.mxu0 %v9265_v22  ;;  %v9249_v26 = vcombine.high %v15901_v24, %v15900_v59  ;;  %v9248_v33 = vcombine.low %v15901_v24, %v15900_v59  ;;  %v15902_v20 = vld [vmem:[#allocation73_spill] sm:$0xff]  ;;  %v15904_v22 = vld [vmem:[#allocation130_spill] sm:$0xff]  ;;  %v15919_v59 = vld [vmem:[#allocation55_spill] sm:$0xff] }
 0x895   :  { %v9245_v4 = vcombine.high %v15903_v5, %v15902_v20  ;;  %v9244_v17 = vcombine.low %v15903_v5, %v15902_v20 }
 0x897   :  { %5826 = vmatpush1.bf16.msra.mxu1 %v9200_v37  ;;  %5867 = vmatpush1.bf16.msra.mxu0 %v9264_v34  ;;  %v15905_v37 = vld [vmem:[#allocation128_spill] sm:$0xff] }
 0x898   :  { %5827 = vmatprep.subr.bf16.mxu1 %v9197_v10  ;;  %5868 = vmatprep.subr.bf16.mxu0 %v9261_v16  ;;  %v9309_v34 = vcombine.high %v15905_v37, %v15904_v22  ;;  %v9308_v15 = vcombine.low %v15905_v37, %v15904_v22  ;;  %v15906_v10 = vld [vmem:[#allocation69_spill] sm:$0xff]  ;;  %v15908_v16 = vld [vmem:[#allocation126_spill] sm:$0xff]  ;;  %v15923_v22 = vld [vmem:[#allocation51_spill] sm:$0xff] }
 0x899   :  { %v9241_v27 = vcombine.high %v15907_v57, %v15906_v10  ;;  %v9240_v18 = vcombine.low %v15907_v57, %v15906_v10 }
 0x89b   :  { %5828 = vmatpush1.bf16.msra.mxu1 %v9196_v21  ;;  %5869 = vmatpush1.bf16.msra.mxu0 %v9260_v1  ;;  %v15909_v21 = vld [vmem:[#allocation124_spill] sm:$0xff] }
 0x89c   :  { %5829 = vmatprep.subr.bf16.mxu1 %v9193_v53  ;;  %5870 = vmatprep.subr.bf16.mxu0 %v9257_v8  ;;  %v9305_v1 = vcombine.high %v15909_v21, %v15908_v16  ;;  %v9304_v31 = vcombine.low %v15909_v21, %v15908_v16  ;;  %v15910_v53 = vld [vmem:[#allocation65_spill] sm:$0xff]  ;;  %v15912_v8 = vld [vmem:[#allocation122_spill] sm:$0xff]  ;;  %v15927_v16 = vld [vmem:[#allocation47_spill] sm:$0xff] }
 0x89d   :  { %v9237_v56 = vcombine.high %v15911_v44, %v15910_v53  ;;  %v9236_v25 = vcombine.low %v15911_v44, %v15910_v53 }
 0x89f   :  { %5830 = vmatpush1.bf16.msra.mxu1 %v9192_v0  ;;  %5871 = vmatpush1.bf16.msra.mxu0 %v9256_v35  ;;  %v15913_v0 = vld [vmem:[#allocation120_spill] sm:$0xff] }
 0x8a0   :  { %5831 = vmatprep.subr.bf16.mxu1 %v9189_v11  ;;  %5872 = vmatprep.subr.bf16.mxu0 %v9253_v62  ;;  %v9301_v35 = vcombine.high %v15913_v0, %v15912_v8  ;;  %v9300_v52 = vcombine.low %v15913_v0, %v15912_v8  ;;  %v15914_v11 = vld [vmem:[#allocation61_spill] sm:$0xff]  ;;  %v15916_v62 = vld [vmem:[#allocation118_spill] sm:$0xff]  ;;  %v15931_v8 = vld [vmem:[#allocation43_spill] sm:$0xff] }
 0x8a1   :  { %v9233_v45 = vcombine.high %v15915_v55, %v15914_v11  ;;  %v9232_v28 = vcombine.low %v15915_v55, %v15914_v11 }
 0x8a3   :  { %5832 = vmatpush1.bf16.msra.mxu1 %v9188_v48  ;;  %5873 = vmatpush1.bf16.msra.mxu0 %v9252_v40  ;;  %v15917_v48 = vld [vmem:[#allocation116_spill] sm:$0xff] }
 0x8a4   :  { %5833 = vmatprep.subr.bf16.mxu1 %v9185_v30  ;;  %5874 = vmatprep.subr.bf16.mxu0 %v9249_v26  ;;  %v9297_v40 = vcombine.high %v15917_v48, %v15916_v62  ;;  %v9296_v13 = vcombine.low %v15917_v48, %v15916_v62  ;;  %v15918_v30 = vld [vmem:[#allocation57_spill] sm:$0xff]  ;;  %v15920_v26 = vld [vmem:[#allocation114_spill] sm:$0xff]  ;;  %v15935_v62 = vld [vmem:[#allocation160_spill] sm:$0xff] }
 0x8a5   :  { %v9229_v24 = vcombine.high %v15919_v59, %v15918_v30  ;;  %v9228_v20 = vcombine.low %v15919_v59, %v15918_v30 }
 0x8a7   :  { %5834 = vmatpush1.bf16.msra.mxu1 %v9184_v51  ;;  %5875 = vmatpush1.bf16.msra.mxu0 %v9248_v33  ;;  %v15921_v51 = vld [vmem:[#allocation112_spill] sm:$0xff] }
 0x8a8   :  { %5835 = vmatprep.subr.bf16.mxu1 %v9245_v4  ;;  %5876 = vmatprep.subr.bf16.mxu0 %v9309_v34  ;;  %v9293_v33 = vcombine.high %v15921_v51, %v15920_v26  ;;  %v9292_v5 = vcombine.low %v15921_v51, %v15920_v26  ;;  %v15922_v4 = vld [vmem:[#allocation53_spill] sm:$0xff]  ;;  %v15924_v34 = vld [vmem:[#allocation110_spill] sm:$0xff]  ;;  %v15939_v26 = vld [vmem:[#allocation156_spill] sm:$0xff] }
 0x8a9   :  { %v9225_v37 = vcombine.high %v15923_v22, %v15922_v4  ;;  %v9224_v10 = vcombine.low %v15923_v22, %v15922_v4 }
 0x8ab   :  { %5836 = vmatpush2.bf16.msra.mxu1 %v9244_v17  ;;  %5877 = vmatpush2.bf16.msra.mxu0 %v9308_v15  ;;  %v15925_v17 = vld [vmem:[#allocation108_spill] sm:$0xff] }
 0x8ac   :  { %5837 = vmatprep.subr.bf16.mxu1 %v9241_v27  ;;  %5878 = vmatprep.subr.bf16.mxu0 %v9305_v1  ;;  %v9289_v15 = vcombine.high %v15925_v17, %v15924_v34  ;;  %v9288_v57 = vcombine.low %v15925_v17, %v15924_v34  ;;  %v15926_v27 = vld [vmem:[#allocation49_spill] sm:$0xff]  ;;  %v15928_v1 = vld [vmem:[#allocation106_spill] sm:$0xff]  ;;  %v15943_v34 = vld [vmem:[#allocation152_spill] sm:$0xff] }
 0x8ad   :  { %v9221_v21 = vcombine.high %v15927_v16, %v15926_v27  ;;  %v9220_v53 = vcombine.low %v15927_v16, %v15926_v27  ;;  %v15946_v27 = vld [vmem:[#allocation150_spill] sm:$0xff]  ;;  %v15947_v16 = vld [vmem:[#allocation148_spill] sm:$0xff] }
 0x8af   :  { %5838 = vmatpush2.bf16.msra.mxu1 %v9240_v18  ;;  %5879 = vmatpush2.bf16.msra.mxu0 %v9304_v31  ;;  %v15929_v18 = vld [vmem:[#allocation104_spill] sm:$0xff] }
 0x8b0   :  { %5839 = vmatprep.subr.bf16.mxu1 %v9237_v56  ;;  %5880 = vmatprep.subr.bf16.mxu0 %v9301_v35  ;;  %v9285_v31 = vcombine.high %v15929_v18, %v15928_v1  ;;  %v9284_v44 = vcombine.low %v15929_v18, %v15928_v1  ;;  %v15930_v56 = vld [vmem:[#allocation45_spill] sm:$0xff]  ;;  %v15932_v35 = vld [vmem:[#allocation102_spill] sm:$0xff]  ;;  %v15949_v18 = vld [vmem:[#allocation212_spill] sm:$0xff] }
 0x8b1   :  { %v9217_v0 = vcombine.high %v15931_v8, %v15930_v56  ;;  %v9216_v11 = vcombine.low %v15931_v8, %v15930_v56  ;;  %v15948_v1 = vld [vmem:[#allocation214_spill] sm:$0xff] }
 0x8b2   :  { %v15952_v8 = vld [vmem:[#allocation210_spill] sm:$0xff] }
 0x8b3   :  { %5840 = vmatpush2.bf16.msra.mxu1 %v9236_v25  ;;  %5881 = vmatpush2.bf16.msra.mxu0 %v9300_v52  ;;  %v15933_v25 = vld [vmem:[#allocation100_spill] sm:$0xff] }
 0x8b4   :  { %5841 = vmatprep.subr.bf16.mxu1 %v9233_v45  ;;  %5882 = vmatprep.subr.bf16.mxu0 %v9297_v40  ;;  %v9281_v52 = vcombine.high %v15933_v25, %v15932_v35  ;;  %v9280_v55 = vcombine.low %v15933_v25, %v15932_v35  ;;  %v15934_v45 = vld [vmem:[#allocation162_spill] sm:$0xff] }
 0x8b5   :  { %v9341_v48 = vcombine.high %v15935_v62, %v15934_v45  ;;  %v15936_v40 = vld [vmem:[#allocation226_spill] sm:$0xff]  ;;  %v9340_v30 = vcombine.low %v15935_v62, %v15934_v45 }
 0x8b6   :  { %v15956_v62 = vld [vmem:[#allocation206_spill] sm:$0xff] }
 0x8b7   :  { %5842 = vmatpush2.bf16.msra.mxu1 %v9232_v28  ;;  %5883 = vmatpush2.bf16.msra.mxu0 %v9296_v13  ;;  %v15937_v28 = vld [vmem:[#allocation224_spill] sm:$0xff] }
 0x8b8   :  { %5843 = vmatprep.subr.bf16.mxu1 %v9229_v24  ;;  %5884 = vmatprep.subr.bf16.mxu0 %v9293_v33  ;;  %v9405_v13 = vcombine.high %v15937_v28, %v15936_v40  ;;  %v9404_v59 = vcombine.low %v15937_v28, %v15936_v40  ;;  %v15938_v24 = vld [vmem:[#allocation158_spill] sm:$0xff] }
 0x8b9   :  { %v9337_v51 = vcombine.high %v15939_v26, %v15938_v24  ;;  %v15940_v33 = vld [vmem:[#allocation222_spill] sm:$0xff]  ;;  %v9336_v4 = vcombine.low %v15939_v26, %v15938_v24 }
 0x8ba   :  { %v15960_v26 = vld [vmem:[#allocation202_spill] sm:$0xff] }
 0x8bb   :  { %5844 = vmatpush2.bf16.msra.mxu1 %v9228_v20  ;;  %5885 = vmatpush2.bf16.msra.mxu0 %v9292_v5  ;;  %v15941_v20 = vld [vmem:[#allocation220_spill] sm:$0xff] }
 0x8bc   :  { %5845 = vmatprep.subr.bf16.mxu1 %v9225_v37  ;;  %5886 = vmatprep.subr.bf16.mxu0 %v9289_v15  ;;  %v9401_v5 = vcombine.high %v15941_v20, %v15940_v33  ;;  %v9400_v22 = vcombine.low %v15941_v20, %v15940_v33  ;;  %v15942_v37 = vld [vmem:[#allocation154_spill] sm:$0xff] }
 0x8bd   :  { %v9333_v17 = vcombine.high %v15943_v34, %v15942_v37  ;;  %v15944_v15 = vld [vmem:[#allocation218_spill] sm:$0xff] }
 0x8bf   :  { %5846 = vmatpush2.bf16.msra.mxu1 %v9224_v10  ;;  %5887 = vmatpush2.bf16.msra.mxu0 %v9288_v57  ;;  %v15945_v10 = vld [vmem:[#allocation216_spill] sm:$0xff] }
 0x8c0   :  { %5847 = vmatprep.subr.bf16.mxu1 %v9221_v21  ;;  %5888 = vmatprep.subr.bf16.mxu0 %v9285_v31  ;;  %v9397_v57 = vcombine.high %v15945_v10, %v15944_v15  ;;  %v9329_v21 = vcombine.high %v15947_v16, %v15946_v27  ;;  %v9393_v31 = vcombine.high %v15949_v18, %v15948_v1 }
 0x8c3   :  { %5848 = vmatpush2.bf16.msra.mxu1 %v9220_v53  ;;  %5889 = vmatpush2.bf16.msra.mxu0 %v9284_v44  ;;  %v15950_v53 = vld [vmem:[#allocation146_spill] sm:$0xff]  ;;  %v15951_v44 = vld [vmem:[#allocation144_spill] sm:$0xff] }
 0x8c4   :  { %5849 = vmatprep.subr.bf16.mxu1 %v9217_v0  ;;  %5890 = vmatprep.subr.bf16.mxu0 %v9281_v52  ;;  %v9325_v56 = vcombine.high %v15951_v44, %v15950_v53  ;;  %v15953_v0 = vld [vmem:[#allocation208_spill] sm:$0xff]  ;;  %v9324_v25 = vcombine.low %v15951_v44, %v15950_v53  ;;  %v15972_v44 = vld [vmem:[#allocation254_spill] sm:$0xff] }
 0x8c5   :  { %v9389_v35 = vcombine.high %v15953_v0, %v15952_v8  ;;  %v9388_v52 = vcombine.low %v15953_v0, %v15952_v8 }
 0x8c7   :  { %5850 = vmatpush2.bf16.msra.mxu1 %v9216_v11  ;;  %5891 = vmatpush2.bf16.msra.mxu0 %v9280_v55  ;;  %v15954_v11 = vld [vmem:[#allocation142_spill] sm:$0xff]  ;;  %v15955_v55 = vld [vmem:[#allocation140_spill] sm:$0xff] }
 0x8c8   :  { %5901 = vmatprep.subr.bf16.mxu1 %v9341_v48  ;;  %5942 = vmatprep.subr.bf16.mxu0 %v9405_v13  ;;  %v9321_v45 = vcombine.high %v15955_v55, %v15954_v11  ;;  %v15957_v48 = vld [vmem:[#allocation204_spill] sm:$0xff]  ;;  %v9320_v28 = vcombine.low %v15955_v55, %v15954_v11  ;;  %v15976_v55 = vld [vmem:[#allocation250_spill] sm:$0xff] }
 0x8c9   :  { %v9385_v40 = vcombine.high %v15957_v48, %v15956_v62  ;;  %v9384_v13 = vcombine.low %v15957_v48, %v15956_v62 }
 0x8ca   :  { %5852 = vmatmul.mubr.bf16.vlgmr.msra.gmra.mxu1 %v14049_v60  ;;  %5893 = vmatmul.mubr.bf16.vlgmr.msra.gmra.mxu0 %v14053_v9  ;;  %v9332_v60 = vcombine.low %v15943_v34, %v15942_v37  ;;  %v9396_v9 = vcombine.low %v15945_v10, %v15944_v15  ;;  %v15964_v34 = vld [vmem:[#allocation198_spill] sm:$0xff] }
 0x8cb   :  { %5902 = vmatpush1.bf16.msra.mxu1 %v9340_v30  ;;  %5943 = vmatpush1.bf16.msra.mxu0 %v9404_v59  ;;  %v15958_v30 = vld [vmem:[#allocation138_spill] sm:$0xff]  ;;  %v15959_v59 = vld [vmem:[#allocation136_spill] sm:$0xff] }
 0x8cc   :  { %5903 = vmatprep.subr.bf16.mxu1 %v9337_v51  ;;  %5944 = vmatprep.subr.bf16.mxu0 %v9401_v5  ;;  %v9317_v24 = vcombine.high %v15959_v59, %v15958_v30  ;;  %v15961_v51 = vld [vmem:[#allocation200_spill] sm:$0xff]  ;;  %v9316_v20 = vcombine.low %v15959_v59, %v15958_v30  ;;  %v15980_v59 = vld [vmem:[#allocation246_spill] sm:$0xff] }
 0x8cd   :  { %5933 = vmatprep.mubr.bf16.mxu1 %v14065_v19  ;;  %5974 = vmatprep.mubr.bf16.mxu0 %v14069_v43  ;;  %v9328_v19 = vcombine.low %v15947_v16, %v15946_v27  ;;  %v9392_v43 = vcombine.low %v15949_v18, %v15948_v1  ;;  %v9381_v33 = vcombine.high %v15961_v51, %v15960_v26  ;;  %v15968_v16 = vld [vmem:[#allocation258_spill] sm:$0xff] }
 0x8ce   :  { %v9380_v5 = vcombine.low %v15961_v51, %v15960_v26 }
 0x8cf   :  { %5904 = vmatpush1.bf16.msra.mxu1 %v9336_v4  ;;  %5945 = vmatpush1.bf16.msra.mxu0 %v9400_v22  ;;  %v15962_v4 = vld [vmem:[#allocation134_spill] sm:$0xff]  ;;  %v15963_v22 = vld [vmem:[#allocation132_spill] sm:$0xff] }
 0x8d0   :  { %5905 = vmatprep.subr.bf16.mxu1 %v9333_v17  ;;  %5946 = vmatprep.subr.bf16.mxu0 %v9397_v57  ;;  %v9313_v37 = vcombine.high %v15963_v22, %v15962_v4  ;;  %v15965_v17 = vld [vmem:[#allocation196_spill] sm:$0xff]  ;;  %v9312_v10 = vcombine.low %v15963_v22, %v15962_v4  ;;  %v15984_v22 = vld [vmem:[#allocation242_spill] sm:$0xff] }
 0x8d1   :  { %v9377_v15 = vcombine.high %v15965_v17, %v15964_v34  ;;  %v9376_v57 = vcombine.low %v15965_v17, %v15964_v34 }
 0x8d3   :  { %5906 = vmatpush1.bf16.msra.mxu1 %v9332_v60  ;;  %5947 = vmatpush1.bf16.msra.mxu0 %v9396_v9  ;;  %v15966_v60 = vld [vmem:[#allocation194_spill] sm:$0xff]  ;;  %v15967_v9 = vld [vmem:[#allocation192_spill] sm:$0xff] }
 0x8d4   :  { %5907 = vmatprep.subr.bf16.mxu1 %v9329_v21  ;;  %5948 = vmatprep.subr.bf16.mxu0 %v9393_v31  ;;  %v9373_v27 = vcombine.high %v15967_v9, %v15966_v60  ;;  %v15969_v21 = vld [vmem:[#allocation256_spill] sm:$0xff]  ;;  %v9372_v18 = vcombine.low %v15967_v9, %v15966_v60  ;;  %v15988_v9 = vld [vmem:[#allocation238_spill] sm:$0xff] }
 0x8d5   :  { %v9437_v1 = vcombine.high %v15969_v21, %v15968_v16  ;;  %v9436_v31 = vcombine.low %v15969_v21, %v15968_v16 }
 0x8d7   :  { %5908 = vmatpush1.bf16.msra.mxu1 %v9328_v19  ;;  %5949 = vmatpush1.bf16.msra.mxu0 %v9392_v43  ;;  %v15970_v19 = vld [vmem:[#allocation190_spill] sm:$0xff]  ;;  %v15971_v43 = vld [vmem:[#allocation188_spill] sm:$0xff] }
 0x8d8   :  { %5909 = vmatprep.subr.bf16.mxu1 %v9325_v56  ;;  %5950 = vmatprep.subr.bf16.mxu0 %v9389_v35  ;;  %v9369_v53 = vcombine.high %v15971_v43, %v15970_v19  ;;  %v15973_v56 = vld [vmem:[#allocation252_spill] sm:$0xff]  ;;  %v9368_v0 = vcombine.low %v15971_v43, %v15970_v19  ;;  %v15992_v43 = vld [vmem:[#allocation234_spill] sm:$0xff] }
 0x8d9   :  { %v9433_v8 = vcombine.high %v15973_v56, %v15972_v44  ;;  %v9432_v35 = vcombine.low %v15973_v56, %v15972_v44 }
 0x8db   :  { %5910 = vmatpush1.bf16.msra.mxu1 %v9324_v25  ;;  %5951 = vmatpush1.bf16.msra.mxu0 %v9388_v52  ;;  %v15974_v25 = vld [vmem:[#allocation186_spill] sm:$0xff]  ;;  %v15975_v52 = vld [vmem:[#allocation184_spill] sm:$0xff] }
 0x8dc   :  { %5911 = vmatprep.subr.bf16.mxu1 %v9321_v45  ;;  %5952 = vmatprep.subr.bf16.mxu0 %v9385_v40  ;;  %v9365_v11 = vcombine.high %v15975_v52, %v15974_v25  ;;  %v15977_v45 = vld [vmem:[#allocation248_spill] sm:$0xff]  ;;  %v9364_v48 = vcombine.low %v15975_v52, %v15974_v25  ;;  %v15996_v52 = vld [vmem:[#allocation230_spill] sm:$0xff] }
 0x8dd   :  { %v9429_v62 = vcombine.high %v15977_v45, %v15976_v55  ;;  %v9428_v40 = vcombine.low %v15977_v45, %v15976_v55 }
 0x8df   :  { %5912 = vmatpush1.bf16.msra.mxu1 %v9320_v28  ;;  %5953 = vmatpush1.bf16.msra.mxu0 %v9384_v13  ;;  %v15978_v28 = vld [vmem:[#allocation182_spill] sm:$0xff]  ;;  %v15979_v13 = vld [vmem:[#allocation180_spill] sm:$0xff] }
 0x8e0   :  { %5913 = vmatprep.subr.bf16.mxu1 %v9317_v24  ;;  %5954 = vmatprep.subr.bf16.mxu0 %v9381_v33  ;;  %v9361_v30 = vcombine.high %v15979_v13, %v15978_v28  ;;  %v15981_v24 = vld [vmem:[#allocation244_spill] sm:$0xff]  ;;  %v9360_v51 = vcombine.low %v15979_v13, %v15978_v28  ;;  %v15998_v28 = vmov 0.0   ;;  %v14478_v13 = vld [vmem:[%s15170_s7 + $0xf0] sm:$0xff] }
 0x8e1   :  { %v9425_v26 = vcombine.high %v15981_v24, %v15980_v59  ;;  %v9424_v33 = vcombine.low %v15981_v24, %v15980_v59  ;;  %v14489_v24 = vld [vmem:[%s15170_s7 + $0x70] sm:$0xff] }
 0x8e3   :  { %5914 = vmatpush1.bf16.msra.mxu1 %v9316_v20  ;;  %5955 = vmatpush1.bf16.msra.mxu0 %v9380_v5  ;;  %v15982_v20 = vld [vmem:[#allocation178_spill] sm:$0xff]  ;;  %v15983_v5 = vld [vmem:[#allocation176_spill] sm:$0xff] }
 0x8e4   :  { %5915 = vmatprep.subr.bf16.mxu1 %v9313_v37  ;;  %5956 = vmatprep.subr.bf16.mxu0 %v9377_v15  ;;  %v9357_v4 = vcombine.high %v15983_v5, %v15982_v20  ;;  %v15985_v37 = vld [vmem:[#allocation240_spill] sm:$0xff]  ;;  %v9356_v17 = vcombine.low %v15983_v5, %v15982_v20 }
 0x8e5   :  { %v9421_v34 = vcombine.high %v15985_v37, %v15984_v22  ;;  %v9420_v15 = vcombine.low %v15985_v37, %v15984_v22  ;;  %v14523_v22 = vld [vmem:[%s15170_s7 + $0xd8] sm:$0xff] }
 0x8e7   :  { %5916 = vmatpush1.bf16.msra.mxu1 %v9312_v10  ;;  %5957 = vmatpush1.bf16.msra.mxu0 %v9376_v57  ;;  %v15986_v10 = vld [vmem:[#allocation174_spill] sm:$0xff]  ;;  %v15987_v57 = vld [vmem:[#allocation172_spill] sm:$0xff] }
 0x8e8   :  { %5917 = vmatprep.subr.bf16.mxu1 %v9373_v27  ;;  %5958 = vmatprep.subr.bf16.mxu0 %v9437_v1  ;;  %v9353_v60 = vcombine.high %v15987_v57, %v15986_v10  ;;  %v15989_v27 = vld [vmem:[#allocation236_spill] sm:$0xff]  ;;  %v9352_v21 = vcombine.low %v15987_v57, %v15986_v10  ;;  %v14539_v10 = vld [vmem:[%s15170_s7 + $0x170] sm:$0xff] }
 0x8e9   :  { %v9417_v16 = vcombine.high %v15989_v27, %v15988_v9  ;;  %v9416_v1 = vcombine.low %v15989_v27, %v15988_v9  ;;  %v14545_v57 = vld [vmem:[%s15170_s7 + $0xd0] sm:$0xff]  ;;  %v14558_v9 = vld [vmem:[%s15170_s7 + $0x168] sm:$0xff] }
 0x8ea   :  { %v14564_v27 = vld [vmem:[%s15170_s7 + $0xc8] sm:$0xff] }
 0x8eb   :  { %5918 = vmatpush2.bf16.msra.mxu1 %v9372_v18  ;;  %5959 = vmatpush2.bf16.msra.mxu0 %v9436_v31  ;;  %v15990_v18 = vld [vmem:[#allocation170_spill] sm:$0xff]  ;;  %v15991_v31 = vld [vmem:[#allocation168_spill] sm:$0xff] }
 0x8ec   :  { %5919 = vmatprep.subr.bf16.mxu1 %v9369_v53  ;;  %5960 = vmatprep.subr.bf16.mxu0 %v9433_v8  ;;  %v9349_v19 = vcombine.high %v15991_v31, %v15990_v18  ;;  %v15993_v53 = vld [vmem:[#allocation232_spill] sm:$0xff]  ;;  %v9348_v56 = vcombine.low %v15991_v31, %v15990_v18  ;;  %v14590_v18 = vld [vmem:[%s15170_s7 + $0x40] sm:$0xff] }
 0x8ed   :  { %v9413_v44 = vcombine.high %v15993_v53, %v15992_v43  ;;  %v9412_v8 = vcombine.low %v15993_v53, %v15992_v43  ;;  %v14596_v31 = vld [vmem:[%s15170_s7 + $0x158] sm:$0xff]  ;;  %v14615_v53 = vld [vmem:[%s15170_s7 + $0x150] sm:$0xff] }
 0x8ee   :  { %v14609_v43 = vld [vmem:[%s15170_s7 + $0x38] sm:$0xff] }
 0x8ef   :  { %5920 = vmatpush2.bf16.msra.mxu1 %v9368_v0  ;;  %5961 = vmatpush2.bf16.msra.mxu0 %v9432_v35  ;;  %v15994_v0 = vld [vmem:[#allocation166_spill] sm:$0xff]  ;;  %v15995_v35 = vld [vmem:[#allocation164_spill] sm:$0xff] }
 0x8f0   :  { %5921 = vmatprep.subr.bf16.mxu1 %v9365_v11  ;;  %5962 = vmatprep.subr.bf16.mxu0 %v9429_v62  ;;  %v9345_v25 = vcombine.high %v15995_v35, %v15994_v0  ;;  %v15997_v11 = vld [vmem:[#allocation228_spill] sm:$0xff]  ;;  %v9344_v45 = vcombine.low %v15995_v35, %v15994_v0  ;;  %v14640_v0 = vld [vmem:[%s15170_s7 + $0xa8] sm:$0xff] }
 0x8f1   :  { %v9409_v55 = vcombine.high %v15997_v11, %v15996_v52  ;;  %v9408_v62 = vcombine.low %v15997_v11, %v15996_v52  ;;  %v14647_v35 = vld [vmem:[%s15170_s7 + $0x28] sm:$0xff]  ;;  %v14659_v52 = vld [vmem:[%s15170_s7 + $0xa0] sm:$0xff] }
 0x8f2   :  { %v14666_v11 = vld [vmem:[%s15170_s7 + $0x20] sm:$0xff] }
 0x8f3   :  { %5922 = vmatpush2.bf16.msra.mxu1 %v9364_v48  ;;  %5963 = vmatpush2.bf16.msra.mxu0 %v9428_v40  ;;  %v14466_v48 = vld [vmem:[%s15170_s7 + $0xf8] sm:$0xff] }
 0x8f4   :  { %5923 = vmatprep.subr.bf16.mxu1 %v9361_v30  ;;  %5964 = vmatprep.subr.bf16.mxu0 %v9425_v26  ;;  %v14472_v40 = vld [vmem:[%s15170_s7 + $0x78] sm:$0xff]  ;;  %v14495_v26 = vld [vmem:[%s15170_s7 + $0xe8] sm:$0xff] }
 0x8f7   :  { %5924 = vmatpush2.bf16.msra.mxu1 %v9360_v51  ;;  %5965 = vmatpush2.bf16.msra.mxu0 %v9424_v33 }
 0x8f8   :  { %5925 = vmatprep.subr.bf16.mxu1 %v9357_v4  ;;  %5966 = vmatprep.subr.bf16.mxu0 %v9421_v34  ;;  %v14517_v4 = vld [vmem:[%s15170_s7 + $0x60] sm:$0xff] }
 0x8fb   :  { %5926 = vmatpush2.bf16.msra.mxu1 %v9356_v17  ;;  %5967 = vmatpush2.bf16.msra.mxu0 %v9420_v15  ;;  %v14529_v17 = vld [vmem:[%s15170_s7 + $0x58] sm:$0xff] }
 0x8fc   :  { %5927 = vmatprep.subr.bf16.mxu1 %v9353_v60  ;;  %5968 = vmatprep.subr.bf16.mxu0 %v9417_v16  ;;  %v14534_v15 = vld [vmem:[%s15170_s7 + $0x178] sm:$0xff]  ;;  %v14552_v60 = vld [vmem:[%s15170_s7 + $0x50] sm:$0xff]  ;;  %v14571_v16 = vld [vmem:[%s15170_s7 + $0x48] sm:$0xff] }
 0x8ff   :  { %5928 = vmatpush2.bf16.msra.mxu1 %v9352_v21  ;;  %5969 = vmatpush2.bf16.msra.mxu0 %v9416_v1  ;;  %v14577_v21 = vld [vmem:[%s15170_s7 + $0x160] sm:$0xff] }
 0x900   :  { %5929 = vmatprep.subr.bf16.mxu1 %v9349_v19  ;;  %5970 = vmatprep.subr.bf16.mxu0 %v9413_v44  ;;  %v14583_v1 = vld [vmem:[%s15170_s7 + $0xc0] sm:$0xff]  ;;  %v14602_v19 = vld [vmem:[%s15170_s7 + $0xb8] sm:$0xff]  ;;  %v14621_v44 = vld [vmem:[%s15170_s7 + $0xb0] sm:$0xff] }
 0x903   :  { %5930 = vmatpush2.bf16.msra.mxu1 %v9348_v56  ;;  %5971 = vmatpush2.bf16.msra.mxu0 %v9412_v8  ;;  %v14628_v56 = vld [vmem:[%s15170_s7 + $0x30] sm:$0xff]  ;;  %v14634_v8 = vld [vmem:[%s15170_s7 + $0x148] sm:$0xff] }
 0x904   :  { %5931 = vmatprep.subr.bf16.mxu1 %v9345_v25  ;;  %5972 = vmatprep.subr.bf16.mxu0 %v9409_v55  ;;  %v14653_v25 = vld [vmem:[%s15170_s7 + $0x140] sm:$0xff]  ;;  %v14672_v55 = vld [vmem:[%s15170_s7 + $0x138] sm:$0xff] }
 0x907   :  { %5932 = vmatpush2.bf16.msra.mxu1 %v9344_v45  ;;  %5973 = vmatpush2.bf16.msra.mxu0 %v9408_v62  ;;  %v14678_v45 = vld [vmem:[%s15170_s7 + $0x98] sm:$0xff] }
 0x908   :  { %9711 = vmatprep.subr.mxu1 %v14466_v48  ;;  %6113 = vmatprep.subr.mxu0 %v15998_v28  ;;  %v14685_v62 = vld [vmem:[%s15170_s7 + $0x18] sm:$0xff] }
 0x90a   :  { %v14480_v30 = vpop.f32.mrf.mxu1  ;;  %v14482_v59 = vpop.f32.mrf.mxu0  ;;  %5934 = vmatmul.mubr.bf16.vlgmr.msra.gmra.mxu1 %v14197_v29  ;;  %5975 = vmatmul.mubr.bf16.vlgmr.msra.gmra.mxu0 %v14201_v46  ;;  %v14505_v29 = vld [vmem:[%s15170_s7 + $0x68] sm:$0xff]  ;;  %v14511_v46 = vld [vmem:[%s15170_s7 + $0xe0] sm:$0xff] }
 0x90b   :  { %9712 = vmatpush3.msra.mxu1 %v14472_v40  ;;  %6114 = vmatpush1.msra.mxu0 %v14534_v15  ;;  %v5690_v32 = vadd.f32 %v14480_v30, %v4358_v47 }
 0x90c   :  { %v14497_v51 = vpop.f32.mrf.mxu1  ;;  %v14499_v33 = vpop.f32.mrf.mxu0  ;;  %9713 = vmatprep.subr.mxu1 %v14478_v13  ;;  %6115 = vmatprep.subr.mxu0 %v15998_v28 }
 0x90d   :  { %9714 = vmatpush3.msra.mxu1 %v14489_v24  ;;  %6116 = vmatpush1.msra.mxu0 %v14539_v10  ;;  %v5692_v7 = vadd.f32 %v14497_v51, %v4362_v42  ;;  %v5731_v23 = vadd.f32 %v14482_v59, %v5690_v32  ;;  %v14830_v42 = vld [vmem:[%s15170_s7 + $0x190] sm:$0xff]  ;;  %v16006_v59 = vld [vmem:[#allocation32_spill] sm:$0xff]  ;;  %v6335_v51 = vld [vmem:[%s15171_s8 + $0x28] sm:$0xff] }
 0x90e   :  { %v5693_v20 = vpop.f32.mrf.mxu1  ;;  %v5734_v5 = vpop.f32.mrf.mxu0  ;;  %9715 = vmatprep.subr.mxu1 %v14495_v26  ;;  %6117 = vmatprep.subr.mxu0 %v15998_v28 }
 0x90f   :  { %9716 = vmatpush3.msra.mxu1 %v14505_v29  ;;  %6118 = vmatpush1.msra.mxu0 %v14558_v9  ;;  %v14691_v20 = vld [vmem:[%s15170_s7 + $0x130] sm:$0xff] }
 0x910   :  { %v5694_v37 = vpop.f32.mrf.mxu1  ;;  %v5735_v34 = vpop.f32.mrf.mxu0  ;;  %9717 = vmatprep.subr.mxu1 %v14511_v46  ;;  %6119 = vmatprep.subr.mxu0 %v15998_v28  ;;  %v14697_v5 = vld [vmem:[%s15170_s7 + $0x90] sm:$0xff] }
 0x911   :  { %9718 = vmatpush3.msra.mxu1 %v14517_v4  ;;  %6120 = vmatpush1.msra.mxu0 %v14577_v21  ;;  %v14704_v37 = vld [vmem:[%s15170_s7 + $0x10] sm:$0xff]  ;;  %v14710_v34 = vld [vmem:[%s15170_s7 + $0x128] sm:$0xff] }
 0x912   :  { %9719 = vmatprep.subr.mxu1 %v14523_v22  ;;  %6121 = vmatprep.subr.mxu0 %v15998_v28 }
 0x913   :  { %9720 = vmatpush3.msra.mxu1 %v14529_v17  ;;  %6122 = vmatpush1.msra.mxu0 %v14596_v31 }
 0x914   :  { %9721 = vmatprep.subr.mxu1 %v14545_v57  ;;  %6123 = vmatprep.subr.mxu0 %v15998_v28 }
 0x915   :  { %9722 = vmatpush3.msra.mxu1 %v14552_v60  ;;  %6124 = vmatpush1.msra.mxu0 %v14615_v53 }
 0x916   :  { %9723 = vmatprep.subr.mxu1 %v14564_v27  ;;  %6125 = vmatprep.subr.mxu0 %v15998_v28 }
 0x917   :  { %9724 = vmatpush3.msra.mxu1 %v14571_v16  ;;  %6126 = vmatpush1.msra.mxu0 %v14634_v8 }
 0x918   :  { %9725 = vmatprep.subr.mxu1 %v14583_v1  ;;  %6127 = vmatprep.subr.mxu0 %v15998_v28 }
 0x919   :  { %9726 = vmatpush3.msra.mxu1 %v14590_v18  ;;  %6128 = vmatpush1.msra.mxu0 %v14653_v25 }
 0x91a   :  { %9727 = vmatprep.subr.mxu1 %v14602_v19  ;;  %6129 = vmatprep.subr.mxu0 %v15998_v28 }
 0x91b   :  { %9728 = vmatpush3.msra.mxu1 %v14609_v43  ;;  %6130 = vmatpush1.msra.mxu0 %v14672_v55 }
 0x91c   :  { %9729 = vmatprep.subr.mxu1 %v14621_v44  ;;  %6131 = vmatprep.subr.mxu0 %v15998_v28 }
 0x91d   :  { %9730 = vmatpush3.msra.mxu1 %v14628_v56  ;;  %6132 = vmatpush1.msra.mxu0 %v14691_v20 }
 0x91e   :  { %9731 = vmatprep.subr.mxu1 %v14640_v0  ;;  %6133 = vmatprep.subr.mxu0 %v15998_v28 }
 0x91f   :  { %9732 = vmatpush3.msra.mxu1 %v14647_v35  ;;  %6134 = vmatpush1.msra.mxu0 %v14710_v34 }
 0x920   :  { %9733 = vmatprep.subr.mxu1 %v14659_v52  ;;  %6135 = vmatprep.subr.mxu0 %v15998_v28 }
 0x921   :  { %9734 = vmatpush3.msra.mxu1 %v14666_v11  ;;  %6136 = vmatpush1.msra.mxu0 %v14729_v58 }
 0x922   :  { %9735 = vmatprep.subr.mxu1 %v14678_v45  ;;  %6137 = vmatprep.subr.mxu0 %v15998_v28 }
 0x923   :  { %9736 = vmatpush3.msra.mxu1 %v14685_v62  ;;  %6138 = vmatpush1.msra.mxu0 %v14748_v12 }
 0x924   :  { %9737 = vmatprep.subr.mxu1 %v14697_v5  ;;  %6139 = vmatprep.subr.mxu0 %v15998_v28 }
 0x925   :  { %9738 = vmatpush3.msra.mxu1 %v14704_v37  ;;  %6140 = vmatpush1.msra.mxu0 %v14757_v41 }
 0x926   :  { %9739 = vmatprep.subr.mxu1 %v14716_v6  ;;  %6141 = vmatprep.subr.mxu0 %v15998_v28 }
 0x927   :  { %9740 = vmatpush3.msra.mxu1 %v14723_v63  ;;  %6142 = vmatpush1.msra.mxu0 %v14766_v49 }
 0x928   :  { %9741 = vmatprep.subr.mxu1 %v14735_v14  ;;  %6143 = vmatprep.subr.mxu0 %v15998_v28 }
 0x929   :  { %9742 = vmatpush3.msra.mxu1 %v14742_v50  ;;  %6144 = vmatpush1.msra.mxu0 %v14773_v54 }
 0x92a   :  { %9746 = vmatprep.subr.mxu1 %v14466_v48  ;;  %v14780_v48 = vld [vmem:[%s15170_s7 + $0x1b8] sm:$0xff]  ;;  %6161 = vmatprep.subr.mxu0 %v15998_v28 }
 0x92b   :  { %16001 = vst [vmem:[#allocation30_spill] sm:$0xff] %v14780_v48  ;;  %6162 = vmatpush2.msra.mxu0 %v14780_v48  ;;  %v14823_v48 = vld [vmem:[%s15170_s7 + $0x198] sm:$0xff] }
 0x92c   :  { %6163 = vmatprep.subr.mxu0 %v15998_v28 }
 0x92d   :  { %6164 = vmatpush2.msra.mxu0 %v14787_v3  ;;  %v5733_v3 = vadd.f32 %v14499_v33, %v5692_v7  ;;  %v16011_v33 = vld [vmem:[#allocation265_spill] sm:$0xff] }
 0x92e   :  { %6165 = vmatprep.subr.mxu0 %v15998_v28 }
 0x92f   :  { %6166 = vmatpush2.msra.mxu0 %v14794_v39 }
 0x930   :  { %6167 = vmatprep.subr.mxu0 %v15998_v28 }
 0x931   :  { %6168 = vmatpush2.msra.mxu0 %v14801_v2 }
 0x932   :  { %6169 = vmatprep.subr.mxu0 %v15998_v28 }
 0x933   :  { %6170 = vmatpush2.msra.mxu0 %v14823_v48 }
 0x934   :  { %6171 = vmatprep.subr.mxu0 %v15998_v28 }
 0x935   :  { %6172 = vmatpush2.msra.mxu0 %v14830_v42 }
 0x936   :  { %6173 = vmatprep.subr.mxu0 %v15998_v28 }
 0x94a   :  { %v5771_v2 = vpop.f32.mrf.mxu1  ;;  %v5812_v39 = vpop.f32.mrf.mxu0 }
 0x94b   :  { %v5772_v54 = vadd.f32 %v5771_v2, %v5731_v23  ;;  %v14839_v23 = vld [vmem:[%s15170_s7 + $0x188] sm:$0xff] }
 0x94c   :  { %v5773_v36 = vpop.f32.mrf.mxu1  ;;  %v5814_v49 = vpop.f32.mrf.mxu0  ;;  %6174 = vmatpush2.msra.mxu0 %v14839_v23 }
 0x94d   :  { %v5774_v38 = vadd.f32 %v5773_v36, %v5733_v3  ;;  %v14841_v36 = vadd.f32 %v5812_v39, %v5772_v54  ;;  %6175 = vmatprep.subr.mxu0 %v15998_v28 }
 0x94e   :  { %v5775_v47 = vpop.f32.mrf.mxu1  ;;  %v5816_v7 = vpop.f32.mrf.mxu0 }
 0x94f   :  { %v14833_v32 = vadd.f32 %v5814_v49, %v5774_v38  ;;  %v14851_v38 = vld [vmem:[%s15170_s7 + $0x180] sm:$0xff]  ;;  %v6183_v54 = vmul.f32 %v14841_v36, %v14841_v36 }
 0x950   :  { %v5776_v2 = vpop.f32.mrf.mxu1  ;;  %v5817_v3 = vpop.f32.mrf.mxu0  ;;  %6176 = vmatpush2.msra.mxu0 %v14851_v38 }
 0x951   :  { %6107 = vmatprep.mubr.f32.mxu1 %v14833_v32  ;;  %v6184_v30 = vmul.f32 %v14833_v32, %v14833_v32 }
 0x952   :  { %6108 = vmatmul.mubr.f32.vlgmr.msra.gmra.mxu1 %v14841_v36 }
 0x953   :  { %9747 = vmatpush3.msra.mxu1 %v14472_v40  ;;  %6254 = vmatprep.mubr.f32.mxu1 %v6184_v30  ;;  %v16005_v40 = vld [vmem:[#allocation90_spill] sm:$0xff] }
 0x954   :  { %9748 = vmatprep.subr.mxu1 %v14478_v13 }
 0x955   :  { %9749 = vmatpush3.msra.mxu1 %v14489_v24  ;;  %v16008_v24 = vld [vmem:[#allocation88_spill] sm:$0xff] }
 0x956   :  { %9750 = vmatprep.subr.mxu1 %v14495_v26  ;;  %v16010_v26 = vld [vmem:[#allocation28_spill] sm:$0xff] }
 0x957   :  { %9751 = vmatpush3.msra.mxu1 %v14505_v29  ;;  %v4366_v29 = vrot.slane %v14810_v61, %v16011_v33 }
 0x958   :  { %9752 = vmatprep.subr.mxu1 %v14511_v46  ;;  %v16012_v46 = vld [vmem:[#allocation266_spill] sm:$0xff] }
 0x959   :  { %9753 = vmatpush3.msra.mxu1 %v14517_v4  ;;  %v4370_v4 = vrot.slane %v14810_v61, %v16012_v46 }
 0x95a   :  { %9754 = vmatprep.subr.mxu1 %v14523_v22 }
 0x95b   :  { %9755 = vmatpush3.msra.mxu1 %v14529_v17 }
 0x95c   :  { %9756 = vmatprep.subr.mxu1 %v14545_v57 }
 0x95d   :  { %9757 = vmatpush3.msra.mxu1 %v14552_v60 }
 0x95e   :  { %9758 = vmatprep.subr.mxu1 %v14564_v27 }
 0x95f   :  { %9759 = vmatpush3.msra.mxu1 %v14571_v16 }
 0x960   :  { %9760 = vmatprep.subr.mxu1 %v14583_v1 }
 0x961   :  { %9761 = vmatpush3.msra.mxu1 %v14590_v18 }
 0x962   :  { %9762 = vmatprep.subr.mxu1 %v14602_v19 }
 0x963   :  { %9763 = vmatpush3.msra.mxu1 %v14609_v43 }
 0x964   :  { %9764 = vmatprep.subr.mxu1 %v14621_v44 }
 0x965   :  { %9765 = vmatpush3.msra.mxu1 %v14628_v56  ;;  %v6334_v56 = vld [vmem:[%s15171_s8 + $0x20] sm:$0xff] }
 0x966   :  { %9766 = vmatprep.subr.mxu1 %v14640_v0  ;;  %v6330_v0 = vld [vmem:[%s15171_s8] sm:$0xff] }
 0x967   :  { %9767 = vmatpush3.msra.mxu1 %v14647_v35  ;;  %v6337_v35 = vld [vmem:[%s15171_s8 + $0x38] sm:$0xff] }
 0x968   :  { %9768 = vmatprep.subr.mxu1 %v14659_v52 }
 0x969   :  { %9769 = vmatpush3.msra.mxu1 %v14666_v11 }
 0x96a   :  { %9770 = vmatprep.subr.mxu1 %v14678_v45 }
 0x96b   :  { %9771 = vmatpush3.msra.mxu1 %v14685_v62 }
 0x96c   :  { %9772 = vmatprep.subr.mxu1 %v14697_v5  ;;  %v6336_v5 = vld [vmem:[%s15171_s8 + $0x30] sm:$0xff] }
 0x96d   :  { %9773 = vmatpush3.msra.mxu1 %v14704_v37 }
 0x96e   :  { %9774 = vmatprep.subr.mxu1 %v14716_v6 }
 0x96f   :  { %9775 = vmatpush3.msra.mxu1 %v14723_v63 }
 0x970   :  { %9776 = vmatprep.subr.mxu1 %v14735_v14 }
 0x971   :  { %9777 = vmatpush3.msra.mxu1 %v14742_v50 }
 0x972   :  { %6255 = vmatmul.mubr.f32.vlgmr.msra.gmra.mxu1 %v6183_v54  ;;  %6260 = vmatprep.subr.mxu1 %v15998_v28 }
 0x973   :  { %6261 = vmatpush1.msra.mxu1 %v14534_v15 }
 0x974   :  { %6262 = vmatprep.subr.mxu1 %v15998_v28 }
 0x975   :  { %6263 = vmatpush1.msra.mxu1 %v14539_v10 }
 0x976   :  { %6264 = vmatprep.subr.mxu1 %v15998_v28 }
 0x977   :  { %6265 = vmatpush1.msra.mxu1 %v14558_v9 }
 0x978   :  { %6266 = vmatprep.subr.mxu1 %v15998_v28 }
 0x979   :  { %6267 = vmatpush1.msra.mxu1 %v14577_v21 }
 0x97a   :  { %6268 = vmatprep.subr.mxu1 %v15998_v28 }
 0x97b   :  { %6269 = vmatpush1.msra.mxu1 %v14596_v31 }
 0x97c   :  { %6270 = vmatprep.subr.mxu1 %v15998_v28 }
 0x97d   :  { %6271 = vmatpush1.msra.mxu1 %v14615_v53 }
 0x97e   :  { %6272 = vmatprep.subr.mxu1 %v15998_v28 }
 0x97f   :  { %6273 = vmatpush1.msra.mxu1 %v14634_v8  ;;  %v6331_v8 = vld [vmem:[%s15171_s8 + $0x8] sm:$0xff] }
 0x980   :  { %6274 = vmatprep.subr.mxu1 %v15998_v28 }
 0x981   :  { %6275 = vmatpush1.msra.mxu1 %v14653_v25 }
 0x982   :  { %6276 = vmatprep.subr.mxu1 %v15998_v28 }
 0x983   :  { %6277 = vmatpush1.msra.mxu1 %v14672_v55 }
 0x984   :  { %6278 = vmatprep.subr.mxu1 %v15998_v28 }
 0x985   :  { %6279 = vmatpush1.msra.mxu1 %v14691_v20 }
 0x986   :  { %6280 = vmatprep.subr.mxu1 %v15998_v28 }
 0x987   :  { %6281 = vmatpush1.msra.mxu1 %v14710_v34 }
 0x988   :  { %6282 = vmatprep.subr.mxu1 %v15998_v28 }
 0x989   :  { %6283 = vmatpush1.msra.mxu1 %v14729_v58 }
 0x98a   :  { %v5853_v49 = vpop.f32.mrf.mxu1  ;;  %v5894_v50 = vpop.f32.mrf.mxu0  ;;  %6284 = vmatprep.subr.mxu1 %v15998_v28 }
 0x98b   :  { %6285 = vmatpush1.msra.mxu1 %v14748_v12  ;;  %v16007_v12 = vld [vmem:[#allocation30_spill] sm:$0xff]  ;;  %v5854_v22 = vadd.f32 %v5853_v49, %v4366_v29  ;;  %v6653_v29 = vld [vmem:[%s15172_s9 + $0x4] sm:$0xf] }
 0x98c   :  { %v5855_v14 = vpop.f32.mrf.mxu1  ;;  %v5896_v6 = vpop.f32.mrf.mxu0  ;;  %6286 = vmatprep.subr.mxu1 %v15998_v28 }
 0x98d   :  { %6287 = vmatpush1.msra.mxu1 %v14757_v41  ;;  %v16009_v41 = vld [vmem:[#allocation86_spill] sm:$0xff]  ;;  %v5856_v17 = vadd.f32 %v5855_v14, %v4370_v4  ;;  %v5895_v15 = vadd.f32 %v5894_v50, %v5854_v22 }
 0x98e   :  { %v5857_v39 = vpop.f32.mrf.mxu1  ;;  %v5898_v63 = vpop.f32.mrf.mxu0  ;;  %6288 = vmatprep.subr.mxu1 %v15998_v28  ;;  %v6679_v4 = vld [vmem:[%s15172_s9 + $0x8] sm:$0xf] }
 0x98f   :  { %6289 = vmatpush1.msra.mxu1 %v16005_v40  ;;  %v5897_v60 = vadd.f32 %v5896_v6, %v5856_v17  ;;  %v16013_v17 = vld [vmem:[#allocation259_spill] sm:$0xff] }
 0x990   :  { %v5858_v13 = vpop.f32.mrf.mxu1  ;;  %v5899_v58 = vpop.f32.mrf.mxu0  ;;  %6290 = vmatprep.subr.mxu1 %v15998_v28 }
 0x991   :  { %6291 = vmatpush1.msra.mxu1 %v16006_v59 }
 0x992   :  { %6308 = vmatprep.subr.mxu1 %v15998_v28 }
 0x993   :  { %6309 = vmatpush2.msra.mxu1 %v16007_v12 }
 0x994   :  { %6310 = vmatprep.subr.mxu1 %v15998_v28 }
 0x995   :  { %6311 = vmatpush2.msra.mxu1 %v16008_v24 }
 0x996   :  { %6312 = vmatprep.subr.mxu1 %v15998_v28 }
 0x997   :  { %6313 = vmatpush2.msra.mxu1 %v16009_v41 }
 0x998   :  { %6314 = vmatprep.subr.mxu1 %v15998_v28 }
 0x999   :  { %6315 = vmatpush2.msra.mxu1 %v16010_v26 }
 0x99a   :  { %6316 = vmatprep.subr.mxu1 %v15998_v28 }
 0x99b   :  { %6317 = vmatpush2.msra.mxu1 %v14823_v48  ;;  %v6333_v48 = vld [vmem:[%s15171_s8 + $0x18] sm:$0xff] }
 0x99c   :  { %6318 = vmatprep.subr.mxu1 %v15998_v28 }
 0x99d   :  { %6319 = vmatpush2.msra.mxu1 %v14830_v42  ;;  %v6332_v42 = vld [vmem:[%s15171_s8 + $0x10] sm:$0xff] }
 0x99e   :  { %6320 = vmatprep.subr.mxu1 %v15998_v28 }
 0x99f   :  { %6321 = vmatpush2.msra.mxu1 %v14839_v23 }
 0x9a0   :  { %6322 = vmatprep.subr.mxu1 %v15998_v28 }
 0x9a1   :  { %6323 = vmatpush2.msra.mxu1 %v14851_v38 }
 0x9a2   :  { %6370 = vmatprep.subr.mxu1 %v6335_v51 }
 0x9ca   :  { %v5935_v10 = vpop.f32.mrf.mxu1  ;;  %v5976_v57 = vpop.f32.mrf.mxu0 }
 0x9cb   :  { %v5936_v9 = vadd.f32 %v5935_v10, %v5895_v15  ;;  %v6658_v15 = vrot.slane %v6653_v29, %v16013_v17 }
 0x9cc   :  { %v5937_v27 = vpop.f32.mrf.mxu1  ;;  %v5978_v16 = vpop.f32.mrf.mxu0 }
 0x9cd   :  { %v5938_v21 = vadd.f32 %v5937_v27, %v5897_v60  ;;  %v14943_v1 = vadd.f32 %v5976_v57, %v5936_v9  ;;  %v6684_v9 = vrot.slane %v6679_v4, %v16013_v17  ;;  %v16014_v27 = vld [vmem:[#allocation260_spill] sm:$0xff] }
 0x9ce   :  { %v5939_v18 = vpop.f32.mrf.mxu1  ;;  %v5980_v31 = vpop.f32.mrf.mxu0 }
 0x9cf   :  { %v14945_v19 = vadd.f32 %v5978_v16, %v5938_v21  ;;  %v6185_v44 = vmul.f32 %v14943_v1, %v14943_v1  ;;  %v6662_v16 = vrot.slane %v6653_v29, %v16014_v27 }
 0x9d0   :  { %v5940_v43 = vpop.f32.mrf.mxu1  ;;  %v5981_v53 = vpop.f32.mrf.mxu0 }
 0x9d1   :  { %v6186_v61 = vmul.f32 %v14945_v19, %v14945_v19  ;;  %9438 = vmatprep.mubr.msk.f32.mxu0 %vm6039_vm5, %v14945_v19  ;;  %v6688_v53 = vrot.slane %v6679_v4, %v16014_v27 }
 0x9d2   :  { %6178 = vmatmul.mubr.f32.vlgmr.msra.gmra.mxu0 %v14943_v1 }
 0x9d3   :  { %9439 = vmatprep.mubr.msk.f32.mxu1 %vm6039_vm5, %v6186_v61 }
 0x9d4   :  { %6325 = vmatmul.mubr.f32.vlgmr.msra.gmra.mxu1 %v6185_v44 }
 0x9d5   :  { %6371 = vmatpush1.msra.mxu1 %v6334_v56  ;;  %6406 = vmatprep.mubr.f32.mxu1 %v15998_v28 }
 0x9d6   :  { %6372 = vmatprep.subr.mxu1 %v6331_v8 }
 0x9d7   :  { %6373 = vmatpush1.msra.mxu1 %v6330_v0 }
 0x9d8   :  { %6441 = vmatprep.subr.mxu1 %v6337_v35 }
 0xa12   :  { %v9743_v25 = vpop.f32.mrf.mxu1 }
 0xa14   :  { %v9744_v52 = vpop.f32.mrf.mxu1 }
 0xa15   :  { %v9745_v55 = vadd.f32 %v9744_v52, %v9743_v25  ;;  %v6670_v25 = vrot.slane %v6653_v29, %v16012_v46 }
 0xa32   :  { %v9778_v11 = vpop.f32.mrf.mxu1 }
 0xa34   :  { %v9779_v45 = vpop.f32.mrf.mxu1 }
 0xa35   :  { %v9780_v7 = vadd.f32 %v9779_v45, %v9778_v11  ;;  %v6696_v45 = vrot.slane %v6679_v4, %v16012_v46 }
 0xa92   :  { %v6179_v62 = vpop.f32.mrf.mxu0 }
 0xa93   :  { %v6180_v20 = vadd.f32 %v9745_v55, %v6179_v62 }
 0xa94   :  { %v6181_v37 = vpop.f32.mrf.mxu0  ;;  %v6326_v34 = vpop.f32.mrf.mxu1 }
 0xa95   :  { %9440 = vmatmul.mubr.msk.f32.vlgmr.msra.gmra.mxu1 %vm6338_vm7, %v6180_v20  ;;  %v6327_v23 = vadd.f32 %v9780_v7, %v6326_v34 }
 0xa96   :  { %6442 = vmatpush1.msra.mxu1 %v6336_v5  ;;  %v6328_v47 = vpop.f32.mrf.mxu1  ;;  %6477 = vmatprep.mubr.f32.mxu1 %v15998_v28 }
 0xa97   :  { %6443 = vmatprep.subr.mxu1 %v6333_v48 }
 0xa98   :  { %6444 = vmatpush1.msra.mxu1 %v6332_v42 }
 0xa99   :  { %6515 = vmatprep.subr.mxu1 %v6335_v51  ;;  %9441 = vmatmul.mubr.msk.f32.vlgmr.msra.gmra.mxu1 %vm6338_vm7, %v6180_v20 }
 0xa9a   :  { %6516 = vmatpush1.msra.mxu1 %v6334_v56  ;;  %6551 = vmatprep.mubr.f32.mxu1 %v15998_v28 }
 0xa9b   :  { %6517 = vmatprep.subr.mxu1 %v6331_v8 }
 0xa9c   :  { %6518 = vmatpush1.msra.mxu1 %v6330_v0 }
 0xa9d   :  { %6586 = vmatprep.subr.mxu1 %v6337_v35  ;;  %9442 = vmatmul.mubr.msk.f32.vlgmr.msra.gmra.mxu1 %vm6338_vm7, %v6327_v23  ;;  %v6692_v35 = vrot.slane %v6679_v4, %v16011_v33 }
 0xa9e   :  { %6587 = vmatpush1.msra.mxu1 %v6336_v5  ;;  %6622 = vmatprep.mubr.f32.mxu1 %v15998_v28 }
 0xa9f   :  { %6588 = vmatprep.subr.mxu1 %v6333_v48 }
 0xaa0   :  { %6589 = vmatpush1.msra.mxu1 %v6332_v42 }
 0xaa1   :  { %9443 = vmatmul.mubr.msk.f32.vlgmr.msra.gmra.mxu1 %vm6338_vm7, %v6327_v23 }
 0xb55   :  { %v6408_v2 = vpop.f32.mrf.mxu1 }
 0xb56   :  { %v6629_v54 = vmul.f32 %v6408_v2, %v6408_v2  ;;  %v6637_v22 = vsub.f32 %v14841_v36, %v6408_v2  ;;  %v6666_v36 = vrot.slane %v6653_v29, %v16011_v33 }
 0xb57   :  { %v6410_v3 = vpop.f32.mrf.mxu1 }
 0xb58   :  { %v6630_v50 = vmul.f32 %v6410_v3, %v6410_v3  ;;  %v6638_v57 = vsub.f32 %v14833_v32, %v6410_v3 }
 0xb59   :  { %v6479_v30 = vpop.f32.mrf.mxu1 }
 0xb5a   :  { %v6631_v39 = vmul.f32 %v6479_v30, %v6479_v30  ;;  %v6639_v18 = vsub.f32 %v14943_v1, %v6479_v30 }
 0xb5b   :  { %v6481_v38 = vpop.f32.mrf.mxu1 }
 0xb5c   :  { %v6632_v58 = vmul.f32 %v6481_v38, %v6481_v38  ;;  %v6640_v0 = vsub.f32 %v14945_v19, %v6481_v38 }
 0xb5d   :  { %v6553_v49 = vpop.f32.mrf.mxu1 }
 0xb5e   :  { %v6633_v14 = vsub.f32 %v6553_v49, %v6629_v54 }
 0xb5f   :  { %v6555_v6 = vpop.f32.mrf.mxu1 }
 0xb60   :  { %v6641_v63 = vadd.f32 1e-05, %v6633_v14  ;;  %v6634_v40 = vsub.f32 %v6555_v6, %v6630_v50 }
 0xb61   :  { %v6624_v13 = vpop.f32.mrf.mxu1 }
 0xb62   :  { %10363 = vrsqrt.f32 %v6641_v63  ;;  %v6642_v59 = vadd.f32 1e-05, %v6634_v40  ;;  %v6635_v12 = vsub.f32 %v6624_v13, %v6631_v39 }
 0xb63   :  { %v6626_v24 = vpop.f32.mrf.mxu1 }
 0xb64   :  { %10365 = vrsqrt.f32 %v6642_v59  ;;  %v6643_v41 = vadd.f32 1e-05, %v6635_v12  ;;  %v6636_v26 = vsub.f32 %v6626_v24, %v6632_v58 }
 0xb66   :  { %10367 = vrsqrt.f32 %v6643_v41  ;;  %v6644_v51 = vadd.f32 1e-05, %v6636_v26 }
 0xb68   :  { %10369 = vrsqrt.f32 %v6644_v51 }
 0xb6f   :  { %v10364_v10 = vpop.eup %10363 }
 0xb70   :  { %v6649_v60 = vmul.f32 %v10364_v10, %v6637_v22 }
 0xb71   :  { %v10366_v21 = vpop.eup %10365 }
 0xb72   :  { %v6675_v31 = vmul.f32 %v6658_v15, %v6649_v60  ;;  %v6650_v43 = vmul.f32 %v10366_v21, %v6638_v57 }
 0xb73   :  { %v10368_v61 = vpop.eup %10367 }
 0xb74   :  { %v14998_v44 = vadd.f32 %v6684_v9, %v6675_v31  ;;  %v6676_v56 = vmul.f32 %v6662_v16, %v6650_v43  ;;  %v6651_v8 = vmul.f32 %v10368_v61, %v6639_v18 }
 0xb75   :  { %v10370_v32 = vpop.eup %10369 }
 0xb76   :  { %v6705_v1 = vmul.f32 0.70710677, %v14998_v44  ;;  %v15004_v52 = vadd.f32 %v6688_v53, %v6676_v56  ;;  %v6677_v11 = vmul.f32 %v6666_v36, %v6651_v8  ;;  %v6652_v55 = vmul.f32 %v10370_v32, %v6640_v0 }
 0xb77   :  { %vm6785_vm8 = vcmp.lt.f32.partialorder %v14998_v44, 0.0 }
 0xb78   :  { %v6709_v62 = vand.u32 2147483647, %v6705_v1  ;;  %v6706_v20 = vmul.f32 0.70710677, %v15004_v52  ;;  %v15008_v5 = vadd.f32 %v6692_v35, %v6677_v11  ;;  %v6678_v37 = vmul.f32 %v6670_v25, %v6652_v55 }
 0xb79   :  { %vm6786_vm12 = vcmp.lt.f32.partialorder %v15004_v52, 0.0 }
 0xb7a   :  { %v6713_v34 = vmul.f32 0.3275911, %v6709_v62  ;;  %v6710_v19 = vand.u32 2147483647, %v6706_v20  ;;  %v6707_v33 = vmul.f32 0.70710677, %v15008_v5  ;;  %v15011_v48 = vadd.f32 %v6696_v45, %v6678_v37 }
 0xb7b   :  { %v6761_v49 = vsub.f32 0.0, %v6709_v62  ;;  %vm6787_vm3 = vcmp.lt.f32.partialorder %v15008_v5, 0.0 }
 0xb7c   :  { %v6717_v42 = vadd.f32 1.0, %v6713_v34  ;;  %v6714_v47 = vmul.f32 0.3275911, %v6710_v19  ;;  %v6711_v7 = vand.u32 2147483647, %v6707_v33  ;;  %v6762_v50 = vsub.f32 0.0, %v6710_v19 }
 0xb7d   :  { %v6708_v23 = vmul.f32 0.70710677, %v15011_v48  ;;  %v6765_v14 = vmul.f32 %v6761_v49, %v6709_v62  ;;  %vm6788_vm9 = vcmp.lt.f32.partialorder %v15011_v48, 0.0 }
 0xb7e   :  { %10371 = vrcp.f32 %v6717_v42  ;;  %v6718_v2 = vadd.f32 1.0, %v6714_v47  ;;  %v6715_v46 = vmul.f32 0.3275911, %v6711_v7  ;;  %v6763_v6 = vsub.f32 0.0, %v6711_v7 }
 0xb7f   :  { %v6712_v3 = vand.u32 2147483647, %v6708_v23  ;;  %v6766_v63 = vmul.f32 %v6762_v50, %v6710_v19  ;;  %v6769_v13 = vmul.f32 1.442695, %v6765_v14 }
 0xb80   :  { %10373 = vrcp.f32 %v6718_v2  ;;  %v6719_v30 = vadd.f32 1.0, %v6715_v46  ;;  %v6767_v59 = vmul.f32 %v6763_v6, %v6711_v7 }
 0xb81   :  { %v6716_v38 = vmul.f32 0.3275911, %v6712_v3  ;;  %v6764_v58 = vsub.f32 0.0, %v6712_v3  ;;  %v6771_v26 = vmul.f32 1.442695, %v6766_v63 }
 0xb82   :  { %10375 = vrcp.f32 %v6719_v30  ;;  %v6773_v10 = vmul.f32 1.442695, %v6767_v59 }
 0xb83   :  { %v6720_v54 = vadd.f32 1.0, %v6716_v38  ;;  %v6768_v4 = vmul.f32 %v6764_v58, %v6712_v3 }
 0xb85   :  { %10377 = vrcp.f32 %v6720_v54  ;;  %v6775_v31 = vmul.f32 1.442695, %v6768_v4 }
 0xb86   :  { %10379 = vpow2.f32 %v6769_v13 }
 0xb87   :  { %10381 = vpow2.f32 %v6771_v26 }
 0xb88   :  { %10383 = vpow2.f32 %v6773_v10 }
 0xb89   :  { %10385 = vpow2.f32 %v6775_v31 }
 0xb8b   :  { %v10372_v39 = vpop.eup %10371 }
 0xb8c   :  { %v6725_v40 = vmul.f32 1.0614054, %v10372_v39 }
 0xb8d   :  { %v10374_v12 = vpop.eup %10373 }
 0xb8e   :  { %v9444_v24 = vadd.f32 -1.4531521, %v6725_v40  ;;  %v6726_v41 = vmul.f32 1.0614054, %v10374_v12  ;;  %v6797_v40 = vmul.f32 0.5, %v14998_v44  ;;  %v6799_v44 = vmul.f32 0.5, %v15008_v5 }
 0xb8f   :  { %v10376_v51 = vpop.eup %10375 }
 0xb90   :  { %v6733_v29 = vmul.f32 %v10372_v39, %v9444_v24  ;;  %v9445_v22 = vadd.f32 -1.4531521, %v6726_v41  ;;  %v6727_v15 = vmul.f32 1.0614054, %v10376_v51 }
 0xb92   :  { %v6737_v57 = vadd.f32 1.4214138, %v6733_v29  ;;  %v10378_v60 = vpop.eup %10377  ;;  %v6734_v9 = vmul.f32 %v10374_v12, %v9445_v22  ;;  %v9446_v16 = vadd.f32 -1.4531521, %v6727_v15 }
 0xb93   :  { %v6728_v18 = vmul.f32 1.0614054, %v10378_v60  ;;  %v10380_v37 = vpop.eup %10379 }
 0xb94   :  { %v6741_v21 = vmul.f32 %v10372_v39, %v6737_v57  ;;  %v6738_v43 = vadd.f32 1.4214138, %v6734_v9  ;;  %v6735_v53 = vmul.f32 %v10376_v51, %v9446_v16  ;;  %v10382_v23 = vpop.eup %10381  ;;  %v6800_v16 = vmul.f32 0.5, %v15011_v48 }
 0xb95   :  { %v9447_v36 = vadd.f32 -1.4531521, %v6728_v18  ;;  %v10384_v38 = vpop.eup %10383 }
 0xb96   :  { %v9448_v61 = vadd.f32 -0.28449672, %v6741_v21  ;;  %v6742_v56 = vmul.f32 %v10374_v12, %v6738_v43  ;;  %v6739_v8 = vadd.f32 1.4214138, %v6735_v53  ;;  %v10386_v63 = vpop.eup %10385 }
 0xb97   :  { %v6736_v0 = vmul.f32 %v10378_v60, %v9447_v36 }
 0xb98   :  { %v6749_v32 = vmul.f32 %v10372_v39, %v9448_v61  ;;  %v9449_v35 = vadd.f32 -0.28449672, %v6742_v56  ;;  %v6743_v25 = vmul.f32 %v10376_v51, %v6739_v8 }
 0xb99   :  { %v6740_v11 = vadd.f32 1.4214138, %v6736_v0 }
 0xb9a   :  { %v6753_v1 = vadd.f32 0.2548296, %v6749_v32  ;;  %v6750_v55 = vmul.f32 %v10374_v12, %v9449_v35  ;;  %v9450_v45 = vadd.f32 -0.28449672, %v6743_v25 }
 0xb9b   :  { %v6744_v20 = vmul.f32 %v10378_v60, %v6740_v11 }
 0xb9c   :  { %v6757_v62 = vmul.f32 %v10372_v39, %v6753_v1  ;;  %v6754_v34 = vadd.f32 0.2548296, %v6750_v55  ;;  %v6751_v19 = vmul.f32 %v10376_v51, %v9450_v45 }
 0xb9d   :  { %v9451_v42 = vadd.f32 -0.28449672, %v6744_v20 }
 0xb9e   :  { %v6777_v33 = vmul.f32 %v10380_v37, %v6757_v62  ;;  %v6758_v47 = vmul.f32 %v10374_v12, %v6754_v34  ;;  %v6755_v7 = vadd.f32 0.2548296, %v6751_v19 }
 0xb9f   :  { %v6752_v46 = vmul.f32 %v10378_v60, %v9451_v42 }
 0xba0   :  { %v6781_v2 = vsub.f32 1.0, %v6777_v33  ;;  %v6778_v3 = vmul.f32 %v10382_v23, %v6758_v47  ;;  %v6759_v30 = vmul.f32 %v10376_v51, %v6755_v7  ;;  %v6798_v51 = vmul.f32 0.5, %v15004_v52 }
 0xba1   :  { %v6756_v49 = vadd.f32 0.2548296, %v6752_v46 }
 0xba2   :  { %v6789_v54 = vsub.f32 0.0, %v6781_v2  ;;  %v6782_v50 = vsub.f32 1.0, %v6778_v3  ;;  %v6779_v14 = vmul.f32 %v10384_v38, %v6759_v30 }
 0xba3   :  { %v6760_v39 = vmul.f32 %v10378_v60, %v6756_v49 }
 0xba4   :  { %v6793_v6 = vsel %vm6785_vm8, %v6789_v54, %v6781_v2  ;;  %v6790_v58 = vsub.f32 0.0, %v6782_v50  ;;  %v6783_v59 = vsub.f32 1.0, %v6779_v14 }
 0xba5   :  { %v6801_v13 = vadd.f32 1.0, %v6793_v6  ;;  %v6780_v12 = vmul.f32 %v10386_v63, %v6760_v39 }
 0xba6   :  { %v6794_v41 = vsel %vm6786_vm12, %v6790_v58, %v6782_v50  ;;  %v6791_v26 = vsub.f32 0.0, %v6783_v59 }
 0xba7   :  { %v15017_v24 = vmul.f32 %v6801_v13, %v6797_v40  ;;  %v6802_v29 = vadd.f32 1.0, %v6794_v41  ;;  %v6784_v4 = vsub.f32 1.0, %v6780_v12 }
 0xba8   :  { %v6795_v22 = vsel %vm6787_vm3, %v6791_v26, %v6783_v59 }
 0xba9   :  { %v6806_v15 = vmul.f32 %v6802_v29, %v6798_v51  ;;  %v6803_v10 = vadd.f32 1.0, %v6795_v22  ;;  %v6792_v57 = vsub.f32 0.0, %v6784_v4 }
 0xbab   :  { %v15023_v60 = vmul.f32 %v6803_v10, %v6799_v44  ;;  %v6796_v9 = vsel %vm6788_vm9, %v6792_v57, %v6784_v4 }
 0xbac   :  { %v6804_v21 = vadd.f32 1.0, %v6796_v9 }
 0xbae   :  { %v15026_v18 = vmul.f32 %v6804_v21, %v6800_v16 }
 0xbaf   :  { %10701 = dma.done.wait [#allocation6 + $0x1], 18432 }
 0xbb0   :  { %10702 = vsyncadd [#allocation6 + $0x1], 4294948864 }
 0xbb1   :  { %10703 = dma.done.wait [#allocation6 + $0x2], 6144 }
 0xbb2   :  { %10704 = vsyncadd [#allocation6 + $0x2], 4294961152 }
 0xbb3   :  { %10705 = dma.done.wait [#allocation6 + $0x3], 512 }
 0xbb4   :  { %10706 = vsyncadd [#allocation6 + $0x3], 4294966784  ;;  %9884 = vmatprep.subr.bf16.mxu1 %v15998_v28  ;;  %9900 = vmatprep.mubr.msk.bf16.mxu1 %vm10711_vm4, %v15998_v28  ;;  %v6854_v52 = vpack.c.bf16 %v6806_v15, %v6806_v15  ;;  %v10387_v5 = vld [vmem:[#allocation4 + $0x150] ss:$24 sps:$4 sm:$0xff]   ;;  %v10388_v31 = vld [vmem:[#allocation4 + $0x120] ss:$24 sps:$4 sm:$0xff]   ;;  %v7084_v37 = vpack.c.bf16 %v15023_v60, %v15023_v60  ;;  %v7188_v54 = vpack.c.bf16 %v15026_v18, %v15026_v18 }
 0xbb5   :  { %9885 = vmatpush3.bf16.msra.mxu1 %v10387_v5  ;;  %v10389_v48 = vld [vmem:[#allocation4 + $0xf0] ss:$24 sps:$4 sm:$0xff]   ;;  %v10390_v43 = vld [vmem:[#allocation4 + $0xc0] ss:$24 sps:$4 sm:$0xff]   ;;  %v10447_v51 = vld [vmem:[#allocation4 + $0x154] ss:$24 sps:$4 sm:$0xff]   ;;  %v6853_v29 = vpack.c.bf16 %v15017_v24, %v15017_v24 }
 0xbb6   :  { %7059 = vmatprep.mubr.bf16.mxu0 %v6854_v52  ;;  %9886 = vmatprep.subr.bf16.mxu1 %v15998_v28  ;;  %v10399_v53 = vld [vmem:[#allocation3 + $0x1fc] ss:$36 sps:$4 sm:$0xff]   ;;  %v10391_v36 = vld [vmem:[#allocation4 + $0x90] ss:$24 sps:$4 sm:$0xff]   ;;  %v10402_v56 = vld [vmem:[#allocation3 + $0x1b4] ss:$36 sps:$4 sm:$0xff]  }
 0xbb7   :  { %v10401_v61 = vld [vmem:[#allocation3 + $0x1f8] ss:$36 sps:$4 sm:$0xff]   ;;  %7027 = vmatprep.subr.bf16.mxu0 %v10399_v53  ;;  %v10404_v8 = vld [vmem:[#allocation3 + $0x1b0] ss:$36 sps:$4 sm:$0xff]   ;;  %v10407_v35 = vld [vmem:[#allocation3 + $0x168] ss:$36 sps:$4 sm:$0xff]  }
 0xbb8   :  { %7028 = vmatpush1.bf16.msra.mxu0 %v10401_v61  ;;  %v10405_v32 = vld [vmem:[#allocation3 + $0x16c] ss:$36 sps:$4 sm:$0xff]   ;;  %v10392_v0 = vld [vmem:[#allocation4 + $0x60] ss:$24 sps:$4 sm:$0xff]   ;;  %v10408_v25 = vld [vmem:[#allocation3 + $0x124] ss:$36 sps:$4 sm:$0xff]  }
 0xbb9   :  { %9887 = vmatpush3.bf16.msra.mxu1 %v10388_v31  ;;  %7029 = vmatprep.subr.bf16.mxu0 %v10402_v56  ;;  %v10393_v1 = vld [vmem:[#allocation4 + $0x30] ss:$24 sps:$4 sm:$0xff]   ;;  %v10410_v11 = vld [vmem:[#allocation3 + $0x120] ss:$36 sps:$4 sm:$0xff]   ;;  %v10413_v62 = vld [vmem:[#allocation3 + $0xd8] ss:$36 sps:$4 sm:$0xff]  }
 0xbba   :  { %9888 = vmatprep.subr.bf16.mxu1 %v15998_v28  ;;  %v10411_v55 = vld [vmem:[#allocation3 + $0xdc] ss:$36 sps:$4 sm:$0xff]   ;;  %v10414_v20 = vld [vmem:[#allocation3 + $0x94] ss:$36 sps:$4 sm:$0xff]   ;;  %v10417_v33 = vld [vmem:[#allocation3 + $0x4c] ss:$36 sps:$4 sm:$0xff]  }
 0xbbb   :  { %v10394_v45 = vld [vmem:[#allocation4] ss:$24 sps:$4 sm:$0xff]   ;;  %v10416_v19 = vld [vmem:[#allocation3 + $0x90] ss:$36 sps:$4 sm:$0xff]   ;;  %v10419_v47 = vld [vmem:[#allocation3 + $0x48] ss:$36 sps:$4 sm:$0xff]  }
 0xbbc   :  { %7030 = vmatpush1.bf16.msra.mxu0 %v10404_v8  ;;  %v10395_v34 = vld [vmem:[#allocation5 + $0x18] sm:$0xff]   ;;  %v10396_v42 = vld [vmem:[#allocation5 + $0x10] sm:$0xff]   ;;  %v10420_v7 = vld [vmem:[#allocation3 + $0x4] ss:$36 sps:$4 sm:$0xff]   ;;  %s10718_s19 = smov [#allocation7]  }
 0xbbd   :  { %9889 = vmatpush3.bf16.msra.mxu1 %v10389_v48  ;;  %7031 = vmatprep.subr.bf16.mxu0 %v10405_v32  ;;  %v10397_v23 = vld [vmem:[#allocation5 + $0x8] sm:$0xff]   ;;  %v10422_v2 = vld [vmem:[#allocation3] ss:$36 sps:$4 sm:$0xff]   ;;  %v10425_v30 = vld [vmem:[#allocation3 + $0x438] ss:$36 sps:$4 sm:$0xff]   ;;  %s8843_s11 = sshll.u32 %s10718_s19, 4  ;;  %s8844_s11 = int_to_ptr.vmem [resolvable:$true] %s8843_s11 }
 0xbbe   :  { %9890 = vmatprep.subr.bf16.mxu1 %v15998_v28  ;;  %v10423_v46 = vld [vmem:[#allocation3 + $0x43c] ss:$36 sps:$4 sm:$0xff]   ;;  %v10426_v38 = vld [vmem:[#allocation3 + $0x3f4] ss:$36 sps:$4 sm:$0xff]   ;;  %v10429_v50 = vld [vmem:[#allocation3 + $0x3ac] ss:$36 sps:$4 sm:$0xff]   ;;  %p10684_p1 = scmp.lt.s32.totalorder %s8844_s11, %s8844_s11 }
 0xbbf   :  { %v10398_v3 = vld [vmem:[#allocation5] sm:$0xff]   ;;  %v10428_v49 = vld [vmem:[#allocation3 + $0x3f0] ss:$36 sps:$4 sm:$0xff]   ;;  %v10431_v14 = vld [vmem:[#allocation3 + $0x3a8] ss:$36 sps:$4 sm:$0xff]   ;;  %s10679_s20 = scalar_lea.vmem %s8844_s11, 128 }
 0xbc0   :  { %7032 = vmatpush1.bf16.msra.mxu0 %v10407_v35  ;;  %v10432_v6 = vld [vmem:[#allocation3 + $0x364] ss:$36 sps:$4 sm:$0xff]   ;;  %v10435_v63 = vld [vmem:[#allocation3 + $0x31c] ss:$36 sps:$4 sm:$0xff]   ;;  %v10438_v13 = vld [vmem:[#allocation3 + $0x2d4] ss:$36 sps:$4 sm:$0xff]   ;;  %p10680_p0 = scmp.ne.s32.totalorder %s8844_s11, %s10679_s20  ;;  %p10685_p2 = scmp.lt.s32.totalorder %s10679_s20, %s10679_s20 }
 0xbc1   :  { %9891 = vmatpush3.bf16.msra.mxu1 %v10390_v43  ;;  %7033 = vmatprep.subr.bf16.mxu0 %v10408_v25  ;;  %v10434_v39 = vld [vmem:[#allocation3 + $0x360] ss:$36 sps:$4 sm:$0xff]   ;;  %v10437_v40 = vld [vmem:[#allocation3 + $0x318] ss:$36 sps:$4 sm:$0xff]   ;;  %v10440_v58 = vld [vmem:[#allocation3 + $0x2d0] ss:$36 sps:$4 sm:$0xff]  }
 0xbc2   :  { %9892 = vmatprep.subr.bf16.mxu1 %v15998_v28  ;;  %v10441_v59 = vld [vmem:[#allocation3 + $0x28c] ss:$36 sps:$4 sm:$0xff]   ;;  %v10444_v41 = vld [vmem:[#allocation3 + $0x244] ss:$36 sps:$4 sm:$0xff]   ;;  %v9493_v18 = vld [vmem:[%s15172_s9 + $0x17] ss:$0 sm:$0xff]  ;;  %p10686_p3 = por %p10685_p2, %p10684_p1 }
 0xbc3   :  { %v10443_v12 = vld [vmem:[#allocation3 + $0x288] ss:$36 sps:$4 sm:$0xff]   ;;  %v10446_v26 = vld [vmem:[#allocation3 + $0x240] ss:$36 sps:$4 sm:$0xff]   ;;  %v16015_v48 = vld [vmem:[#allocation280_spill] sm:$0xff]  ;;  %v16020_v25 = vmov 0  }
 0xbc4   :  { %7034 = vmatpush1.bf16.msra.mxu0 %v10410_v11  ;;  %v10448_v4 = vld [vmem:[#allocation4 + $0x124] ss:$24 sps:$4 sm:$0xff]   ;;  %v10449_v22 = vld [vmem:[#allocation4 + $0xf4] ss:$24 sps:$4 sm:$0xff]   ;;  %p10687_p4 = pnand %p10686_p3, %p10680_p0 }
 0xbc5   :  { %9893 = vmatpush3.bf16.msra.mxu1 %v10391_v36  ;;  %7035 = vmatprep.subr.bf16.mxu0 %v10411_v55  ;;  %v10450_v15 = vld [vmem:[#allocation4 + $0xc4] ss:$24 sps:$4 sm:$0xff]   ;;  %v10451_v24 = vld [vmem:[#allocation4 + $0x94] ss:$24 sps:$4 sm:$0xff]  }
 0xbc6   :  { %9894 = vmatprep.subr.bf16.mxu1 %v15998_v28  ;;  %v10452_v44 = vld [vmem:[#allocation4 + $0x64] ss:$24 sps:$4 sm:$0xff]   ;;  %v10453_v10 = vld [vmem:[#allocation4 + $0x34] ss:$24 sps:$4 sm:$0xff]  }
 0xbc7   :  { %v10454_v57 = vld [vmem:[#allocation4 + $0x4] ss:$24 sps:$4 sm:$0xff]   ;;  %v16017_v36 = vld [vmem:[#allocation278_spill] sm:$0xff]  ;;  %v16018_v56 = vld [vmem:[#allocation279_spill] sm:$0xff] }
 0xbc8   :  { %7036 = vmatpush1.bf16.msra.mxu0 %v10413_v62  ;;  %v16019_v8 = vsel %vm13888_vm1, %v16017_v36, %v16018_v56  ;;  %v10455_v62 = vld [vmem:[#allocation4 + $0x158] ss:$24 sps:$4 sm:$0xff]  }
 0xbc9   :  { %9895 = vmatpush3.bf16.msra.mxu1 %v10392_v0  ;;  %7037 = vmatprep.subr.bf16.mxu0 %v10414_v20  ;;  %v10456_v20 = vld [vmem:[#allocation4 + $0x128] ss:$24 sps:$4 sm:$0xff]  }
 0xbca   :  { %9896 = vmatprep.subr.bf16.mxu1 %v15998_v28 }
 0xbcc   :  { %7038 = vmatpush1.bf16.msra.mxu0 %v10416_v19  ;;  %v10459_v19 = vld [vmem:[#allocation4 + $0x98] ss:$24 sps:$4 sm:$0xff]  }
 0xbcd   :  { %9897 = vmatpush3.bf16.msra.mxu1 %v10393_v1  ;;  %7039 = vmatprep.subr.bf16.mxu0 %v10417_v33  ;;  %v10460_v33 = vld [vmem:[#allocation4 + $0x68] ss:$24 sps:$4 sm:$0xff]  }
 0xbce   :  { %9898 = vmatprep.subr.bf16.mxu1 %v15998_v28 }
 0xbd0   :  { %7040 = vmatpush1.bf16.msra.mxu0 %v10419_v47  ;;  %v10462_v47 = vld [vmem:[#allocation4 + $0x8] ss:$24 sps:$4 sm:$0xff]  }
 0xbd1   :  { %9899 = vmatpush3.bf16.msra.mxu1 %v10394_v45  ;;  %7041 = vmatprep.subr.bf16.mxu0 %v10420_v7  ;;  %v10463_v7 = vld [vmem:[#allocation4 + $0x15c] ss:$24 sps:$4 sm:$0xff]  }
 0xbd2   :  { %9904 = vmatprep.subr.bf16.mxu1 %v15998_v28 }
 0xbd4   :  { %9901 = vmatmul.mubr.bf16.vlgmr.msra.gmra.mxu1 %v7084_v37  ;;  %7042 = vmatpush1.bf16.msra.mxu0 %v10422_v2  ;;  %v10457_v37 = vld [vmem:[#allocation4 + $0xf8] ss:$24 sps:$4 sm:$0xff]  }
 0xbd5   :  { %9905 = vmatpush3.bf16.msra.mxu1 %v10395_v34  ;;  %9912 = vmatprep.mubr.msk.bf16.mxu1 %vm10711_vm4, %v15998_v28  ;;  %v10458_v34 = vld [vmem:[#allocation4 + $0xc8] ss:$24 sps:$4 sm:$0xff]  }
 0xbd6   :  { %9906 = vmatprep.subr.bf16.mxu1 %v15998_v28  ;;  %7043 = vmatprep.subr.bf16.mxu0 %v10423_v46  ;;  %v10468_v2 = vld [vmem:[#allocation4 + $0x130] ss:$24 sps:$4 sm:$0xff]   ;;  %v10466_v46 = vld [vmem:[#allocation4 + $0x12c] ss:$24 sps:$4 sm:$0xff]  }
 0xbd8   :  { %7044 = vmatpush2.bf16.msra.mxu0 %v10425_v30  ;;  %v10469_v30 = vld [vmem:[#allocation4 + $0xfc] ss:$24 sps:$4 sm:$0xff]  }
 0xbd9   :  { %9907 = vmatpush3.bf16.msra.mxu1 %v10396_v42  ;;  %7045 = vmatprep.subr.bf16.mxu0 %v10426_v38  ;;  %v10461_v42 = vld [vmem:[#allocation4 + $0x38] ss:$24 sps:$4 sm:$0xff]  }
 0xbda   :  { %9908 = vmatprep.subr.bf16.mxu1 %v15998_v28  ;;  %v10474_v38 = vld [vmem:[#allocation4 + $0xd0] ss:$24 sps:$4 sm:$0xff]  }
 0xbdc   :  { %7046 = vmatpush2.bf16.msra.mxu0 %v10428_v49  ;;  %v10477_v49 = vld [vmem:[#allocation4 + $0xa0] ss:$24 sps:$4 sm:$0xff]  }
 0xbdd   :  { %9909 = vmatpush3.bf16.msra.mxu1 %v10397_v23  ;;  %7047 = vmatprep.subr.bf16.mxu0 %v10429_v50  ;;  %v10465_v23 = vld [vmem:[#allocation4 + $0x160] ss:$24 sps:$4 sm:$0xff]   ;;  %v10475_v50 = vld [vmem:[#allocation4 + $0x9c] ss:$24 sps:$4 sm:$0xff]  }
 0xbde   :  { %9910 = vmatprep.subr.bf16.mxu1 %v15998_v28 }
 0xbe0   :  { %7048 = vmatpush2.bf16.msra.mxu0 %v10431_v14  ;;  %v10480_v14 = vld [vmem:[#allocation4 + $0x70] ss:$24 sps:$4 sm:$0xff]  }
 0xbe1   :  { %9911 = vmatpush3.bf16.msra.mxu1 %v10398_v3  ;;  %7049 = vmatprep.subr.bf16.mxu0 %v10432_v6  ;;  %v10471_v3 = vld [vmem:[#allocation4 + $0x100] ss:$24 sps:$4 sm:$0xff]   ;;  %v10478_v6 = vld [vmem:[#allocation4 + $0x6c] ss:$24 sps:$4 sm:$0xff]  }
 0xbe2   :  { %9936 = vmatprep.subr.bf16.mxu1 %v15998_v28 }
 0xbe4   :  { %9913 = vmatmul.mubr.msk.bf16.vlgmr.msra.gmra.mxu1 %vm6039_vm5, %v7188_v54  ;;  %7050 = vmatpush2.bf16.msra.mxu0 %v10434_v39  ;;  %v10472_v54 = vld [vmem:[#allocation4 + $0xcc] ss:$24 sps:$4 sm:$0xff]  }
 0xbe5   :  { %9952 = vmatprep.mubr.msk.bf16.mxu1 %vm10711_vm4, %v15998_v28  ;;  %7051 = vmatprep.subr.bf16.mxu0 %v10435_v63  ;;  %v9507_v63 = vld [vmem:[%s15172_s9 + $0x24] ss:$0 sm:$0xff] }
 0xbe6   :  { %9937 = vmatpush3.bf16.msra.mxu1 %v10455_v62  ;;  %v10487_v62 = vld [vmem:[#allocation3 + $0x200] ss:$36 sps:$4 sm:$0xff]  }
 0xbe7   :  { %9938 = vmatprep.subr.bf16.mxu1 %v15998_v28 }
 0xbe8   :  { %7052 = vmatpush2.bf16.msra.mxu0 %v10437_v40  ;;  %v16021_v40 = vld [vmem:[#allocation267_spill] sm:$0xff] }
 0xbe9   :  { %7053 = vmatprep.subr.bf16.mxu0 %v10438_v13 }
 0xbea   :  { %9939 = vmatpush3.bf16.msra.mxu1 %v10456_v20  ;;  %v10489_v20 = vld [vmem:[#allocation3 + $0x204] ss:$36 sps:$4 sm:$0xff]  }
 0xbeb   :  { %9940 = vmatprep.subr.bf16.mxu1 %v15998_v28 }
 0xbec   :  { %7054 = vmatpush2.bf16.msra.mxu0 %v10440_v58 }
 0xbed   :  { %7055 = vmatprep.subr.bf16.mxu0 %v10441_v59 }
 0xbee   :  { %9941 = vmatpush3.bf16.msra.mxu1 %v10457_v37  ;;  %v9484_v37 = vld [vmem:[%s15172_s9 + $0x16] ss:$0 sm:$0xff] }
 0xbef   :  { %9942 = vmatprep.subr.bf16.mxu1 %v15998_v28 }
 0xbf0   :  { %7056 = vmatpush2.bf16.msra.mxu0 %v10443_v12 }
 0xbf1   :  { %7057 = vmatprep.subr.bf16.mxu0 %v10444_v41 }
 0xbf2   :  { %9943 = vmatpush3.bf16.msra.mxu1 %v10458_v34  ;;  %v9510_v34 = vld [vmem:[%s15172_s9 + $0x25] ss:$0 sm:$0xff] }
 0xbf3   :  { %9944 = vmatprep.subr.bf16.mxu1 %v15998_v28 }
 0xbf4   :  { %7058 = vmatpush2.bf16.msra.mxu0 %v10446_v26 }
 0xbf5   :  { %9916 = vmatprep.subr.bf16.mxu0 %v15998_v28 }
 0xbf6   :  { %9945 = vmatpush3.bf16.msra.mxu1 %v10459_v19 }
 0xbf7   :  { %7060 = vmatmul.mubr.bf16.vlgmr.msra.gmra.mxu0 %v6853_v29  ;;  %9946 = vmatprep.subr.bf16.mxu1 %v15998_v28 }
 0xbf8   :  { %9917 = vmatpush3.bf16.msra.mxu0 %v10447_v51  ;;  %9932 = vmatprep.mubr.msk.bf16.mxu0 %vm10711_vm4, %v15998_v28 }
 0xbf9   :  { %9918 = vmatprep.subr.bf16.mxu0 %v15998_v28 }
 0xbfa   :  { %9947 = vmatpush3.bf16.msra.mxu1 %v10460_v33 }
 0xbfb   :  { %9948 = vmatprep.subr.bf16.mxu1 %v15998_v28 }
 0xbfc   :  { %9919 = vmatpush3.bf16.msra.mxu0 %v10448_v4 }
 0xbfd   :  { %9920 = vmatprep.subr.bf16.mxu0 %v15998_v28 }
 0xbfe   :  { %9949 = vmatpush3.bf16.msra.mxu1 %v10461_v42 }
 0xbff   :  { %9950 = vmatprep.subr.bf16.mxu1 %v15998_v28 }
 0xc00   :  { %9921 = vmatpush3.bf16.msra.mxu0 %v10449_v22 }
 0xc01   :  { %9922 = vmatprep.subr.bf16.mxu0 %v15998_v28 }
 0xc02   :  { %9951 = vmatpush3.bf16.msra.mxu1 %v10462_v47 }
 0xc03   :  { %7928 = vmatprep.subr.bf16.mxu1 %v10489_v20  ;;  %v10553_v20 = vld [vmem:[#allocation3 + $0x58] ss:$36 sps:$4 sm:$0xff]  }
 0xc04   :  { %9923 = vmatpush3.bf16.msra.mxu0 %v10450_v15 }
 0xc05   :  { %9924 = vmatprep.subr.bf16.mxu0 %v15998_v28 }
 0xc08   :  { %9925 = vmatpush3.bf16.msra.mxu0 %v10451_v24 }
 0xc09   :  { %9926 = vmatprep.subr.bf16.mxu0 %v15998_v28 }
 0xc0c   :  { %9927 = vmatpush3.bf16.msra.mxu0 %v10452_v44 }
 0xc0d   :  { %9928 = vmatprep.subr.bf16.mxu0 %v15998_v28 }
 0xc10   :  { %9929 = vmatpush3.bf16.msra.mxu0 %v10453_v10 }
 0xc11   :  { %9930 = vmatprep.subr.bf16.mxu0 %v15998_v28 }
 0xc14   :  { %9931 = vmatpush3.bf16.msra.mxu0 %v10454_v57 }
 0xc15   :  { %7615 = vmatprep.subr.bf16.mxu0 %v10465_v23 }
 0xc94   :  { %v15064_v60 = vpop.f32.mrf.mxu1 }
 0xc95   :  { %v7175_v33 = vadd.f32 %v9484_v37, %v15064_v60  ;;  %v10498_v60 = vld [vmem:[#allocation3 + $0x12c] ss:$36 sps:$4 sm:$0xff]   ;;  %v10558_v37 = vld [vmem:[#allocation3 + $0x14] ss:$36 sps:$4 sm:$0xff]  }
 0xc96   :  { %v9902_v9 = vpop.f32.mrf.mxu1 }
 0xc98   :  { %v7177_v16 = vpop.f32.mrf.mxu1 }
 0xc9a   :  { %v9903_v21 = vpop.f32.mrf.mxu1 }
 0xca4   :  { %v7257_v52 = vpop.f32.mrf.mxu1 }
 0xca5   :  { %v7258_v5 = vadd.f32 %v9493_v18, %v7257_v52 }
 0xca6   :  { %v9914_v31 = vpop.f32.mrf.mxu1 }
 0xca7   :  { %v7263_v43 = vmul.f32 %v7258_v5, %v16015_v48 }
 0xca8   :  { %v7260_v53 = vpop.f32.mrf.mxu1 }
 0xca9   :  { %v7264_v32 = vadd.f32 %v7263_v43, %v16019_v8 }
 0xcaa   :  { %v9915_v0 = vpop.f32.mrf.mxu1 }
 0xcab   :  { %v7281_v35 = vpack.c.bf16 %v7264_v32, %v7264_v32 }
 0xcad   :  { %9933 = vmatmul.mubr.bf16.vlgmr.msra.gmra.mxu0 %v7281_v35  ;;  %v10483_v35 = vld [vmem:[#allocation4 + $0x40] ss:$24 sps:$4 sm:$0xff]  }
 0xcae   :  { %7647 = vmatprep.mubr.bf16.mxu0 %v16020_v25  ;;  %7616 = vmatpush1.bf16.msra.mxu0 %v10463_v7  ;;  %v10481_v25 = vld [vmem:[#allocation4 + $0x3c] ss:$24 sps:$4 sm:$0xff]  }
 0xcaf   :  { %7617 = vmatprep.subr.bf16.mxu0 %v10468_v2  ;;  %v10570_v2 = vld [vmem:[#allocation3 + $0x374] ss:$36 sps:$4 sm:$0xff]  }
 0xcb2   :  { %7618 = vmatpush1.bf16.msra.mxu0 %v10466_v46  ;;  %v16023_v46 = vld [vmem:[#allocation275_spill] sm:$0xff] }
 0xcb3   :  { %7619 = vmatprep.subr.bf16.mxu0 %v10471_v3  ;;  %v16024_v3 = vld [vmem:[#allocation276_spill] sm:$0xff] }
 0xcb6   :  { %7620 = vmatpush1.bf16.msra.mxu0 %v10469_v30  ;;  %v16025_v30 = vsel %vm13860_vm6, %v16023_v46, %v16024_v3  ;;  %v10568_v46 = vld [vmem:[#allocation3 + $0x370] ss:$36 sps:$4 sm:$0xff]  }
 0xcb7   :  { %v15076_v1 = vpop.f32.mrf.mxu0  ;;  %7621 = vmatprep.subr.bf16.mxu0 %v10474_v38  ;;  %v10573_v3 = vld [vmem:[#allocation3 + $0x32c] ss:$36 sps:$4 sm:$0xff]  }
 0xcb9   :  { %v15078_v11 = vpop.f32.mrf.mxu0 }
 0xcba   :  { %7622 = vmatpush1.bf16.msra.mxu0 %v10472_v54 }
 0xcbb   :  { %v7065_v55 = vpop.f32.mrf.mxu0  ;;  %7623 = vmatprep.subr.bf16.mxu0 %v10477_v49 }
 0xcbc   :  { %v10486_v55 = vld [vmem:[#allocation4 + $0x10] ss:$24 sps:$4 sm:$0xff]  }
 0xcbd   :  { %v7066_v45 = vpop.f32.mrf.mxu0 }
 0xcbe   :  { %7624 = vmatpush1.bf16.msra.mxu0 %v10475_v50  ;;  %v10484_v45 = vld [vmem:[#allocation4 + $0xc] ss:$24 sps:$4 sm:$0xff]   ;;  %v10492_v50 = vld [vmem:[#allocation3 + $0x1bc] ss:$36 sps:$4 sm:$0xff]  }
 0xcbf   :  { %7625 = vmatprep.subr.bf16.mxu0 %v10480_v14  ;;  %v10490_v14 = vld [vmem:[#allocation3 + $0x1b8] ss:$36 sps:$4 sm:$0xff]  }
 0xcc2   :  { %7626 = vmatpush1.bf16.msra.mxu0 %v10478_v6  ;;  %v10495_v6 = vld [vmem:[#allocation3 + $0x174] ss:$36 sps:$4 sm:$0xff]  }
 0xcc3   :  { %7627 = vmatprep.subr.bf16.mxu0 %v10483_v35  ;;  %v10549_v35 = vld [vmem:[#allocation3 + $0xec] ss:$36 sps:$4 sm:$0xff]  }
 0xcc6   :  { %7628 = vmatpush1.bf16.msra.mxu0 %v10481_v25  ;;  %v10547_v25 = vld [vmem:[#allocation3 + $0xe8] ss:$36 sps:$4 sm:$0xff]  }
 0xcc7   :  { %7629 = vmatprep.subr.bf16.mxu0 %v10486_v55  ;;  %v10552_v55 = vld [vmem:[#allocation3 + $0xa4] ss:$36 sps:$4 sm:$0xff]  }
 0xcca   :  { %7630 = vmatpush1.bf16.msra.mxu0 %v10484_v45  ;;  %v10550_v45 = vld [vmem:[#allocation3 + $0xa0] ss:$36 sps:$4 sm:$0xff]  }
 0xd6d   :  { %v7364_v39 = vpop.f32.mrf.mxu0 }
 0xd6e   :  { %v7365_v13 = vadd.f32 %v7364_v39, %v16021_v40  ;;  %v10493_v39 = vld [vmem:[#allocation3 + $0x170] ss:$36 sps:$4 sm:$0xff]   ;;  %v10501_v40 = vld [vmem:[#allocation3 + $0xe4] ss:$36 sps:$4 sm:$0xff]  }
 0xd6f   :  { %v9934_v58 = vpop.f32.mrf.mxu0 }
 0xd70   :  { %v7377_v59 = vadd.f32 %v9507_v63, %v7365_v13  ;;  %v10496_v63 = vld [vmem:[#allocation3 + $0x128] ss:$36 sps:$4 sm:$0xff]   ;;  %v10499_v13 = vld [vmem:[#allocation3 + $0xe0] ss:$36 sps:$4 sm:$0xff]  }
 0xd71   :  { %v7367_v12 = vpop.f32.mrf.mxu0  ;;  %v10504_v58 = vld [vmem:[#allocation3 + $0x9c] ss:$36 sps:$4 sm:$0xff]  }
 0xd72   :  { %v7378_v41 = vmul.f32 0.70710677, %v7377_v59  ;;  %vm7398_vm10 = vcmp.lt.f32.partialorder %v7377_v59, 0.0  ;;  %v7401_v56 = vmul.f32 0.5, %v7377_v59  ;;  %v10502_v59 = vld [vmem:[#allocation3 + $0x98] ss:$36 sps:$4 sm:$0xff]  }
 0xd73   :  { %v9935_v26 = vpop.f32.mrf.mxu0  ;;  %v10507_v12 = vld [vmem:[#allocation3 + $0x54] ss:$36 sps:$4 sm:$0xff]  }
 0xd74   :  { %v7379_v51 = vand.u32 2147483647, %v7378_v41  ;;  %v10505_v41 = vld [vmem:[#allocation3 + $0x50] ss:$36 sps:$4 sm:$0xff]  }
 0xd75   :  { %v10510_v26 = vld [vmem:[#allocation3 + $0xc] ss:$36 sps:$4 sm:$0xff]  }
 0xd76   :  { %v7380_v29 = vmul.f32 0.3275911, %v7379_v51  ;;  %v7392_v22 = vsub.f32 0.0, %v7379_v51 }
 0xd78   :  { %v7381_v4 = vadd.f32 1.0, %v7380_v29  ;;  %v7393_v15 = vmul.f32 %v7392_v22, %v7379_v51  ;;  %v10508_v51 = vld [vmem:[#allocation3 + $0x8] ss:$36 sps:$4 sm:$0xff]   ;;  %v10516_v22 = vld [vmem:[#allocation3 + $0x3fc] ss:$36 sps:$4 sm:$0xff]  }
 0xd79   :  { %v10513_v29 = vld [vmem:[#allocation3 + $0x444] ss:$36 sps:$4 sm:$0xff]  }
 0xd7a   :  { %10655 = vrcp.f32 %v7381_v4  ;;  %v7394_v10 = vmul.f32 1.442695, %v7393_v15  ;;  %v10511_v4 = vld [vmem:[#allocation3 + $0x440] ss:$36 sps:$4 sm:$0xff]   ;;  %v10514_v15 = vld [vmem:[#allocation3 + $0x3f8] ss:$36 sps:$4 sm:$0xff]  }
 0xd7c   :  { %10657 = vpow2.f32 %v7394_v10  ;;  %v10522_v10 = vld [vmem:[#allocation3 + $0x36c] ss:$36 sps:$4 sm:$0xff]  }
 0xd87   :  { %v10656_v24 = vpop.eup %10655 }
 0xd88   :  { %v7383_v44 = vmul.f32 1.0614054, %v10656_v24 }
 0xd89   :  { %v10658_v48 = vpop.eup %10657 }
 0xd8a   :  { %v9508_v57 = vadd.f32 -1.4531521, %v7383_v44  ;;  %v10517_v44 = vld [vmem:[#allocation3 + $0x3b0] ss:$36 sps:$4 sm:$0xff]  }
 0xd8c   :  { %v7385_v9 = vmul.f32 %v10656_v24, %v9508_v57  ;;  %v10520_v57 = vld [vmem:[#allocation3 + $0x368] ss:$36 sps:$4 sm:$0xff]  }
 0xd8e   :  { %v7386_v16 = vadd.f32 1.4214138, %v7385_v9  ;;  %v10525_v9 = vld [vmem:[#allocation3 + $0x324] ss:$36 sps:$4 sm:$0xff]  }
 0xd90   :  { %v7387_v21 = vmul.f32 %v10656_v24, %v7386_v16  ;;  %v10523_v16 = vld [vmem:[#allocation3 + $0x320] ss:$36 sps:$4 sm:$0xff]  }
 0xd92   :  { %v9509_v18 = vadd.f32 -0.28449672, %v7387_v21  ;;  %v10528_v21 = vld [vmem:[#allocation3 + $0x2dc] ss:$36 sps:$4 sm:$0xff]  }
 0xd94   :  { %v7389_v52 = vmul.f32 %v10656_v24, %v9509_v18  ;;  %v10526_v18 = vld [vmem:[#allocation3 + $0x2d8] ss:$36 sps:$4 sm:$0xff]  }
 0xd96   :  { %v7390_v5 = vadd.f32 0.2548296, %v7389_v52  ;;  %v10529_v52 = vld [vmem:[#allocation3 + $0x290] ss:$36 sps:$4 sm:$0xff]  }
 0xd98   :  { %v7391_v31 = vmul.f32 %v10656_v24, %v7390_v5  ;;  %v10519_v24 = vld [vmem:[#allocation3 + $0x3b4] ss:$36 sps:$4 sm:$0xff]  }
 0xd99   :  { %v10531_v5 = vld [vmem:[#allocation3 + $0x294] ss:$36 sps:$4 sm:$0xff]  }
 0xd9a   :  { %v7396_v43 = vmul.f32 %v10658_v48, %v7391_v31  ;;  %v10534_v31 = vld [vmem:[#allocation3 + $0x24c] ss:$36 sps:$4 sm:$0xff]  }
 0xd9b   :  { %v10532_v48 = vld [vmem:[#allocation3 + $0x248] ss:$36 sps:$4 sm:$0xff]  }
 0xd9c   :  { %v7397_v53 = vsub.f32 1.0, %v7396_v43  ;;  %v10535_v43 = vld [vmem:[#allocation3 + $0x208] ss:$36 sps:$4 sm:$0xff]  }
 0xd9e   :  { %v7399_v61 = vsub.f32 0.0, %v7397_v53 }
 0xda0   :  { %v7400_v36 = vsel %vm7398_vm10, %v7399_v61, %v7397_v53  ;;  %v10537_v53 = vld [vmem:[#allocation3 + $0x20c] ss:$36 sps:$4 sm:$0xff]   ;;  %v10540_v61 = vld [vmem:[#allocation3 + $0x1c4] ss:$36 sps:$4 sm:$0xff]  }
 0xda1   :  { %v7402_v8 = vadd.f32 1.0, %v7400_v36  ;;  %8167 = vmatprep.subr.bf16.mxu0 %v10537_v53  ;;  %v10538_v36 = vld [vmem:[#allocation3 + $0x1c0] ss:$36 sps:$4 sm:$0xff]  }
 0xda3   :  { %v7403_v32 = vmul.f32 %v7402_v8, %v7401_v56  ;;  %v10543_v56 = vld [vmem:[#allocation3 + $0x17c] ss:$36 sps:$4 sm:$0xff]  }
 0xda4   :  { %v10541_v8 = vld [vmem:[#allocation3 + $0x178] ss:$36 sps:$4 sm:$0xff]  }
 0xda5   :  { %v7420_v0 = vpack.c.bf16 %v7403_v32, %v7403_v32  ;;  %v10546_v32 = vld [vmem:[#allocation3 + $0x134] ss:$36 sps:$4 sm:$0xff]  }
 0xda7   :  { %9953 = vmatmul.mubr.bf16.vlgmr.msra.gmra.mxu1 %v7420_v0  ;;  %v10544_v0 = vld [vmem:[#allocation3 + $0x130] ss:$36 sps:$4 sm:$0xff]  }
 0xda8   :  { %7929 = vmatpush1.bf16.msra.mxu1 %v10487_v62  ;;  %v10555_v62 = vld [vmem:[#allocation3 + $0x5c] ss:$36 sps:$4 sm:$0xff]  }
 0xda9   :  { %7930 = vmatprep.subr.bf16.mxu1 %v10492_v50  ;;  %v16026_v50 = vld [vmem:[#allocation263_spill] sm:$0xff] }
 0xdac   :  { %7931 = vmatpush1.bf16.msra.mxu1 %v10490_v14 }
 0xdad   :  { %7932 = vmatprep.subr.bf16.mxu1 %v10495_v6 }
 0xdb0   :  { %7933 = vmatpush1.bf16.msra.mxu1 %v10493_v39 }
 0xdb1   :  { %7934 = vmatprep.subr.bf16.mxu1 %v10498_v60 }
 0xdb4   :  { %7935 = vmatpush1.bf16.msra.mxu1 %v10496_v63  ;;  %v16027_v63 = vld [vmem:[#allocation264_spill] sm:$0xff] }
 0xdb5   :  { %7936 = vmatprep.subr.bf16.mxu1 %v10501_v40 }
 0xdb8   :  { %7937 = vmatpush1.bf16.msra.mxu1 %v10499_v13 }
 0xdb9   :  { %7938 = vmatprep.subr.bf16.mxu1 %v10504_v58 }
 0xdbc   :  { %7939 = vmatpush1.bf16.msra.mxu1 %v10502_v59 }
 0xdbd   :  { %7940 = vmatprep.subr.bf16.mxu1 %v10507_v12 }
 0xdc0   :  { %7941 = vmatpush1.bf16.msra.mxu1 %v10505_v41 }
 0xdc1   :  { %7942 = vmatprep.subr.bf16.mxu1 %v10510_v26 }
 0xdc4   :  { %7943 = vmatpush1.bf16.msra.mxu1 %v10508_v51 }
 0xdc5   :  { %7944 = vmatprep.subr.bf16.mxu1 %v10513_v29 }
 0xdc8   :  { %7945 = vmatpush2.bf16.msra.mxu1 %v10511_v4 }
 0xdc9   :  { %7946 = vmatprep.subr.bf16.mxu1 %v10516_v22 }
 0xdcc   :  { %7947 = vmatpush2.bf16.msra.mxu1 %v10514_v15 }
 0xdcd   :  { %7948 = vmatprep.subr.bf16.mxu1 %v10519_v24 }
 0xdd0   :  { %7949 = vmatpush2.bf16.msra.mxu1 %v10517_v44 }
 0xdd1   :  { %7950 = vmatprep.subr.bf16.mxu1 %v10522_v10 }
 0xdd4   :  { %7951 = vmatpush2.bf16.msra.mxu1 %v10520_v57 }
 0xdd5   :  { %7952 = vmatprep.subr.bf16.mxu1 %v10525_v9 }
 0xdd8   :  { %7953 = vmatpush2.bf16.msra.mxu1 %v10523_v16 }
 0xdd9   :  { %7954 = vmatprep.subr.bf16.mxu1 %v10528_v21 }
 0xddc   :  { %7955 = vmatpush2.bf16.msra.mxu1 %v10526_v18 }
 0xddd   :  { %7956 = vmatprep.subr.bf16.mxu1 %v10531_v5 }
 0xde0   :  { %7957 = vmatpush2.bf16.msra.mxu1 %v10529_v52 }
 0xde1   :  { %7958 = vmatprep.subr.bf16.mxu1 %v10534_v31 }
 0xde4   :  { %7959 = vmatpush2.bf16.msra.mxu1 %v10532_v48 }
 0xe67   :  { %v7510_v19 = vpop.f32.mrf.mxu1 }
 0xe68   :  { %v7511_v42 = vadd.f32 %v9510_v34, %v7510_v19  ;;  %v10556_v34 = vld [vmem:[#allocation3 + $0x10] ss:$36 sps:$4 sm:$0xff]  }
 0xe69   :  { %v9954_v47 = vpop.f32.mrf.mxu1  ;;  %v10561_v19 = vld [vmem:[#allocation3 + $0x44c] ss:$36 sps:$4 sm:$0xff]  }
 0xe6a   :  { %v7516_v7 = vmul.f32 %v7511_v42, %v7175_v33  ;;  %v10559_v33 = vld [vmem:[#allocation3 + $0x448] ss:$36 sps:$4 sm:$0xff]   ;;  %v10562_v47 = vld [vmem:[#allocation3 + $0x400] ss:$36 sps:$4 sm:$0xff]  }
 0xe6b   :  { %v7513_v23 = vpop.f32.mrf.mxu1  ;;  %v10564_v42 = vld [vmem:[#allocation3 + $0x404] ss:$36 sps:$4 sm:$0xff]  }
 0xe6c   :  { %v7517_v38 = vadd.f32 %v7516_v7, %v16025_v30  ;;  %v10567_v7 = vld [vmem:[#allocation3 + $0x3bc] ss:$36 sps:$4 sm:$0xff]   ;;  %v10571_v30 = vld [vmem:[#allocation3 + $0x328] ss:$36 sps:$4 sm:$0xff]  }
 0xe6d   :  { %v9955_v54 = vpop.f32.mrf.mxu1  ;;  %v10565_v23 = vld [vmem:[#allocation3 + $0x3b8] ss:$36 sps:$4 sm:$0xff]  }
 0xe6e   :  { %v7534_v49 = vpack.c.bf16 %v7517_v38, %v7517_v38  ;;  %v7656_v38 = vld [vmem:[%s15172_s9 + $0x26] sm:$0x3] }
 0xe6f   :  { %v7661_v54 = vrot.slane %v7656_v38, %v16013_v17  ;;  %v7665_v6 = vrot.slane %v7656_v38, %v16014_v27 }
 0xe70   :  { %7648 = vmatmul.mubr.bf16.vlgmr.msra.gmra.mxu0 %v7534_v49 }
 0xe71   :  { %8168 = vmatpush1.bf16.msra.mxu0 %v10535_v43 }
 0xe72   :  { %8169 = vmatprep.subr.bf16.mxu0 %v10540_v61 }
 0xe75   :  { %8170 = vmatpush1.bf16.msra.mxu0 %v10538_v36 }
 0xe76   :  { %8171 = vmatprep.subr.bf16.mxu0 %v10543_v56 }
 0xe79   :  { %8172 = vmatpush1.bf16.msra.mxu0 %v10541_v8 }
 0xe7a   :  { %8173 = vmatprep.subr.bf16.mxu0 %v10546_v32 }
 0xe7d   :  { %8174 = vmatpush1.bf16.msra.mxu0 %v10544_v0 }
 0xe7e   :  { %8175 = vmatprep.subr.bf16.mxu0 %v10549_v35 }
 0xe81   :  { %8176 = vmatpush1.bf16.msra.mxu0 %v10547_v25 }
 0xe82   :  { %8177 = vmatprep.subr.bf16.mxu0 %v10552_v55 }
 0xe85   :  { %8178 = vmatpush1.bf16.msra.mxu0 %v10550_v45 }
 0xe86   :  { %8179 = vmatprep.subr.bf16.mxu0 %v10555_v62 }
 0xe89   :  { %8180 = vmatpush1.bf16.msra.mxu0 %v10553_v20 }
 0xe8a   :  { %8181 = vmatprep.subr.bf16.mxu0 %v10558_v37 }
 0xe8d   :  { %8182 = vmatpush1.bf16.msra.mxu0 %v10556_v34 }
 0xe8e   :  { %8183 = vmatprep.subr.bf16.mxu0 %v10561_v19 }
 0xe91   :  { %8184 = vmatpush2.bf16.msra.mxu0 %v10559_v33 }
 0xe92   :  { %8185 = vmatprep.subr.bf16.mxu0 %v10564_v42 }
 0xe95   :  { %8186 = vmatpush2.bf16.msra.mxu0 %v10562_v47 }
 0xe96   :  { %8187 = vmatprep.subr.bf16.mxu0 %v10567_v7 }
 0xe99   :  { %8188 = vmatpush2.bf16.msra.mxu0 %v10565_v23 }
 0xe9a   :  { %8189 = vmatprep.subr.bf16.mxu0 %v10570_v2 }
 0xe9d   :  { %8190 = vmatpush2.bf16.msra.mxu0 %v10568_v46 }
 0xe9e   :  { %8191 = vmatprep.subr.bf16.mxu0 %v10573_v3 }
 0xea1   :  { %8192 = vmatpush2.bf16.msra.mxu0 %v10571_v30 }
 0xf30   :  { %v7649_v49 = vpop.f32.mrf.mxu0 }
 0xf31   :  { %v7650_v14 = vadd.f32 %v7649_v49, %v16026_v50 }
 0xf32   :  { %v7651_v39 = vpop.f32.mrf.mxu0 }
 0xf33   :  { %v7668_v60 = vadd.f32 %v7661_v54, %v7650_v14  ;;  %v7652_v40 = vadd.f32 %v16027_v63, %v7651_v39  ;;  %v10576_v39 = vld [vmem:[#allocation3 + $0x2e4] ss:$36 sps:$4 sm:$0xff]  }
 0xf34   :  { %v7653_v13 = vpop.f32.mrf.mxu0  ;;  %v10574_v63 = vld [vmem:[#allocation3 + $0x2e0] ss:$36 sps:$4 sm:$0xff]   ;;  %8193 = vmatprep.subr.bf16.mxu0 %v10576_v39  ;;  %v10622_v39 = vld [vmem:[#allocation3 + $0x2e8] ss:$36 sps:$4 sm:$0xff]  }
 0xf35   :  { %v7670_v58 = vmul.f32 0.70710677, %v7668_v60  ;;  %v7669_v59 = vadd.f32 %v7665_v6, %v7652_v40  ;;  %vm7710_vm6 = vcmp.lt.f32.partialorder %v7668_v60, 0.0  ;;  %v7716_v3 = vmul.f32 0.5, %v7668_v60  ;;  %8194 = vmatpush2.bf16.msra.mxu0 %v10574_v63  ;;  %v10579_v40 = vld [vmem:[#allocation3 + $0x29c] ss:$36 sps:$4 sm:$0xff]  }
 0xf36   :  { %v7654_v12 = vpop.f32.mrf.mxu0  ;;  %v10577_v13 = vld [vmem:[#allocation3 + $0x298] ss:$36 sps:$4 sm:$0xff]   ;;  %8195 = vmatprep.subr.bf16.mxu0 %v10579_v40  ;;  %v10583_v60 = vld [vmem:[#allocation3 + $0x210] ss:$36 sps:$4 sm:$0xff]   ;;  %v10625_v63 = vld [vmem:[#allocation3 + $0x2a0] ss:$36 sps:$4 sm:$0xff]  }
 0xf37   :  { %v7672_v41 = vand.u32 2147483647, %v7670_v58  ;;  %v7671_v26 = vmul.f32 0.70710677, %v7669_v59  ;;  %vm7711_vm11 = vcmp.lt.f32.partialorder %v7669_v59, 0.0  ;;  %v7717_v38 = vmul.f32 0.5, %v7669_v59 }
 0xf38   :  { %v10582_v58 = vld [vmem:[#allocation3 + $0x254] ss:$36 sps:$4 sm:$0xff]   ;;  %v10627_v40 = vld [vmem:[#allocation3 + $0x2a4] ss:$36 sps:$4 sm:$0xff]  }
 0xf39   :  { %v7674_v51 = vmul.f32 0.3275911, %v7672_v41  ;;  %v7673_v29 = vand.u32 2147483647, %v7671_v26  ;;  %v7698_v24 = vsub.f32 0.0, %v7672_v41  ;;  %8196 = vmatpush2.bf16.msra.mxu0 %v10577_v13 }
 0xf3a   :  { %v10580_v12 = vld [vmem:[#allocation3 + $0x250] ss:$36 sps:$4 sm:$0xff]   ;;  %8197 = vmatprep.subr.bf16.mxu0 %v10582_v58  ;;  %v7756_v26 = vld [vmem:[%s15172_s9 + $0x28] sm:$0x3]  ;;  %v10630_v13 = vld [vmem:[#allocation3 + $0x25c] ss:$36 sps:$4 sm:$0xff]  }
 0xf3b   :  { %v7676_v4 = vadd.f32 1.0, %v7674_v51  ;;  %v7675_v22 = vmul.f32 0.3275911, %v7673_v29  ;;  %v7699_v44 = vsub.f32 0.0, %v7673_v29  ;;  %v7700_v10 = vmul.f32 %v7698_v24, %v7672_v41  ;;  %v10585_v59 = vld [vmem:[#allocation3 + $0x214] ss:$36 sps:$4 sm:$0xff]  }
 0xf3c   :  { %8480 = vmatprep.subr.bf16.mxu1 %v10585_v59  ;;  %v6855_v41 = vld [vmem:[%s15172_s9 + $0x14] sm:$0x3]  ;;  %v10628_v58 = vld [vmem:[#allocation3 + $0x258] ss:$36 sps:$4 sm:$0xff]  }
 0xf3d   :  { %10659 = vrcp.f32 %v7676_v4  ;;  %v7677_v15 = vadd.f32 1.0, %v7675_v22  ;;  %v7701_v9 = vmul.f32 %v7699_v44, %v7673_v29  ;;  %v7702_v21 = vmul.f32 1.442695, %v7700_v10  ;;  %8198 = vmatpush2.bf16.msra.mxu0 %v10580_v12  ;;  %v10631_v12 = vld [vmem:[#allocation3 + $0x458] ss:$36 sps:$4 sm:$0xff]  }
 0xf3e   :  { %v6860_v51 = vrot.slane %v6855_v41, %v16013_v17  ;;  %v7761_v29 = vrot.slane %v7756_v26, %v16013_v17  ;;  %v6864_v4 = vrot.slane %v6855_v41, %v16014_v27  ;;  %v7765_v22 = vrot.slane %v7756_v26, %v16014_v27  ;;  %v10633_v59 = vld [vmem:[#allocation3 + $0x410] ss:$36 sps:$4 sm:$0xff]   ;;  %9813 = vmatprep.subr.bf16.mxu0 %v10631_v12  ;;  %v10635_v26 = vld [vmem:[#allocation3 + $0x3c8] ss:$36 sps:$4 sm:$0xff]  }
 0xf3f   :  { %10661 = vrcp.f32 %v7677_v15  ;;  %v7704_v5 = vmul.f32 1.442695, %v7701_v9  ;;  %v10634_v41 = vld [vmem:[#allocation3 + $0x1d0] ss:$36 sps:$4 sm:$0xff]  }
 0xf40   :  { %10663 = vpow2.f32 %v7702_v21  ;;  %v7062_v24 = vadd.f32 %v15076_v1, %v6860_v51  ;;  %v10636_v51 = vld [vmem:[#allocation3 + $0x188] ss:$36 sps:$4 sm:$0xff]  }
 0xf41   :  { %10665 = vpow2.f32 %v7704_v5  ;;  %v16029_v5 = vld [vmem:[#allocation270_spill] sm:$0xff] }
 0xf4a   :  { %v10660_v57 = vpop.eup %10659 }
 0xf4b   :  { %v7680_v16 = vmul.f32 1.0614054, %v10660_v57 }
 0xf4c   :  { %v10662_v18 = vpop.eup %10661 }
 0xf4d   :  { %v9535_v52 = vadd.f32 -1.4531521, %v7680_v16  ;;  %v7681_v31 = vmul.f32 1.0614054, %v10662_v18  ;;  %v10664_v62 = vpop.eup %10663 }
 0xf4e   :  { %v10666_v19 = vpop.eup %10665 }
 0xf4f   :  { %v7684_v48 = vmul.f32 %v10660_v57, %v9535_v52  ;;  %v9536_v43 = vadd.f32 -1.4531521, %v7681_v31  ;;  %v16030_v31 = vld [vmem:[#allocation271_spill] sm:$0xff] }
 0xf51   :  { %v7686_v53 = vadd.f32 1.4214138, %v7684_v48  ;;  %v7685_v61 = vmul.f32 %v10662_v18, %v9536_v43  ;;  %v16031_v48 = vsel %vm13735_vm0, %v16029_v5, %v16030_v31  ;;  %v16037_v31 = vld [vmem:[#allocation262_spill] sm:$0xff] }
 0xf53   :  { %v7688_v36 = vmul.f32 %v10660_v57, %v7686_v53  ;;  %v7687_v56 = vadd.f32 1.4214138, %v7685_v61 }
 0xf55   :  { %v9537_v8 = vadd.f32 -0.28449672, %v7688_v36  ;;  %v7689_v32 = vmul.f32 %v10662_v18, %v7687_v56  ;;  %v16033_v36 = vld [vmem:[#allocation272_spill] sm:$0xff]  ;;  %v16034_v56 = vld [vmem:[#allocation273_spill] sm:$0xff] }
 0xf56   :  { %v16035_v1 = vsel %vm13742_vm2, %v16033_v36, %v16034_v56 }
 0xf57   :  { %v7692_v0 = vmul.f32 %v10660_v57, %v9537_v8  ;;  %v9538_v35 = vadd.f32 -0.28449672, %v7689_v32 }
 0xf59   :  { %v7694_v25 = vadd.f32 0.2548296, %v7692_v0  ;;  %v7693_v55 = vmul.f32 %v10662_v18, %v9538_v35  ;;  %v10586_v35 = vld [vmem:[#allocation3 + $0x1c8] ss:$36 sps:$4 sm:$0xff]  }
 0xf5b   :  { %v7696_v45 = vmul.f32 %v10660_v57, %v7694_v25  ;;  %v7695_v20 = vadd.f32 0.2548296, %v7693_v55  ;;  %v7064_v57 = vadd.f32 %v15078_v11, %v6864_v4  ;;  %v10588_v11 = vld [vmem:[#allocation3 + $0x1cc] ss:$36 sps:$4 sm:$0xff]   ;;  %v10591_v25 = vld [vmem:[#allocation3 + $0x184] ss:$36 sps:$4 sm:$0xff]  }
 0xf5c   :  { %v10589_v55 = vld [vmem:[#allocation3 + $0x180] ss:$36 sps:$4 sm:$0xff]  }
 0xf5d   :  { %v7706_v37 = vmul.f32 %v10664_v62, %v7696_v45  ;;  %v7697_v34 = vmul.f32 %v10662_v18, %v7695_v20  ;;  %v10594_v45 = vld [vmem:[#allocation3 + $0x13c] ss:$36 sps:$4 sm:$0xff]   ;;  %v10597_v20 = vld [vmem:[#allocation3 + $0xf4] ss:$36 sps:$4 sm:$0xff]  }
 0xf5e   :  { %v10592_v62 = vld [vmem:[#allocation3 + $0x138] ss:$36 sps:$4 sm:$0xff]   ;;  %v10638_v4 = vld [vmem:[#allocation3 + $0x140] ss:$36 sps:$4 sm:$0xff]  }
 0xf5f   :  { %v7708_v33 = vsub.f32 1.0, %v7706_v37  ;;  %v7707_v42 = vmul.f32 %v10666_v19, %v7697_v34  ;;  %v10595_v37 = vld [vmem:[#allocation3 + $0xf0] ss:$36 sps:$4 sm:$0xff]   ;;  %v10598_v19 = vld [vmem:[#allocation3 + $0xa8] ss:$36 sps:$4 sm:$0xff]  }
 0xf60   :  { %v10600_v34 = vld [vmem:[#allocation3 + $0xac] ss:$36 sps:$4 sm:$0xff]  }
 0xf61   :  { %v7712_v47 = vsub.f32 0.0, %v7708_v33  ;;  %v7709_v7 = vsub.f32 1.0, %v7707_v42  ;;  %v10601_v42 = vld [vmem:[#allocation3 + $0x60] ss:$36 sps:$4 sm:$0xff]  }
 0xf63   :  { %v7714_v23 = vsel %vm7710_vm6, %v7712_v47, %v7708_v33  ;;  %v7713_v46 = vsub.f32 0.0, %v7709_v7  ;;  %v10603_v33 = vld [vmem:[#allocation3 + $0x64] ss:$36 sps:$4 sm:$0xff]   ;;  %v10606_v47 = vld [vmem:[#allocation3 + $0x1c] ss:$36 sps:$4 sm:$0xff]  }
 0xf64   :  { %v7718_v2 = vadd.f32 1.0, %v7714_v23  ;;  %v10609_v23 = vld [vmem:[#allocation3 + $0x454] ss:$36 sps:$4 sm:$0xff]  }
 0xf65   :  { %v7715_v30 = vsel %vm7711_vm11, %v7713_v46, %v7709_v7  ;;  %v10604_v7 = vld [vmem:[#allocation3 + $0x18] ss:$36 sps:$4 sm:$0xff]   ;;  %v10612_v46 = vld [vmem:[#allocation3 + $0x40c] ss:$36 sps:$4 sm:$0xff]  }
 0xf66   :  { %v7719_v54 = vadd.f32 1.0, %v7715_v30  ;;  %v7720_v49 = vmul.f32 %v7718_v2, %v7716_v3  ;;  %v10607_v2 = vld [vmem:[#allocation3 + $0x450] ss:$36 sps:$4 sm:$0xff]   ;;  %v10610_v3 = vld [vmem:[#allocation3 + $0x408] ss:$36 sps:$4 sm:$0xff]  }
 0xf67   :  { %v10615_v30 = vld [vmem:[#allocation3 + $0x3c4] ss:$36 sps:$4 sm:$0xff]  }
 0xf68   :  { %v7721_v50 = vmul.f32 %v7719_v54, %v7717_v38  ;;  %v7754_v6 = vpack.c.bf16 %v7720_v49, %v7720_v49  ;;  %v10613_v38 = vld [vmem:[#allocation3 + $0x3c0] ss:$36 sps:$4 sm:$0xff]   ;;  %v10616_v49 = vld [vmem:[#allocation3 + $0x378] ss:$36 sps:$4 sm:$0xff]  }
 0xf69   :  { %v10618_v54 = vld [vmem:[#allocation3 + $0x37c] ss:$36 sps:$4 sm:$0xff]  }
 0xf6a   :  { %v7755_v14 = vpack.c.bf16 %v7721_v50, %v7721_v50  ;;  %v10621_v50 = vld [vmem:[#allocation3 + $0x334] ss:$36 sps:$4 sm:$0xff]  }
 0xf6c   :  { %7960 = vmatprep.mubr.bf16.mxu1 %v7755_v14  ;;  %v10619_v14 = vld [vmem:[#allocation3 + $0x330] ss:$36 sps:$4 sm:$0xff]  }
 0xf6d   :  { %7961 = vmatmul.mubr.bf16.vlgmr.msra.gmra.mxu1 %v7754_v6  ;;  %v10624_v6 = vld [vmem:[#allocation3 + $0x2ec] ss:$36 sps:$4 sm:$0xff]  }
 0xf6e   :  { %8481 = vmatpush1.bf16.msra.mxu1 %v10583_v60  ;;  %v10632_v60 = vld [vmem:[#allocation3 + $0x218] ss:$36 sps:$4 sm:$0xff]  }
 0xf6f   :  { %8482 = vmatprep.subr.bf16.mxu1 %v10588_v11 }
 0xf72   :  { %8483 = vmatpush1.bf16.msra.mxu1 %v10586_v35 }
 0xf73   :  { %8484 = vmatprep.subr.bf16.mxu1 %v10591_v25 }
 0xf76   :  { %8485 = vmatpush1.bf16.msra.mxu1 %v10589_v55 }
 0xf77   :  { %8486 = vmatprep.subr.bf16.mxu1 %v10594_v45 }
 0xf7a   :  { %8487 = vmatpush1.bf16.msra.mxu1 %v10592_v62 }
 0xf7b   :  { %8488 = vmatprep.subr.bf16.mxu1 %v10597_v20 }
 0xf7e   :  { %8489 = vmatpush1.bf16.msra.mxu1 %v10595_v37 }
 0xf7f   :  { %8490 = vmatprep.subr.bf16.mxu1 %v10600_v34 }
 0xf82   :  { %8491 = vmatpush1.bf16.msra.mxu1 %v10598_v19 }
 0xf83   :  { %8492 = vmatprep.subr.bf16.mxu1 %v10603_v33 }
 0xf86   :  { %8493 = vmatpush1.bf16.msra.mxu1 %v10601_v42 }
 0xf87   :  { %8494 = vmatprep.subr.bf16.mxu1 %v10606_v47 }
 0xf8a   :  { %8495 = vmatpush1.bf16.msra.mxu1 %v10604_v7 }
 0xf8b   :  { %8496 = vmatprep.subr.bf16.mxu1 %v10609_v23 }
 0xf8e   :  { %8497 = vmatpush2.bf16.msra.mxu1 %v10607_v2 }
 0xf8f   :  { %8498 = vmatprep.subr.bf16.mxu1 %v10612_v46 }
 0xf92   :  { %8499 = vmatpush2.bf16.msra.mxu1 %v10610_v3 }
 0xf93   :  { %8500 = vmatprep.subr.bf16.mxu1 %v10615_v30 }
 0xf96   :  { %8501 = vmatpush2.bf16.msra.mxu1 %v10613_v38 }
 0xf97   :  { %8502 = vmatprep.subr.bf16.mxu1 %v10618_v54 }
 0xf9a   :  { %8503 = vmatpush2.bf16.msra.mxu1 %v10616_v49 }
 0xf9b   :  { %8504 = vmatprep.subr.bf16.mxu1 %v10621_v50 }
 0xf9e   :  { %8505 = vmatpush2.bf16.msra.mxu1 %v10619_v14 }
 0xf9f   :  { %8506 = vmatprep.subr.bf16.mxu1 %v10624_v6 }
 0xfa2   :  { %8507 = vmatpush2.bf16.msra.mxu1 %v10622_v39 }
 0xfa3   :  { %8508 = vmatprep.subr.bf16.mxu1 %v10627_v40 }
 0xfa6   :  { %8509 = vmatpush2.bf16.msra.mxu1 %v10625_v63 }
 0xfa7   :  { %8510 = vmatprep.subr.bf16.mxu1 %v10630_v13 }
 0xfaa   :  { %8511 = vmatpush2.bf16.msra.mxu1 %v10628_v58 }
0x102d   :  { %v7962_v15 = vpop.f32.mrf.mxu1 }
0x102e   :  { %v7963_v44 = vadd.f32 %v7962_v15, %v7761_v29  ;;  %v10637_v29 = vld [vmem:[#allocation3 + $0x380] ss:$36 sps:$4 sm:$0xff]   ;;  %v10640_v15 = vld [vmem:[#allocation3 + $0xf8] ss:$36 sps:$4 sm:$0xff]  }
0x102f   :  { %v7964_v10 = vpop.f32.mrf.mxu1 }
0x1030   :  { %v7969_v9 = vmul.f32 %v7963_v44, %v7062_v24  ;;  %v7965_v16 = vadd.f32 %v7964_v10, %v7765_v22  ;;  %v10639_v22 = vld [vmem:[#allocation3 + $0x338] ss:$36 sps:$4 sm:$0xff]   ;;  %v10641_v24 = vld [vmem:[#allocation3 + $0x2f0] ss:$36 sps:$4 sm:$0xff]   ;;  %v8208_v10 = vld [vmem:[%s15172_s9 + $0x2a] sm:$0x3] }
0x1031   :  { %v7966_v21 = vpop.f32.mrf.mxu1  ;;  %v10642_v44 = vld [vmem:[#allocation3 + $0xb0] ss:$36 sps:$4 sm:$0xff]  }
0x1032   :  { %v7970_v18 = vmul.f32 %v7965_v16, %v7064_v57  ;;  %v7971_v43 = vadd.f32 %v7969_v9, %v16031_v48  ;;  %v8213_v57 = vrot.slane %v8208_v10, %v16013_v17  ;;  %v16036_v16 = vld [vmem:[#allocation261_spill] sm:$0xff] }
0x1033   :  { %v7967_v53 = vpop.f32.mrf.mxu1 }
0x1034   :  { %v7972_v8 = vadd.f32 %v7970_v18, %v16035_v1  ;;  %v8005_v0 = vpack.c.bf16 %v7971_v43, %v7971_v43  ;;  %v8217_v18 = vrot.slane %v8208_v10, %v16014_v27 }
0x1036   :  { %v8006_v32 = vpack.c.bf16 %v7972_v8, %v7972_v8 }
0x1038   :  { %8199 = vmatprep.mubr.bf16.mxu0 %v8006_v32 }
0x1039   :  { %8200 = vmatmul.mubr.bf16.vlgmr.msra.gmra.mxu0 %v8005_v0 }
0x103a   :  { %9814 = vmatpush3.bf16.msra.mxu0 %v10632_v60 }
0x103b   :  { %9815 = vmatprep.subr.bf16.mxu0 %v10633_v59 }
0x103e   :  { %9816 = vmatpush3.bf16.msra.mxu0 %v10634_v41 }
0x103f   :  { %9817 = vmatprep.subr.bf16.mxu0 %v10635_v26 }
0x1042   :  { %9818 = vmatpush3.bf16.msra.mxu0 %v10636_v51 }
0x1043   :  { %9819 = vmatprep.subr.bf16.mxu0 %v10637_v29 }
0x1046   :  { %9820 = vmatpush3.bf16.msra.mxu0 %v10638_v4 }
0x1047   :  { %9821 = vmatprep.subr.bf16.mxu0 %v10639_v22 }
0x104a   :  { %9822 = vmatpush3.bf16.msra.mxu0 %v10640_v15 }
0x104b   :  { %9823 = vmatprep.subr.bf16.mxu0 %v10641_v24 }
0x104e   :  { %9824 = vmatpush3.bf16.msra.mxu0 %v10642_v44 }
0x10f9   :  { %v8201_v9 = vpop.f32.mrf.mxu0 }
0x10fa   :  { %v8202_v21 = vadd.f32 %v8201_v9, %v16036_v16 }
0x10fb   :  { %v8203_v52 = vpop.f32.mrf.mxu0 }
0x10fc   :  { %v8220_v5 = vadd.f32 %v8213_v57, %v8202_v21  ;;  %v8204_v48 = vadd.f32 %v8203_v52, %v16037_v31  ;;  %v10643_v21 = vld [vmem:[#allocation3 + $0x2a8] ss:$36 sps:$4 sm:$0xff]   ;;  %v10645_v52 = vld [vmem:[#allocation3 + $0x260] ss:$36 sps:$4 sm:$0xff]  }
0x10fd   :  { %v8205_v43 = vpop.f32.mrf.mxu0  ;;  %9825 = vmatprep.subr.bf16.mxu0 %v10643_v21  ;;  %v10646_v31 = vld [vmem:[#allocation3 + $0x20] ss:$36 sps:$4 sm:$0xff]  }
0x10fe   :  { %v8222_v53 = vmul.f32 0.70710677, %v8220_v5  ;;  %v8221_v61 = vadd.f32 %v8217_v18, %v8204_v48  ;;  %vm8262_vm0 = vcmp.lt.f32.partialorder %v8220_v5, 0.0  ;;  %v8268_v22 = vmul.f32 0.5, %v8220_v5  ;;  %v10644_v18 = vld [vmem:[#allocation3 + $0x68] ss:$36 sps:$4 sm:$0xff]  }
0x10ff   :  { %v8206_v36 = vpop.f32.mrf.mxu0  ;;  %9826 = vmatpush3.bf16.msra.mxu0 %v10644_v18  ;;  %v8308_v5 = vld [vmem:[%s15172_s9 + $0x2c] sm:$0x3] }
0x1100   :  { %v8224_v56 = vand.u32 2147483647, %v8222_v53  ;;  %v8223_v1 = vmul.f32 0.70710677, %v8221_v61  ;;  %vm8263_vm2 = vcmp.lt.f32.partialorder %v8221_v61, 0.0  ;;  %v8269_v24 = vmul.f32 0.5, %v8221_v61  ;;  %9827 = vmatprep.subr.bf16.mxu0 %v10645_v52 }
0x1101   :  { %v8313_v48 = vrot.slane %v8308_v5, %v16013_v17  ;;  %v8317_v43 = vrot.slane %v8308_v5, %v16014_v27  ;;  %v10648_v17 = vld [vmem:[#allocation4 + $0x134] ss:$24 sps:$4 sm:$0xff]   ;;  %v10649_v27 = vld [vmem:[#allocation4 + $0x104] ss:$24 sps:$4 sm:$0xff]  }
0x1102   :  { %v8226_v8 = vmul.f32 0.3275911, %v8224_v56  ;;  %v8225_v32 = vand.u32 2147483647, %v8223_v1  ;;  %v8250_v25 = vsub.f32 0.0, %v8224_v56 }
0x1103   :  { %9828 = vmatpush3.bf16.msra.mxu0 %v10646_v31 }
0x1104   :  { %v8228_v0 = vadd.f32 1.0, %v8226_v8  ;;  %v8227_v11 = vmul.f32 0.3275911, %v8225_v32  ;;  %v8251_v55 = vsub.f32 0.0, %v8225_v32  ;;  %v8252_v45 = vmul.f32 %v8250_v25, %v8224_v56  ;;  %9956 = vmatprep.subr.bf16.mxu0 %v15998_v28  ;;  %v10651_v25 = vld [vmem:[#allocation4 + $0xa4] ss:$24 sps:$4 sm:$0xff]  }
0x1106   :  { %10667 = vrcp.f32 %v8228_v0  ;;  %v8229_v35 = vadd.f32 1.0, %v8227_v11  ;;  %v8253_v20 = vmul.f32 %v8251_v55, %v8225_v32  ;;  %v8254_v34 = vmul.f32 1.442695, %v8252_v45  ;;  %v10647_v11 = vld [vmem:[#allocation4 + $0x164] ss:$24 sps:$4 sm:$0xff]  }
0x1107   :  { %v10652_v55 = vld [vmem:[#allocation4 + $0x74] ss:$24 sps:$4 sm:$0xff]   ;;  %v10653_v45 = vld [vmem:[#allocation4 + $0x44] ss:$24 sps:$4 sm:$0xff]  }
0x1108   :  { %10669 = vrcp.f32 %v8229_v35  ;;  %v8256_v42 = vmul.f32 1.442695, %v8253_v20  ;;  %v10650_v35 = vld [vmem:[#allocation4 + $0xd4] ss:$24 sps:$4 sm:$0xff]  }
0x1109   :  { %10671 = vpow2.f32 %v8254_v34 }
0x110a   :  { %10673 = vpow2.f32 %v8256_v42 }
0x1113   :  { %v10668_v62 = vpop.eup %10667 }
0x1114   :  { %v8232_v37 = vmul.f32 1.0614054, %v10668_v62 }
0x1115   :  { %v10670_v19 = vpop.eup %10669 }
0x1116   :  { %v9603_v33 = vadd.f32 -1.4531521, %v8232_v37  ;;  %v8233_v47 = vmul.f32 1.0614054, %v10670_v19  ;;  %v10672_v63 = vpop.eup %10671  ;;  %v9639_v37 = vld [vmem:[%s15172_s9 + $0x2e] ss:$0 sm:$0xff] }
0x1117   :  { %v10674_v12 = vpop.eup %10673 }
0x1118   :  { %v8236_v7 = vmul.f32 %v10668_v62, %v9603_v33  ;;  %v9604_v23 = vadd.f32 -1.4531521, %v8233_v47 }
0x111a   :  { %v8238_v2 = vadd.f32 1.4214138, %v8236_v7  ;;  %v8237_v46 = vmul.f32 %v10670_v19, %v9604_v23 }
0x111c   :  { %v8240_v3 = vmul.f32 %v10668_v62, %v8238_v2  ;;  %v8239_v30 = vadd.f32 1.4214138, %v8237_v46 }
0x111e   :  { %v9605_v38 = vadd.f32 -0.28449672, %v8240_v3  ;;  %v8241_v54 = vmul.f32 %v10670_v19, %v8239_v30 }
0x1120   :  { %v8244_v49 = vmul.f32 %v10668_v62, %v9605_v38  ;;  %v9606_v50 = vadd.f32 -0.28449672, %v8241_v54 }
0x1122   :  { %v8246_v14 = vadd.f32 0.2548296, %v8244_v49  ;;  %v8245_v6 = vmul.f32 %v10670_v19, %v9606_v50 }
0x1124   :  { %v8248_v39 = vmul.f32 %v10668_v62, %v8246_v14  ;;  %v8247_v40 = vadd.f32 0.2548296, %v8245_v6  ;;  %v10654_v62 = vld [vmem:[#allocation4 + $0x14] ss:$24 sps:$4 sm:$0xff]  }
0x1126   :  { %v8258_v13 = vmul.f32 %v10672_v63, %v8248_v39  ;;  %v8249_v58 = vmul.f32 %v10670_v19, %v8247_v40 }
0x1128   :  { %v8260_v60 = vsub.f32 1.0, %v8258_v13  ;;  %v8259_v59 = vmul.f32 %v10674_v12, %v8249_v58 }
0x112a   :  { %v8264_v41 = vsub.f32 0.0, %v8260_v60  ;;  %v8261_v26 = vsub.f32 1.0, %v8259_v59 }
0x112c   :  { %v8266_v51 = vsel %vm8262_vm0, %v8264_v41, %v8260_v60  ;;  %v8265_v4 = vsub.f32 0.0, %v8261_v26 }
0x112d   :  { %v8270_v29 = vadd.f32 1.0, %v8266_v51 }
0x112e   :  { %v8267_v15 = vsel %vm8263_vm2, %v8265_v4, %v8261_v26 }
0x112f   :  { %v8271_v44 = vadd.f32 1.0, %v8267_v15  ;;  %v8272_v10 = vmul.f32 %v8270_v29, %v8268_v22  ;;  %v9658_v22 = vld [vmem:[%s15172_s9 + $0x2f] ss:$0 sm:$0xff] }
0x1131   :  { %v8273_v57 = vmul.f32 %v8271_v44, %v8269_v24  ;;  %v8306_v16 = vpack.c.bf16 %v8272_v10, %v8272_v10 }
0x1133   :  { %v8307_v9 = vpack.c.bf16 %v8273_v57, %v8273_v57 }
0x1135   :  { %8512 = vmatprep.mubr.bf16.mxu1 %v8307_v9 }
0x1136   :  { %8513 = vmatmul.mubr.bf16.vlgmr.msra.gmra.mxu1 %v8306_v16 }
0x11f6   :  { %v8514_v53 = vpop.f32.mrf.mxu1 }
0x11f7   :  { %v8515_v61 = vadd.f32 %v8514_v53, %v8313_v48 }
0x11f8   :  { %v8516_v36 = vpop.f32.mrf.mxu1 }
0x11f9   :  { %v8517_v56 = vadd.f32 %v8516_v36, %v8317_v43  ;;  %v8553_v32 = vpack.c.bf16 %v8515_v61, %v8515_v61 }
0x11fa   :  { %v8518_v1 = vpop.f32.mrf.mxu1 }
0x11fb   :  { %v8554_v8 = vpack.c.bf16 %v8517_v56, %v8517_v56 }
0x11fc   :  { %v8519_v0 = vpop.f32.mrf.mxu1 }
0x11fd   :  { %8690 = vmatprep.mubr.bf16.mxu0 %v8554_v8 }
0x11fe   :  { %8691 = vmatmul.mubr.bf16.vlgmr.msra.gmra.mxu0 %v8553_v32 }
0x11ff   :  { %9972 = vmatprep.mubr.msk.bf16.mxu0 %vm10711_vm4, %v15998_v28  ;;  %9957 = vmatpush3.bf16.msra.mxu0 %v10647_v11 }
0x1200   :  { %9958 = vmatprep.subr.bf16.mxu0 %v15998_v28 }
0x1203   :  { %9959 = vmatpush3.bf16.msra.mxu0 %v10648_v17 }
0x1204   :  { %9960 = vmatprep.subr.bf16.mxu0 %v15998_v28 }
0x1207   :  { %9961 = vmatpush3.bf16.msra.mxu0 %v10649_v27 }
0x1208   :  { %9962 = vmatprep.subr.bf16.mxu0 %v15998_v28 }
0x120b   :  { %9963 = vmatpush3.bf16.msra.mxu0 %v10650_v35 }
0x120c   :  { %9964 = vmatprep.subr.bf16.mxu0 %v15998_v28 }
0x120f   :  { %9965 = vmatpush3.bf16.msra.mxu0 %v10651_v25 }
0x1210   :  { %9966 = vmatprep.subr.bf16.mxu0 %v15998_v28 }
0x1213   :  { %9967 = vmatpush3.bf16.msra.mxu0 %v10652_v55 }
0x1214   :  { %9968 = vmatprep.subr.bf16.mxu0 %v15998_v28 }
0x1217   :  { %9969 = vmatpush3.bf16.msra.mxu0 %v10653_v45 }
0x1218   :  { %9970 = vmatprep.subr.bf16.mxu0 %v15998_v28 }
0x121b   :  { %9971 = vmatpush3.bf16.msra.mxu0 %v10654_v62 }
0x12be   :  { %v9829_v20 = vpop.f32.mrf.mxu0 }
0x12c0   :  { %v9830_v34 = vpop.f32.mrf.mxu0 }
0x12c1   :  { %v9831_v19 = vadd.f32 %v9830_v34, %v9829_v20 }
0x12c2   :  { %v9832_v33 = vpop.f32.mrf.mxu0 }
0x12c3   :  { %v8693_v42 = vadd.f32 %v9831_v19, %v9639_v37 }
0x12c4   :  { %v9833_v47 = vpop.f32.mrf.mxu0 }
0x12c5   :  { %v8698_v7 = vmul.f32 0.70710677, %v8693_v42  ;;  %vm8718_vm4 = vcmp.lt.f32.partialorder %v8693_v42, 0.0  ;;  %v8721_v26 = vmul.f32 0.5, %v8693_v42 }
0x12c7   :  { %v8699_v23 = vand.u32 2147483647, %v8698_v7 }
0x12c9   :  { %v8700_v2 = vmul.f32 0.3275911, %v8699_v23  ;;  %v8712_v3 = vsub.f32 0.0, %v8699_v23 }
0x12cb   :  { %v8701_v46 = vadd.f32 1.0, %v8700_v2  ;;  %v8713_v30 = vmul.f32 %v8712_v3, %v8699_v23 }
0x12cd   :  { %10675 = vrcp.f32 %v8701_v46  ;;  %v8714_v54 = vmul.f32 1.442695, %v8713_v30 }
0x12cf   :  { %10677 = vpow2.f32 %v8714_v54 }
0x12da   :  { %v10676_v28 = vpop.eup %10675 }
0x12db   :  { %v8703_v38 = vmul.f32 1.0614054, %v10676_v28 }
0x12dc   :  { %v10678_v58 = vpop.eup %10677 }
0x12dd   :  { %v9656_v49 = vadd.f32 -1.4531521, %v8703_v38 }
0x12df   :  { %v8705_v50 = vmul.f32 %v10676_v28, %v9656_v49 }
0x12e1   :  { %v8706_v14 = vadd.f32 1.4214138, %v8705_v50 }
0x12e3   :  { %v8707_v6 = vmul.f32 %v10676_v28, %v8706_v14 }
0x12e5   :  { %v9657_v39 = vadd.f32 -0.28449672, %v8707_v6 }
0x12e7   :  { %v8709_v63 = vmul.f32 %v10676_v28, %v9657_v39 }
0x12e9   :  { %v8710_v40 = vadd.f32 0.2548296, %v8709_v63 }
0x12eb   :  { %v8711_v13 = vmul.f32 %v10676_v28, %v8710_v40 }
0x12ed   :  { %v8716_v12 = vmul.f32 %v10678_v58, %v8711_v13 }
0x12ef   :  { %v8717_v60 = vsub.f32 1.0, %v8716_v12 }
0x12f1   :  { %v8719_v59 = vsub.f32 0.0, %v8717_v60 }
0x12f3   :  { %v8720_v41 = vsel %vm8718_vm4, %v8719_v59, %v8717_v60 }
0x12f4   :  { %v8722_v51 = vadd.f32 1.0, %v8720_v41 }
0x12f6   :  { %v8723_v29 = vmul.f32 %v8722_v51, %v8721_v26 }
0x12f8   :  { %v8740_v4 = vpack.c.bf16 %v8723_v29, %v8723_v29 }
0x12fa   :  { %9973 = vmatmul.mubr.bf16.vlgmr.msra.gmra.mxu0 %v8740_v4 }
0x13ba   :  { %v8830_v15 = vpop.f32.mrf.mxu0 }
0x13bb   :  { %v8831_v24 = vadd.f32 %v9658_v22, %v8830_v15 }
0x13bc   :  { %v9974_v44 = vpop.f32.mrf.mxu0 }
0x13bd   :  { %8836 = vst [vmem:[#allocation7] sm:$0xff] %v8831_v24 }
0x13be   :  { %v8833_v10 = vpop.f32.mrf.mxu0 }
0x13bf   :  { %10690 = shalt.err (!%p10687_p4)
}
0x13c0   :  { %8846 = dma.vmem_to_hbm [thread:$0]  %s8844_s11, 128, %s15177_s14, [#allocation8]   ;;  %v9975_v57 = vpop.f32.mrf.mxu0 }
0x13c1   :  { %10707 = dma.done.wait [#allocation8], 128  }
0x13c2   :  { %10708 = vsyncadd [#allocation8], 4294967168 }
0x13c3   :  { %8850 = vsyncpa [#allocation8], 1 }
0x13c4   :  { %8851 = vsyncmov [#allocation6] }
0x13c7   :  { %s8852_s9 = vpop.sfrf %8851 }
0x13c8   :  { %p9667_p5 = scmp.ne.s32.totalorder %s8852_s9, 0 }
0x13ca   :  { %8856 = shalt.err (%p9667_p5)  }
0x13cb   :  { %8858 = vsyncmov [#allocation6 + $0x1] }
0x13ce   :  { %s8859_s21 = vpop.sfrf %8858 }
0x13cf   :  { %p9668_p6 = scmp.ne.s32.totalorder %s8859_s21, 0 }
0x13d1   :  { %8863 = shalt.err (%p9668_p6)  }
0x13d2   :  { %8865 = vsyncmov [#allocation6 + $0x2] }
0x13d5   :  { %s8866_s22 = vpop.sfrf %8865 }
0x13d6   :  { %p9669_p7 = scmp.ne.s32.totalorder %s8866_s22, 0 }
0x13d8   :  { %8870 = shalt.err (%p9669_p7)  }
0x13d9   :  { %8872 = vsyncmov [#allocation6 + $0x3] }
0x13dc   :  { %s8873_s23 = vpop.sfrf %8872 }
0x13dd   :  { %p9670_p8 = scmp.ne.s32.totalorder %s8873_s23, 0 }
0x13df   :  { %8877 = shalt.err (%p9670_p8)  }

</bundles_post_ra>
